<compile_context>
chip_gen: v5e
topology: v5e:2x2
jax: 0.10.0
libtpu: 0.0.40
codegen_flags: <defaults>
</compile_context>

<pallas_src>
import jax
import jax.numpy as jnp
from jax.experimental import pallas as pl
from jax.experimental.pallas import tpu as pltpu


# (Cin, Cout, stride, padding, activation) for c1..c6 / b1..b6 of the Encoder.
_LAYER_CFG = [
    (1,    128,  8, 0, "tanh"),
    (128,  128, 16, 1, "tanh"),
    (128,  256,  8, 0, "tanh"),
    (256,  256, 16, 1, "tanh"),
    (256, 1024,  4, 0, "tanh"),
    (1024, 2048, 2, 0, "relu_l2norm"),
]
_BN_EPS = 1e-5  # nn.BatchNorm1d default eps


def _build_plan(L):
    """Static (trace-time) per-layer lengths and strided source positions."""
    plan = []
    L_in = L
    for (cin, cout, stride, pad, act) in _LAYER_CFG:
        L_out = (L_in + 2 * pad - 1) // stride + 1            # kernel_size = 1
        src = [j * stride - pad for j in range(L_out)]        # <0 or >=L_in -> zero pad
        plan.append(dict(cin=cin, cout=cout, L_in=L_in, L_out=L_out, src=src, act=act))
        L_in = L_out
    return plan


def _make_fused_kernel(B, plan):
    n = len(plan)

    def kernel(*refs):
        x_ref = refs[0]                                   # (B*L1, 1) f32 layer-1 gathered input
        w_refs = [refs[1 + 2 * i] for i in range(n)]      # folded conv*BN weights
        s_refs = [refs[2 + 2 * i] for i in range(n)]      # folded per-channel shifts (1, Cout)
        out_ref = refs[1 + 2 * n]                         # (B, 2048) f32
        scr = refs[2 + 2 * n:]
        w_last_vmem, dma_sem = scr[0], scr[1]
        h_refs = scr[2:2 + (n - 1)]                       # layer 1..n-1 outputs (B*L_out, Cout) f32
        a_refs = scr[2 + (n - 1):]                        # layer 2..n assembled inputs (B*L_out, Cin) f32

        # Kick off the big final-layer weight DMA (HBM -> VMEM); overlaps layers 1..n-1.
        w_last_copy = pltpu.make_async_copy(w_refs[n - 1], w_last_vmem, dma_sem.at[0])
        w_last_copy.start()

        # Layer 1: Cin == 1, so the 1x1 conv is an outer product done on the VPU.
        y = jnp.tanh(x_ref[...] * w_refs[0][...] + s_refs[0][...])     # (B*L1, 128) f32
        h_refs[0][...] = y.astype(h_refs[0].dtype)

        # Layers 2..n: strided row gather (VMEM -> VMEM) + matmul + shift + activation.
        for li in range(1, n):
            cfg, prev = plan[li], plan[li - 1]
            a_ref = a_refs[li - 1]
            for b in range(B):
                for j, src in enumerate(cfg["src"]):
                    dst = b * cfg["L_out"] + j
                    if 0 <= src < prev["L_out"]:
                        a_ref[pl.ds(dst, 1), :] = \
                            h_refs[li - 1][pl.ds(b * prev["L_out"] + src, 1), :]
                    else:  # conv zero padding
                        a_ref[pl.ds(dst, 1), :] = jnp.zeros((1, cfg["cin"]), a_ref.dtype)

            if li == n - 1:
                w_last_copy.wait()                        # weight arrived while we computed above
                w = w_last_vmem[...]
            else:
                w = w_refs[li][...]
            y = jnp.dot(a_ref[...].astype(w.dtype), w,
                        preferred_element_type=jnp.float32) + s_refs[li][...]

            if cfg["act"] == "tanh":
                h_refs[li][...] = jnp.tanh(y).astype(h_refs[li].dtype)
            else:
                # F.relu, then F.normalize(dim=1) applied AFTER .view(B, 1, 2048):
                # the normalized dim has size 1, so out = y / clamp_min(|y|, 1e-12),
                # and |y| == y because y >= 0 after the relu.
                y = jnp.maximum(y, 0.0)
                out_ref[...] = (y / jnp.maximum(y, 1e-12)).astype(out_ref.dtype)

    return kernel


def init_params(key):
    """Deterministic parameters; Conv bias + eval-mode BN folded into (weight, shift)."""
    params = []
    for li, (cin, cout, _, _, _) in enumerate(_LAYER_CFG):
        key, k1, k2, k3, k4, k5, k6 = jax.random.split(key, 7)
        w = jax.random.normal(k1, (cout, cin, 1), jnp.float32) / jnp.sqrt(float(cin))
        b = 0.1 * jax.random.normal(k2, (cout,), jnp.float32)
        gamma = jax.random.uniform(k3, (cout,), jnp.float32, 0.5, 1.5)
        beta = 0.1 * jax.random.normal(k4, (cout,), jnp.float32)
        rmean = 0.1 * jax.random.normal(k5, (cout,), jnp.float32)
        rvar = jax.random.uniform(k6, (cout,), jnp.float32, 0.5, 1.5)
        scale = gamma / jnp.sqrt(rvar + _BN_EPS)                 # (Cout,)
        shift = (b - rmean) * scale + beta                       # (Cout,)
        wt = jnp.transpose(w[:, :, 0]) * scale[None, :]          # (Cin, Cout), BN scale folded in
        if li > 0:
            wt = wt.astype(jnp.bfloat16)                         # MXU-fed weights in bf16
        params.append((wt, shift.reshape(1, cout)))
    return params


@jax.jit
def encoder_forward(x_ncw, params):
    """x_ncw: (B, 1, L) float32, PyTorch NCW layout. Returns (B, 1, 2048)."""
    B, cin0, L = x_ncw.shape
    assert cin0 == 1
    plan = _build_plan(L)
    assert plan[-1]["L_out"] == 1 and plan[-1]["cout"] == 2048, \
        "input length must reduce to one position for .view(B, 1, 2048)"

    # Layer-1 strided gather of the raw input (kernel_size=1, padding=0).
    l1 = plan[0]
    idx = jnp.asarray(l1["src"], jnp.int32)
    x_g = jnp.take(x_ncw[:, 0, :], idx, axis=1).reshape(B * l1["L_out"], 1)

    in_specs = [pl.BlockSpec(x_g.shape, lambda i: (0, 0))]
    flat_in = [x_g]
    for li, (w, s) in enumerate(params):
        if li == len(params) - 1:
            in_specs.append(pl.BlockSpec(memory_space=pl.ANY))   # big weight stays in HBM
        else:
            in_specs.append(pl.BlockSpec(w.shape, lambda i: (0, 0)))
        in_specs.append(pl.BlockSpec(s.shape, lambda i: (0, 0)))
        flat_in += [w, s]

    scratch_shapes = [
        pltpu.VMEM(params[-1][0].shape, params[-1][0].dtype),    # final-layer weight VMEM buffer
        pltpu.SemaphoreType.DMA((1,)),
    ]
    scratch_shapes += [pltpu.VMEM((B * cfg["L_out"], cfg["cout"]), jnp.float32)
                       for cfg in plan[:-1]]                      # h1..h5
    scratch_shapes += [pltpu.VMEM((B * cfg["L_out"], cfg["cin"]), jnp.float32)
                       for cfg in plan[1:]]                       # a2..a6

    out = pl.pallas_call(
        _make_fused_kernel(B, plan),
        out_shape=jax.ShapeDtypeStruct((B, plan[-1]["cout"]), jnp.float32),
        grid=(1,),
        in_specs=in_specs,
        out_specs=pl.BlockSpec((B, plan[-1]["cout"]), lambda i: (0, 0)),
        scratch_shapes=scratch_shapes,
        compiler_params=pltpu.CompilerParams(dimension_semantics=("arbitrary",)),
    )(*flat_in)
    return out.reshape(B, 1, plan[-1]["cout"])


if __name__ == "__main__":
    key = jax.random.PRNGKey(0)
    kx, kp = jax.random.split(key)
    # Input length 1024 reduces through strides 8,16,8,16,4,2 to length 1, which
    # the final .view(B, 1, 2048) in the PyTorch module requires.
    B, L = 2, 1024
    x = jax.random.normal(kx, (B, 1, L), jnp.float32)   # (B, C=1, L) like PyTorch
    params = init_params(kp)

    out = jax.block_until_ready(encoder_forward(x, params))
    assert out.shape == (B, 1, 2048), out.shape
    assert bool(jnp.all(jnp.isfinite(out)))
    print("KERNEL_OK")
</pallas_src>

<mosaic_0001>
module attributes {stable_mosaic.version = 11 : i64} {
  func.func @kernel(%arg0: i32, %arg1: memref<256x1xf32, #tpu.memory_space<vmem>>, %arg2: memref<1x128xf32, #tpu.memory_space<vmem>>, %arg3: memref<1x128xf32, #tpu.memory_space<vmem>>, %arg4: memref<128x128xbf16, #tpu.memory_space<vmem>>, %arg5: memref<1x128xf32, #tpu.memory_space<vmem>>, %arg6: memref<128x256xbf16, #tpu.memory_space<vmem>>, %arg7: memref<1x256xf32, #tpu.memory_space<vmem>>, %arg8: memref<256x256xbf16, #tpu.memory_space<vmem>>, %arg9: memref<1x256xf32, #tpu.memory_space<vmem>>, %arg10: memref<256x1024xbf16, #tpu.memory_space<vmem>>, %arg11: memref<1x1024xf32, #tpu.memory_space<vmem>>, %arg12: memref<1024x2048xbf16, #tpu.memory_space<any>>, %arg13: memref<1x2048xf32, #tpu.memory_space<vmem>>, %arg14: memref<2x2048xf32, #tpu.memory_space<vmem>>, %arg15: memref<1024x2048xbf16, #tpu.memory_space<vmem>>, %arg16: memref<1x!tpu.dma_semaphore, #tpu.memory_space<semaphore_mem>>, %arg17: memref<256x128xf32, #tpu.memory_space<vmem>>, %arg18: memref<18x128xf32, #tpu.memory_space<vmem>>, %arg19: memref<4x256xf32, #tpu.memory_space<vmem>>, %arg20: memref<2x256xf32, #tpu.memory_space<vmem>>, %arg21: memref<2x1024xf32, #tpu.memory_space<vmem>>, %arg22: memref<18x128xf32, #tpu.memory_space<vmem>>, %arg23: memref<4x128xf32, #tpu.memory_space<vmem>>, %arg24: memref<2x256xf32, #tpu.memory_space<vmem>>, %arg25: memref<2x256xf32, #tpu.memory_space<vmem>>, %arg26: memref<2x1024xf32, #tpu.memory_space<vmem>>) attributes {dimension_semantics = [#tpu.dimension_semantics<arbitrary>], iteration_bounds = array<i64: 1>, scalar_prefetch = 0 : i64, scratch_operands = 12 : i64, tpu.core_type = #tpu.core_type<tc>, window_params = [{pipeline_mode = #tpu.pipeline_mode<synchronous>, transform_indices = @transform_0, window_bounds = array<i64: 256, 1>}, {pipeline_mode = #tpu.pipeline_mode<synchronous>, transform_indices = @transform_1, window_bounds = array<i64: 1, 128>}, {pipeline_mode = #tpu.pipeline_mode<synchronous>, transform_indices = @transform_2, window_bounds = array<i64: 1, 128>}, {pipeline_mode = #tpu.pipeline_mode<synchronous>, transform_indices = @transform_3, window_bounds = array<i64: 128, 128>}, {pipeline_mode = #tpu.pipeline_mode<synchronous>, transform_indices = @transform_4, window_bounds = array<i64: 1, 128>}, {pipeline_mode = #tpu.pipeline_mode<synchronous>, transform_indices = @transform_5, window_bounds = array<i64: 128, 256>}, {pipeline_mode = #tpu.pipeline_mode<synchronous>, transform_indices = @transform_6, window_bounds = array<i64: 1, 256>}, {pipeline_mode = #tpu.pipeline_mode<synchronous>, transform_indices = @transform_7, window_bounds = array<i64: 256, 256>}, {pipeline_mode = #tpu.pipeline_mode<synchronous>, transform_indices = @transform_8, window_bounds = array<i64: 1, 256>}, {pipeline_mode = #tpu.pipeline_mode<synchronous>, transform_indices = @transform_9, window_bounds = array<i64: 256, 1024>}, {pipeline_mode = #tpu.pipeline_mode<synchronous>, transform_indices = @transform_10, window_bounds = array<i64: 1, 1024>}, {}, {pipeline_mode = #tpu.pipeline_mode<synchronous>, transform_indices = @transform_12, window_bounds = array<i64: 1, 2048>}, {pipeline_mode = #tpu.pipeline_mode<synchronous>, transform_indices = @transform_13, window_bounds = array<i64: 2, 2048>}]} {
    %c0_i32 = arith.constant 0 : i32
    %0 = tpu.memref_slice %arg16[%c0_i32] : memref<1x!tpu.dma_semaphore, #tpu.memory_space<semaphore_mem>> -> memref<1x!tpu.dma_semaphore, #tpu.memory_space<semaphore_mem>>
    %1 = tpu.memref_squeeze %0 : memref<1x!tpu.dma_semaphore, #tpu.memory_space<semaphore_mem>> -> memref<!tpu.dma_semaphore, #tpu.memory_space<semaphore_mem>>
    tpu.enqueue_dma source(%arg12 : memref<1024x2048xbf16, #tpu.memory_space<any>>) target(%arg15 : memref<1024x2048xbf16, #tpu.memory_space<vmem>>) target_semaphore(%1 : memref<!tpu.dma_semaphore, #tpu.memory_space<semaphore_mem>>)
    %c0 = arith.constant 0 : index
    %c0_0 = arith.constant 0 : index
    %2 = vector.load %arg1[%c0, %c0_0] : memref<256x1xf32, #tpu.memory_space<vmem>>, vector<256x1xf32>
    %c0_1 = arith.constant 0 : index
    %c0_2 = arith.constant 0 : index
    %3 = vector.load %arg2[%c0_1, %c0_2] : memref<1x128xf32, #tpu.memory_space<vmem>>, vector<1x128xf32>
    %4 = vector.broadcast %2 : vector<256x1xf32> to vector<256x128xf32>
    %5 = vector.broadcast %3 : vector<1x128xf32> to vector<256x128xf32>
    %6 = arith.mulf %4, %5 : vector<256x128xf32>
    %c0_3 = arith.constant 0 : index
    %c0_4 = arith.constant 0 : index
    %7 = vector.load %arg3[%c0_3, %c0_4] : memref<1x128xf32, #tpu.memory_space<vmem>>, vector<1x128xf32>
    %8 = vector.broadcast %7 : vector<1x128xf32> to vector<256x128xf32>
    %9 = arith.addf %6, %8 : vector<256x128xf32>
    %10 = math.tanh %9 : vector<256x128xf32>
    %c0_5 = arith.constant 0 : index
    %c0_6 = arith.constant 0 : index
    %11 = vector.load %arg17[%c0_5, %c0_6] : memref<256x128xf32, #tpu.memory_space<vmem>>, vector<256x128xf32>
    tpu.vector_store %arg17[%c0_5, %c0_6], %10 {strides = array<i32>} : memref<256x128xf32, #tpu.memory_space<vmem>>, vector<256x128xf32>,
    %cst = arith.constant 0.000000e+00 : f32
    %12 = vector.broadcast %cst : f32 to vector<1x128xf32>
    %c0_7 = arith.constant 0 : index
    %c0_8 = arith.constant 0 : index
    %13 = vector.load %arg22[%c0_7, %c0_8] : memref<18x128xf32, #tpu.memory_space<vmem>>, vector<1x128xf32>
    tpu.vector_store %arg22[%c0_7, %c0_8], %12 {strides = array<i32>} : memref<18x128xf32, #tpu.memory_space<vmem>>, vector<1x128xf32>,
    %c15 = arith.constant 15 : index
    %c0_9 = arith.constant 0 : index
    %14 = vector.load %arg17[%c15, %c0_9] : memref<256x128xf32, #tpu.memory_space<vmem>>, vector<1x128xf32>
    %c1 = arith.constant 1 : index
    %c0_10 = arith.constant 0 : index
    %15 = vector.load %arg22[%c1, %c0_10] : memref<18x128xf32, #tpu.memory_space<vmem>>, vector<1x128xf32>
    tpu.vector_store %arg22[%c1, %c0_10], %14 {strides = array<i32>} : memref<18x128xf32, #tpu.memory_space<vmem>>, vector<1x128xf32>,
    %c31 = arith.constant 31 : index
    %c0_11 = arith.constant 0 : index
    %16 = vector.load %arg17[%c31, %c0_11] : memref<256x128xf32, #tpu.memory_space<vmem>>, vector<1x128xf32>
    %c2 = arith.constant 2 : index
    %c0_12 = arith.constant 0 : index
    %17 = vector.load %arg22[%c2, %c0_12] : memref<18x128xf32, #tpu.memory_space<vmem>>, vector<1x128xf32>
    tpu.vector_store %arg22[%c2, %c0_12], %16 {strides = array<i32>} : memref<18x128xf32, #tpu.memory_space<vmem>>, vector<1x128xf32>,
    %c47 = arith.constant 47 : index
    %c0_13 = arith.constant 0 : index
    %18 = vector.load %arg17[%c47, %c0_13] : memref<256x128xf32, #tpu.memory_space<vmem>>, vector<1x128xf32>
    %c3 = arith.constant 3 : index
    %c0_14 = arith.constant 0 : index
    %19 = vector.load %arg22[%c3, %c0_14] : memref<18x128xf32, #tpu.memory_space<vmem>>, vector<1x128xf32>
    tpu.vector_store %arg22[%c3, %c0_14], %18 {strides = array<i32>} : memref<18x128xf32, #tpu.memory_space<vmem>>, vector<1x128xf32>,
    %c63 = arith.constant 63 : index
    %c0_15 = arith.constant 0 : index
    %20 = vector.load %arg17[%c63, %c0_15] : memref<256x128xf32, #tpu.memory_space<vmem>>, vector<1x128xf32>
    %c4 = arith.constant 4 : index
    %c0_16 = arith.constant 0 : index
    %21 = vector.load %arg22[%c4, %c0_16] : memref<18x128xf32, #tpu.memory_space<vmem>>, vector<1x128xf32>
    tpu.vector_store %arg22[%c4, %c0_16], %20 {strides = array<i32>} : memref<18x128xf32, #tpu.memory_space<vmem>>, vector<1x128xf32>,
    %c79 = arith.constant 79 : index
    %c0_17 = arith.constant 0 : index
    %22 = vector.load %arg17[%c79, %c0_17] : memref<256x128xf32, #tpu.memory_space<vmem>>, vector<1x128xf32>
    %c5 = arith.constant 5 : index
    %c0_18 = arith.constant 0 : index
    %23 = vector.load %arg22[%c5, %c0_18] : memref<18x128xf32, #tpu.memory_space<vmem>>, vector<1x128xf32>
    tpu.vector_store %arg22[%c5, %c0_18], %22 {strides = array<i32>} : memref<18x128xf32, #tpu.memory_space<vmem>>, vector<1x128xf32>,
    %c95 = arith.constant 95 : index
    %c0_19 = arith.constant 0 : index
    %24 = vector.load %arg17[%c95, %c0_19] : memref<256x128xf32, #tpu.memory_space<vmem>>, vector<1x128xf32>
    %c6 = arith.constant 6 : index
    %c0_20 = arith.constant 0 : index
    %25 = vector.load %arg22[%c6, %c0_20] : memref<18x128xf32, #tpu.memory_space<vmem>>, vector<1x128xf32>
    tpu.vector_store %arg22[%c6, %c0_20], %24 {strides = array<i32>} : memref<18x128xf32, #tpu.memory_space<vmem>>, vector<1x128xf32>,
    %c111 = arith.constant 111 : index
    %c0_21 = arith.constant 0 : index
    %26 = vector.load %arg17[%c111, %c0_21] : memref<256x128xf32, #tpu.memory_space<vmem>>, vector<1x128xf32>
    %c7 = arith.constant 7 : index
    %c0_22 = arith.constant 0 : index
    %27 = vector.load %arg22[%c7, %c0_22] : memref<18x128xf32, #tpu.memory_space<vmem>>, vector<1x128xf32>
    tpu.vector_store %arg22[%c7, %c0_22], %26 {strides = array<i32>} : memref<18x128xf32, #tpu.memory_space<vmem>>, vector<1x128xf32>,
    %c127 = arith.constant 127 : index
    %c0_23 = arith.constant 0 : index
    %28 = vector.load %arg17[%c127, %c0_23] : memref<256x128xf32, #tpu.memory_space<vmem>>, vector<1x128xf32>
    %c8 = arith.constant 8 : index
    %c0_24 = arith.constant 0 : index
    %29 = vector.load %arg22[%c8, %c0_24] : memref<18x128xf32, #tpu.memory_space<vmem>>, vector<1x128xf32>
    tpu.vector_store %arg22[%c8, %c0_24], %28 {strides = array<i32>} : memref<18x128xf32, #tpu.memory_space<vmem>>, vector<1x128xf32>,
    %cst_25 = arith.constant 0.000000e+00 : f32
    %30 = vector.broadcast %cst_25 : f32 to vector<1x128xf32>
    %c9 = arith.constant 9 : index
    %c0_26 = arith.constant 0 : index
    %31 = vector.load %arg22[%c9, %c0_26] : memref<18x128xf32, #tpu.memory_space<vmem>>, vector<1x128xf32>
    tpu.vector_store %arg22[%c9, %c0_26], %30 {strides = array<i32>} : memref<18x128xf32, #tpu.memory_space<vmem>>, vector<1x128xf32>,
    %c143 = arith.constant 143 : index
    %c0_27 = arith.constant 0 : index
    %32 = vector.load %arg17[%c143, %c0_27] : memref<256x128xf32, #tpu.memory_space<vmem>>, vector<1x128xf32>
    %c10 = arith.constant 10 : index
    %c0_28 = arith.constant 0 : index
    %33 = vector.load %arg22[%c10, %c0_28] : memref<18x128xf32, #tpu.memory_space<vmem>>, vector<1x128xf32>
    tpu.vector_store %arg22[%c10, %c0_28], %32 {strides = array<i32>} : memref<18x128xf32, #tpu.memory_space<vmem>>, vector<1x128xf32>,
    %c159 = arith.constant 159 : index
    %c0_29 = arith.constant 0 : index
    %34 = vector.load %arg17[%c159, %c0_29] : memref<256x128xf32, #tpu.memory_space<vmem>>, vector<1x128xf32>
    %c11 = arith.constant 11 : index
    %c0_30 = arith.constant 0 : index
    %35 = vector.load %arg22[%c11, %c0_30] : memref<18x128xf32, #tpu.memory_space<vmem>>, vector<1x128xf32>
    tpu.vector_store %arg22[%c11, %c0_30], %34 {strides = array<i32>} : memref<18x128xf32, #tpu.memory_space<vmem>>, vector<1x128xf32>,
    %c175 = arith.constant 175 : index
    %c0_31 = arith.constant 0 : index
    %36 = vector.load %arg17[%c175, %c0_31] : memref<256x128xf32, #tpu.memory_space<vmem>>, vector<1x128xf32>
    %c12 = arith.constant 12 : index
    %c0_32 = arith.constant 0 : index
    %37 = vector.load %arg22[%c12, %c0_32] : memref<18x128xf32, #tpu.memory_space<vmem>>, vector<1x128xf32>
    tpu.vector_store %arg22[%c12, %c0_32], %36 {strides = array<i32>} : memref<18x128xf32, #tpu.memory_space<vmem>>, vector<1x128xf32>,
    %c191 = arith.constant 191 : index
    %c0_33 = arith.constant 0 : index
    %38 = vector.load %arg17[%c191, %c0_33] : memref<256x128xf32, #tpu.memory_space<vmem>>, vector<1x128xf32>
    %c13 = arith.constant 13 : index
    %c0_34 = arith.constant 0 : index
    %39 = vector.load %arg22[%c13, %c0_34] : memref<18x128xf32, #tpu.memory_space<vmem>>, vector<1x128xf32>
    tpu.vector_store %arg22[%c13, %c0_34], %38 {strides = array<i32>} : memref<18x128xf32, #tpu.memory_space<vmem>>, vector<1x128xf32>,
    %c207 = arith.constant 207 : index
    %c0_35 = arith.constant 0 : index
    %40 = vector.load %arg17[%c207, %c0_35] : memref<256x128xf32, #tpu.memory_space<vmem>>, vector<1x128xf32>
    %c14 = arith.constant 14 : index
    %c0_36 = arith.constant 0 : index
    %41 = vector.load %arg22[%c14, %c0_36] : memref<18x128xf32, #tpu.memory_space<vmem>>, vector<1x128xf32>
    tpu.vector_store %arg22[%c14, %c0_36], %40 {strides = array<i32>} : memref<18x128xf32, #tpu.memory_space<vmem>>, vector<1x128xf32>,
    %c223 = arith.constant 223 : index
    %c0_37 = arith.constant 0 : index
    %42 = vector.load %arg17[%c223, %c0_37] : memref<256x128xf32, #tpu.memory_space<vmem>>, vector<1x128xf32>
    %c15_38 = arith.constant 15 : index
    %c0_39 = arith.constant 0 : index
    %43 = vector.load %arg22[%c15_38, %c0_39] : memref<18x128xf32, #tpu.memory_space<vmem>>, vector<1x128xf32>
    tpu.vector_store %arg22[%c15_38, %c0_39], %42 {strides = array<i32>} : memref<18x128xf32, #tpu.memory_space<vmem>>, vector<1x128xf32>,
    %c239 = arith.constant 239 : index
    %c0_40 = arith.constant 0 : index
    %44 = vector.load %arg17[%c239, %c0_40] : memref<256x128xf32, #tpu.memory_space<vmem>>, vector<1x128xf32>
    %c16 = arith.constant 16 : index
    %c0_41 = arith.constant 0 : index
    %45 = vector.load %arg22[%c16, %c0_41] : memref<18x128xf32, #tpu.memory_space<vmem>>, vector<1x128xf32>
    tpu.vector_store %arg22[%c16, %c0_41], %44 {strides = array<i32>} : memref<18x128xf32, #tpu.memory_space<vmem>>, vector<1x128xf32>,
    %c255 = arith.constant 255 : index
    %c0_42 = arith.constant 0 : index
    %46 = vector.load %arg17[%c255, %c0_42] : memref<256x128xf32, #tpu.memory_space<vmem>>, vector<1x128xf32>
    %c17 = arith.constant 17 : index
    %c0_43 = arith.constant 0 : index
    %47 = vector.load %arg22[%c17, %c0_43] : memref<18x128xf32, #tpu.memory_space<vmem>>, vector<1x128xf32>
    tpu.vector_store %arg22[%c17, %c0_43], %46 {strides = array<i32>} : memref<18x128xf32, #tpu.memory_space<vmem>>, vector<1x128xf32>,
    %c0_44 = arith.constant 0 : index
    %c0_45 = arith.constant 0 : index
    %48 = vector.load %arg4[%c0_44, %c0_45] : memref<128x128xbf16, #tpu.memory_space<vmem>>, vector<128x128xbf16>
    %c0_46 = arith.constant 0 : index
    %c0_47 = arith.constant 0 : index
    %49 = vector.load %arg22[%c0_46, %c0_47] : memref<18x128xf32, #tpu.memory_space<vmem>>, vector<18x128xf32>
    %50 = arith.truncf %49 : vector<18x128xf32> to vector<18x128xbf16>
    %cst_48 = arith.constant dense<0.000000e+00> : vector<18x128xf32>
    %51 = tpu.matmul %50, %48, %cst_48 {dimension_numbers = #tpu.dot_dimension_numbers<[1], [0], [0], [1], [0, 0, 1, 1], [], []>} : vector<18x128xbf16>, vector<128x128xbf16>, vector<18x128xf32> -> vector<18x128xf32>
    %c0_49 = arith.constant 0 : index
    %c0_50 = arith.constant 0 : index
    %52 = vector.load %arg5[%c0_49, %c0_50] : memref<1x128xf32, #tpu.memory_space<vmem>>, vector<1x128xf32>
    %53 = vector.broadcast %52 : vector<1x128xf32> to vector<18x128xf32>
    %54 = arith.addf %51, %53 : vector<18x128xf32>
    %55 = math.tanh %54 : vector<18x128xf32>
    %c0_51 = arith.constant 0 : index
    %c0_52 = arith.constant 0 : index
    %56 = vector.load %arg18[%c0_51, %c0_52] : memref<18x128xf32, #tpu.memory_space<vmem>>, vector<18x128xf32>
    tpu.vector_store %arg18[%c0_51, %c0_52], %55 {strides = array<i32>} : memref<18x128xf32, #tpu.memory_space<vmem>>, vector<18x128xf32>,
    %c0_53 = arith.constant 0 : index
    %c0_54 = arith.constant 0 : index
    %57 = vector.load %arg18[%c0_53, %c0_54] : memref<18x128xf32, #tpu.memory_space<vmem>>, vector<1x128xf32>
    %c0_55 = arith.constant 0 : index
    %c0_56 = arith.constant 0 : index
    %58 = vector.load %arg23[%c0_55, %c0_56] : memref<4x128xf32, #tpu.memory_space<vmem>>, vector<1x128xf32>
    tpu.vector_store %arg23[%c0_55, %c0_56], %57 {strides = array<i32>} : memref<4x128xf32, #tpu.memory_space<vmem>>, vector<1x128xf32>,
    %c8_57 = arith.constant 8 : index
    %c0_58 = arith.constant 0 : index
    %59 = vector.load %arg18[%c8_57, %c0_58] : memref<18x128xf32, #tpu.memory_space<vmem>>, vector<1x128xf32>
    %c1_59 = arith.constant 1 : index
    %c0_60 = arith.constant 0 : index
    %60 = vector.load %arg23[%c1_59, %c0_60] : memref<4x128xf32, #tpu.memory_space<vmem>>, vector<1x128xf32>
    tpu.vector_store %arg23[%c1_59, %c0_60], %59 {strides = array<i32>} : memref<4x128xf32, #tpu.memory_space<vmem>>, vector<1x128xf32>,
    %c9_61 = arith.constant 9 : index
    %c0_62 = arith.constant 0 : index
    %61 = vector.load %arg18[%c9_61, %c0_62] : memref<18x128xf32, #tpu.memory_space<vmem>>, vector<1x128xf32>
    %c2_63 = arith.constant 2 : index
    %c0_64 = arith.constant 0 : index
    %62 = vector.load %arg23[%c2_63, %c0_64] : memref<4x128xf32, #tpu.memory_space<vmem>>, vector<1x128xf32>
    tpu.vector_store %arg23[%c2_63, %c0_64], %61 {strides = array<i32>} : memref<4x128xf32, #tpu.memory_space<vmem>>, vector<1x128xf32>,
    %c17_65 = arith.constant 17 : index
    %c0_66 = arith.constant 0 : index
    %63 = vector.load %arg18[%c17_65, %c0_66] : memref<18x128xf32, #tpu.memory_space<vmem>>, vector<1x128xf32>
    %c3_67 = arith.constant 3 : index
    %c0_68 = arith.constant 0 : index
    %64 = vector.load %arg23[%c3_67, %c0_68] : memref<4x128xf32, #tpu.memory_space<vmem>>, vector<1x128xf32>
    tpu.vector_store %arg23[%c3_67, %c0_68], %63 {strides = array<i32>} : memref<4x128xf32, #tpu.memory_space<vmem>>, vector<1x128xf32>,
    %c0_69 = arith.constant 0 : index
    %c0_70 = arith.constant 0 : index
    %65 = vector.load %arg6[%c0_69, %c0_70] : memref<128x256xbf16, #tpu.memory_space<vmem>>, vector<128x256xbf16>
    %c0_71 = arith.constant 0 : index
    %c0_72 = arith.constant 0 : index
    %66 = vector.load %arg23[%c0_71, %c0_72] : memref<4x128xf32, #tpu.memory_space<vmem>>, vector<4x128xf32>
    %67 = arith.truncf %66 : vector<4x128xf32> to vector<4x128xbf16>
    %cst_73 = arith.constant dense<0.000000e+00> : vector<4x256xf32>
    %68 = tpu.matmul %67, %65, %cst_73 {dimension_numbers = #tpu.dot_dimension_numbers<[1], [0], [0], [1], [0, 0, 1, 1], [], []>} : vector<4x128xbf16>, vector<128x256xbf16>, vector<4x256xf32> -> vector<4x256xf32>
    %c0_74 = arith.constant 0 : index
    %c0_75 = arith.constant 0 : index
    %69 = vector.load %arg7[%c0_74, %c0_75] : memref<1x256xf32, #tpu.memory_space<vmem>>, vector<1x256xf32>
    %70 = vector.broadcast %69 : vector<1x256xf32> to vector<4x256xf32>
    %71 = arith.addf %68, %70 : vector<4x256xf32>
    %72 = math.tanh %71 : vector<4x256xf32>
    %c0_76 = arith.constant 0 : index
    %c0_77 = arith.constant 0 : index
    %73 = vector.load %arg19[%c0_76, %c0_77] : memref<4x256xf32, #tpu.memory_space<vmem>>, vector<4x256xf32>
    tpu.vector_store %arg19[%c0_76, %c0_77], %72 {strides = array<i32>} : memref<4x256xf32, #tpu.memory_space<vmem>>, vector<4x256xf32>,
    %cst_78 = arith.constant 0.000000e+00 : f32
    %74 = vector.broadcast %cst_78 : f32 to vector<1x256xf32>
    %c0_79 = arith.constant 0 : index
    %c0_80 = arith.constant 0 : index
    %75 = vector.load %arg24[%c0_79, %c0_80] : memref<2x256xf32, #tpu.memory_space<vmem>>, vector<1x256xf32>
    tpu.vector_store %arg24[%c0_79, %c0_80], %74 {strides = array<i32>} : memref<2x256xf32, #tpu.memory_space<vmem>>, vector<1x256xf32>,
    %cst_81 = arith.constant 0.000000e+00 : f32
    %76 = vector.broadcast %cst_81 : f32 to vector<1x256xf32>
    %c1_82 = arith.constant 1 : index
    %c0_83 = arith.constant 0 : index
    %77 = vector.load %arg24[%c1_82, %c0_83] : memref<2x256xf32, #tpu.memory_space<vmem>>, vector<1x256xf32>
    tpu.vector_store %arg24[%c1_82, %c0_83], %76 {strides = array<i32>} : memref<2x256xf32, #tpu.memory_space<vmem>>, vector<1x256xf32>,
    %c0_84 = arith.constant 0 : index
    %c0_85 = arith.constant 0 : index
    %78 = vector.load %arg8[%c0_84, %c0_85] : memref<256x256xbf16, #tpu.memory_space<vmem>>, vector<256x256xbf16>
    %c0_86 = arith.constant 0 : index
    %c0_87 = arith.constant 0 : index
    %79 = vector.load %arg24[%c0_86, %c0_87] : memref<2x256xf32, #tpu.memory_space<vmem>>, vector<2x256xf32>
    %80 = arith.truncf %79 : vector<2x256xf32> to vector<2x256xbf16>
    %cst_88 = arith.constant dense<0.000000e+00> : vector<2x256xf32>
    %81 = tpu.matmul %80, %78, %cst_88 {dimension_numbers = #tpu.dot_dimension_numbers<[1], [0], [0], [1], [0, 0, 1, 1], [], []>} : vector<2x256xbf16>, vector<256x256xbf16>, vector<2x256xf32> -> vector<2x256xf32>
    %c0_89 = arith.constant 0 : index
    %c0_90 = arith.constant 0 : index
    %82 = vector.load %arg9[%c0_89, %c0_90] : memref<1x256xf32, #tpu.memory_space<vmem>>, vector<1x256xf32>
    %83 = vector.broadcast %82 : vector<1x256xf32> to vector<2x256xf32>
    %84 = arith.addf %81, %83 : vector<2x256xf32>
    %85 = math.tanh %84 : vector<2x256xf32>
    %c0_91 = arith.constant 0 : index
    %c0_92 = arith.constant 0 : index
    %86 = vector.load %arg20[%c0_91, %c0_92] : memref<2x256xf32, #tpu.memory_space<vmem>>, vector<2x256xf32>
    tpu.vector_store %arg20[%c0_91, %c0_92], %85 {strides = array<i32>} : memref<2x256xf32, #tpu.memory_space<vmem>>, vector<2x256xf32>,
    %c0_93 = arith.constant 0 : index
    %c0_94 = arith.constant 0 : index
    %87 = vector.load %arg20[%c0_93, %c0_94] : memref<2x256xf32, #tpu.memory_space<vmem>>, vector<1x256xf32>
    %c0_95 = arith.constant 0 : index
    %c0_96 = arith.constant 0 : index
    %88 = vector.load %arg25[%c0_95, %c0_96] : memref<2x256xf32, #tpu.memory_space<vmem>>, vector<1x256xf32>
    tpu.vector_store %arg25[%c0_95, %c0_96], %87 {strides = array<i32>} : memref<2x256xf32, #tpu.memory_space<vmem>>, vector<1x256xf32>,
    %c1_97 = arith.constant 1 : index
    %c0_98 = arith.constant 0 : index
    %89 = vector.load %arg20[%c1_97, %c0_98] : memref<2x256xf32, #tpu.memory_space<vmem>>, vector<1x256xf32>
    %c1_99 = arith.constant 1 : index
    %c0_100 = arith.constant 0 : index
    %90 = vector.load %arg25[%c1_99, %c0_100] : memref<2x256xf32, #tpu.memory_space<vmem>>, vector<1x256xf32>
    tpu.vector_store %arg25[%c1_99, %c0_100], %89 {strides = array<i32>} : memref<2x256xf32, #tpu.memory_space<vmem>>, vector<1x256xf32>,
    %c0_101 = arith.constant 0 : index
    %c0_102 = arith.constant 0 : index
    %91 = vector.load %arg10[%c0_101, %c0_102] : memref<256x1024xbf16, #tpu.memory_space<vmem>>, vector<256x1024xbf16>
    %c0_103 = arith.constant 0 : index
    %c0_104 = arith.constant 0 : index
    %92 = vector.load %arg25[%c0_103, %c0_104] : memref<2x256xf32, #tpu.memory_space<vmem>>, vector<2x256xf32>
    %93 = arith.truncf %92 : vector<2x256xf32> to vector<2x256xbf16>
    %cst_105 = arith.constant dense<0.000000e+00> : vector<2x1024xf32>
    %94 = tpu.matmul %93, %91, %cst_105 {dimension_numbers = #tpu.dot_dimension_numbers<[1], [0], [0], [1], [0, 0, 1, 1], [], []>} : vector<2x256xbf16>, vector<256x1024xbf16>, vector<2x1024xf32> -> vector<2x1024xf32>
    %c0_106 = arith.constant 0 : index
    %c0_107 = arith.constant 0 : index
    %95 = vector.load %arg11[%c0_106, %c0_107] : memref<1x1024xf32, #tpu.memory_space<vmem>>, vector<1x1024xf32>
    %96 = vector.broadcast %95 : vector<1x1024xf32> to vector<2x1024xf32>
    %97 = arith.addf %94, %96 : vector<2x1024xf32>
    %98 = math.tanh %97 : vector<2x1024xf32>
    %c0_108 = arith.constant 0 : index
    %c0_109 = arith.constant 0 : index
    %99 = vector.load %arg21[%c0_108, %c0_109] : memref<2x1024xf32, #tpu.memory_space<vmem>>, vector<2x1024xf32>
    tpu.vector_store %arg21[%c0_108, %c0_109], %98 {strides = array<i32>} : memref<2x1024xf32, #tpu.memory_space<vmem>>, vector<2x1024xf32>,
    %c0_110 = arith.constant 0 : index
    %c0_111 = arith.constant 0 : index
    %100 = vector.load %arg21[%c0_110, %c0_111] : memref<2x1024xf32, #tpu.memory_space<vmem>>, vector<1x1024xf32>
    %c0_112 = arith.constant 0 : index
    %c0_113 = arith.constant 0 : index
    %101 = vector.load %arg26[%c0_112, %c0_113] : memref<2x1024xf32, #tpu.memory_space<vmem>>, vector<1x1024xf32>
    tpu.vector_store %arg26[%c0_112, %c0_113], %100 {strides = array<i32>} : memref<2x1024xf32, #tpu.memory_space<vmem>>, vector<1x1024xf32>,
    %c1_114 = arith.constant 1 : index
    %c0_115 = arith.constant 0 : index
    %102 = vector.load %arg21[%c1_114, %c0_115] : memref<2x1024xf32, #tpu.memory_space<vmem>>, vector<1x1024xf32>
    %c1_116 = arith.constant 1 : index
    %c0_117 = arith.constant 0 : index
    %103 = vector.load %arg26[%c1_116, %c0_117] : memref<2x1024xf32, #tpu.memory_space<vmem>>, vector<1x1024xf32>
    tpu.vector_store %arg26[%c1_116, %c0_117], %102 {strides = array<i32>} : memref<2x1024xf32, #tpu.memory_space<vmem>>, vector<1x1024xf32>,
    %c0_i32_118 = arith.constant 0 : i32
    %104 = tpu.memref_slice %arg16[%c0_i32_118] : memref<1x!tpu.dma_semaphore, #tpu.memory_space<semaphore_mem>> -> memref<1x!tpu.dma_semaphore, #tpu.memory_space<semaphore_mem>>
    %105 = tpu.memref_squeeze %104 : memref<1x!tpu.dma_semaphore, #tpu.memory_space<semaphore_mem>> -> memref<!tpu.dma_semaphore, #tpu.memory_space<semaphore_mem>>
    tpu.wait_dma2 semaphore(%105 : memref<!tpu.dma_semaphore, #tpu.memory_space<semaphore_mem>>) src(%arg12 : memref<1024x2048xbf16, #tpu.memory_space<any>>) dst(%arg15 : memref<1024x2048xbf16, #tpu.memory_space<vmem>>)
    %c0_119 = arith.constant 0 : index
    %c0_120 = arith.constant 0 : index
    %106 = vector.load %arg15[%c0_119, %c0_120] : memref<1024x2048xbf16, #tpu.memory_space<vmem>>, vector<1024x2048xbf16>
    %c0_121 = arith.constant 0 : index
    %c0_122 = arith.constant 0 : index
    %107 = vector.load %arg26[%c0_121, %c0_122] : memref<2x1024xf32, #tpu.memory_space<vmem>>, vector<2x1024xf32>
    %108 = arith.truncf %107 : vector<2x1024xf32> to vector<2x1024xbf16>
    %cst_123 = arith.constant dense<0.000000e+00> : vector<2x2048xf32>
    %109 = tpu.matmul %108, %106, %cst_123 {dimension_numbers = #tpu.dot_dimension_numbers<[1], [0], [0], [1], [0, 0, 1, 1], [], []>} : vector<2x1024xbf16>, vector<1024x2048xbf16>, vector<2x2048xf32> -> vector<2x2048xf32>
    %c0_124 = arith.constant 0 : index
    %c0_125 = arith.constant 0 : index
    %110 = vector.load %arg13[%c0_124, %c0_125] : memref<1x2048xf32, #tpu.memory_space<vmem>>, vector<1x2048xf32>
    %111 = vector.broadcast %110 : vector<1x2048xf32> to vector<2x2048xf32>
    %112 = arith.addf %109, %111 : vector<2x2048xf32>
    %cst_126 = arith.constant 0.000000e+00 : f32
    %113 = vector.broadcast %cst_126 : f32 to vector<2x2048xf32>
    %114 = arith.maximumf %112, %113 : vector<2x2048xf32>
    %cst_127 = arith.constant 9.99999996E-13 : f32
    %115 = vector.broadcast %cst_127 : f32 to vector<2x2048xf32>
    %116 = arith.maximumf %114, %115 : vector<2x2048xf32>
    %117 = arith.divf %114, %116 : vector<2x2048xf32>
    %c0_128 = arith.constant 0 : index
    %c0_129 = arith.constant 0 : index
    %118 = vector.load %arg14[%c0_128, %c0_129] : memref<2x2048xf32, #tpu.memory_space<vmem>>, vector<2x2048xf32>
    tpu.vector_store %arg14[%c0_128, %c0_129], %117 {strides = array<i32>} : memref<2x2048xf32, #tpu.memory_space<vmem>>, vector<2x2048xf32>,
    return
  }
  func.func @transform_0(%arg0: i32) -> (i32, i32) {
    %c0_i32 = arith.constant 0 : i32
    %c0_i32_0 = arith.constant 0 : i32
    %c0_i32_1 = arith.constant 0 : i32
    return %c0_i32, %c0_i32_0 : i32, i32
  }
  func.func @transform_1(%arg0: i32) -> (i32, i32) {
    %c0_i32 = arith.constant 0 : i32
    %c0_i32_0 = arith.constant 0 : i32
    %c0_i32_1 = arith.constant 0 : i32
    return %c0_i32, %c0_i32_0 : i32, i32
  }
  func.func @transform_2(%arg0: i32) -> (i32, i32) {
    %c0_i32 = arith.constant 0 : i32
    %c0_i32_0 = arith.constant 0 : i32
    %c0_i32_1 = arith.constant 0 : i32
    return %c0_i32, %c0_i32_0 : i32, i32
  }
  func.func @transform_3(%arg0: i32) -> (i32, i32) {
    %c0_i32 = arith.constant 0 : i32
    %c0_i32_0 = arith.constant 0 : i32
    %c0_i32_1 = arith.constant 0 : i32
    return %c0_i32, %c0_i32_0 : i32, i32
  }
  func.func @transform_4(%arg0: i32) -> (i32, i32) {
    %c0_i32 = arith.constant 0 : i32
    %c0_i32_0 = arith.constant 0 : i32
    %c0_i32_1 = arith.constant 0 : i32
    return %c0_i32, %c0_i32_0 : i32, i32
  }
  func.func @transform_5(%arg0: i32) -> (i32, i32) {
    %c0_i32 = arith.constant 0 : i32
    %c0_i32_0 = arith.constant 0 : i32
    %c0_i32_1 = arith.constant 0 : i32
    return %c0_i32, %c0_i32_0 : i32, i32
  }
  func.func @transform_6(%arg0: i32) -> (i32, i32) {
    %c0_i32 = arith.constant 0 : i32
    %c0_i32_0 = arith.constant 0 : i32
    %c0_i32_1 = arith.constant 0 : i32
    return %c0_i32, %c0_i32_0 : i32, i32
  }
  func.func @transform_7(%arg0: i32) -> (i32, i32) {
    %c0_i32 = arith.constant 0 : i32
    %c0_i32_0 = arith.constant 0 : i32
    %c0_i32_1 = arith.constant 0 : i32
    return %c0_i32, %c0_i32_0 : i32, i32
  }
  func.func @transform_8(%arg0: i32) -> (i32, i32) {
    %c0_i32 = arith.constant 0 : i32
    %c0_i32_0 = arith.constant 0 : i32
    %c0_i32_1 = arith.constant 0 : i32
    return %c0_i32, %c0_i32_0 : i32, i32
  }
  func.func @transform_9(%arg0: i32) -> (i32, i32) {
    %c0_i32 = arith.constant 0 : i32
    %c0_i32_0 = arith.constant 0 : i32
    %c0_i32_1 = arith.constant 0 : i32
    return %c0_i32, %c0_i32_0 : i32, i32
  }
  func.func @transform_10(%arg0: i32) -> (i32, i32) {
    %c0_i32 = arith.constant 0 : i32
    %c0_i32_0 = arith.constant 0 : i32
    %c0_i32_1 = arith.constant 0 : i32
    return %c0_i32, %c0_i32_0 : i32, i32
  }
  func.func @transform_12(%arg0: i32) -> (i32, i32) {
    %c0_i32 = arith.constant 0 : i32
    %c0_i32_0 = arith.constant 0 : i32
    %c0_i32_1 = arith.constant 0 : i32
    return %c0_i32, %c0_i32_0 : i32, i32
  }
  func.func @transform_13(%arg0: i32) -> (i32, i32) {
    %c0_i32 = arith.constant 0 : i32
    %c0_i32_0 = arith.constant 0 : i32
    %c0_i32_1 = arith.constant 0 : i32
    return %c0_i32, %c0_i32_0 : i32, i32
  }
}

</mosaic_0001>

<bundles_post_ra>
// kernel: encoder_forward.1
= control target key start
LH: loop header
LB: loop body
LE: loop exit
PB: predicated region body
PF: predicated region fallthrough
CT: control target
= control target key end

     0   :  { %18 = vsyncpa [#allocation15], 0  ;;  %s17859_s0 = inlined_call_operand.vmem [shape: f32[256,1], index: 0, kind: input, shape index: {}]   ;;  %s17860_s1 = inlined_call_operand.hbm [shape: f32[1,128], index: 1, kind: input, shape index: {}]   ;;  %s17861_s2 = inlined_call_operand.hbm [shape: f32[1,128], index: 2, kind: input, shape index: {}]   ;;  %s17862_s3 = inlined_call_operand.hbm [shape: bf16[128,128], index: 3, kind: input, shape index: {}]   ;;  %s17863_s4 = inlined_call_operand.hbm [shape: f32[1,128], index: 4, kind: input, shape index: {}]   ;;  %s17864_s5 = inlined_call_operand.hbm [shape: bf16[128,256], index: 5, kind: input, shape index: {}]   ;;  %s17865_s6 = inlined_call_operand.hbm [shape: f32[1,256], index: 6, kind: input, shape index: {}]   ;;  %s17866_s7 = inlined_call_operand.hbm [shape: bf16[256,256], index: 7, kind: input, shape index: {}]   ;;  %s17867_s8 = inlined_call_operand.hbm [shape: f32[1,256], index: 8, kind: input, shape index: {}]   ;;  %s17868_s9 = inlined_call_operand.hbm [shape: bf16[256,1024], index: 9, kind: input, shape index: {}]   ;;  %s17869_s10 = inlined_call_operand.hbm [shape: f32[1,1024], index: 10, kind: input, shape index: {}]   ;;  %s17870_s11 = inlined_call_operand.hbm [shape: bf16[1024,2048], index: 11, kind: input, shape index: {}]   ;;  %s17871_s12 = inlined_call_operand.hbm [shape: f32[1,2048], index: 12, kind: input, shape index: {}]   ;;  %s17872_s13 = inlined_call_operand.vmem [shape: f32[2,2048], index: 13, kind: output, shape index: {}]  }
   0x1   :  { %19 = vsyncpa [#allocation17], 0 }
   0x2   :  { %20 = vsyncpa [#allocation20], 0 }
   0x3   :  { %21 = vsyncpa [#allocation23], 0 }
   0x4   :  { %22 = vsyncpa [#allocation26], 0  ;;  %s42_s27 = sshll.u32 %s17861_s2, 4  ;;  %s43_s27 = int_to_ptr.hbm [resolvable:$true] %s42_s27 }
   0x5   :  { %23 = vsyncpa [#allocation29], 0  ;;  %s16852_s28 = smov [#allocation16]   ;;  %s66_s15 = sshll.u32 %s17863_s4, 4  ;;  %s67_s15 = int_to_ptr.hbm [resolvable:$true] %s66_s15 }
   0x6   :  { %s44_s29 = sshll.u32 %s16852_s28, 4  ;;  %s16853_s16 = smov [#allocation19]   ;;  %s45_s29 = int_to_ptr.vmem [resolvable:$true] %s44_s29 }
   0x7   :  { %47 = dma.hbm_to_vmem [thread:$0]  %s43_s27, 16, %s45_s29, [#allocation17]  }
   0x8   :  { %s68_s17 = sshll.u32 %s16853_s16, 4  ;;  %s90_s20 = sshll.u32 %s17865_s6, 4  ;;  %s69_s17 = int_to_ptr.vmem [resolvable:$true] %s68_s17  ;;  %s91_s20 = int_to_ptr.hbm [resolvable:$true] %s90_s20 }
   0x9   :  { %71 = dma.hbm_to_vmem [thread:$0]  %s67_s15, 16, %s69_s17, [#allocation20]  }
   0xa   :  { %s114_s22 = sshll.u32 %s17867_s8, 4  ;;  %s16854_s23 = smov [#allocation22]   ;;  %s115_s22 = int_to_ptr.hbm [resolvable:$true] %s114_s22 }
   0xb   :  { %s92_s24 = sshll.u32 %s16854_s23, 4  ;;  %s16855_s4 = smov [#allocation25]   ;;  %s93_s24 = int_to_ptr.vmem [resolvable:$true] %s92_s24 }
   0xc   :  { %95 = dma.hbm_to_vmem [thread:$0]  %s91_s20, 32, %s93_s24, [#allocation23]  }
   0xd   :  { %s116_s25 = sshll.u32 %s16855_s4, 4  ;;  %s138_s28 = sshll.u32 %s17869_s10, 4  ;;  %s117_s25 = int_to_ptr.vmem [resolvable:$true] %s116_s25  ;;  %s139_s28 = int_to_ptr.hbm [resolvable:$true] %s138_s28 }
   0xe   :  { %119 = dma.hbm_to_vmem [thread:$0]  %s115_s22, 32, %s117_s25, [#allocation26]  }
   0xf   :  { %s31_s30 = sshll.u32 %s17860_s1, 4  ;;  %s16856_s14 = smov [#allocation28]   ;;  %s32_s30 = int_to_ptr.hbm [resolvable:$true] %s31_s30 }
  0x10   :  { %s140_s8 = sshll.u32 %s16856_s14, 4  ;;  %s16857_s15 = smov [#allocation14]   ;;  %s141_s8 = int_to_ptr.vmem [resolvable:$true] %s140_s8 }
  0x11   :  { %143 = dma.hbm_to_vmem [thread:$0]  %s139_s28, 128, %s141_s8, [#allocation29]  }
  0x12   :  { %s33_s16 = sshll.u32 %s16857_s15, 4  ;;  %s52_s19 = sshll.u32 %s17862_s3, 4  ;;  %s34_s16 = int_to_ptr.vmem [resolvable:$true] %s33_s16  ;;  %s53_s19 = int_to_ptr.hbm [resolvable:$true] %s52_s19 }
  0x13   :  { %36 = dma.hbm_to_vmem [thread:$0]  %s32_s30, 16, %s34_s16, [#allocation15]  }
  0x14   :  { %s16858_s10 = smov [#allocation18]   ;;  %s76_s1 = sshll.u32 %s17864_s5, 4  ;;  %s77_s1 = int_to_ptr.hbm [resolvable:$true] %s76_s1 }
  0x15   :  { %s54_s20 = sshll.u32 %s16858_s10, 4  ;;  %s16859_s22 = smov 64   ;;  %s55_s20 = int_to_ptr.vmem [resolvable:$true] %s54_s20 }
  0x16   :  { %s16860_s23 = smov 4   ;;  %s16861_s24 = smov [#allocation21]  }
  0x17   :  { %60 = dma.hbm_to_vmem [thread:$0]  %s53_s19, 1024, %s55_s20, [#allocation17], %s16859_s22, %s16859_s22, %s16860_s23  }
  0x18   :  { %s78_s4 = sshll.u32 %s16861_s24, 4  ;;  %s16862_s25 = smov 128   ;;  %s79_s4 = int_to_ptr.vmem [resolvable:$true] %s78_s4 }
  0x19   :  { %s16863_s26 = smov 8   ;;  %s100_s28 = sshll.u32 %s17866_s7, 4  ;;  %s101_s28 = int_to_ptr.hbm [resolvable:$true] %s100_s28 }
  0x1a   :  { %84 = dma.hbm_to_vmem [thread:$0]  %s77_s1, 2048, %s79_s4, [#allocation20], %s16862_s25, %s16862_s25, %s16863_s26  }
  0x1b   :  { %s16864_s6 = smov [#allocation24]   ;;  %s124_s14 = sshll.u32 %s17868_s9, 4  ;;  %s125_s14 = int_to_ptr.hbm [resolvable:$true] %s124_s14 }
  0x1c   :  { %s102_s29 = sshll.u32 %s16864_s6, 4  ;;  %s16865_s8 = smov [#allocation27]   ;;  %s103_s29 = int_to_ptr.vmem [resolvable:$true] %s102_s29 }
  0x1d   :  { %108 = dma.hbm_to_vmem [thread:$0]  %s101_s28, 4096, %s103_s29, [#allocation23], %s16862_s25, %s16862_s25, %s16863_s26  }
  0x1e   :  { %s126_s15 = sshll.u32 %s16865_s8, 4  ;;  %s16866_s16 = smov 512   ;;  %s127_s15 = int_to_ptr.vmem [resolvable:$true] %s126_s15 }
  0x1f   :  { %s16867_s17 = smov 32   ;;  %s149_s7 = sshll.u32 %s17871_s12, 4  ;;  %s150_s7 = int_to_ptr.hbm [resolvable:$true] %s149_s7 }
  0x20   :  { %132 = dma.hbm_to_vmem [thread:$0]  %s125_s14, 16384, %s127_s15, [#allocation26], %s16866_s16, %s16866_s16, %s16867_s17  }
  0x21   :  { %s16868_s10 = smov [#allocation30]  }
  0x22   :  { %s151_s20 = sshll.u32 %s16868_s10, 4  ;;  %s152_s20 = int_to_ptr.vmem [resolvable:$true] %s151_s20 }
  0x23   :  { %154 = dma.hbm_to_vmem [thread:$0]  %s150_s7, 256, %s152_s20, [#allocation29]  }
  0x24   :  { %16838 = dma.done.wait [#allocation15], 16  }
  0x25   :  { %16839 = vsyncadd [#allocation15], 4294967280 }
  0x26   :  { %16840 = dma.done.wait [#allocation17], 1040  }
  0x27   :  { %16841 = vsyncadd [#allocation17], 4294966256 }
  0x28   :  { %16842 = dma.done.wait [#allocation20], 2064  }
  0x29   :  { %16843 = vsyncadd [#allocation20], 4294965232 }
  0x2a   :  { %16844 = dma.done.wait [#allocation23], 4128  }
  0x2b   :  { %16845 = vsyncadd [#allocation23], 4294963168 }
  0x2c   :  { %16846 = dma.done.wait [#allocation26], 16416  }
  0x2d   :  { %16847 = vsyncadd [#allocation26], 4294950880 }
  0x2e   :  { %16848 = dma.done.wait [#allocation29], 384  }
  0x2f   :  { %16849 = vsyncadd [#allocation29], 4294966912  ;;  %v16869_v0 = vmov 0   ;;  %v221_v1 = vld [vmem:[%s17859_s0 + $0x48] sm:$0xff]  ;;  %v223_v4 = vld [vmem:[%s17859_s0 + $0x58] sm:$0xff]  ;;  %v16870_v60 = vmov 0.0  }
  0x30   :  { %16419 = vset.pattern.permute.xlu2 %v16869_v0  ;;  %16418 = vset.pattern.permute.xlu1 %v16869_v0  ;;  %v217_v2 = vld [vmem:[%s17859_s0 + $0x28] sm:$0xff]  ;;  %v219_v5 = vld [vmem:[%s17859_s0 + $0x38] sm:$0xff]  ;;  %v214_v16 = vld [vmem:[%s17859_s0 + $0x10] sm:$0xff]  ;;  %540 = vst [vmem:[#allocation9] sm:$0x1] %v16870_v60  ;;  %vm1089_vm1 = vcmask 1041408  }
  0x31   :  { %16417 = vset.pattern.permute.xlu0 %v16869_v0  ;;  %v213_v3 = vld [vmem:[%s17859_s0 + $0x8] sm:$0xff]  ;;  %292 = vperm.xlu2 %16419, %v221_v1   ;;  %v215_v6 = vld [vmem:[%s17859_s0 + $0x18] sm:$0xff]  ;;  %v212_v17 = vld [vmem:[%s17859_s0] sm:$0xff]  ;;  %557 = vst [vmem:[#allocation9 + $0x9] sm:$0x1] %v16870_v60  ;;  %s206_s25 = sshll.u32 %s17870_s11, 4  ;;  %s207_s25 = int_to_ptr.hbm [resolvable:$true] %s206_s25 }
  0x32   :  { %272 = vperm.xlu1 %16418, %v217_v2   ;;  %252 = vperm.xlu0 %16417, %v213_v3   ;;  %v229_v7 = vld [vmem:[%s17859_s0 + $0x88] sm:$0xff]  ;;  %v227_v8 = vld [vmem:[%s17859_s0 + $0x78] sm:$0xff]  ;;  %v220_v19 = vld [vmem:[%s17859_s0 + $0x40] sm:$0xff]  ;;  %s16871_s26 = smov [#allocation2]   ;;  %vm2125_vm2 = vcmask 1045508   ;;  %vm814_vm3 = vcmask 1043456  }
  0x33   :  { %v225_v9 = vld [vmem:[%s17859_s0 + $0x68] sm:$0xff]  ;;  %v235_v10 = vld [vmem:[%s17859_s0 + $0xb8] sm:$0xff]  ;;  %v218_v20 = vld [vmem:[%s17859_s0 + $0x30] sm:$0xff]  ;;  %s208_s3 = sshll.u32 %s16871_s26, 4  ;;  %s209_s3 = int_to_ptr.vmem [resolvable:$true] %s208_s3 }
  0x34   :  { %v233_v11 = vld [vmem:[%s17859_s0 + $0xa8] sm:$0xff]  ;;  %v231_v12 = vld [vmem:[%s17859_s0 + $0x98] sm:$0xff]  ;;  %v216_v21 = vld [vmem:[%s17859_s0 + $0x20] sm:$0xff]  ;;  %211 = dma.hbm_to_vmem [thread:$0]  %s207_s25, 131072, %s209_s3, [#allocation3] }
  0x35   :  { %v241_v13 = vld [vmem:[%s17859_s0 + $0xe8] sm:$0xff]  ;;  %v239_v14 = vld [vmem:[%s17859_s0 + $0xd8] sm:$0xff]  ;;  %v226_v22 = vld [vmem:[%s17859_s0 + $0x70] sm:$0xff] }
  0x36   :  { %v237_v15 = vld [vmem:[%s17859_s0 + $0xc8] sm:$0xff]  ;;  %v243_v18 = vld [vmem:[%s17859_s0 + $0xf8] sm:$0xff]  ;;  %v224_v23 = vld [vmem:[%s17859_s0 + $0x60] sm:$0xff] }
  0x37   :  { %v222_v24 = vld [vmem:[%s17859_s0 + $0x50] sm:$0xff]  ;;  %v232_v25 = vld [vmem:[%s17859_s0 + $0xa0] sm:$0xff]  ;;  %v17071_v33 = vld [vmem:[#allocation14] ss:$0 sm:$0xff] }
  0x38   :  { %v230_v26 = vld [vmem:[%s17859_s0 + $0x90] sm:$0xff]  ;;  %v228_v27 = vld [vmem:[%s17859_s0 + $0x80] sm:$0xff]  ;;  %v17073_v35 = vld [vmem:[#allocation16] ss:$0 sm:$0xff] }
  0x39   :  { %302 = vperm.xlu2 %16419, %v223_v4   ;;  %v238_v28 = vld [vmem:[%s17859_s0 + $0xd0] sm:$0xff]  ;;  %v236_v29 = vld [vmem:[%s17859_s0 + $0xc0] sm:$0xff] }
  0x3a   :  { %282 = vperm.xlu1 %16418, %v219_v5   ;;  %262 = vperm.xlu0 %16417, %v215_v6   ;;  %v234_v30 = vld [vmem:[%s17859_s0 + $0xb0] sm:$0xff]  ;;  %v240_v32 = vld [vmem:[%s17859_s0 + $0xe0] sm:$0xff] }
  0x3b   :  { %v242_v31 = vld [vmem:[%s17859_s0 + $0xf0] sm:$0xff]  ;;  %v15196_v46 = vld [vmem:[#allocation18 + $0x38] sm:$0xff]  ;;  %v15195_v57 = vld [vmem:[#allocation18 + $0x30] sm:$0xff] }
  0x3c   :  { %647 = vmatpush.bf16.msra.mxu0 %v15196_v46  ;;  %v15194_v61 = vld [vmem:[#allocation18 + $0x28] sm:$0xff] }
  0x40   :  { %648 = vmatpush.bf16.msra.mxu0 %v15195_v57 }
  0x41   :  { %332 = vperm.xlu2 %16419, %v229_v7   ;;  %v15193_v7 = vld [vmem:[#allocation18 + $0x20] sm:$0xff] }
  0x42   :  { %322 = vperm.xlu1 %16418, %v227_v8   ;;  %312 = vperm.xlu0 %16417, %v225_v9  }
  0x44   :  { %649 = vmatpush.bf16.msra.mxu0 %v15194_v61 }
  0x48   :  { %650 = vmatpush.bf16.msra.mxu0 %v15193_v7 }
  0x49   :  { %362 = vperm.xlu2 %16419, %v235_v10  }
  0x4a   :  { %352 = vperm.xlu1 %16418, %v233_v11   ;;  %342 = vperm.xlu0 %16417, %v231_v12   ;;  %v15192_v12 = vld [vmem:[#allocation18 + $0x18] sm:$0xff] }
  0x4c   :  { %651 = vmatpush.bf16.msra.mxu0 %v15192_v12 }
  0x51   :  { %392 = vperm.xlu2 %16419, %v241_v13  }
  0x52   :  { %382 = vperm.xlu1 %16418, %v239_v14   ;;  %372 = vperm.xlu0 %16417, %v237_v15  }
  0x59   :  { %257 = vperm.xlu2 %16419, %v214_v16  }
  0x5a   :  { %247 = vperm.xlu1 %16418, %v212_v17   ;;  %402 = vperm.xlu0 %16417, %v243_v18  }
  0x61   :  { %287 = vperm.xlu2 %16419, %v220_v19  }
  0x62   :  { %277 = vperm.xlu1 %16418, %v218_v20   ;;  %267 = vperm.xlu0 %16417, %v216_v21  }
  0x69   :  { %317 = vperm.xlu2 %16419, %v226_v22   ;;  %v15191_v22 = vld [vmem:[#allocation18 + $0x10] sm:$0xff] }
  0x6a   :  { %307 = vperm.xlu1 %16418, %v224_v23   ;;  %297 = vperm.xlu0 %16417, %v222_v24  }
  0x6b   :  { %652 = vmatpush.bf16.msra.mxu0 %v15191_v22 }
  0x71   :  { %347 = vperm.xlu2 %16419, %v232_v25  }
  0x72   :  { %337 = vperm.xlu1 %16418, %v230_v26   ;;  %327 = vperm.xlu0 %16417, %v228_v27  }
  0x79   :  { %377 = vperm.xlu2 %16419, %v238_v28  }
  0x7a   :  { %367 = vperm.xlu1 %16418, %v236_v29   ;;  %357 = vperm.xlu0 %16417, %v234_v30   ;;  %v15190_v29 = vld [vmem:[#allocation18 + $0x8] sm:$0xff] }
  0x7b   :  { %653 = vmatpush.bf16.msra.mxu0 %v15190_v29 }
  0x82   :  { %397 = vperm.xlu1 %16418, %v242_v31   ;;  %387 = vperm.xlu0 %16417, %v240_v32  }
  0x8b   :  { %v293_v34 = vpop.permute.xlu2 %292 }
  0x8c   :  { %v417_v36 = vmul.f32 %v17071_v33, %v293_v34 }
  0x8e   :  { %v453_v37 = vadd.f32 %v17073_v35, %v417_v36 }
  0x90   :  { %16423 = vtanh.f32 %v453_v37 }
  0x93   :  { %v303_v38 = vpop.permute.xlu2 %302 }
  0x94   :  { %v419_v39 = vmul.f32 %v17071_v33, %v303_v38 }
  0x96   :  { %v16424_v40 = vpop.eup %16423  ;;  %v455_v41 = vadd.f32 %v17073_v35, %v419_v39 }
  0x97   :  { %517 = vst [vmem:[#allocation4 + $0x48] sm:$0xff] %v16424_v40 }
  0x98   :  { %16425 = vtanh.f32 %v455_v41  ;;  %v15189_v41 = vld [vmem:[#allocation18] sm:$0xff] }
  0x99   :  { %654 = vmatpush.bf16.msra.mxu0 %v15189_v41 }
  0x9b   :  { %v333_v42 = vpop.permute.xlu2 %332 }
  0x9c   :  { %v425_v43 = vmul.f32 %v17071_v33, %v333_v42 }
  0x9e   :  { %v16426_v44 = vpop.eup %16425  ;;  %v461_v45 = vadd.f32 %v17073_v35, %v425_v43  ;;  %v549_v47 = vld [vmem:[#allocation4 + $0x4f] sm:$0x1] }
  0x9f   :  { %519 = vst [vmem:[#allocation4 + $0x58] sm:$0xff] %v16426_v44 }
  0xa0   :  { %16427 = vtanh.f32 %v461_v45  ;;  %550 = vst [vmem:[#allocation9 + $0x5] sm:$0x1] %v549_v47 }
  0xa3   :  { %v363_v48 = vpop.permute.xlu2 %362 }
  0xa4   :  { %v273_v49 = vpop.permute.xlu1 %272  ;;  %v431_v50 = vmul.f32 %v17071_v33, %v363_v48  ;;  %v253_v52 = vpop.permute.xlu0 %252 }
  0xa5   :  { %v413_v51 = vmul.f32 %v17071_v33, %v273_v49  ;;  %v409_v53 = vmul.f32 %v17071_v33, %v253_v52 }
  0xa6   :  { %v16428_v54 = vpop.eup %16427  ;;  %v467_v55 = vadd.f32 %v17073_v35, %v431_v50  ;;  %v551_v58 = vld [vmem:[#allocation4 + $0x5f] sm:$0x1] }
  0xa7   :  { %v449_v56 = vadd.f32 %v17073_v35, %v413_v51  ;;  %525 = vst [vmem:[#allocation4 + $0x88] sm:$0xff] %v16428_v54  ;;  %v445_v59 = vadd.f32 %v17073_v35, %v409_v53 }
  0xa8   :  { %16429 = vtanh.f32 %v467_v55  ;;  %552 = vst [vmem:[#allocation9 + $0x6] sm:$0x1] %v551_v58 }
  0xa9   :  { %16431 = vtanh.f32 %v449_v56 }
  0xaa   :  { %16433 = vtanh.f32 %v445_v59 }
  0xab   :  { %v393_v62 = vpop.permute.xlu2 %392 }
  0xac   :  { %v283_v63 = vpop.permute.xlu1 %282  ;;  %v437_v0 = vmul.f32 %v17071_v33, %v393_v62  ;;  %v263_v2 = vpop.permute.xlu0 %262 }
  0xad   :  { %v415_v1 = vmul.f32 %v17071_v33, %v283_v63  ;;  %v411_v3 = vmul.f32 %v17071_v33, %v263_v2  ;;  %v818_v63 = vlaneseq }
  0xae   :  { %v16430_v4 = vpop.eup %16429  ;;  %v473_v5 = vadd.f32 %v17073_v35, %v437_v0  ;;  %v558_v10 = vld [vmem:[#allocation4 + $0x8f] sm:$0x1]  ;;  %v10790_v0 = vld [vmem:[#allocation27 + $0x190] sm:$0xf] }
  0xaf   :  { %v451_v6 = vadd.f32 %v17073_v35, %v415_v1  ;;  %v16432_v8 = vpop.eup %16431  ;;  %531 = vst [vmem:[#allocation4 + $0xb8] sm:$0xff] %v16430_v4  ;;  %v447_v9 = vadd.f32 %v17073_v35, %v411_v3  ;;  %vm17113_vm0 = vcmp.lt.s32.totalorder %v818_v63, 256 }
  0xb0   :  { %v16434_v11 = vpop.eup %16433  ;;  %513 = vst [vmem:[#allocation4 + $0x28] sm:$0xff] %v16432_v8  ;;  %16435 = vtanh.f32 %v473_v5 }
  0xb1   :  { %509 = vst [vmem:[#allocation4 + $0x8] sm:$0xff] %v16434_v11  ;;  %16437 = vtanh.f32 %v451_v6 }
  0xb2   :  { %16439 = vtanh.f32 %v447_v9  ;;  %559 = vst [vmem:[#allocation9 + $0xa] sm:$0x1] %v558_v10 }
  0xb3   :  { %v258_v14 = vpop.permute.xlu2 %257  ;;  %822 = vst.msk [vmem:[#allocation11] ss:$2 sm:$0x3] %vm17113_vm0, %v16870_v60 }
  0xb4   :  { %v323_v13 = vpop.permute.xlu1 %322  ;;  %v410_v16 = vmul.f32 %v17071_v33, %v258_v14  ;;  %v313_v17 = vpop.permute.xlu0 %312  ;;  %824 = vst.msk [vmem:[#allocation11 + $0x1] ss:$2 sm:$0x3] %vm17113_vm0, %v16870_v60 }
  0xb5   :  { %v423_v15 = vmul.f32 %v17071_v33, %v323_v13  ;;  %v421_v18 = vmul.f32 %v17071_v33, %v313_v17 }
  0xb6   :  { %v16436_v19 = vpop.eup %16435  ;;  %v446_v21 = vadd.f32 %v17073_v35, %v410_v16  ;;  %v564_v28 = vld [vmem:[#allocation4 + $0xbf] sm:$0x1] }
  0xb7   :  { %v459_v20 = vadd.f32 %v17073_v35, %v423_v15  ;;  %v16438_v23 = vpop.eup %16437  ;;  %537 = vst [vmem:[#allocation4 + $0xe8] sm:$0xff] %v16436_v19  ;;  %v457_v24 = vadd.f32 %v17073_v35, %v421_v18  ;;  %v545_v27 = vld [vmem:[#allocation4 + $0x2f] sm:$0x1] }
  0xb8   :  { %v16440_v25 = vpop.eup %16439  ;;  %515 = vst [vmem:[#allocation4 + $0x38] sm:$0xff] %v16438_v23  ;;  %v541_v26 = vld [vmem:[#allocation4 + $0xf] sm:$0x1] }
  0xb9   :  { %16441 = vtanh.f32 %v459_v20  ;;  %511 = vst [vmem:[#allocation4 + $0x18] sm:$0xff] %v16440_v25 }
  0xba   :  { %16443 = vtanh.f32 %v446_v21  ;;  %542 = vst [vmem:[#allocation9 + $0x1] sm:$0x1] %v541_v26 }
  0xbb   :  { %16445 = vtanh.f32 %v457_v24  ;;  %v288_v31 = vpop.permute.xlu2 %287  ;;  %546 = vst [vmem:[#allocation9 + $0x3] sm:$0x1] %v545_v27 }
  0xbc   :  { %v353_v30 = vpop.permute.xlu1 %352  ;;  %v416_v34 = vmul.f32 %v17071_v33, %v288_v31  ;;  %v343_v36 = vpop.permute.xlu0 %342  ;;  %565 = vst [vmem:[#allocation9 + $0xd] sm:$0x1] %v564_v28 }
  0xbd   :  { %v429_v32 = vmul.f32 %v17071_v33, %v353_v30  ;;  %v427_v37 = vmul.f32 %v17071_v33, %v343_v36 }
  0xbe   :  { %v452_v40 = vadd.f32 %v17073_v35, %v416_v34  ;;  %v570_v47 = vld [vmem:[#allocation4 + $0xef] sm:$0x1] }
  0xbf   :  { %v16442_v38 = vpop.eup %16441  ;;  %v465_v39 = vadd.f32 %v17073_v35, %v429_v32  ;;  %v463_v43 = vadd.f32 %v17073_v35, %v427_v37  ;;  %v547_v46 = vld [vmem:[#allocation4 + $0x3f] sm:$0x1]  ;;  %571 = vst [vmem:[#allocation9 + $0x10] sm:$0x1] %v570_v47 }
  0xc0   :  { %v16444_v42 = vpop.eup %16443  ;;  %523 = vst [vmem:[#allocation4 + $0x78] sm:$0xff] %v16442_v38  ;;  %v543_v45 = vld [vmem:[#allocation4 + $0x1f] sm:$0x1] }
  0xc1   :  { %v16446_v44 = vpop.eup %16445  ;;  %16447 = vtanh.f32 %v465_v39  ;;  %544 = vst [vmem:[#allocation9 + $0x2] sm:$0x1] %v543_v45 }
  0xc2   :  { %521 = vst [vmem:[#allocation4 + $0x68] sm:$0xff] %v16446_v44  ;;  %16449 = vtanh.f32 %v452_v40 }
  0xc3   :  { %16451 = vtanh.f32 %v463_v43  ;;  %v318_v49 = vpop.permute.xlu2 %317  ;;  %548 = vst [vmem:[#allocation9 + $0x4] sm:$0x1] %v547_v46 }
  0xc4   :  { %v383_v48 = vpop.permute.xlu1 %382  ;;  %v422_v51 = vmul.f32 %v17071_v33, %v318_v49  ;;  %v373_v52 = vpop.permute.xlu0 %372 }
  0xc5   :  { %v435_v50 = vmul.f32 %v17071_v33, %v383_v48  ;;  %v433_v53 = vmul.f32 %v17071_v33, %v373_v52 }
  0xc6   :  { %v458_v56 = vadd.f32 %v17073_v35, %v422_v51 }
  0xc7   :  { %v16448_v54 = vpop.eup %16447  ;;  %v471_v55 = vadd.f32 %v17073_v35, %v435_v50  ;;  %v469_v58 = vadd.f32 %v17073_v35, %v433_v53  ;;  %v555_v62 = vld [vmem:[#allocation4 + $0x7f] sm:$0x1] }
  0xc8   :  { %v16450_v57 = vpop.eup %16449  ;;  %529 = vst [vmem:[#allocation4 + $0xa8] sm:$0xff] %v16448_v54 }
  0xc9   :  { %v16452_v59 = vpop.eup %16451  ;;  %16453 = vtanh.f32 %v471_v55  ;;  %v553_v61 = vld [vmem:[#allocation4 + $0x6f] sm:$0x1]  ;;  %556 = vst [vmem:[#allocation9 + $0x8] sm:$0x1] %v555_v62 }
  0xca   :  { %527 = vst [vmem:[#allocation4 + $0x98] sm:$0xff] %v16452_v59  ;;  %16455 = vtanh.f32 %v458_v56 }
  0xcb   :  { %16457 = vtanh.f32 %v469_v58  ;;  %554 = vst [vmem:[#allocation9 + $0x7] sm:$0x1] %v553_v61  ;;  %v348_v1 = vpop.permute.xlu2 %347 }
  0xcc   :  { %v248_v2 = vpop.permute.xlu1 %247  ;;  %v428_v3 = vmul.f32 %v17071_v33, %v348_v1  ;;  %v403_v4 = vpop.permute.xlu0 %402 }
  0xcd   :  { %v408_v5 = vmul.f32 %v17071_v33, %v248_v2  ;;  %v439_v6 = vmul.f32 %v17071_v33, %v403_v4 }
  0xce   :  { %v464_v8 = vadd.f32 %v17073_v35, %v428_v3 }
  0xcf   :  { %v16454_v7 = vpop.eup %16453  ;;  %v444_v9 = vadd.f32 %v17073_v35, %v408_v5  ;;  %v475_v11 = vadd.f32 %v17073_v35, %v439_v6  ;;  %v562_v14 = vld [vmem:[#allocation4 + $0xaf] sm:$0x1] }
  0xd0   :  { %v16456_v10 = vpop.eup %16455  ;;  %535 = vst [vmem:[#allocation4 + $0xd8] sm:$0xff] %v16454_v7  ;;  %16459 = vtanh.f32 %v464_v8 }
  0xd1   :  { %v16458_v12 = vpop.eup %16457  ;;  %v560_v13 = vld [vmem:[#allocation4 + $0x9f] sm:$0x1]  ;;  %16461 = vtanh.f32 %v475_v11  ;;  %563 = vst [vmem:[#allocation9 + $0xc] sm:$0x1] %v562_v14  ;;  %v15211_v11 = vld [vmem:[#allocation21 + $0x74] sm:$0xf] }
  0xd2   :  { %533 = vst [vmem:[#allocation4 + $0xc8] sm:$0xff] %v16458_v12  ;;  %16463 = vtanh.f32 %v444_v9  ;;  %v590_v40 = vld [vmem:[#allocation9] sm:$0xff]  ;;  %v10446_v9 = vld [vmem:[#allocation21 + $0x70] sm:$0xf]  ;;  %v15212_v10 = vld [vmem:[#allocation21 + $0x74] sm:$0xf0] }
  0xd3   :  { %561 = vst [vmem:[#allocation9 + $0xb] sm:$0x1] %v560_v13  ;;  %v378_v15 = vpop.permute.xlu2 %377  ;;  %v10447_v12 = vor.u32 %v15212_v10, %v10446_v9  ;;  %v10448_v13 = vld [vmem:[#allocation21 + $0x78] sm:$0xf0]  ;;  %v15243_v9 = vld [vmem:[#allocation24 + $0xf4] sm:$0xf] }
  0xd4   :  { %v278_v16 = vpop.permute.xlu1 %277  ;;  %v434_v60 = vmul.f32 %v17071_v33, %v378_v15  ;;  %v268_v17 = vpop.permute.xlu0 %267  ;;  %v10451_v14 = vor.u32 %v15211_v11, %v10448_v13  ;;  %v10438_v15 = vld [vmem:[#allocation21 + $0x60] sm:$0xf] }
  0xd5   :  { %v414_v18 = vmul.f32 %v17071_v33, %v278_v16  ;;  %v412_v19 = vmul.f32 %v17071_v33, %v268_v17  ;;  %783 = vmatpush.bf16.msra.mxu1 %v10447_v12  ;;  %v15209_v16 = vld [vmem:[#allocation21 + $0x64] sm:$0xf]  ;;  %v10440_v17 = vld [vmem:[#allocation21 + $0x68] sm:$0xf0]  ;;  %v10576_v10 = vld [vmem:[#allocation24 + $0xf8] sm:$0xf0] }
  0xd6   :  { %v16460_v20 = vpop.eup %16459  ;;  %v470_v21 = vadd.f32 %v17073_v35, %v434_v60  ;;  %796 = vmatpush.bf16.msra.mxu2 %v10451_v14  ;;  %v10579_v12 = vor.u32 %v15243_v9, %v10576_v10  ;;  %v10486_v13 = vld [vmem:[#allocation24 + $0x40] sm:$0xf]  ;;  %v15222_v14 = vld [vmem:[#allocation24 + $0x44] sm:$0xf0] }
  0xd7   :  { %v450_v22 = vadd.f32 %v17073_v35, %v414_v18  ;;  %v16462_v23 = vpop.eup %16461  ;;  %v448_v24 = vadd.f32 %v17073_v35, %v412_v19  ;;  %v568_v27 = vld [vmem:[#allocation4 + $0xdf] sm:$0x1]  ;;  %v10443_v18 = vor.u32 %v15209_v16, %v10440_v17  ;;  %v15207_v20 = vld [vmem:[#allocation21 + $0x54] sm:$0xf]  ;;  %v15242_v16 = vld [vmem:[#allocation24 + $0xe4] sm:$0xf0] }
  0xd8   :  { %v16464_v25 = vpop.eup %16463  ;;  %539 = vst [vmem:[#allocation4 + $0xf8] sm:$0xff] %v16462_v23  ;;  %16465 = vtanh.f32 %v470_v21  ;;  %v15208_v19 = vld [vmem:[#allocation21 + $0x54] sm:$0xf0]  ;;  %v10504_v17 = vld [vmem:[#allocation24 + $0x68] sm:$0xf0] }
  0xd9   :  { %v566_v26 = vld [vmem:[#allocation4 + $0xcf] sm:$0x1]  ;;  %16467 = vtanh.f32 %v448_v24  ;;  %569 = vst [vmem:[#allocation9 + $0xf] sm:$0x1] %v568_v27  ;;  %v10422_v24 = vld [vmem:[#allocation21 + $0x40] sm:$0xf] }
  0xda   :  { %16469 = vtanh.f32 %v450_v22  ;;  %567 = vst [vmem:[#allocation9 + $0xe] sm:$0x1] %v566_v26  ;;  %797 = vmatpush.bf16.msra.mxu2 %v10443_v18  ;;  %v10432_v22 = vld [vmem:[#allocation21 + $0x58] sm:$0xf0]  ;;  %v15206_v25 = vld [vmem:[#allocation21 + $0x44] sm:$0xf0] }
  0xdb   :  { %v10435_v23 = vor.u32 %v15207_v20, %v10432_v22  ;;  %v15205_v26 = vld [vmem:[#allocation21 + $0x44] sm:$0xf]  ;;  %v10423_v27 = vor.u32 %v15206_v25, %v10422_v24  ;;  %v10478_v22 = vld [vmem:[#allocation24 + $0x30] sm:$0xf]  ;;  %v15220_v25 = vld [vmem:[#allocation24 + $0x34] sm:$0xf0] }
  0xdc   :  { %v308_v28 = vpop.permute.xlu1 %307  ;;  %v298_v29 = vpop.permute.xlu0 %297  ;;  %v15241_v20 = vld [vmem:[#allocation24 + $0xe4] sm:$0xf] }
  0xdd   :  { %v420_v30 = vmul.f32 %v17071_v33, %v308_v28  ;;  %v418_v31 = vmul.f32 %v17071_v33, %v298_v29  ;;  %v10424_v28 = vld [vmem:[#allocation21 + $0x48] sm:$0xf0] }
  0xde   :  { %v16466_v32 = vpop.eup %16465  ;;  %798 = vmatpush.bf16.msra.mxu2 %v10435_v23  ;;  %v10427_v29 = vor.u32 %v15205_v26, %v10424_v28  ;;  %v10558_v26 = vld [vmem:[#allocation24 + $0xd0] sm:$0xf]  ;;  %v10479_v28 = vor.u32 %v15220_v25, %v10478_v22  ;;  %v15231_v22 = vld [vmem:[#allocation24 + $0x94] sm:$0xf] }
  0xdf   :  { %v456_v34 = vadd.f32 %v17073_v35, %v420_v30  ;;  %v16468_v36 = vpop.eup %16467  ;;  %v454_v37 = vadd.f32 %v17073_v35, %v418_v31  ;;  %v572_v38 = vld [vmem:[#allocation4 + $0xff] sm:$0x1]  ;;  %v10414_v30 = vld [vmem:[#allocation21 + $0x30] sm:$0xf]  ;;  %v15203_v32 = vld [vmem:[#allocation21 + $0x34] sm:$0xf] }
  0xe0   :  { %v16470_v39 = vpop.eup %16469  ;;  %573 = vst [vmem:[#allocation9 + $0x11] sm:$0x1] %v572_v38  ;;  %v15204_v31 = vld [vmem:[#allocation21 + $0x34] sm:$0xf0]  ;;  %v10416_v36 = vld [vmem:[#allocation21 + $0x38] sm:$0xf0] }
  0xe1   :  { %16471 = vtanh.f32 %v456_v34  ;;  %v591_v41 = vld [vmem:[#allocation9 + $0x8] sm:$0xff]  ;;  %v10415_v34 = vor.u32 %v15204_v31, %v10414_v30  ;;  %v10406_v38 = vld [vmem:[#allocation21 + $0x20] sm:$0xf]  ;;  %v15202_v39 = vld [vmem:[#allocation21 + $0x24] sm:$0xf0] }
  0xe2   :  { %16473 = vtanh.f32 %v454_v37  ;;  %v593_v42 = vpack.c.bf16 %v591_v41, %v590_v40  ;;  %799 = vmatpush.bf16.msra.mxu2 %v10427_v29  ;;  %v10419_v37 = vor.u32 %v15203_v32, %v10416_v36  ;;  %v15201_v40 = vld [vmem:[#allocation21 + $0x24] sm:$0xf]  ;;  %v10407_v41 = vor.u32 %v15202_v39, %v10406_v38  ;;  %v15223_v29 = vld [vmem:[#allocation24 + $0x54] sm:$0xf]  ;;  %v10496_v30 = vld [vmem:[#allocation24 + $0x58] sm:$0xf0] }
  0xe3   :  { %v15239_v31 = vld [vmem:[#allocation24 + $0xd4] sm:$0xf]  ;;  %v10470_v36 = vld [vmem:[#allocation24 + $0x20] sm:$0xf]  ;;  %v10499_v38 = vor.u32 %v15223_v29, %v10496_v30  ;;  %v10456_v29 = vld [vmem:[#allocation24 + $0x8] sm:$0xf0] }
  0xe4   :  { %v338_v43 = vpop.permute.xlu1 %337  ;;  %v328_v44 = vpop.permute.xlu0 %327  ;;  %655 = vmatmul.bf16.vlgmr.msra.gmra.mxu0 %v593_v42  ;;  %v10408_v42 = vld [vmem:[#allocation21 + $0x28] sm:$0xf0]  ;;  %v15229_v30 = vld [vmem:[#allocation24 + $0x84] sm:$0xf] }
  0xe5   :  { %v426_v45 = vmul.f32 %v17071_v33, %v338_v43  ;;  %v424_v46 = vmul.f32 %v17071_v33, %v328_v44  ;;  %v10510_v43 = vld [vmem:[#allocation24 + $0x70] sm:$0xf]  ;;  %v15228_v44 = vld [vmem:[#allocation24 + $0x74] sm:$0xf0] }
  0xe6   :  { %800 = vmatpush.bf16.msra.mxu2 %v10419_v37  ;;  %v15218_v37 = vld [vmem:[#allocation24 + $0x24] sm:$0xf0] }
  0xe7   :  { %v16472_v47 = vpop.eup %16471  ;;  %v462_v48 = vadd.f32 %v17073_v35, %v426_v45  ;;  %v460_v50 = vadd.f32 %v17073_v35, %v424_v46  ;;  %v592_v59 = vld [vmem:[#allocation9 + $0x10] sm:$0x3]  ;;  %v10411_v45 = vor.u32 %v15201_v40, %v10408_v42  ;;  %v10511_v46 = vor.u32 %v15228_v44, %v10510_v43  ;;  %v10550_v40 = vld [vmem:[#allocation24 + $0xc0] sm:$0xf]  ;;  %v15221_v42 = vld [vmem:[#allocation24 + $0x44] sm:$0xf] }
  0xe8   :  { %v16474_v49 = vpop.eup %16473  ;;  %v594_v61 = vpack.c.bf16 %v592_v59, %v592_v59  ;;  %v10398_v47 = vld [vmem:[#allocation21 + $0x10] sm:$0xf]  ;;  %v17151_v59 = vld [vmem:[#allocation19] ss:$0 sm:$0xff]  ;;  %v15237_v44 = vld [vmem:[#allocation24 + $0xc4] sm:$0xf] }
  0xe9   :  { %16475 = vtanh.f32 %v462_v48  ;;  %1032 = vmatpush.bf16.msra.mxu3 %v10511_v46  ;;  %v15200_v48 = vld [vmem:[#allocation21 + $0x14] sm:$0xf0]  ;;  %v15199_v49 = vld [vmem:[#allocation21 + $0x14] sm:$0xf]  ;;  %v10488_v43 = vld [vmem:[#allocation24 + $0x48] sm:$0xf0]  ;;  %v10471_v46 = vor.u32 %v15218_v37, %v10470_v36 }
  0xea   :  { %16477 = vtanh.f32 %v460_v50  ;;  %801 = vmatpush.bf16.msra.mxu2 %v10411_v45  ;;  %v10399_v50 = vor.u32 %v15200_v48, %v10398_v47  ;;  %v10552_v45 = vld [vmem:[#allocation24 + $0xc8] sm:$0xf0] }
  0xec   :  { %v368_v51 = vpop.permute.xlu1 %367  ;;  %v358_v52 = vpop.permute.xlu0 %357 }
  0xed   :  { %v432_v53 = vmul.f32 %v17071_v33, %v368_v51  ;;  %v430_v54 = vmul.f32 %v17071_v33, %v358_v52  ;;  %v10400_v51 = vld [vmem:[#allocation21 + $0x18] sm:$0xf0]  ;;  %v10502_v52 = vld [vmem:[#allocation24 + $0x60] sm:$0xf] }
  0xef   :  { %v16476_v55 = vpop.eup %16475  ;;  %v468_v56 = vadd.f32 %v17073_v35, %v432_v53  ;;  %v466_v58 = vadd.f32 %v17073_v35, %v430_v54  ;;  %v15226_v53 = vld [vmem:[#allocation24 + $0x64] sm:$0xf0]  ;;  %v10403_v54 = vor.u32 %v15199_v49, %v10400_v51  ;;  %v10491_v49 = vor.u32 %v15221_v42, %v10488_v43 }
  0xf0   :  { %v16478_v57 = vpop.eup %16477  ;;  %v10503_v55 = vor.u32 %v15226_v53, %v10502_v52  ;;  %v10462_v53 = vld [vmem:[#allocation24 + $0x10] sm:$0xf] }
  0xf1   :  { %16479 = vtanh.f32 %v468_v56  ;;  %802 = vmatpush.bf16.msra.mxu2 %v10403_v54  ;;  %v10390_v56 = vld [vmem:[#allocation21] sm:$0xf]  ;;  %v15198_v57 = vld [vmem:[#allocation21 + $0x4] sm:$0xf0]  ;;  %v15216_v54 = vld [vmem:[#allocation24 + $0x14] sm:$0xf0] }
  0xf2   :  { %16481 = vtanh.f32 %v466_v58  ;;  %1033 = vmatpush.bf16.msra.mxu3 %v10503_v55  ;;  %v15197_v58 = vld [vmem:[#allocation21 + $0x4] sm:$0xf]  ;;  %v10542_v55 = vld [vmem:[#allocation24 + $0xb0] sm:$0xf] }
  0xf4   :  { %v398_v62 = vpop.permute.xlu1 %397  ;;  %v388_v63 = vpop.permute.xlu0 %387  ;;  %660 = vmatmul.bf16.gmra.mxu0 %v594_v61  ;;  %v10391_v61 = vor.u32 %v15198_v57, %v10390_v56  ;;  %v857_v56 = vld [vmem:[#allocation11] sm:$0xf]  ;;  %v10463_v57 = vor.u32 %v15216_v54, %v10462_v53  ;;  %v10808_v53 = vld [vmem:[#allocation27 + $0x1e0] sm:$0xf0] }
  0xf5   :  { %v438_v1 = vmul.f32 %v17071_v33, %v398_v62  ;;  %v436_v2 = vmul.f32 %v17071_v33, %v388_v63  ;;  %v15210_v33 = vld [vmem:[#allocation21 + $0x64] sm:$0xf0]  ;;  %v10392_v62 = vld [vmem:[#allocation21 + $0x8] sm:$0xf0]  ;;  %v10494_v63 = vld [vmem:[#allocation24 + $0x50] sm:$0xf] }
  0xf6   :  { %v10439_v60 = vor.u32 %v15210_v33, %v10438_v15  ;;  %v10566_v15 = vld [vmem:[#allocation24 + $0xe0] sm:$0xf]  ;;  %v10487_v33 = vor.u32 %v15222_v14, %v10486_v13  ;;  %v15233_v13 = vld [vmem:[#allocation24 + $0xa4] sm:$0xf]  ;;  %859 = vst [vmem:[#allocation1] ss:$4 sm:$0xff] %v857_v56 }
  0xf7   :  { %v16480_v3 = vpop.eup %16479  ;;  %v474_v4 = vadd.f32 %v17073_v35, %v438_v1  ;;  %v472_v6 = vadd.f32 %v17073_v35, %v436_v2  ;;  %v10430_v35 = vld [vmem:[#allocation21 + $0x50] sm:$0xf]  ;;  %v15224_v1 = vld [vmem:[#allocation24 + $0x54] sm:$0xf0]  ;;  %v10395_v2 = vor.u32 %v15197_v58, %v10392_v62  ;;  %v10480_v62 = vld [vmem:[#allocation24 + $0x38] sm:$0xf0] }
  0xf8   :  { %v16482_v5 = vpop.eup %16481  ;;  %784 = vmatpush.bf16.msra.mxu1 %v10439_v60  ;;  %v10431_v21 = vor.u32 %v15208_v19, %v10430_v35  ;;  %v10495_v3 = vor.u32 %v15224_v1, %v10494_v63  ;;  %v15225_v60 = vld [vmem:[#allocation24 + $0x64] sm:$0xf]  ;;  %v10567_v35 = vor.u32 %v15242_v16, %v10566_v15  ;;  %v15236_v58 = vld [vmem:[#allocation24 + $0xb4] sm:$0xf0]  ;;  %v10526_v16 = vld [vmem:[#allocation24 + $0x90] sm:$0xf] }
  0xf9   :  { %16483 = vtanh.f32 %v474_v4  ;;  %v10574_v4 = vld [vmem:[#allocation24 + $0xf0] sm:$0xf]  ;;  %v15244_v5 = vld [vmem:[#allocation24 + $0xf4] sm:$0xf0]  ;;  %803 = vmatpush.bf16.msra.mxu2 %v10395_v2  ;;  %v10507_v19 = vor.u32 %v15225_v60, %v10504_v17  ;;  %v10543_v63 = vor.u32 %v15236_v58, %v10542_v55  ;;  %v15235_v2 = vld [vmem:[#allocation24 + $0xb4] sm:$0xf] }
  0xfa   :  { %16485 = vtanh.f32 %v472_v6  ;;  %v15227_v6 = vld [vmem:[#allocation24 + $0x74] sm:$0xf]  ;;  %1034 = vmatpush.bf16.msra.mxu3 %v10495_v3  ;;  %v10544_v3 = vld [vmem:[#allocation24 + $0xb8] sm:$0xf0]  ;;  %v15365_v56 = vld [vmem:[#allocation27 + $0x3c4] sm:$0xf] }
  0xfc   :  { %785 = vmatpush.bf16.msra.mxu1 %v10431_v21  ;;  %v10568_v21 = vld [vmem:[#allocation24 + $0xe8] sm:$0xf0] }
  0xfd   :  { %1071 = vmatpush.bf16.msrb.mxu2 %v10579_v12  ;;  %v10571_v24 = vor.u32 %v15241_v20, %v10568_v21  ;;  %v10472_v12 = vld [vmem:[#allocation24 + $0x28] sm:$0xf0]  ;;  %v15215_v20 = vld [vmem:[#allocation24 + $0x14] sm:$0xf]  ;;  %v10464_v21 = vld [vmem:[#allocation24 + $0x18] sm:$0xf0] }
  0xfe   :  { %1035 = vmatpush.bf16.msra.mxu3 %v10487_v33  ;;  %v10536_v33 = vld [vmem:[#allocation24 + $0xa8] sm:$0xf0]  ;;  %v10467_v25 = vor.u32 %v15215_v20, %v10464_v21  ;;  %v861_v36 = vld.sshfl [vmem:[#allocation1 + $0x8] sm:$0xff pattern:$0x73625140] }
  0xff   :  { %v16484_v7 = vpop.eup %16483  ;;  %v865_v43 = vpack.c.bf16 %v861_v36, %v861_v36  ;;  %v15281_v20 = vld [vmem:[#allocation27 + $0x11c] sm:$0xf0] }
 0x100   :  { %v16486_v8 = vpop.eup %16485  ;;  %786 = vmatpush.bf16.msra.mxu1 %v10423_v27  ;;  %v10575_v7 = vor.u32 %v15244_v5, %v10574_v4  ;;  %v15240_v27 = vld [vmem:[#allocation24 + $0xd4] sm:$0xf0]  ;;  %v10454_v4 = vld [vmem:[#allocation24] sm:$0xf]  ;;  %v10547_v5 = vor.u32 %v15235_v2, %v10544_v3  ;;  %v15293_v3 = vld [vmem:[#allocation27 + $0x184] sm:$0xf] }
 0x101   :  { %v10512_v8 = vld [vmem:[#allocation24 + $0x78] sm:$0xf0]  ;;  %v10559_v32 = vor.u32 %v15240_v27, %v10558_v26  ;;  %1072 = vmatpush.bf16.msrb.mxu2 %v10571_v24  ;;  %v10518_v27 = vld [vmem:[#allocation24 + $0x80] sm:$0xf] }
 0x102   :  { %v10515_v11 = vor.u32 %v15227_v6, %v10512_v8  ;;  %1045 = vmatpush.bf16.msrb.mxu0 %v10575_v7  ;;  %1036 = vmatpush.bf16.msra.mxu3 %v10479_v28  ;;  %v15214_v6 = vld [vmem:[#allocation24 + $0x4] sm:$0xf0]  ;;  %v10534_v7 = vld [vmem:[#allocation24 + $0xa0] sm:$0xf]  ;;  %v10528_v24 = vld [vmem:[#allocation24 + $0x98] sm:$0xf0] }
 0x103   :  { %v15234_v8 = vld [vmem:[#allocation24 + $0xa4] sm:$0xf0]  ;;  %v10455_v9 = vor.u32 %v15214_v6, %v10454_v4  ;;  %v10531_v26 = vor.u32 %v15231_v22, %v10528_v24  ;;  %v15361_v2 = vld [vmem:[#allocation27 + $0x39c] sm:$0xf0] }
 0x104   :  { %787 = vmatpush.bf16.msra.mxu1 %v10415_v34  ;;  %v10560_v34 = vld [vmem:[#allocation24 + $0xd8] sm:$0xf0]  ;;  %v10535_v10 = vor.u32 %v15234_v8, %v10534_v7  ;;  %v15230_v28 = vld [vmem:[#allocation24 + $0x84] sm:$0xf0]  ;;  %v10966_v21 = vld [vmem:[#allocation27 + $0x300] sm:$0xf] }
 0x105   :  { %v10563_v39 = vor.u32 %v15239_v31, %v10560_v34  ;;  %v10520_v31 = vld [vmem:[#allocation24 + $0x88] sm:$0xf0]  ;;  %v10519_v34 = vor.u32 %v15230_v28, %v10518_v27  ;;  %v10776_v4 = vld [vmem:[#allocation27 + $0x1a0] sm:$0xf0] }
 0x106   :  { %1046 = vmatpush.bf16.msrb.mxu0 %v10567_v35  ;;  %1037 = vmatpush.bf16.msra.mxu3 %v10471_v46  ;;  %v10539_v35 = vor.u32 %v15233_v13, %v10536_v33  ;;  %v10779_v6 = vor.u32 %v15293_v3, %v10776_v4  ;;  %v15357_v7 = vld [vmem:[#allocation27 + $0x384] sm:$0xf] }
 0x107   :  { %1073 = vmatpush.bf16.msrb.mxu2 %v10563_v39  ;;  %v11032_v8 = vld [vmem:[#allocation27 + $0x3a0] sm:$0xf0] }
 0x108   :  { %788 = vmatpush.bf16.msra.mxu1 %v10407_v41  ;;  %v15238_v41 = vld [vmem:[#allocation24 + $0xc4] sm:$0xf0] }
 0x109   :  { %v10551_v47 = vor.u32 %v15238_v41, %v10550_v40  ;;  %v10523_v40 = vor.u32 %v15229_v30, %v10520_v31  ;;  %v10744_v33 = vld [vmem:[#allocation27 + $0x160] sm:$0xf0]  ;;  %v10678_v30 = vld [vmem:[#allocation27 + $0xc0] sm:$0xf] }
 0x10a   :  { %1047 = vmatpush.bf16.msrb.mxu0 %v10559_v32  ;;  %1038 = vmatpush.bf16.msra.mxu3 %v10463_v57  ;;  %v860_v32 = vld.sshfl [vmem:[#allocation1] sm:$0xff pattern:$0x73625140]  ;;  %v11064_v57 = vld [vmem:[#allocation27 + $0x3e0] sm:$0xf0] }
 0x10b   :  { %v11067_v58 = vor.u32 %v15365_v56, %v11064_v57  ;;  %v15277_v24 = vld [vmem:[#allocation27 + $0x104] sm:$0xf]  ;;  %v15273_v31 = vld [vmem:[#allocation27 + $0xdc] sm:$0xf0] }
 0x10c   :  { %789 = vmatpush.bf16.msra.mxu1 %v10399_v50  ;;  %v10555_v50 = vor.u32 %v15237_v44, %v10552_v45  ;;  %v15341_v27 = vld [vmem:[#allocation27 + $0x304] sm:$0xf]  ;;  %v10679_v36 = vor.u32 %v15273_v31, %v10678_v30  ;;  %v11072_v30 = vld [vmem:[#allocation27 + $0x3e8] sm:$0xf0]  ;;  %v10782_v31 = vld [vmem:[#allocation27 + $0x188] sm:$0xf] }
 0x10d   :  { %v10904_v56 = vld [vmem:[#allocation27 + $0x2a0] sm:$0xf0] }
 0x10e   :  { %1048 = vmatpush.bf16.msrb.mxu0 %v10551_v47  ;;  %1074 = vmatpush.bf16.msrb.mxu2 %v10555_v50  ;;  %v10806_v47 = vld [vmem:[#allocation27 + $0x1c0] sm:$0xf]  ;;  %v15253_v3 = vld [vmem:[#allocation27 + $0x44] sm:$0xf] }
 0x10f   :  { %1039 = vmatpush.bf16.msra.mxu3 %v10455_v9  ;;  %v11035_v9 = vor.u32 %v15357_v7, %v11032_v8  ;;  %v10616_v4 = vld [vmem:[#allocation27 + $0x60] sm:$0xf0] }
 0x110   :  { %790 = vmatpush.bf16.msra.mxu1 %v10391_v61  ;;  %v15219_v61 = vld [vmem:[#allocation24 + $0x34] sm:$0xf]  ;;  %v15317_v7 = vld [vmem:[#allocation27 + $0x244] sm:$0xf] }
 0x111   :  { %v10483_v1 = vor.u32 %v15219_v61, %v10480_v62  ;;  %v10774_v61 = vld [vmem:[#allocation27 + $0x180] sm:$0xf]  ;;  %v10872_v8 = vld [vmem:[#allocation27 + $0x260] sm:$0xf0] }
 0x112   :  { %1049 = vmatpush.bf16.msrb.mxu0 %v10543_v63  ;;  %1075 = vmatpush.bf16.msrb.mxu2 %v10547_v5  ;;  %v15297_v62 = vld [vmem:[#allocation27 + $0x19c] sm:$0xf0] }
 0x113   :  { %v11030_v63 = vld [vmem:[#allocation27 + $0x380] sm:$0xf] }
 0x114   :  { %1058 = vmatpush.bf16.msrb.mxu1 %v10515_v11  ;;  %v15217_v11 = vld [vmem:[#allocation24 + $0x24] sm:$0xf]  ;;  %v11031_v5 = vor.u32 %v15361_v2, %v11030_v63 }
 0x115   :  { %v10475_v15 = vor.u32 %v15217_v11, %v10472_v12  ;;  %v15289_v11 = vld [vmem:[#allocation27 + $0x15c] sm:$0xf0] }
 0x116   :  { %1050 = vmatpush.bf16.msrb.mxu0 %v10535_v10  ;;  %1076 = vmatpush.bf16.msrb.mxu2 %v10539_v35  ;;  %v10742_v10 = vld [vmem:[#allocation27 + $0x140] sm:$0xf] }
 0x117   :  { %v10998_v12 = vld [vmem:[#allocation27 + $0x340] sm:$0xf]  ;;  %v10743_v13 = vor.u32 %v15289_v11, %v10742_v10  ;;  %v10875_v10 = vor.u32 %v15317_v7, %v10872_v8  ;;  %v15346_v7 = vld [vmem:[#allocation27 + $0x324] sm:$0xf0]  ;;  %v15278_v8 = vld [vmem:[#allocation27 + $0x10c] sm:$0xf] }
 0x118   :  { %1059 = vmatpush.bf16.msrb.mxu1 %v10507_v19  ;;  %v15232_v19 = vld [vmem:[#allocation24 + $0x94] sm:$0xf0]  ;;  %v15321_v2 = vld [vmem:[#allocation27 + $0x25c] sm:$0xf0] }
 0x119   :  { %v10582_v11 = vld [vmem:[#allocation27] sm:$0xf] }
 0x11a   :  { %1077 = vmatpush.bf16.msrb.mxu2 %v10531_v26  ;;  %v10712_v26 = vld [vmem:[#allocation27 + $0x120] sm:$0xf0] }
 0x11b   :  { %v10715_v28 = vor.u32 %v15277_v24, %v10712_v26  ;;  %v15302_v26 = vld [vmem:[#allocation27 + $0x1cc] sm:$0xf] }
 0x11c   :  { %1060 = vmatpush.bf16.msrb.mxu1 %v10499_v38  ;;  %v864_v38 = vpack.c.bf16 %v860_v32, %v860_v32  ;;  %v10934_v32 = vld [vmem:[#allocation27 + $0x2c0] sm:$0xf] }
 0x11e   :  { %1040 = vmatmul.bf16.vlgmr.msra.gmra.mxu3 %v864_v38  ;;  %1078 = vmatpush.bf16.msrb.mxu2 %v10523_v40 }
 0x120   :  { %1061 = vmatpush.bf16.msrb.mxu1 %v10491_v49  ;;  %v11062_v49 = vld [vmem:[#allocation27 + $0x3c0] sm:$0xf] }
 0x124   :  { %1062 = vmatpush.bf16.msrb.mxu1 %v10483_v1  ;;  %v10775_v1 = vor.u32 %v15297_v62, %v10774_v61  ;;  %v15257_v61 = vld [vmem:[#allocation27 + $0x5c] sm:$0xf0] }
 0x125   :  { %v10870_v62 = vld [vmem:[#allocation27 + $0x240] sm:$0xf] }
 0x128   :  { %1063 = vmatpush.bf16.msrb.mxu1 %v10475_v15  ;;  %v15285_v15 = vld [vmem:[#allocation27 + $0x144] sm:$0xf] }
 0x12c   :  { %1064 = vmatpush.bf16.msrb.mxu1 %v10467_v25 }
 0x161   :  { %v656_v18 = vpop.f32.mrf.mxu0 }
 0x162   :  { %v657_v23 = vadd.f32 %v17151_v59, %v656_v18 }
 0x164   :  { %16487 = vtanh.f32 %v657_v23  ;;  %v10527_v23 = vor.u32 %v15232_v19, %v10526_v16  ;;  %v10710_v19 = vld [vmem:[#allocation27 + $0x100] sm:$0xf] }
 0x165   :  { %v10711_v22 = vor.u32 %v15281_v20, %v10710_v19  ;;  %v10814_v19 = vld [vmem:[#allocation27 + $0x1c8] sm:$0xf] }
 0x166   :  { %1051 = vmatpush.bf16.msrb.mxu0 %v10527_v23  ;;  %v15345_v23 = vld [vmem:[#allocation27 + $0x31c] sm:$0xf0] }
 0x167   :  { %v10967_v25 = vor.u32 %v15345_v23, %v10966_v21  ;;  %v11070_v23 = vld [vmem:[#allocation27 + $0x3c8] sm:$0xf] }
 0x169   :  { %v658_v48 = vpop.f32.mrf.mxu0 }
 0x16a   :  { %v16488_v51 = vpop.eup %16487  ;;  %v659_v52 = vadd.f32 %v17151_v59, %v658_v48  ;;  %1052 = vmatpush.bf16.msrb.mxu0 %v10519_v34  ;;  %v15305_v48 = vld [vmem:[#allocation27 + $0x1dc] sm:$0xf0] }
 0x16b   :  { %668 = vst [vmem:[#allocation5] sm:$0xff] %v16488_v51  ;;  %v10807_v50 = vor.u32 %v15305_v48, %v10806_v47  ;;  %v15369_v51 = vld [vmem:[#allocation27 + $0x3dc] sm:$0xf0] }
 0x16c   :  { %16489 = vtanh.f32 %v659_v52  ;;  %v15301_v52 = vld [vmem:[#allocation27 + $0x1c4] sm:$0xf]  ;;  %v11063_v54 = vor.u32 %v15369_v51, %v11062_v49  ;;  %v15265_v47 = vld [vmem:[#allocation27 + $0x9c] sm:$0xf0] }
 0x16d   :  { %1053 = vmatmul.bf16.vlgmr.msrb.gmra.mxu0 %v865_v43  ;;  %v10811_v55 = vor.u32 %v15301_v52, %v10808_v53  ;;  %1894 = vmatpush.bf16.msrb.mxu3 %v10807_v50  ;;  %v10902_v48 = vld [vmem:[#allocation27 + $0x280] sm:$0xf]  ;;  %v15261_v51 = vld [vmem:[#allocation27 + $0x84] sm:$0xf] }
 0x16e   :  { %1907 = vmatpush.bf16.msra.mxu0 %v11063_v54  ;;  %v15329_v50 = vld [vmem:[#allocation27 + $0x29c] sm:$0xf0]  ;;  %v10648_v52 = vld [vmem:[#allocation27 + $0xa0] sm:$0xf0] }
 0x16f   :  { %v10903_v53 = vor.u32 %v15329_v50, %v10902_v48  ;;  %v10651_v54 = vor.u32 %v15261_v51, %v10648_v52  ;;  %v15290_v50 = vld [vmem:[#allocation27 + $0x164] sm:$0xf0] }
 0x170   :  { %v11006_v51 = vld [vmem:[#allocation27 + $0x348] sm:$0xf] }
 0x171   :  { %v661_v14 = vpop.f32.mrf.mxu0  ;;  %1895 = vmatpush.bf16.msrb.mxu3 %v10775_v1 }
 0x172   :  { %v16490_v60 = vpop.eup %16489  ;;  %v662_v17 = vadd.f32 %v17151_v59, %v661_v14  ;;  %v671_v18 = vld [vmem:[#allocation5] sm:$0x1]  ;;  %v15213_v59 = vld [vmem:[#allocation24 + $0x4] sm:$0xf]  ;;  %1908 = vmatpush.bf16.msra.mxu0 %v11031_v5  ;;  %v10871_v5 = vor.u32 %v15321_v2, %v10870_v62  ;;  %v15350_v62 = vld [vmem:[#allocation27 + $0x34c] sm:$0xf] }
 0x173   :  { %669 = vst [vmem:[#allocation5 + $0x8] sm:$0xff] %v16490_v60  ;;  %v10459_v39 = vor.u32 %v15213_v59, %v10456_v29  ;;  %v15353_v14 = vld [vmem:[#allocation27 + $0x35c] sm:$0xf0]  ;;  %v10747_v60 = vor.u32 %v15285_v15, %v10744_v33  ;;  %v10968_v59 = vld [vmem:[#allocation27 + $0x320] sm:$0xf0] }
 0x174   :  { %16491 = vtanh.f32 %v662_v17  ;;  %672 = vst [vmem:[#allocation10] sm:$0x1] %v671_v18  ;;  %v10999_v16 = vor.u32 %v15353_v14, %v10998_v12  ;;  %v15349_v17 = vld [vmem:[#allocation27 + $0x344] sm:$0xf]  ;;  %v10971_v29 = vor.u32 %v15341_v27, %v10968_v59  ;;  %v15249_v12 = vld [vmem:[#allocation27 + $0x1c] sm:$0xf0] }
 0x175   :  { %1065 = vmatpush.bf16.msrb.mxu1 %v10459_v39  ;;  %v11000_v18 = vld [vmem:[#allocation27 + $0x360] sm:$0xf0]  ;;  %1896 = vmatpush.bf16.msrb.mxu3 %v10743_v13  ;;  %v10838_v13 = vld [vmem:[#allocation27 + $0x200] sm:$0xf]  ;;  %v10583_v14 = vor.u32 %v15249_v12, %v10582_v11  ;;  %v10816_v27 = vld [vmem:[#allocation27 + $0x1e8] sm:$0xf0] }
 0x176   :  { %v11003_v35 = vor.u32 %v15349_v17, %v11000_v18  ;;  %1909 = vmatpush.bf16.msra.mxu0 %v10999_v16  ;;  %v10680_v39 = vld [vmem:[#allocation27 + $0xe0] sm:$0xf0]  ;;  %v15313_v15 = vld [vmem:[#allocation27 + $0x21c] sm:$0xf0]  ;;  %v10819_v59 = vor.u32 %v15302_v26, %v10816_v27  ;;  %v15342_v12 = vld [vmem:[#allocation27 + $0x30c] sm:$0xf] }
 0x177   :  { %v15245_v33 = vld [vmem:[#allocation27 + $0x4] sm:$0xf]  ;;  %v10654_v27 = vld [vmem:[#allocation27 + $0x88] sm:$0xf] }
 0x178   :  { %v10584_v16 = vld [vmem:[#allocation27 + $0x20] sm:$0xf0] }
 0x179   :  { %v663_v37 = vpop.f32.mrf.mxu0  ;;  %1897 = vmatpush.bf16.msrb.mxu3 %v10711_v22  ;;  %v10587_v17 = vor.u32 %v15245_v33, %v10584_v16  ;;  %v15309_v18 = vld [vmem:[#allocation27 + $0x204] sm:$0xf]  ;;  %v15306_v22 = vld [vmem:[#allocation27 + $0x1e4] sm:$0xf0] }
 0x17a   :  { %v16492_v41 = vpop.eup %16491  ;;  %v673_v42 = vld [vmem:[#allocation5 + $0x8] sm:$0x3]   ;;  %1910 = vmatpush.bf16.msra.mxu0 %v10967_v25  ;;  %v15337_v37 = vld [vmem:[#allocation27 + $0x2dc] sm:$0xf0]  ;;  %v10815_v24 = vor.u32 %v15306_v22, %v10814_v19  ;;  %v15370_v25 = vld [vmem:[#allocation27 + $0x3e4] sm:$0xf0] }
 0x17b   :  { %670 = vst [vmem:[#allocation5 + $0x10] sm:$0x3] %v16492_v41  ;;  %v10935_v40 = vor.u32 %v15337_v37, %v10934_v32  ;;  %v11038_v37 = vld [vmem:[#allocation27 + $0x388] sm:$0xf]  ;;  %v15334_v19 = vld [vmem:[#allocation27 + $0x2cc] sm:$0xf] }
 0x17c   :  { %674 = vst [vmem:[#allocation10 + $0x1] sm:$0x3] %v673_v42   ;;  %v15333_v42 = vld [vmem:[#allocation27 + $0x2c4] sm:$0xf]  ;;  %v15274_v33 = vld [vmem:[#allocation27 + $0xe4] sm:$0xf0] }
 0x17d   :  { %1898 = vmatpush.bf16.msrb.mxu3 %v10679_v36  ;;  %v15298_v36 = vld [vmem:[#allocation27 + $0x1a4] sm:$0xf0]  ;;  %v10944_v22 = vld [vmem:[#allocation27 + $0x2e8] sm:$0xf0] }
 0x17e   :  { %1911 = vmatpush.bf16.msra.mxu0 %v10935_v40  ;;  %v10942_v16 = vld [vmem:[#allocation27 + $0x2c8] sm:$0xf] }
 0x182   :  { %v677_v44 = vld [vmem:[#allocation5 + $0x11] sm:$0x1]  ;;  %1912 = vmatpush.bf16.msra.mxu0 %v10903_v53  ;;  %v15354_v53 = vld [vmem:[#allocation27 + $0x364] sm:$0xf0] }
 0x183   :  { %678 = vst [vmem:[#allocation10 + $0x3] sm:$0x1] %v677_v44 }
 0x186   :  { %1913 = vmatpush.bf16.msra.mxu0 %v10871_v5  ;;  %v10974_v5 = vld [vmem:[#allocation27 + $0x308] sm:$0xf] }
 0x18a   :  { %v695_v45 = vld [vmem:[#allocation10] sm:$0xf] }
 0x18b   :  { %v696_v46 = vpack.c.bf16 %v695_v45, %v695_v45 }
 0x18d   :  { %791 = vmatmul.bf16.vlgmr.msra.gmra.mxu1 %v696_v46  ;;  %804 = vmatmul.bf16.vlgmr.msra.gmra.mxu2 %v696_v46  ;;  %v10646_v46 = vld [vmem:[#allocation27 + $0x80] sm:$0xf] }
 0x18e   :  { %1920 = vmatpush.bf16.msra.mxu1 %v10811_v55  ;;  %1933 = vmatpush.bf16.msra.mxu2 %v11067_v58  ;;  %v10647_v49 = vor.u32 %v15265_v47, %v10646_v46  ;;  %v15325_v55 = vld [vmem:[#allocation27 + $0x284] sm:$0xf]  ;;  %v10614_v58 = vld [vmem:[#allocation27 + $0x40] sm:$0xf]  ;;  %v11040_v46 = vld [vmem:[#allocation27 + $0x3a8] sm:$0xf0] }
 0x18f   :  { %v10907_v57 = vor.u32 %v15325_v55, %v10904_v56  ;;  %v10615_v1 = vor.u32 %v15257_v61, %v10614_v58  ;;  %v10752_v55 = vld [vmem:[#allocation27 + $0x168] sm:$0xf0]  ;;  %v11007_v58 = vor.u32 %v15354_v53, %v11006_v51 }
 0x190   :  { %1899 = vmatpush.bf16.msrb.mxu3 %v10647_v49  ;;  %v10750_v49 = vld [vmem:[#allocation27 + $0x148] sm:$0xf]  ;;  %v15318_v51 = vld [vmem:[#allocation27 + $0x24c] sm:$0xf] }
 0x191   :  { %v10751_v52 = vor.u32 %v15290_v50, %v10750_v49  ;;  %v10624_v49 = vld [vmem:[#allocation27 + $0x68] sm:$0xf0] }
 0x192   :  { %1921 = vmatpush.bf16.msra.mxu1 %v10779_v6  ;;  %1934 = vmatpush.bf16.msra.mxu2 %v11035_v9  ;;  %v10619_v6 = vor.u32 %v15253_v3, %v10616_v4  ;;  %v10718_v3 = vld [vmem:[#allocation27 + $0x108] sm:$0xf] }
 0x193   :  { %v15282_v4 = vld [vmem:[#allocation27 + $0x124] sm:$0xf0] }
 0x194   :  { %1900 = vmatpush.bf16.msrb.mxu3 %v10615_v1 }
 0x196   :  { %1922 = vmatpush.bf16.msra.mxu1 %v10747_v60  ;;  %1935 = vmatpush.bf16.msra.mxu2 %v11003_v35  ;;  %v10839_v60 = vor.u32 %v15313_v15, %v10838_v13  ;;  %v10840_v35 = vld [vmem:[#allocation27 + $0x220] sm:$0xf0]  ;;  %v10976_v13 = vld [vmem:[#allocation27 + $0x328] sm:$0xf0] }
 0x197   :  { %v10843_v21 = vor.u32 %v15309_v18, %v10840_v35  ;;  %v10979_v15 = vor.u32 %v15342_v12, %v10976_v13  ;;  %v15270_v18 = vld [vmem:[#allocation27 + $0xcc] sm:$0xf] }
 0x198   :  { %1901 = vmatpush.bf16.msrb.mxu3 %v10583_v14  ;;  %1914 = vmatpush.bf16.msra.mxu0 %v10839_v60  ;;  %v10686_v14 = vld [vmem:[#allocation27 + $0xc8] sm:$0xf]  ;;  %v10688_v35 = vld [vmem:[#allocation27 + $0xe8] sm:$0xf0] }
 0x199   :  { %v15338_v60 = vld [vmem:[#allocation27 + $0x2e4] sm:$0xf0]  ;;  %v10691_v26 = vor.u32 %v15270_v18, %v10688_v35  ;;  %v15371_v18 = vld [vmem:[#allocation27 + $0x3ec] sm:$0xf0]  ;;  %v15303_v35 = vld [vmem:[#allocation27 + $0x1d4] sm:$0xf] }
 0x19a   :  { %1923 = vmatpush.bf16.msra.mxu1 %v10715_v28  ;;  %1936 = vmatpush.bf16.msra.mxu2 %v10971_v29  ;;  %v11071_v28 = vor.u32 %v15370_v25, %v11070_v23  ;;  %v15366_v29 = vld [vmem:[#allocation27 + $0x3cc] sm:$0xf]  ;;  %v10943_v25 = vor.u32 %v15338_v60, %v10942_v16  ;;  %v10822_v16 = vld [vmem:[#allocation27 + $0x1d0] sm:$0xf] }
 0x19b   :  { %v11075_v32 = vor.u32 %v15366_v29, %v11072_v30  ;;  %v10947_v29 = vor.u32 %v15334_v19, %v10944_v22  ;;  %v15330_v30 = vld [vmem:[#allocation27 + $0x2a4] sm:$0xf0]  ;;  %v15307_v60 = vld [vmem:[#allocation27 + $0x1ec] sm:$0xf0]  ;;  %v10824_v19 = vld [vmem:[#allocation27 + $0x1f0] sm:$0xf0] }
 0x19c   :  { %1946 = vmatpush.bf16.msra.mxu3 %v10815_v24  ;;  %1959 = vmatpush.bf16.msrb.mxu0 %v11071_v28  ;;  %v15266_v28 = vld [vmem:[#allocation27 + $0xa4] sm:$0xf0] }
 0x19d   :  { %1066 = vmatmul.bf16.vlgmr.msrb.gmra.mxu1 %v864_v38  ;;  %1079 = vmatmul.bf16.vlgmr.msrb.gmra.mxu2 %v865_v43  ;;  %v15269_v38 = vld [vmem:[#allocation27 + $0xc4] sm:$0xf] }
 0x19e   :  { %v10683_v41 = vor.u32 %v15269_v38, %v10680_v39  ;;  %v10936_v43 = vld [vmem:[#allocation27 + $0x2e0] sm:$0xf0]  ;;  %v15362_v38 = vld [vmem:[#allocation27 + $0x3a4] sm:$0xf0]  ;;  %v10783_v39 = vor.u32 %v15298_v36, %v10782_v31  ;;  %v15262_v31 = vld [vmem:[#allocation27 + $0x8c] sm:$0xf] }
 0x19f   :  { %v10939_v45 = vor.u32 %v15333_v42, %v10936_v43  ;;  %v11039_v40 = vor.u32 %v15362_v38, %v11038_v37  ;;  %v10784_v42 = vld [vmem:[#allocation27 + $0x1a8] sm:$0xf0] }
 0x1a0   :  { %1924 = vmatpush.bf16.msra.mxu1 %v10683_v41  ;;  %v15294_v41 = vld [vmem:[#allocation27 + $0x18c] sm:$0xf]  ;;  %1947 = vmatpush.bf16.msra.mxu3 %v10783_v39  ;;  %v10655_v39 = vor.u32 %v15266_v28, %v10654_v27  ;;  %v15299_v28 = vld [vmem:[#allocation27 + $0x1ac] sm:$0xf0] }
 0x1a1   :  { %v17158_v44 = vpop.f32.mrf.mxu3  ;;  %1937 = vmatpush.bf16.msra.mxu2 %v10939_v45  ;;  %v15358_v43 = vld [vmem:[#allocation27 + $0x38c] sm:$0xf]  ;;  %v10787_v45 = vor.u32 %v15294_v41, %v10784_v42  ;;  %1960 = vmatpush.bf16.msrb.mxu0 %v11039_v40  ;;  %v10622_v42 = vld [vmem:[#allocation27 + $0x48] sm:$0xf] }
 0x1a2   :  { %v11043_v48 = vor.u32 %v15358_v43, %v11040_v46  ;;  %v15326_v36 = vld [vmem:[#allocation27 + $0x28c] sm:$0xf]  ;;  %v15258_v43 = vld [vmem:[#allocation27 + $0x64] sm:$0xf0] }
 0x1a3   :  { %v10912_v37 = vld [vmem:[#allocation27 + $0x2a8] sm:$0xf0] }
 0x1a4   :  { %1925 = vmatpush.bf16.msra.mxu1 %v10651_v54  ;;  %v15286_v54 = vld [vmem:[#allocation27 + $0x14c] sm:$0xf]  ;;  %1948 = vmatpush.bf16.msra.mxu3 %v10751_v52  ;;  %v10915_v46 = vor.u32 %v15326_v36, %v10912_v37  ;;  %v10792_v36 = vld [vmem:[#allocation27 + $0x1b0] sm:$0xf0] }
 0x1a5   :  { %1938 = vmatpush.bf16.msra.mxu2 %v10907_v57  ;;  %v866_v57 = vld [vmem:[#allocation25] sm:$0x3]  ;;  %v10755_v61 = vor.u32 %v15286_v54, %v10752_v55  ;;  %1961 = vmatpush.bf16.msrb.mxu0 %v11007_v58  ;;  %v10880_v52 = vld [vmem:[#allocation27 + $0x268] sm:$0xf0]  ;;  %v10623_v54 = vor.u32 %v15258_v43, %v10622_v42  ;;  %v15250_v58 = vld [vmem:[#allocation27 + $0x24] sm:$0xf0] }
 0x1a6   :  { %v868_v1 = vperm.slane %v866_v57, 0  ;;  %v15359_v37 = vld [vmem:[#allocation27 + $0x394] sm:$0xf] }
 0x1a8   :  { %1926 = vmatpush.bf16.msra.mxu1 %v10619_v6  ;;  %v10719_v6 = vor.u32 %v15282_v4, %v10718_v3  ;;  %v1042_v23 = vadd.f32 %v17158_v44, %v868_v1  ;;  %v15246_v1 = vld [vmem:[#allocation27 + $0xc] sm:$0xf] }
 0x1a9   :  { %v1043_v9 = vpop.f32.mrf.mxu3  ;;  %1939 = vmatpush.bf16.msra.mxu2 %v10875_v10  ;;  %v10975_v10 = vor.u32 %v15346_v7, %v10974_v5  ;;  %v15310_v3 = vld [vmem:[#allocation27 + $0x20c] sm:$0xf] }
 0x1aa   :  { %v10720_v9 = vld [vmem:[#allocation27 + $0x128] sm:$0xf0]  ;;  %1949 = vmatpush.bf16.msra.mxu3 %v10719_v6 }
 0x1ab   :  { %v10723_v11 = vor.u32 %v15278_v8, %v10720_v9  ;;  %1962 = vmatpush.bf16.msrb.mxu0 %v10975_v10  ;;  %v10848_v4 = vld [vmem:[#allocation27 + $0x228] sm:$0xf0] }
 0x1ac   :  { %1927 = vmatpush.bf16.msra.mxu1 %v10587_v17  ;;  %v10851_v8 = vor.u32 %v15310_v3, %v10848_v4  ;;  %v10694_v3 = vld [vmem:[#allocation27 + $0xd0] sm:$0xf] }
 0x1ad   :  { %1940 = vmatpush.bf16.msra.mxu2 %v10843_v21  ;;  %v10687_v21 = vor.u32 %v15274_v33, %v10686_v14  ;;  %v15275_v4 = vld [vmem:[#allocation27 + $0xec] sm:$0xf0] }
 0x1af   :  { %1950 = vmatpush.bf16.msra.mxu3 %v10687_v21  ;;  %1963 = vmatpush.bf16.msrb.mxu0 %v10943_v25  ;;  %v11080_v21 = vld [vmem:[#allocation27 + $0x3f0] sm:$0xf0] }
 0x1b0   :  { %1972 = vmatpush.bf16.msrb.mxu1 %v10819_v59  ;;  %v10910_v59 = vld [vmem:[#allocation27 + $0x288] sm:$0xf] }
 0x1b1   :  { %1985 = vmatpush.bf16.msrb.mxu2 %v11075_v32  ;;  %v10656_v32 = vld [vmem:[#allocation27 + $0xa8] sm:$0xf0]  ;;  %v10911_v40 = vor.u32 %v15330_v30, %v10910_v59  ;;  %v10827_v59 = vor.u32 %v15303_v35, %v10824_v19  ;;  %v11046_v30 = vld [vmem:[#allocation27 + $0x390] sm:$0xf]  ;;  %v15263_v35 = vld [vmem:[#allocation27 + $0x94] sm:$0xf] }
 0x1b2   :  { %v10659_v41 = vor.u32 %v15262_v31, %v10656_v32  ;;  %v15363_v31 = vld [vmem:[#allocation27 + $0x3ac] sm:$0xf0]  ;;  %v15295_v32 = vld [vmem:[#allocation27 + $0x194] sm:$0xf] }
 0x1b3   :  { %1951 = vmatpush.bf16.msra.mxu3 %v10655_v39  ;;  %1964 = vmatpush.bf16.msrb.mxu0 %v10911_v40  ;;  %v10791_v39 = vor.u32 %v15299_v28, %v10790_v0  ;;  %v10758_v40 = vld [vmem:[#allocation27 + $0x150] sm:$0xf]  ;;  %v10795_v42 = vor.u32 %v15295_v32, %v10792_v36  ;;  %v10664_v19 = vld [vmem:[#allocation27 + $0xb0] sm:$0xf0] }
 0x1b4   :  { %1973 = vmatpush.bf16.msrb.mxu1 %v10787_v45  ;;  %v10878_v45 = vld [vmem:[#allocation27 + $0x248] sm:$0xf]  ;;  %v10667_v0 = vor.u32 %v15263_v35, %v10664_v19  ;;  %v15319_v32 = vld [vmem:[#allocation27 + $0x254] sm:$0xf]  ;;  %v15352_v35 = vld [vmem:[#allocation27 + $0x35c] sm:$0xf] }
 0x1b5   :  { %1986 = vmatpush.bf16.msrb.mxu2 %v11043_v48  ;;  %v15254_v48 = vld [vmem:[#allocation27 + $0x4c] sm:$0xf]  ;;  %v10888_v36 = vld [vmem:[#allocation27 + $0x270] sm:$0xf0]  ;;  %v11024_v19 = vld [vmem:[#allocation27 + $0x378] sm:$0xf0] }
 0x1b7   :  { %1952 = vmatpush.bf16.msra.mxu3 %v10623_v54  ;;  %v15283_v54 = vld [vmem:[#allocation27 + $0x12c] sm:$0xf0] }
 0x1b8   :  { %1974 = vmatpush.bf16.msrb.mxu1 %v10755_v61  ;;  %v10846_v61 = vld [vmem:[#allocation27 + $0x208] sm:$0xf] }
 0x1bc   :  { %1975 = vmatpush.bf16.msrb.mxu1 %v10723_v11 }
 0x1c0   :  { %1976 = vmatpush.bf16.msrb.mxu1 %v10691_v26  ;;  %v10823_v26 = vor.u32 %v15307_v60, %v10822_v16 }
 0x1c4   :  { %1977 = vmatpush.bf16.msrb.mxu1 %v10659_v41  ;;  %v15291_v41 = vld [vmem:[#allocation27 + $0x16c] sm:$0xf0] }
 0x1ea   :  { %v17156_v34 = vpop.f32.mrf.mxu0 }
 0x1eb   :  { %v1055_v44 = vadd.f32 %v17156_v34, %v1042_v23 }
 0x1ed   :  { %16493 = vtanh.f32 %v1055_v44  ;;  %v11047_v44 = vor.u32 %v15363_v31, %v11046_v30  ;;  %v15255_v30 = vld [vmem:[#allocation27 + $0x54] sm:$0xf] }
 0x1ee   :  { %v10632_v31 = vld [vmem:[#allocation27 + $0x70] sm:$0xf0] }
 0x1f2   :  { %v1056_v63 = vpop.f32.mrf.mxu0 }
 0x1f3   :  { %v11008_v63 = vld [vmem:[#allocation27 + $0x368] sm:$0xf0]  ;;  %v16494_v9 = vpop.eup %16493 }
 0x1f4   :  { %v11011_v2 = vor.u32 %v15350_v62, %v11008_v63  ;;  %v10883_v62 = vor.u32 %v15318_v51, %v10880_v52  ;;  %v15314_v63 = vld [vmem:[#allocation27 + $0x224] sm:$0xf0]  ;;  %v10759_v51 = vor.u32 %v15291_v41, %v10758_v40  ;;  %v10854_v40 = vld [vmem:[#allocation27 + $0x210] sm:$0xf] }
 0x1f5   :  { %v10847_v6 = vor.u32 %v15314_v63, %v10846_v61  ;;  %v10728_v61 = vld [vmem:[#allocation27 + $0x130] sm:$0xf0]  ;;  %v15315_v41 = vld [vmem:[#allocation27 + $0x22c] sm:$0xf0] }
 0x1f6   :  { %1987 = vmatpush.bf16.msrb.mxu2 %v11011_v2  ;;  %v10592_v2 = vld [vmem:[#allocation27 + $0x28] sm:$0xf0]  ;;  %v10984_v63 = vld [vmem:[#allocation27 + $0x330] sm:$0xf0] }
 0x1f7   :  { %v10595_v7 = vor.u32 %v15246_v1, %v10592_v2 }
 0x1fa   :  { %1988 = vmatpush.bf16.msrb.mxu2 %v10979_v15 }
 0x1fe   :  { %1989 = vmatpush.bf16.msrb.mxu2 %v10947_v29 }
 0x202   :  { %1990 = vmatpush.bf16.msrb.mxu2 %v10915_v46  ;;  %v15355_v46 = vld [vmem:[#allocation27 + $0x36c] sm:$0xf0] }
 0x206   :  { %1991 = vmatpush.bf16.msrb.mxu2 %v10883_v62  ;;  %v15343_v62 = vld [vmem:[#allocation27 + $0x314] sm:$0xf] }
 0x20a   :  { %v792_v20 = vpop.f32.mrf.mxu1  ;;  %1992 = vmatpush.bf16.msrb.mxu2 %v10851_v8  ;;  %v15339_v8 = vld [vmem:[#allocation27 + $0x2ec] sm:$0xf0] }
 0x20b   :  { %v869_v20 = vperm.slane %v866_v57, 1  ;;  %v10590_v57 = vld [vmem:[#allocation27 + $0x8] sm:$0xf] }
 0x20c   :  { %v10591_v5 = vor.u32 %v15250_v58, %v10590_v57  ;;  %v15347_v57 = vld [vmem:[#allocation27 + $0x32c] sm:$0xf0]  ;;  %v15279_v58 = vld [vmem:[#allocation27 + $0x114] sm:$0xf] }
 0x20e   :  { %1953 = vmatpush.bf16.msra.mxu3 %v10591_v5  ;;  %v10731_v5 = vor.u32 %v15279_v58, %v10728_v61 }
 0x210   :  { %v805_v47 = vpop.f32.mrf.mxu2 }
 0x211   :  { %v15322_v47 = vld [vmem:[#allocation27 + $0x264] sm:$0xf0] }
 0x212   :  { %v794_v56 = vpop.f32.mrf.mxu1  ;;  %v10879_v55 = vor.u32 %v15322_v47, %v10878_v45  ;;  %v11014_v45 = vld [vmem:[#allocation27 + $0x350] sm:$0xf]  ;;  %v15287_v47 = vld [vmem:[#allocation27 + $0x154] sm:$0xf] }
 0x213   :  { %v10627_v56 = vor.u32 %v15254_v48, %v10624_v49  ;;  %v10760_v48 = vld [vmem:[#allocation27 + $0x170] sm:$0xf0]  ;;  %v11015_v52 = vor.u32 %v15355_v46, %v11014_v45 }
 0x214   :  { %1965 = vmatpush.bf16.msrb.mxu0 %v10879_v55  ;;  %v15351_v49 = vld [vmem:[#allocation27 + $0x354] sm:$0xf] }
 0x215   :  { %1978 = vmatpush.bf16.msrb.mxu1 %v10627_v56  ;;  %v10982_v56 = vld [vmem:[#allocation27 + $0x310] sm:$0xf]  ;;  %v15247_v45 = vld [vmem:[#allocation27 + $0x14] sm:$0xf] }
 0x216   :  { %v10983_v2 = vor.u32 %v15347_v57, %v10982_v56  ;;  %v10600_v46 = vld [vmem:[#allocation27 + $0x30] sm:$0xf0]  ;;  %v15368_v56 = vld [vmem:[#allocation27 + $0x3dc] sm:$0xf] }
 0x217   :  { %v11088_v57 = vld [vmem:[#allocation27 + $0x3f8] sm:$0xf0]  ;;  %v10603_v58 = vor.u32 %v15247_v45, %v10600_v46 }
 0x218   :  { %v807_v17 = vpop.f32.mrf.mxu2  ;;  %1966 = vmatpush.bf16.msrb.mxu0 %v10847_v6  ;;  %v10987_v6 = vor.u32 %v15343_v62, %v10984_v63  ;;  %v15336_v45 = vld [vmem:[#allocation27 + $0x2dc] sm:$0xf] }
 0x219   :  { %1979 = vmatpush.bf16.msrb.mxu1 %v10595_v7  ;;  %v11078_v17 = vld [vmem:[#allocation27 + $0x3d0] sm:$0xf]  ;;  %v10960_v46 = vld [vmem:[#allocation27 + $0x2f8] sm:$0xf0] }
 0x21a   :  { %v1067_v24 = vpop.f32.mrf.mxu1  ;;  %v11079_v27 = vor.u32 %v15371_v18, %v11078_v17  ;;  %v10950_v7 = vld [vmem:[#allocation27 + $0x2d0] sm:$0xf] }
 0x21b   :  { %v1068_v38 = vadd.f32 %v1067_v24, %v869_v20  ;;  %v15367_v20 = vld [vmem:[#allocation27 + $0x3d4] sm:$0xf]  ;;  %v10918_v17 = vld [vmem:[#allocation27 + $0x290] sm:$0xf] }
 0x21c   :  { %v11083_v29 = vor.u32 %v15367_v20, %v11080_v21  ;;  %v15331_v18 = vld [vmem:[#allocation27 + $0x2ac] sm:$0xf0]  ;;  %v15327_v20 = vld [vmem:[#allocation27 + $0x294] sm:$0xf] }
 0x21d   :  { %v10920_v21 = vld [vmem:[#allocation27 + $0x2b0] sm:$0xf0] }
 0x21e   :  { %v10923_v28 = vor.u32 %v15327_v20, %v10920_v21 }
 0x220   :  { %v1080_v50 = vpop.f32.mrf.mxu2 }
 0x221   :  { %v1081_v53 = vadd.f32 %v1080_v50, %v1068_v38  ;;  %v11048_v38 = vld [vmem:[#allocation27 + $0x3b0] sm:$0xf0] }
 0x222   :  { %v1069_v34 = vpop.f32.mrf.mxu1  ;;  %v11051_v43 = vor.u32 %v15359_v37, %v11048_v38  ;;  %v11016_v50 = vld [vmem:[#allocation27 + $0x370] sm:$0xf0]  ;;  %v10598_v37 = vld [vmem:[#allocation27 + $0x10] sm:$0xf] }
 0x223   :  { %16495 = vtanh.f32 %v1081_v53  ;;  %v10726_v53 = vld [vmem:[#allocation27 + $0x110] sm:$0xf]  ;;  %v10763_v34 = vor.u32 %v15287_v47, %v10760_v48  ;;  %v11019_v55 = vor.u32 %v15351_v49, %v11016_v50  ;;  %v15311_v47 = vld [vmem:[#allocation27 + $0x214] sm:$0xf]  ;;  %v10830_v49 = vld [vmem:[#allocation27 + $0x1d8] sm:$0xf] }
 0x224   :  { %v10727_v1 = vor.u32 %v15283_v54, %v10726_v53  ;;  %v10856_v48 = vld [vmem:[#allocation27 + $0x230] sm:$0xf0]  ;;  %v15308_v50 = vld [vmem:[#allocation27 + $0x1f4] sm:$0xf0]  ;;  %v15304_v53 = vld [vmem:[#allocation27 + $0x1dc] sm:$0xf] }
 0x225   :  { %v10859_v61 = vor.u32 %v15311_v47, %v10856_v48  ;;  %v10831_v62 = vor.u32 %v15308_v50, %v10830_v49  ;;  %v10670_v49 = vld [vmem:[#allocation27 + $0x98] sm:$0xf] }
 0x226   :  { %v15268_v50 = vld [vmem:[#allocation27 + $0xb4] sm:$0xf0] }
 0x228   :  { %v1082_v10 = vpop.f32.mrf.mxu2 }
 0x229   :  { %v16496_v11 = vpop.eup %16495  ;;  %v10696_v10 = vld [vmem:[#allocation27 + $0xf0] sm:$0xf0] }
 0x22a   :  { %v1088_v12 = vrot.slane %v16496_v11, 6  ;;  %v15335_v11 = vld [vmem:[#allocation27 + $0x2d4] sm:$0xf] }
 0x22c   :  { %v1090_v13 = vsel %vm1089_vm1, %v16494_v9, %v1088_v12  ;;  %v15271_v9 = vld [vmem:[#allocation27 + $0xd4] sm:$0xf] }
 0x22d   :  { %1092 = vst [vmem:[#allocation7] sm:$0xf] %v1090_v13  ;;  %v10952_v12 = vld [vmem:[#allocation27 + $0x2f0] sm:$0xf0]  ;;  %v10695_v13 = vor.u32 %v15275_v4, %v10694_v3  ;;  %v10699_v16 = vor.u32 %v15271_v9, %v10696_v10  ;;  %v11091_v4 = vor.u32 %v15368_v56, %v11088_v57  ;;  %v15360_v9 = vld [vmem:[#allocation27 + $0x39c] sm:$0xf] }
 0x22e   :  { %v10955_v60 = vor.u32 %v15335_v11, %v10952_v12  ;;  %v11056_v10 = vld [vmem:[#allocation27 + $0x3b8] sm:$0xf0] }
 0x22f   :  { %v15328_v56 = vld [vmem:[#allocation27 + $0x29c] sm:$0xf] }
 0x230   :  { %v10928_v57 = vld [vmem:[#allocation27 + $0x2b8] sm:$0xf0] }
 0x234   :  { %v1093_v14 = vld [vmem:[#allocation7] ss:$2 sm:$0x3]  ;;  %v1096_v15 = vld [vmem:[#allocation7 + $0x1] ss:$2 sm:$0x3] }
 0x235   :  { %1094 = vst.msk [vmem:[#allocation12] ss:$2 sm:$0x3] %vm17113_vm0, %v1093_v14  ;;  %v10951_v14 = vor.u32 %v15339_v8, %v10950_v7  ;;  %v15296_v7 = vld [vmem:[#allocation27 + $0x19c] sm:$0xf] }
 0x236   :  { %1098 = vst.msk [vmem:[#allocation12 + $0x1] ss:$2 sm:$0x3] %vm17113_vm0, %v1096_v15  ;;  %v10662_v15 = vld [vmem:[#allocation27 + $0x90] sm:$0xf] }
 0x237   :  { %v10800_v8 = vld [vmem:[#allocation27 + $0x1b8] sm:$0xf0] }
 0x23d   :  { %v1227_v33 = vld [vmem:[#allocation12] sm:$0xf] }
 0x23e   :  { %1229 = vst [vmem:[#allocation1] ss:$4 sm:$0xff] %v1227_v33  ;;  %v15267_v33 = vld [vmem:[#allocation27 + $0xac] sm:$0xf0] }
 0x245   :  { %v1230_v22 = vld.sshfl [vmem:[#allocation1] sm:$0xff pattern:$0x73625140]  ;;  %v1231_v23 = vld.sshfl [vmem:[#allocation1 + $0x8] sm:$0xff pattern:$0x73625140] }
 0x246   :  { %v17167_v24 = vpack.c.bf16 %v1230_v22, %v1230_v22  ;;  %v17169_v25 = vpack.c.bf16 %v1231_v23, %v1231_v23  ;;  %v10663_v22 = vor.u32 %v15267_v33, %v10662_v15  ;;  %v10919_v23 = vor.u32 %v15331_v18, %v10918_v17  ;;  %v15288_v17 = vld [vmem:[#allocation27 + $0x15c] sm:$0xf] }
 0x247   :  { %v10803_v15 = vor.u32 %v15296_v7, %v10800_v8  ;;  %v11059_v33 = vor.u32 %v15360_v9, %v11056_v10  ;;  %v10768_v18 = vld [vmem:[#allocation27 + $0x178] sm:$0xf0] }
 0x248   :  { %1902 = vmatmul.bf16.vlgmr.msrb.gmra.mxu3 %v17167_v24  ;;  %1915 = vmatmul.bf16.vlgmr.msra.gmra.mxu0 %v17169_v25  ;;  %v15320_v7 = vld [vmem:[#allocation27 + $0x25c] sm:$0xf] }
 0x249   :  { %1928 = vmatmul.bf16.vlgmr.msra.gmra.mxu1 %v17167_v24  ;;  %1941 = vmatmul.bf16.vlgmr.msra.gmra.mxu2 %v17169_v25  ;;  %v10896_v8 = vld [vmem:[#allocation27 + $0x278] sm:$0xf0] }
 0x24a   :  { %1998 = vmatpush.bf16.msrb.mxu3 %v10823_v26  ;;  %2011 = vmatpush.bf16.msra.mxu0 %v11079_v27  ;;  %v10630_v26 = vld [vmem:[#allocation27 + $0x50] sm:$0xf] }
 0x24b   :  { %2024 = vmatpush.bf16.msra.mxu1 %v10827_v59  ;;  %2037 = vmatpush.bf16.msra.mxu2 %v11083_v29  ;;  %v15259_v27 = vld [vmem:[#allocation27 + $0x6c] sm:$0xf0] }
 0x24c   :  { %v10886_v59 = vld [vmem:[#allocation27 + $0x250] sm:$0xf]  ;;  %v10631_v38 = vor.u32 %v15259_v27, %v10630_v26  ;;  %v10771_v26 = vor.u32 %v15288_v17, %v10768_v18  ;;  %v11027_v27 = vor.u32 %v15352_v35, %v11024_v19  ;;  %v15312_v17 = vld [vmem:[#allocation27 + $0x21c] sm:$0xf] }
 0x24d   :  { %v15323_v29 = vld [vmem:[#allocation27 + $0x26c] sm:$0xf0]  ;;  %v10864_v18 = vld [vmem:[#allocation27 + $0x238] sm:$0xf0] }
 0x24e   :  { %1999 = vmatpush.bf16.msrb.mxu3 %v10791_v39  ;;  %2012 = vmatpush.bf16.msra.mxu0 %v11047_v44  ;;  %v10887_v39 = vor.u32 %v15323_v29, %v10886_v59  ;;  %v15251_v44 = vld [vmem:[#allocation27 + $0x2c] sm:$0xf0]  ;;  %v15280_v59 = vld [vmem:[#allocation27 + $0x11c] sm:$0xf] }
 0x24f   :  { %2025 = vmatpush.bf16.msra.mxu1 %v10795_v42  ;;  %2038 = vmatpush.bf16.msra.mxu2 %v11051_v43  ;;  %v10635_v42 = vor.u32 %v15255_v30, %v10632_v31  ;;  %v10891_v43 = vor.u32 %v15319_v32, %v10888_v36  ;;  %v10599_v54 = vor.u32 %v15251_v44, %v10598_v37  ;;  %v10736_v29 = vld [vmem:[#allocation27 + $0x138] sm:$0xf0]  ;;  %v10702_v37 = vld [vmem:[#allocation27 + $0xd8] sm:$0xf] }
 0x250   :  { %v15344_v30 = vld [vmem:[#allocation27 + $0x31c] sm:$0xf] }
 0x251   :  { %v10992_v31 = vld [vmem:[#allocation27 + $0x338] sm:$0xf0] }
 0x252   :  { %2000 = vmatpush.bf16.msrb.mxu3 %v10759_v51  ;;  %2013 = vmatpush.bf16.msra.mxu0 %v11015_v52  ;;  %v11086_v51 = vld [vmem:[#allocation27 + $0x3d8] sm:$0xf]  ;;  %v10995_v44 = vor.u32 %v15344_v30, %v10992_v31 }
 0x253   :  { %2026 = vmatpush.bf16.msra.mxu1 %v10763_v34  ;;  %2039 = vmatpush.bf16.msra.mxu2 %v11019_v55  ;;  %v15372_v52 = vld [vmem:[#allocation27 + $0x3f4] sm:$0xf0]  ;;  %v10855_v34 = vor.u32 %v15315_v41, %v10854_v40  ;;  %v10832_v55 = vld [vmem:[#allocation27 + $0x1f8] sm:$0xf0] }
 0x254   :  { %v11087_v63 = vor.u32 %v15372_v52, %v11086_v51  ;;  %v10835_v3 = vor.u32 %v15304_v53, %v10832_v55  ;;  %v10958_v40 = vld [vmem:[#allocation27 + $0x2d8] sm:$0xf]  ;;  %v10963_v52 = vor.u32 %v15336_v45, %v10960_v46  ;;  %v10672_v55 = vld [vmem:[#allocation27 + $0xb8] sm:$0xf0] }
 0x255   :  { %v15340_v41 = vld [vmem:[#allocation27 + $0x2f4] sm:$0xf0] }
 0x256   :  { %2001 = vmatpush.bf16.msrb.mxu3 %v10727_v1  ;;  %2014 = vmatpush.bf16.msra.mxu0 %v10983_v2  ;;  %v10798_v1 = vld [vmem:[#allocation27 + $0x198] sm:$0xf]  ;;  %v10959_v48 = vor.u32 %v15340_v41, %v10958_v40 }
 0x257   :  { %2027 = vmatpush.bf16.msra.mxu1 %v10731_v5  ;;  %2040 = vmatpush.bf16.msra.mxu2 %v10987_v6  ;;  %v15300_v2 = vld [vmem:[#allocation27 + $0x1b4] sm:$0xf0] }
 0x258   :  { %1954 = vmatmul.bf16.vlgmr.msra.gmra.mxu3 %v17167_v24  ;;  %1967 = vmatmul.bf16.vlgmr.msrb.gmra.mxu0 %v17169_v25  ;;  %v11054_v5 = vld [vmem:[#allocation27 + $0x398] sm:$0xf]  ;;  %v10799_v11 = vor.u32 %v15300_v2, %v10798_v1  ;;  %v10931_v2 = vor.u32 %v15328_v56, %v10928_v57 }
 0x259   :  { %1980 = vmatmul.bf16.vlgmr.msrb.gmra.mxu1 %v17167_v24  ;;  %1993 = vmatmul.bf16.vlgmr.msrb.gmra.mxu2 %v17169_v25  ;;  %v15364_v6 = vld [vmem:[#allocation27 + $0x3b4] sm:$0xf0] }
 0x25a   :  { %2002 = vmatpush.bf16.msrb.mxu3 %v10695_v13  ;;  %2015 = vmatpush.bf16.msra.mxu0 %v10951_v14  ;;  %v11055_v12 = vor.u32 %v15364_v6, %v11054_v5  ;;  %v10766_v13 = vld [vmem:[#allocation27 + $0x158] sm:$0xf]  ;;  %v15256_v5 = vld [vmem:[#allocation27 + $0x5c] sm:$0xf] }
 0x25b   :  { %2028 = vmatpush.bf16.msra.mxu1 %v10699_v16  ;;  %2041 = vmatpush.bf16.msra.mxu2 %v10955_v60  ;;  %v15292_v14 = vld [vmem:[#allocation27 + $0x174] sm:$0xf0]  ;;  %v10640_v6 = vld [vmem:[#allocation27 + $0x78] sm:$0xf0] }
 0x25c   :  { %v11022_v16 = vld [vmem:[#allocation27 + $0x358] sm:$0xf]  ;;  %v10767_v20 = vor.u32 %v15292_v14, %v10766_v13  ;;  %v10643_v13 = vor.u32 %v15256_v5, %v10640_v6  ;;  %v10899_v14 = vor.u32 %v15320_v7, %v10896_v8 }
 0x25d   :  { %v15356_v60 = vld [vmem:[#allocation27 + $0x374] sm:$0xf0] }
 0x25e   :  { %2003 = vmatpush.bf16.msrb.mxu3 %v10663_v22  ;;  %2016 = vmatpush.bf16.msra.mxu0 %v10919_v23  ;;  %v11023_v21 = vor.u32 %v15356_v60, %v11022_v16  ;;  %v10734_v22 = vld [vmem:[#allocation27 + $0x118] sm:$0xf]  ;;  %v15248_v16 = vld [vmem:[#allocation27 + $0x1c] sm:$0xf] }
 0x25f   :  { %2029 = vmatpush.bf16.msra.mxu1 %v10667_v0  ;;  %2042 = vmatpush.bf16.msra.mxu2 %v10923_v28  ;;  %v15284_v23 = vld [vmem:[#allocation27 + $0x134] sm:$0xf0]  ;;  %v10608_v60 = vld [vmem:[#allocation27 + $0x38] sm:$0xf0] }
 0x260   :  { %v10990_v0 = vld [vmem:[#allocation27 + $0x318] sm:$0xf]  ;;  %v10735_v32 = vor.u32 %v15284_v23, %v10734_v22 }
 0x261   :  { %v15348_v28 = vld [vmem:[#allocation27 + $0x334] sm:$0xf0] }
 0x262   :  { %2004 = vmatpush.bf16.msrb.mxu3 %v10631_v38  ;;  %2017 = vmatpush.bf16.msra.mxu0 %v10887_v39  ;;  %v10991_v36 = vor.u32 %v15348_v28, %v10990_v0  ;;  %v15276_v38 = vld [vmem:[#allocation27 + $0xf4] sm:$0xf0]  ;;  %v10739_v39 = vor.u32 %v15280_v59, %v10736_v29  ;;  %v1236_v59 = vld [vmem:[#allocation28] sm:$0xff] }
 0x263   :  { %2030 = vmatpush.bf16.msra.mxu1 %v10635_v42  ;;  %2043 = vmatpush.bf16.msra.mxu2 %v10891_v43  ;;  %v15272_v42 = vld [vmem:[#allocation27 + $0xdc] sm:$0xf]  ;;  %v10703_v47 = vor.u32 %v15276_v38, %v10702_v37  ;;  %v10926_v53 = vld [vmem:[#allocation27 + $0x298] sm:$0xf]  ;;  %v1239_v29 = vperm.slane %v1236_v59, 1  ;;  %v1241_v38 = vperm.slane %v1236_v59, 3 }
 0x264   :  { %v10704_v43 = vld [vmem:[#allocation27 + $0xf8] sm:$0xf0]  ;;  %v1243_v8 = vperm.slane %v1236_v59, 5 }
 0x265   :  { %v10707_v51 = vor.u32 %v15272_v42, %v10704_v43 }
 0x266   :  { %2005 = vmatpush.bf16.msrb.mxu3 %v10599_v54  ;;  %2018 = vmatpush.bf16.msra.mxu0 %v10855_v34  ;;  %v15332_v54 = vld [vmem:[#allocation27 + $0x2b4] sm:$0xf0]  ;;  %v15264_v34 = vld [vmem:[#allocation27 + $0x9c] sm:$0xf] }
 0x267   :  { %2031 = vmatpush.bf16.msra.mxu1 %v10603_v58  ;;  %2044 = vmatpush.bf16.msra.mxu2 %v10859_v61  ;;  %v10671_v58 = vor.u32 %v15268_v50, %v10670_v49  ;;  %v10927_v61 = vor.u32 %v15332_v54, %v10926_v53  ;;  %v10675_v1 = vor.u32 %v15264_v34, %v10672_v55 }
 0x269   :  { %2006 = vmatmul.bf16.vlgmr.msrb.gmra.mxu3 %v17167_v24  ;;  %2019 = vmatmul.bf16.vlgmr.msra.gmra.mxu0 %v17169_v25 }
 0x26a   :  { %2050 = vmatpush.bf16.msra.mxu3 %v10831_v62  ;;  %2063 = vmatpush.bf16.msrb.mxu0 %v11087_v63  ;;  %v10638_v62 = vld [vmem:[#allocation27 + $0x58] sm:$0xf] }
 0x26b   :  { %2076 = vmatpush.bf16.msrb.mxu1 %v10835_v3  ;;  %2089 = vmatpush.bf16.msrb.mxu2 %v11091_v4  ;;  %v15260_v63 = vld [vmem:[#allocation27 + $0x74] sm:$0xf0] }
 0x26c   :  { %2032 = vmatmul.bf16.vlgmr.msra.gmra.mxu1 %v17167_v24  ;;  %2045 = vmatmul.bf16.vlgmr.msra.gmra.mxu2 %v17169_v25  ;;  %v10894_v3 = vld [vmem:[#allocation27 + $0x258] sm:$0xf]  ;;  %v10639_v9 = vor.u32 %v15260_v63, %v10638_v62 }
 0x26d   :  { %v15324_v4 = vld [vmem:[#allocation27 + $0x274] sm:$0xf0] }
 0x26e   :  { %2051 = vmatpush.bf16.msra.mxu3 %v10799_v11  ;;  %2064 = vmatpush.bf16.msrb.mxu0 %v11055_v12  ;;  %v10895_v10 = vor.u32 %v15324_v4, %v10894_v3  ;;  %v10606_v11 = vld [vmem:[#allocation27 + $0x18] sm:$0xf] }
 0x26f   :  { %2077 = vmatpush.bf16.msrb.mxu1 %v10803_v15  ;;  %2090 = vmatpush.bf16.msrb.mxu2 %v11059_v33  ;;  %v15252_v12 = vld [vmem:[#allocation27 + $0x34] sm:$0xf0] }
 0x270   :  { %v10862_v15 = vld [vmem:[#allocation27 + $0x218] sm:$0xf]  ;;  %v10607_v35 = vor.u32 %v15252_v12, %v10606_v11 }
 0x271   :  { %v15316_v33 = vld [vmem:[#allocation27 + $0x234] sm:$0xf0] }
 0x272   :  { %2052 = vmatpush.bf16.msra.mxu3 %v10767_v20  ;;  %2065 = vmatpush.bf16.msrb.mxu0 %v11023_v21  ;;  %v10863_v19 = vor.u32 %v15316_v33, %v10862_v15  ;;  %v10611_v20 = vor.u32 %v15248_v16, %v10608_v60  ;;  %v10867_v21 = vor.u32 %v15312_v17, %v10864_v18  ;;  %v1244_v33 = vperm.slane %v1236_v59, 6 }
 0x273   :  { %2078 = vmatpush.bf16.msrb.mxu1 %v10771_v26  ;;  %2091 = vmatpush.bf16.msrb.mxu2 %v11027_v27 }
 0x276   :  { %2053 = vmatpush.bf16.msra.mxu3 %v10735_v32  ;;  %2066 = vmatpush.bf16.msrb.mxu0 %v10991_v36 }
 0x277   :  { %2079 = vmatpush.bf16.msrb.mxu1 %v10739_v39  ;;  %2092 = vmatpush.bf16.msrb.mxu2 %v10995_v44  ;;  %v1240_v44 = vperm.slane %v1236_v59, 2 }
 0x27a   :  { %2054 = vmatpush.bf16.msra.mxu3 %v10703_v47  ;;  %2067 = vmatpush.bf16.msrb.mxu0 %v10959_v48 }
 0x27b   :  { %2080 = vmatpush.bf16.msrb.mxu1 %v10707_v51  ;;  %2093 = vmatpush.bf16.msrb.mxu2 %v10963_v52 }
 0x27e   :  { %2055 = vmatpush.bf16.msra.mxu3 %v10671_v58  ;;  %2068 = vmatpush.bf16.msrb.mxu0 %v10927_v61 }
 0x27f   :  { %2081 = vmatpush.bf16.msrb.mxu1 %v10675_v1  ;;  %2094 = vmatpush.bf16.msrb.mxu2 %v10931_v2 }
 0x282   :  { %2056 = vmatpush.bf16.msra.mxu3 %v10639_v9  ;;  %2069 = vmatpush.bf16.msrb.mxu0 %v10895_v10  ;;  %v1242_v9 = vperm.slane %v1236_v59, 4 }
 0x283   :  { %2082 = vmatpush.bf16.msrb.mxu1 %v10643_v13  ;;  %2095 = vmatpush.bf16.msrb.mxu2 %v10899_v14  ;;  %v1245_v14 = vperm.slane %v1236_v59, 7 }
 0x286   :  { %2057 = vmatpush.bf16.msra.mxu3 %v10607_v35  ;;  %2070 = vmatpush.bf16.msrb.mxu0 %v10863_v19 }
 0x287   :  { %2083 = vmatpush.bf16.msrb.mxu1 %v10611_v20  ;;  %2096 = vmatpush.bf16.msrb.mxu2 %v10867_v21 }
 0x289   :  { %2058 = vmatmul.bf16.vlgmr.msra.gmra.mxu3 %v17167_v24  ;;  %2071 = vmatmul.bf16.vlgmr.msrb.gmra.mxu0 %v17169_v25 }
 0x28a   :  { %2084 = vmatmul.bf16.vlgmr.msrb.gmra.mxu1 %v17167_v24  ;;  %2097 = vmatmul.bf16.vlgmr.msrb.gmra.mxu2 %v17169_v25  ;;  %v1238_v24 = vperm.slane %v1236_v59, 0 }
 0x2c5   :  { %v1916_v22 = vpop.f32.mrf.mxu0 }
 0x2c6   :  { %v1929_v23 = vpop.f32.mrf.mxu1 }
 0x2c7   :  { %v1930_v32 = vadd.f32 %v1929_v23, %v1239_v29 }
 0x2cb   :  { %v1903_v26 = vpop.f32.mrf.mxu3 }
 0x2cc   :  { %v1942_v27 = vpop.f32.mrf.mxu2  ;;  %v1904_v36 = vadd.f32 %v1903_v26, %v1238_v24 }
 0x2cd   :  { %v1918_v0 = vpop.f32.mrf.mxu0  ;;  %v1943_v39 = vadd.f32 %v1942_v27, %v1930_v32 }
 0x2ce   :  { %v1931_v28 = vpop.f32.mrf.mxu1  ;;  %v1917_v40 = vadd.f32 %v1916_v22, %v1904_v36 }
 0x2cf   :  { %16497 = vtanh.f32 %v1943_v39 }
 0x2d0   :  { %16499 = vtanh.f32 %v1917_v40 }
 0x2d3   :  { %v1905_v30 = vpop.f32.mrf.mxu3 }
 0x2d4   :  { %v1944_v25 = vpop.f32.mrf.mxu2 }
 0x2d5   :  { %v1968_v31 = vpop.f32.mrf.mxu0  ;;  %v16498_v50 = vpop.eup %16497 }
 0x2d6   :  { %v1981_v37 = vpop.f32.mrf.mxu1  ;;  %v16500_v52 = vpop.eup %16499  ;;  %v2118_v34 = vrot.slane %v16498_v50, 6 }
 0x2d7   :  { %v1982_v41 = vadd.f32 %v1981_v37, %v1241_v38 }
 0x2d8   :  { %v2124_v62 = vsel %vm1089_vm1, %v16500_v52, %v2118_v34 }
 0x2db   :  { %v1955_v42 = vpop.f32.mrf.mxu3 }
 0x2dc   :  { %v1956_v43 = vadd.f32 %v1955_v42, %v1240_v44  ;;  %v1994_v45 = vpop.f32.mrf.mxu2 }
 0x2dd   :  { %v1995_v46 = vadd.f32 %v1994_v45, %v1982_v41  ;;  %v1970_v47 = vpop.f32.mrf.mxu0 }
 0x2de   :  { %v1969_v48 = vadd.f32 %v1968_v31, %v1956_v43  ;;  %v1983_v49 = vpop.f32.mrf.mxu1 }
 0x2df   :  { %16501 = vtanh.f32 %v1995_v46 }
 0x2e0   :  { %16503 = vtanh.f32 %v1969_v48 }
 0x2e3   :  { %v1957_v51 = vpop.f32.mrf.mxu3 }
 0x2e4   :  { %v1996_v53 = vpop.f32.mrf.mxu2 }
 0x2e5   :  { %v16502_v54 = vpop.eup %16501 }
 0x2e6   :  { %v16504_v55 = vpop.eup %16503  ;;  %v2120_v57 = vrot.slane %v16502_v54, 2  ;;  %v2020_v58 = vpop.f32.mrf.mxu0 }
 0x2e7   :  { %v2119_v56 = vrot.slane %v16504_v55, 4 }
 0x2e9   :  { %v2033_v61 = vpop.f32.mrf.mxu1  ;;  %v2126_v63 = vsel %vm2125_vm2, %v2119_v56, %v2120_v57 }
 0x2ea   :  { %v2127_v1 = vsel %vm814_vm3, %v2124_v62, %v2126_v63  ;;  %v2034_v11 = vadd.f32 %v2033_v61, %v1243_v8 }
 0x2eb   :  { %2133 = vst [vmem:[#allocation8] sm:$0xff] %v2127_v1 }
 0x2ec   :  { %v2007_v2 = vpop.f32.mrf.mxu3 }
 0x2ed   :  { %v2008_v12 = vadd.f32 %v2007_v2, %v1242_v9 }
 0x2ee   :  { %v2022_v4 = vpop.f32.mrf.mxu0 }
 0x2ef   :  { %v2046_v3 = vpop.f32.mrf.mxu2  ;;  %v2021_v16 = vadd.f32 %v2020_v58, %v2008_v12 }
 0x2f0   :  { %v2047_v15 = vadd.f32 %v2046_v3, %v2034_v11 }
 0x2f1   :  { %v2035_v5 = vpop.f32.mrf.mxu1 }
 0x2f2   :  { %16505 = vtanh.f32 %v2047_v15 }
 0x2f3   :  { %16507 = vtanh.f32 %v2021_v16 }
 0x2f4   :  { %v2009_v6 = vpop.f32.mrf.mxu3 }
 0x2f7   :  { %v2048_v7 = vpop.f32.mrf.mxu2 }
 0x2f8   :  { %v16506_v23 = vpop.eup %16505 }
 0x2f9   :  { %v16508_v27 = vpop.eup %16507  ;;  %v2121_v29 = vrot.slane %v16506_v23, 6 }
 0x2fb   :  { %v2128_v25 = vsel %vm1089_vm1, %v16508_v27, %v2121_v29 }
 0x306   :  { %v2072_v10 = vpop.f32.mrf.mxu0 }
 0x307   :  { %v2085_v13 = vpop.f32.mrf.mxu1 }
 0x308   :  { %v2086_v60 = vadd.f32 %v2085_v13, %v1245_v14 }
 0x30c   :  { %v2059_v17 = vpop.f32.mrf.mxu3 }
 0x30d   :  { %v2060_v18 = vadd.f32 %v2059_v17, %v1244_v33  ;;  %v2098_v35 = vpop.f32.mrf.mxu2 }
 0x30e   :  { %v2099_v19 = vadd.f32 %v2098_v35, %v2086_v60  ;;  %v2074_v20 = vpop.f32.mrf.mxu0 }
 0x30f   :  { %v2073_v21 = vadd.f32 %v2072_v10, %v2060_v18  ;;  %v2087_v22 = vpop.f32.mrf.mxu1 }
 0x310   :  { %16509 = vtanh.f32 %v2099_v19 }
 0x311   :  { %16511 = vtanh.f32 %v2073_v21 }
 0x314   :  { %v2061_v26 = vpop.f32.mrf.mxu3 }
 0x315   :  { %v2100_v0 = vpop.f32.mrf.mxu2 }
 0x316   :  { %v16510_v28 = vpop.eup %16509 }
 0x317   :  { %v16512_v59 = vpop.eup %16511  ;;  %v2123_v30 = vrot.slane %v16510_v28, 2 }
 0x318   :  { %v2122_v24 = vrot.slane %v16512_v59, 4 }
 0x31a   :  { %v2129_v31 = vsel %vm2125_vm2, %v2122_v24, %v2123_v30 }
 0x31b   :  { %v2130_v32 = vsel %vm814_vm3, %v2128_v25, %v2129_v31 }
 0x31c   :  { %2134 = vst [vmem:[#allocation8 + $0x8] sm:$0xff] %v2130_v32 }
 0x323   :  { %v2135_v36 = vld [vmem:[#allocation8] ss:$2 sm:$0xff]  ;;  %v2138_v37 = vld [vmem:[#allocation8 + $0x1] ss:$2 sm:$0xff] }
 0x324   :  { %2136 = vst [vmem:[#allocation13] ss:$2 sm:$0xff] %v2135_v36 }
 0x325   :  { %2140 = vst [vmem:[#allocation13 + $0x1] ss:$2 sm:$0xff] %v2138_v37 }
 0x326   :  { %16850 = dma.done.wait [#allocation3], 131072 }
 0x327   :  { %16851 = vsyncadd [#allocation3], 4294836224  ;;  %v11542_v38 = vld [vmem:[#allocation2 + $0x380] sm:$0xf] }
 0x328   :  { %v15493_v39 = vld [vmem:[#allocation2 + $0x3bc] sm:$0xf0] }
 0x329   :  { %v12054_v44 = vld [vmem:[#allocation2 + $0x780] sm:$0xf]  ;;  %v11543_v40 = vor.u32 %v15493_v39, %v11542_v38 }
 0x32a   :  { %v15621_v41 = vld [vmem:[#allocation2 + $0x7bc] sm:$0xf0] }
 0x32b   :  { %v13078_v42 = vld [vmem:[#allocation2 + $0xf80] sm:$0xf]  ;;  %v12055_v45 = vor.u32 %v15621_v41, %v12054_v44  ;;  %8356 = vmatpush.bf16.msrb.mxu3 %v11543_v40 }
 0x32c   :  { %v15877_v43 = vld [vmem:[#allocation2 + $0xfbc] sm:$0xf0] }
 0x32d   :  { %v13079_v46 = vor.u32 %v15877_v43, %v13078_v42  ;;  %v12566_v47 = vld [vmem:[#allocation2 + $0xb80] sm:$0xf]  ;;  %8369 = vmatpush.bf16.msra.mxu0 %v12055_v45 }
 0x32e   :  { %v15749_v48 = vld [vmem:[#allocation2 + $0xbbc] sm:$0xf0] }
 0x32f   :  { %v11478_v49 = vld [vmem:[#allocation2 + $0x300] sm:$0xf]  ;;  %v12567_v50 = vor.u32 %v15749_v48, %v12566_v47  ;;  %8395 = vmatpush.bf16.msra.mxu2 %v13079_v46 }
 0x330   :  { %v15477_v51 = vld [vmem:[#allocation2 + $0x33c] sm:$0xf0] }
 0x331   :  { %v11990_v52 = vld [vmem:[#allocation2 + $0x700] sm:$0xf]  ;;  %v11479_v54 = vor.u32 %v15477_v51, %v11478_v49  ;;  %8382 = vmatpush.bf16.msra.mxu1 %v12567_v50 }
 0x332   :  { %v15605_v53 = vld [vmem:[#allocation2 + $0x73c] sm:$0xf0] }
 0x333   :  { %v11991_v34 = vor.u32 %v15605_v53, %v11990_v52  ;;  %v13014_v55 = vld [vmem:[#allocation2 + $0xf00] sm:$0xf]  ;;  %8357 = vmatpush.bf16.msrb.mxu3 %v11479_v54 }
 0x334   :  { %v15861_v56 = vld [vmem:[#allocation2 + $0xf3c] sm:$0xf0] }
 0x335   :  { %v12502_v57 = vld [vmem:[#allocation2 + $0xb00] sm:$0xf]  ;;  %v13015_v58 = vor.u32 %v15861_v56, %v13014_v55  ;;  %8370 = vmatpush.bf16.msra.mxu0 %v11991_v34 }
 0x336   :  { %v15733_v61 = vld [vmem:[#allocation2 + $0xb3c] sm:$0xf0] }
 0x337   :  { %v11414_v62 = vld [vmem:[#allocation2 + $0x280] sm:$0xf]  ;;  %v12503_v1 = vor.u32 %v15733_v61, %v12502_v57  ;;  %8396 = vmatpush.bf16.msra.mxu2 %v13015_v58 }
 0x338   :  { %v15461_v63 = vld [vmem:[#allocation2 + $0x2bc] sm:$0xf0] }
 0x339   :  { %v11926_v2 = vld [vmem:[#allocation2 + $0x680] sm:$0xf]  ;;  %v11415_v5 = vor.u32 %v15461_v63, %v11414_v62  ;;  %8383 = vmatpush.bf16.msra.mxu1 %v12503_v1 }
 0x33a   :  { %v15589_v3 = vld [vmem:[#allocation2 + $0x6bc] sm:$0xf0] }
 0x33b   :  { %v12950_v4 = vld [vmem:[#allocation2 + $0xe80] sm:$0xf]  ;;  %v11927_v9 = vor.u32 %v15589_v3, %v11926_v2  ;;  %8358 = vmatpush.bf16.msrb.mxu3 %v11415_v5 }
 0x33c   :  { %v15845_v6 = vld [vmem:[#allocation2 + $0xebc] sm:$0xf0] }
 0x33d   :  { %v12438_v7 = vld [vmem:[#allocation2 + $0xa80] sm:$0xf]  ;;  %v12951_v10 = vor.u32 %v15845_v6, %v12950_v4  ;;  %8371 = vmatpush.bf16.msra.mxu0 %v11927_v9 }
 0x33e   :  { %v15717_v8 = vld [vmem:[#allocation2 + $0xabc] sm:$0xf0] }
 0x33f   :  { %v11350_v11 = vld [vmem:[#allocation2 + $0x200] sm:$0xf]  ;;  %v12439_v14 = vor.u32 %v15717_v8, %v12438_v7  ;;  %8397 = vmatpush.bf16.msra.mxu2 %v12951_v10 }
 0x340   :  { %v15445_v12 = vld [vmem:[#allocation2 + $0x23c] sm:$0xf0] }
 0x341   :  { %v11862_v13 = vld [vmem:[#allocation2 + $0x600] sm:$0xf]  ;;  %v11351_v18 = vor.u32 %v15445_v12, %v11350_v11  ;;  %8384 = vmatpush.bf16.msra.mxu1 %v12439_v14 }
 0x342   :  { %v15573_v15 = vld [vmem:[#allocation2 + $0x63c] sm:$0xf0] }
 0x343   :  { %v12886_v33 = vld [vmem:[#allocation2 + $0xe00] sm:$0xf]  ;;  %v11863_v35 = vor.u32 %v15573_v15, %v11862_v13  ;;  %8359 = vmatpush.bf16.msrb.mxu3 %v11351_v18 }
 0x344   :  { %v15829_v16 = vld [vmem:[#allocation2 + $0xe3c] sm:$0xf0] }
 0x345   :  { %v12374_v60 = vld [vmem:[#allocation2 + $0xa00] sm:$0xf]  ;;  %v12887_v19 = vor.u32 %v15829_v16, %v12886_v33  ;;  %8372 = vmatpush.bf16.msra.mxu0 %v11863_v35 }
 0x346   :  { %v15701_v17 = vld [vmem:[#allocation2 + $0xa3c] sm:$0xf0] }
 0x347   :  { %v11286_v20 = vld [vmem:[#allocation2 + $0x180] sm:$0xf]  ;;  %v12375_v23 = vor.u32 %v15701_v17, %v12374_v60  ;;  %8398 = vmatpush.bf16.msra.mxu2 %v12887_v19 }
 0x348   :  { %v15429_v21 = vld [vmem:[#allocation2 + $0x1bc] sm:$0xf0] }
 0x349   :  { %v11798_v22 = vld [vmem:[#allocation2 + $0x580] sm:$0xf]  ;;  %v11287_v59 = vor.u32 %v15429_v21, %v11286_v20  ;;  %8385 = vmatpush.bf16.msra.mxu1 %v12375_v23 }
 0x34a   :  { %v15557_v26 = vld [vmem:[#allocation2 + $0x5bc] sm:$0xf0] }
 0x34b   :  { %v12822_v27 = vld [vmem:[#allocation2 + $0xd80] sm:$0xf]  ;;  %v11799_v24 = vor.u32 %v15557_v26, %v11798_v22  ;;  %8360 = vmatpush.bf16.msrb.mxu3 %v11287_v59 }
 0x34c   :  { %v15813_v0 = vld [vmem:[#allocation2 + $0xdbc] sm:$0xf0] }
 0x34d   :  { %v12310_v28 = vld [vmem:[#allocation2 + $0x980] sm:$0xf]  ;;  %v12823_v30 = vor.u32 %v15813_v0, %v12822_v27  ;;  %8373 = vmatpush.bf16.msra.mxu0 %v11799_v24  ;;  %v3169_v27 = vld [vmem:[#allocation13] sm:$0xff] }
 0x34e   :  { %v15685_v29 = vld [vmem:[#allocation2 + $0x9bc] sm:$0xf0]  ;;  %3173 = vst [vmem:[#allocation1] ss:$4 sm:$0xff] %v3169_v27 }
 0x34f   :  { %v11222_v25 = vld [vmem:[#allocation2 + $0x100] sm:$0xf]  ;;  %v12311_v36 = vor.u32 %v15685_v29, %v12310_v28  ;;  %8399 = vmatpush.bf16.msra.mxu2 %v12823_v30 }
 0x350   :  { %v15413_v31 = vld [vmem:[#allocation2 + $0x13c] sm:$0xf0] }
 0x351   :  { %v11734_v32 = vld [vmem:[#allocation2 + $0x500] sm:$0xf]  ;;  %v11223_v41 = vor.u32 %v15413_v31, %v11222_v25  ;;  %8386 = vmatpush.bf16.msra.mxu1 %v12311_v36 }
 0x352   :  { %v15541_v37 = vld [vmem:[#allocation2 + $0x53c] sm:$0xf0] }
 0x353   :  { %v12758_v38 = vld [vmem:[#allocation2 + $0xd00] sm:$0xf]  ;;  %v11735_v42 = vor.u32 %v15541_v37, %v11734_v32  ;;  %8361 = vmatpush.bf16.msrb.mxu3 %v11223_v41 }
 0x354   :  { %v15797_v39 = vld [vmem:[#allocation2 + $0xd3c] sm:$0xf0] }
 0x355   :  { %v12246_v44 = vld [vmem:[#allocation2 + $0x900] sm:$0xf]  ;;  %v12759_v43 = vor.u32 %v15797_v39, %v12758_v38  ;;  %8374 = vmatpush.bf16.msra.mxu0 %v11735_v42 }
 0x356   :  { %v15669_v40 = vld [vmem:[#allocation2 + $0x93c] sm:$0xf0] }
 0x357   :  { %v11158_v45 = vld [vmem:[#allocation2 + $0x80] sm:$0xf]  ;;  %v12247_v48 = vor.u32 %v15669_v40, %v12246_v44  ;;  %8400 = vmatpush.bf16.msra.mxu2 %v12759_v43 }
 0x358   :  { %v15397_v46 = vld [vmem:[#allocation2 + $0xbc] sm:$0xf0] }
 0x359   :  { %v11670_v47 = vld [vmem:[#allocation2 + $0x480] sm:$0xf]  ;;  %v11159_v54 = vor.u32 %v15397_v46, %v11158_v45  ;;  %8387 = vmatpush.bf16.msra.mxu1 %v12247_v48 }
 0x35a   :  { %v15525_v49 = vld [vmem:[#allocation2 + $0x4bc] sm:$0xf0] }
 0x35b   :  { %v12694_v50 = vld [vmem:[#allocation2 + $0xc80] sm:$0xf]  ;;  %v11671_v56 = vor.u32 %v15525_v49, %v11670_v47  ;;  %8362 = vmatpush.bf16.msrb.mxu3 %v11159_v54  ;;  %v3179_v54 = vld.sshfl [vmem:[#allocation1 + $0x18] sm:$0xff pattern:$0x73625140] }
 0x35c   :  { %v15781_v51 = vld [vmem:[#allocation2 + $0xcbc] sm:$0xf0] }
 0x35d   :  { %v12182_v52 = vld [vmem:[#allocation2 + $0x880] sm:$0xf]  ;;  %v12695_v57 = vor.u32 %v15781_v51, %v12694_v50  ;;  %8375 = vmatpush.bf16.msra.mxu0 %v11671_v56  ;;  %v17198_v56 = vpack.c.bf16 %v3179_v54, %v3179_v54 }
 0x35e   :  { %v15653_v53 = vld [vmem:[#allocation2 + $0x8bc] sm:$0xf0] }
 0x35f   :  { %v11094_v34 = vld [vmem:[#allocation2] sm:$0xf]  ;;  %v12183_v63 = vor.u32 %v15653_v53, %v12182_v52  ;;  %8401 = vmatpush.bf16.msra.mxu2 %v12695_v57  ;;  %v3176_v52 = vld.sshfl [vmem:[#allocation1] sm:$0xff pattern:$0x73625140] }
 0x360   :  { %v15381_v55 = vld [vmem:[#allocation2 + $0x3c] sm:$0xf0] }
 0x361   :  { %v11606_v58 = vld [vmem:[#allocation2 + $0x400] sm:$0xf]  ;;  %v11095_v7 = vor.u32 %v15381_v55, %v11094_v34  ;;  %8388 = vmatpush.bf16.msra.mxu1 %v12183_v63  ;;  %v17196_v55 = vpack.c.bf16 %v3176_v52, %v3176_v52 }
 0x362   :  { %v15509_v61 = vld [vmem:[#allocation2 + $0x43c] sm:$0xf0] }
 0x363   :  { %v12630_v62 = vld [vmem:[#allocation2 + $0xc00] sm:$0xf]  ;;  %v11607_v11 = vor.u32 %v15509_v61, %v11606_v58  ;;  %8363 = vmatpush.bf16.msrb.mxu3 %v11095_v7  ;;  %v3178_v58 = vld.sshfl [vmem:[#allocation1 + $0x10] sm:$0xff pattern:$0x73625140] }
 0x364   :  { %v15765_v1 = vld [vmem:[#allocation2 + $0xc3c] sm:$0xf0] }
 0x365   :  { %v13590_v2 = vld [vmem:[#allocation2 + $0x1380] sm:$0xf]  ;;  %v12631_v12 = vor.u32 %v15765_v1, %v12630_v62  ;;  %8376 = vmatpush.bf16.msra.mxu0 %v11607_v11 }
 0x366   :  { %v16005_v3 = vld [vmem:[#allocation2 + $0x13bc] sm:$0xf0]  ;;  %8364 = vmatmul.bf16.vlgmr.msrb.gmra.mxu3 %v17196_v55 }
 0x367   :  { %v14102_v4 = vld [vmem:[#allocation2 + $0x1780] sm:$0xf]  ;;  %v13591_v15 = vor.u32 %v16005_v3, %v13590_v2  ;;  %8402 = vmatpush.bf16.msra.mxu2 %v12631_v12  ;;  %v17202_v3 = vpack.c.bf16 %v3178_v58, %v3178_v58 }
 0x368   :  { %v16133_v5 = vld [vmem:[#allocation2 + $0x17bc] sm:$0xf0] }
 0x369   :  { %v15126_v6 = vld [vmem:[#allocation2 + $0x1f80] sm:$0xf]  ;;  %v14103_v33 = vor.u32 %v16133_v5, %v14102_v4  ;;  %8408 = vmatpush.bf16.msra.mxu3 %v13591_v15 }
 0x36a   :  { %v16389_v8 = vld [vmem:[#allocation2 + $0x1fbc] sm:$0xf0]  ;;  %8403 = vmatmul.bf16.vlgmr.msra.gmra.mxu2 %v17198_v56 }
 0x36b   :  { %v12118_v9 = vld [vmem:[#allocation2 + $0x800] sm:$0xf]  ;;  %v15127_v60 = vor.u32 %v16389_v8, %v15126_v6  ;;  %8421 = vmatpush.bf16.msrb.mxu0 %v14103_v33 }
 0x36c   :  { %v15637_v10 = vld [vmem:[#allocation2 + $0x83c] sm:$0xf0] }
 0x36d   :  { %v14614_v13 = vld [vmem:[#allocation2 + $0x1b80] sm:$0xf]  ;;  %v12119_v17 = vor.u32 %v15637_v10, %v12118_v9  ;;  %8447 = vmatpush.bf16.msrb.mxu2 %v15127_v60 }
 0x36e   :  { %v16261_v14 = vld [vmem:[#allocation2 + $0x1bbc] sm:$0xf0] }
 0x36f   :  { %v13526_v16 = vld [vmem:[#allocation2 + $0x1300] sm:$0xf]  ;;  %v14615_v20 = vor.u32 %v16261_v14, %v14614_v13  ;;  %8389 = vmatpush.bf16.msra.mxu1 %v12119_v17  ;;  %v3170_v17 = vld [vmem:[#allocation13 + $0x8] sm:$0xff] }
 0x370   :  { %v15989_v18 = vld [vmem:[#allocation2 + $0x133c] sm:$0xf0]  ;;  %3175 = vst [vmem:[#allocation1 + $0x20] ss:$4 sm:$0xff] %v3170_v17 }
 0x371   :  { %v14038_v35 = vld [vmem:[#allocation2 + $0x1700] sm:$0xf]  ;;  %v13527_v0 = vor.u32 %v15989_v18, %v13526_v16 }
 0x372   :  { %v16117_v19 = vld [vmem:[#allocation2 + $0x173c] sm:$0xf0]  ;;  %8390 = vmatmul.bf16.vlgmr.msra.gmra.mxu1 %v17202_v3 }
 0x373   :  { %v15062_v21 = vld [vmem:[#allocation2 + $0x1f00] sm:$0xf]  ;;  %v14039_v28 = vor.u32 %v16117_v19, %v14038_v35  ;;  %8434 = vmatpush.bf16.msrb.mxu1 %v14615_v20  ;;  %8409 = vmatpush.bf16.msra.mxu3 %v13527_v0 }
 0x374   :  { %v16373_v22 = vld [vmem:[#allocation2 + $0x1f3c] sm:$0xf0] }
 0x375   :  { %v14550_v23 = vld [vmem:[#allocation2 + $0x1b00] sm:$0xf]  ;;  %v15063_v59 = vor.u32 %v16373_v22, %v15062_v21  ;;  %8422 = vmatpush.bf16.msrb.mxu0 %v14039_v28 }
 0x376   :  { %v16245_v26 = vld [vmem:[#allocation2 + $0x1b3c] sm:$0xf0] }
 0x377   :  { %v13462_v29 = vld [vmem:[#allocation2 + $0x1280] sm:$0xf]  ;;  %v14551_v31 = vor.u32 %v16245_v26, %v14550_v23  ;;  %8448 = vmatpush.bf16.msrb.mxu2 %v15063_v59  ;;  %v3180_v54 = vld.sshfl [vmem:[#allocation1 + $0x20] sm:$0xff pattern:$0x73625140] }
 0x378   :  { %v15973_v24 = vld [vmem:[#allocation2 + $0x12bc] sm:$0xf0] }
 0x379   :  { %v13974_v30 = vld [vmem:[#allocation2 + $0x1680] sm:$0xf]  ;;  %v13463_v39 = vor.u32 %v15973_v24, %v13462_v29  ;;  %8435 = vmatpush.bf16.msrb.mxu1 %v14551_v31 }
 0x37a   :  { %v16101_v25 = vld [vmem:[#allocation2 + $0x16bc] sm:$0xf0] }
 0x37b   :  { %v14998_v32 = vld [vmem:[#allocation2 + $0x1e80] sm:$0xf]  ;;  %v13975_v44 = vor.u32 %v16101_v25, %v13974_v30  ;;  %8410 = vmatpush.bf16.msra.mxu3 %v13463_v39 }
 0x37c   :  { %v16357_v36 = vld [vmem:[#allocation2 + $0x1ebc] sm:$0xf0] }
 0x37d   :  { %v14486_v37 = vld [vmem:[#allocation2 + $0x1a80] sm:$0xf]  ;;  %v14999_v42 = vor.u32 %v16357_v36, %v14998_v32  ;;  %8423 = vmatpush.bf16.msrb.mxu0 %v13975_v44  ;;  %v15485_v44 = vld [vmem:[#allocation2 + $0x384] sm:$0xf] }
 0x37e   :  { %v16229_v38 = vld [vmem:[#allocation2 + $0x1abc] sm:$0xf0] }
 0x37f   :  { %v13398_v40 = vld [vmem:[#allocation2 + $0x1200] sm:$0xf]  ;;  %v14487_v47 = vor.u32 %v16229_v38, %v14486_v37  ;;  %8449 = vmatpush.bf16.msrb.mxu2 %v14999_v42  ;;  %v15613_v42 = vld [vmem:[#allocation2 + $0x784] sm:$0xf] }
 0x380   :  { %v15957_v41 = vld [vmem:[#allocation2 + $0x123c] sm:$0xf0] }
 0x381   :  { %v13910_v43 = vld [vmem:[#allocation2 + $0x1600] sm:$0xf]  ;;  %v13399_v51 = vor.u32 %v15957_v41, %v13398_v40  ;;  %8436 = vmatpush.bf16.msrb.mxu1 %v14487_v47  ;;  %v11544_v41 = vld [vmem:[#allocation2 + $0x3c0] sm:$0xf0] }
 0x382   :  { %v16085_v45 = vld [vmem:[#allocation2 + $0x163c] sm:$0xf0]  ;;  %v13080_v47 = vld [vmem:[#allocation2 + $0xfc0] sm:$0xf0]  ;;  %v11547_v58 = vor.u32 %v15485_v44, %v11544_v41 }
 0x383   :  { %v14934_v46 = vld [vmem:[#allocation2 + $0x1e00] sm:$0xf]  ;;  %v13911_v34 = vor.u32 %v16085_v45, %v13910_v43  ;;  %8411 = vmatpush.bf16.msra.mxu3 %v13399_v51  ;;  %v12056_v43 = vld [vmem:[#allocation2 + $0x7c0] sm:$0xf0] }
 0x384   :  { %v16341_v48 = vld [vmem:[#allocation2 + $0x1e3c] sm:$0xf0]  ;;  %v12568_v51 = vld [vmem:[#allocation2 + $0xbc0] sm:$0xf0] }
 0x385   :  { %v14422_v49 = vld [vmem:[#allocation2 + $0x1a00] sm:$0xf]  ;;  %v14935_v61 = vor.u32 %v16341_v48, %v14934_v46  ;;  %8424 = vmatpush.bf16.msrb.mxu0 %v13911_v34  ;;  %v15869_v46 = vld [vmem:[#allocation2 + $0xf84] sm:$0xf] }
 0x386   :  { %v16213_v50 = vld [vmem:[#allocation2 + $0x1a3c] sm:$0xf0]  ;;  %v15469_v34 = vld [vmem:[#allocation2 + $0x304] sm:$0xf] }
 0x387   :  { %v13334_v53 = vld [vmem:[#allocation2 + $0x1180] sm:$0xf]  ;;  %v14423_v4 = vor.u32 %v16213_v50, %v14422_v49  ;;  %8450 = vmatpush.bf16.msrb.mxu2 %v14935_v61  ;;  %v15741_v50 = vld [vmem:[#allocation2 + $0xb84] sm:$0xf] }
 0x388   :  { %v3177_v57 = vld.sshfl [vmem:[#allocation1 + $0x8] sm:$0xff pattern:$0x73625140] }
 0x389   :  { %v15941_v62 = vld [vmem:[#allocation2 + $0x11bc] sm:$0xf0]  ;;  %v17200_v2 = vpack.c.bf16 %v3177_v57, %v3177_v57  ;;  %8437 = vmatpush.bf16.msrb.mxu1 %v14423_v4  ;;  %v11480_v61 = vld [vmem:[#allocation2 + $0x340] sm:$0xf0] }
 0x38a   :  { %v13846_v63 = vld [vmem:[#allocation2 + $0x1580] sm:$0xf]  ;;  %v13335_v9 = vor.u32 %v15941_v62, %v13334_v53  ;;  %v3183_v62 = vld.sshfl [vmem:[#allocation1 + $0x38] sm:$0xff pattern:$0x73625140] }
 0x38b   :  { %v16069_v1 = vld [vmem:[#allocation2 + $0x15bc] sm:$0xf0]  ;;  %8377 = vmatmul.bf16.vlgmr.msra.gmra.mxu0 %v17200_v2  ;;  %v15597_v4 = vld [vmem:[#allocation2 + $0x704] sm:$0xf] }
 0x38c   :  { %v14870_v5 = vld [vmem:[#allocation2 + $0x1d80] sm:$0xf]  ;;  %v13847_v10 = vor.u32 %v16069_v1, %v13846_v63  ;;  %8412 = vmatpush.bf16.msra.mxu3 %v13335_v9  ;;  %v12059_v63 = vor.u32 %v15613_v42, %v12056_v43  ;;  %v13083_v1 = vor.u32 %v15869_v46, %v13080_v47  ;;  %v15853_v9 = vld [vmem:[#allocation2 + $0xf04] sm:$0xf] }
 0x38d   :  { %v16325_v6 = vld [vmem:[#allocation2 + $0x1dbc] sm:$0xf0]  ;;  %v12376_v44 = vld [vmem:[#allocation2 + $0xa40] sm:$0xf0] }
 0x38e   :  { %v14358_v7 = vld [vmem:[#allocation2 + $0x1980] sm:$0xf]  ;;  %v14871_v12 = vor.u32 %v16325_v6, %v14870_v5  ;;  %8425 = vmatpush.bf16.msrb.mxu0 %v13847_v10  ;;  %v13016_v10 = vld [vmem:[#allocation2 + $0xf40] sm:$0xf0] }
 0x38f   :  { %v16197_v8 = vld [vmem:[#allocation2 + $0x19bc] sm:$0xf0]  ;;  %v13019_v17 = vor.u32 %v15853_v9, %v13016_v10  ;;  %v15421_v42 = vld [vmem:[#allocation2 + $0x184] sm:$0xf] }
 0x390   :  { %v13270_v11 = vld [vmem:[#allocation2 + $0x1100] sm:$0xf]  ;;  %v14359_v33 = vor.u32 %v16197_v8, %v14358_v7  ;;  %8451 = vmatpush.bf16.msrb.mxu2 %v14871_v12  ;;  %v17208_v7 = vpack.c.bf16 %v3180_v54, %v3180_v54  ;;  %v11992_v8 = vld [vmem:[#allocation2 + $0x740] sm:$0xf0]  ;;  %v17210_v12 = vpack.c.bf16 %v3183_v62, %v3183_v62 }
 0x391   :  { %v15925_v13 = vld [vmem:[#allocation2 + $0x113c] sm:$0xf0]  ;;  %v11288_v43 = vld [vmem:[#allocation2 + $0x1c0] sm:$0xf0] }
 0x392   :  { %v13782_v14 = vld [vmem:[#allocation2 + $0x1500] sm:$0xf]  ;;  %v13271_v19 = vor.u32 %v15925_v13, %v13270_v11  ;;  %8438 = vmatpush.bf16.msrb.mxu1 %v14359_v33  ;;  %v12571_v11 = vor.u32 %v15741_v50, %v12568_v51  ;;  %v3182_v13 = vld.sshfl [vmem:[#allocation1 + $0x30] sm:$0xff pattern:$0x73625140]  ;;  %v11291_v50 = vor.u32 %v15421_v42, %v11288_v43 }
 0x393   :  { %v16053_v15 = vld [vmem:[#allocation2 + $0x153c] sm:$0xf0]  ;;  %v12504_v33 = vld [vmem:[#allocation2 + $0xb40] sm:$0xf0] }
 0x394   :  { %v14806_v16 = vld [vmem:[#allocation2 + $0x1d00] sm:$0xf]  ;;  %v13783_v20 = vor.u32 %v16053_v15, %v13782_v14  ;;  %8413 = vmatpush.bf16.msra.mxu3 %v13271_v19  ;;  %v11483_v14 = vor.u32 %v15469_v34, %v11480_v61  ;;  %v15725_v15 = vld [vmem:[#allocation2 + $0xb04] sm:$0xf] }
 0x395   :  { %v16309_v60 = vld [vmem:[#allocation2 + $0x1d3c] sm:$0xf0]  ;;  %v15581_v19 = vld [vmem:[#allocation2 + $0x684] sm:$0xf] }
 0x396   :  { %v14294_v18 = vld [vmem:[#allocation2 + $0x1900] sm:$0xf]  ;;  %v14807_v23 = vor.u32 %v16309_v60, %v14806_v16  ;;  %8426 = vmatpush.bf16.msrb.mxu0 %v13783_v20  ;;  %v11995_v60 = vor.u32 %v15597_v4, %v11992_v8  ;;  %v11928_v20 = vld [vmem:[#allocation2 + $0x6c0] sm:$0xf0] }
 0x397   :  { %v16181_v35 = vld [vmem:[#allocation2 + $0x193c] sm:$0xf0]  ;;  %v11800_v46 = vld [vmem:[#allocation2 + $0x5c0] sm:$0xf0] }
 0x398   :  { %v13206_v21 = vld [vmem:[#allocation2 + $0x1080] sm:$0xf]  ;;  %v14295_v28 = vor.u32 %v16181_v35, %v14294_v18  ;;  %8452 = vmatpush.bf16.msrb.mxu2 %v14807_v23  ;;  %v15453_v18 = vld [vmem:[#allocation2 + $0x284] sm:$0xf]  ;;  %v17215_v23 = vpack.c.bf16 %v3182_v13, %v3182_v13 }
 0x399   :  { %v15909_v22 = vld [vmem:[#allocation2 + $0x10bc] sm:$0xf0]  ;;  %v11416_v35 = vld [vmem:[#allocation2 + $0x2c0] sm:$0xf0] }
 0x39a   :  { %v13718_v26 = vld [vmem:[#allocation2 + $0x1480] sm:$0xf]  ;;  %v13207_v36 = vor.u32 %v15909_v22, %v13206_v21  ;;  %8439 = vmatpush.bf16.msrb.mxu1 %v14295_v28  ;;  %v15837_v21 = vld [vmem:[#allocation2 + $0xe84] sm:$0xf] }
 0x39b   :  { %v16037_v27 = vld [vmem:[#allocation2 + $0x14bc] sm:$0xf0]  ;;  %v12952_v22 = vld [vmem:[#allocation2 + $0xec0] sm:$0xf0] }
 0x39c   :  { %v14742_v0 = vld [vmem:[#allocation2 + $0x1c80] sm:$0xf]  ;;  %v13719_v37 = vor.u32 %v16037_v27, %v13718_v26  ;;  %8414 = vmatpush.bf16.msra.mxu3 %v13207_v36  ;;  %v12507_v26 = vor.u32 %v15725_v15, %v12504_v33  ;;  %v11419_v27 = vor.u32 %v15453_v18, %v11416_v35  ;;  %v12440_v28 = vld [vmem:[#allocation2 + $0xac0] sm:$0xf0] }
 0x39d   :  { %v16293_v29 = vld [vmem:[#allocation2 + $0x1cbc] sm:$0xf0]  ;;  %v12888_v36 = vld [vmem:[#allocation2 + $0xe40] sm:$0xf0] }
 0x39e   :  { %v14230_v59 = vld [vmem:[#allocation2 + $0x1880] sm:$0xf]  ;;  %v14743_v40 = vor.u32 %v16293_v29, %v14742_v0  ;;  %8427 = vmatpush.bf16.msrb.mxu0 %v13719_v37  ;;  %v15709_v0 = vld [vmem:[#allocation2 + $0xa84] sm:$0xf]  ;;  %v11931_v29 = vor.u32 %v15581_v19, %v11928_v20 }
 0x39f   :  { %v16165_v24 = vld [vmem:[#allocation2 + $0x18bc] sm:$0xf0]  ;;  %v12443_v37 = vor.u32 %v15709_v0, %v12440_v28  ;;  %v15805_v47 = vld [vmem:[#allocation2 + $0xd84] sm:$0xf] }
 0x3a0   :  { %v13142_v30 = vld [vmem:[#allocation2 + $0x1000] sm:$0xf]  ;;  %v14231_v45 = vor.u32 %v16165_v24, %v14230_v59  ;;  %8453 = vmatpush.bf16.msrb.mxu2 %v14743_v40  ;;  %v12955_v59 = vor.u32 %v15837_v21, %v12952_v22  ;;  %v15437_v24 = vld [vmem:[#allocation2 + $0x204] sm:$0xf] }
 0x3a1   :  { %v15893_v25 = vld [vmem:[#allocation2 + $0x103c] sm:$0xf0]  ;;  %v15677_v51 = vld [vmem:[#allocation2 + $0x984] sm:$0xf] }
 0x3a2   :  { %v13654_v31 = vld [vmem:[#allocation2 + $0x1400] sm:$0xf]  ;;  %v13143_v52 = vor.u32 %v15893_v25, %v13142_v30  ;;  %8440 = vmatpush.bf16.msrb.mxu1 %v14231_v45  ;;  %v11352_v30 = vld [vmem:[#allocation2 + $0x240] sm:$0xf0] }
 0x3a3   :  { %v16021_v32 = vld [vmem:[#allocation2 + $0x143c] sm:$0xf0]  ;;  %v15565_v25 = vld [vmem:[#allocation2 + $0x604] sm:$0xf] }
 0x3a4   :  { %v14678_v38 = vld [vmem:[#allocation2 + $0x1c00] sm:$0xf]  ;;  %v13655_v53 = vor.u32 %v16021_v32, %v13654_v31  ;;  %8415 = vmatpush.bf16.msra.mxu3 %v13143_v52  ;;  %v11864_v31 = vld [vmem:[#allocation2 + $0x640] sm:$0xf0] }
 0x3a5   :  { %v16277_v39 = vld [vmem:[#allocation2 + $0x1c3c] sm:$0xf0]  ;;  %v15821_v32 = vld [vmem:[#allocation2 + $0xe04] sm:$0xf]  ;;  %v11867_v40 = vor.u32 %v15565_v25, %v11864_v31 }
 0x3a6   :  { %v14166_v48 = vld [vmem:[#allocation2 + $0x1800] sm:$0xf]  ;;  %v14679_v57 = vor.u32 %v16277_v39, %v14678_v38  ;;  %8428 = vmatpush.bf16.msrb.mxu0 %v13655_v53  ;;  %v11355_v38 = vor.u32 %v15437_v24, %v11352_v30  ;;  %v15693_v39 = vld [vmem:[#allocation2 + $0xa04] sm:$0xf]  ;;  %v12891_v41 = vor.u32 %v15821_v32, %v12888_v36 }
 0x3a7   :  { %v16149_v49 = vld [vmem:[#allocation2 + $0x183c] sm:$0xf0]  ;;  %8416 = vmatmul.bf16.vlgmr.msra.gmra.mxu3 %v17208_v7  ;;  %v15549_v45 = vld [vmem:[#allocation2 + $0x584] sm:$0xf] }
 0x3a8   :  { %v3181_v5 = vld.sshfl [vmem:[#allocation1 + $0x28] sm:$0xff pattern:$0x73625140]  ;;  %v14167_v6 = vor.u32 %v16149_v49, %v14166_v48  ;;  %8454 = vmatpush.bf16.msrb.mxu2 %v14679_v57  ;;  %8460 = vmatpush.bf16.msrb.mxu3 %v11547_v58  ;;  %v12379_v49 = vor.u32 %v15693_v39, %v12376_v44  ;;  %v11803_v53 = vor.u32 %v15549_v45, %v11800_v46 }
 0x3a9   :  { %v17212_v16 = vpack.c.bf16 %v3181_v5, %v3181_v5  ;;  %v12824_v48 = vld [vmem:[#allocation2 + $0xdc0] sm:$0xf0] }
 0x3aa   :  { %8473 = vmatpush.bf16.msra.mxu0 %v12059_v63  ;;  %8441 = vmatpush.bf16.msrb.mxu1 %v14167_v6  ;;  %v12312_v52 = vld [vmem:[#allocation2 + $0x9c0] sm:$0xf0]  ;;  %v12827_v54 = vor.u32 %v15805_v47, %v12824_v48 }
 0x3ab   :  { %8455 = vmatmul.bf16.vlgmr.msrb.gmra.mxu2 %v17210_v12  ;;  %8429 = vmatmul.bf16.vlgmr.msrb.gmra.mxu0 %v17212_v16  ;;  %v15405_v34 = vld [vmem:[#allocation2 + $0x104] sm:$0xf] }
 0x3ac   :  { %8499 = vmatpush.bf16.msra.mxu2 %v13083_v1  ;;  %8461 = vmatpush.bf16.msrb.mxu3 %v11483_v14  ;;  %v11224_v57 = vld [vmem:[#allocation2 + $0x140] sm:$0xf0]  ;;  %v12315_v1 = vor.u32 %v15677_v51, %v12312_v52 }
 0x3ad   :  { %8442 = vmatmul.bf16.vlgmr.msrb.gmra.mxu1 %v17215_v23  ;;  %v15533_v58 = vld [vmem:[#allocation2 + $0x504] sm:$0xf]  ;;  %v11227_v4 = vor.u32 %v15405_v34, %v11224_v57 }
 0x3ae   :  { %8486 = vmatpush.bf16.msra.mxu1 %v12571_v11  ;;  %8474 = vmatpush.bf16.msra.mxu0 %v11995_v60  ;;  %v11736_v61 = vld [vmem:[#allocation2 + $0x540] sm:$0xf0] }
 0x3af   :  { %v15789_v62 = vld [vmem:[#allocation2 + $0xd04] sm:$0xf]  ;;  %v11739_v8 = vor.u32 %v15533_v58, %v11736_v61 }
 0x3b0   :  { %8500 = vmatpush.bf16.msra.mxu2 %v13019_v17  ;;  %8462 = vmatpush.bf16.msrb.mxu3 %v11419_v27  ;;  %v12760_v63 = vld [vmem:[#allocation2 + $0xd40] sm:$0xf0] }
 0x3b1   :  { %v15661_v5 = vld [vmem:[#allocation2 + $0x904] sm:$0xf]  ;;  %v12763_v9 = vor.u32 %v15789_v62, %v12760_v63 }
 0x3b2   :  { %8487 = vmatpush.bf16.msra.mxu1 %v12507_v26  ;;  %8475 = vmatpush.bf16.msra.mxu0 %v11931_v29  ;;  %v12248_v6 = vld [vmem:[#allocation2 + $0x940] sm:$0xf0] }
 0x3b3   :  { %v15389_v10 = vld [vmem:[#allocation2 + $0x84] sm:$0xf]  ;;  %v12251_v60 = vor.u32 %v15661_v5, %v12248_v6 }
 0x3b4   :  { %8501 = vmatpush.bf16.msra.mxu2 %v12955_v59  ;;  %8463 = vmatpush.bf16.msrb.mxu3 %v11355_v38  ;;  %v11160_v11 = vld [vmem:[#allocation2 + $0xc0] sm:$0xf0] }
 0x3b5   :  { %v15517_v13 = vld [vmem:[#allocation2 + $0x484] sm:$0xf]  ;;  %v11163_v18 = vor.u32 %v15389_v10, %v11160_v11 }
 0x3b6   :  { %8488 = vmatpush.bf16.msra.mxu1 %v12443_v37  ;;  %8476 = vmatpush.bf16.msra.mxu0 %v11867_v40  ;;  %v11672_v14 = vld [vmem:[#allocation2 + $0x4c0] sm:$0xf0] }
 0x3b7   :  { %v15773_v15 = vld [vmem:[#allocation2 + $0xc84] sm:$0xf]  ;;  %v11675_v21 = vor.u32 %v15517_v13, %v11672_v14 }
 0x3b8   :  { %8502 = vmatpush.bf16.msra.mxu2 %v12891_v41  ;;  %8464 = vmatpush.bf16.msrb.mxu3 %v11291_v50  ;;  %v12696_v33 = vld [vmem:[#allocation2 + $0xcc0] sm:$0xf0] }
 0x3b9   :  { %v15645_v17 = vld [vmem:[#allocation2 + $0x884] sm:$0xf]  ;;  %v12699_v22 = vor.u32 %v15773_v15, %v12696_v33 }
 0x3ba   :  { %8489 = vmatpush.bf16.msra.mxu1 %v12379_v49  ;;  %8477 = vmatpush.bf16.msra.mxu0 %v11803_v53  ;;  %v12184_v35 = vld [vmem:[#allocation2 + $0x8c0] sm:$0xf0] }
 0x3bb   :  { %v15373_v19 = vld [vmem:[#allocation2 + $0x4] sm:$0xf]  ;;  %v12187_v24 = vor.u32 %v15645_v17, %v12184_v35 }
 0x3bc   :  { %8503 = vmatpush.bf16.msra.mxu2 %v12827_v54  ;;  %8465 = vmatpush.bf16.msrb.mxu3 %v11227_v4  ;;  %v11096_v20 = vld [vmem:[#allocation2 + $0x40] sm:$0xf0] }
 0x3bd   :  { %v15501_v26 = vld [vmem:[#allocation2 + $0x404] sm:$0xf]  ;;  %v11099_v32 = vor.u32 %v15373_v19, %v11096_v20 }
 0x3be   :  { %8490 = vmatpush.bf16.msra.mxu1 %v12315_v1  ;;  %8478 = vmatpush.bf16.msra.mxu0 %v11739_v8  ;;  %v11608_v27 = vld [vmem:[#allocation2 + $0x440] sm:$0xf0] }
 0x3bf   :  { %v15757_v0 = vld [vmem:[#allocation2 + $0xc04] sm:$0xf]  ;;  %v11611_v39 = vor.u32 %v15501_v26, %v11608_v27 }
 0x3c0   :  { %8504 = vmatpush.bf16.msra.mxu2 %v12763_v9  ;;  %v12632_v28 = vld [vmem:[#allocation2 + $0xc40] sm:$0xf0]  ;;  %8466 = vmatpush.bf16.msrb.mxu3 %v11163_v18 }
 0x3c1   :  { %v15997_v29 = vld [vmem:[#allocation2 + $0x1384] sm:$0xf]  ;;  %v12635_v44 = vor.u32 %v15757_v0, %v12632_v28 }
 0x3c2   :  { %v13592_v59 = vld [vmem:[#allocation2 + $0x13c0] sm:$0xf0]  ;;  %8491 = vmatpush.bf16.msra.mxu1 %v12251_v60  ;;  %8479 = vmatpush.bf16.msra.mxu0 %v11675_v21 }
 0x3c3   :  { %v16125_v30 = vld [vmem:[#allocation2 + $0x1784] sm:$0xf]  ;;  %v13595_v42 = vor.u32 %v15997_v29, %v13592_v59 }
 0x3c4   :  { %v14104_v25 = vld [vmem:[#allocation2 + $0x17c0] sm:$0xf0]  ;;  %8505 = vmatpush.bf16.msra.mxu2 %v12699_v22  ;;  %8467 = vmatpush.bf16.msrb.mxu3 %v11099_v32 }
 0x3c5   :  { %v16381_v31 = vld [vmem:[#allocation2 + $0x1f84] sm:$0xf]  ;;  %v14107_v43 = vor.u32 %v16125_v30, %v14104_v25 }
 0x3c6   :  { %v15128_v36 = vld [vmem:[#allocation2 + $0x1fc0] sm:$0xf0]  ;;  %8492 = vmatpush.bf16.msra.mxu1 %v12187_v24  ;;  %8480 = vmatpush.bf16.msra.mxu0 %v11611_v39 }
 0x3c7   :  { %v15629_v37 = vld [vmem:[#allocation2 + $0x804] sm:$0xf]  ;;  %v15131_v46 = vor.u32 %v16381_v31, %v15128_v36  ;;  %8468 = vmatmul.bf16.vlgmr.msrb.gmra.mxu3 %v17196_v55 }
 0x3c8   :  { %v12120_v38 = vld [vmem:[#allocation2 + $0x840] sm:$0xf0]  ;;  %8506 = vmatpush.bf16.msra.mxu2 %v12635_v44  ;;  %8512 = vmatpush.bf16.msra.mxu3 %v13595_v42 }
 0x3c9   :  { %v16253_v40 = vld [vmem:[#allocation2 + $0x1b84] sm:$0xf]  ;;  %v12123_v47 = vor.u32 %v15629_v37, %v12120_v38  ;;  %8481 = vmatmul.bf16.vlgmr.msra.gmra.mxu0 %v17200_v2 }
 0x3ca   :  { %v14616_v41 = vld [vmem:[#allocation2 + $0x1bc0] sm:$0xf0]  ;;  %8525 = vmatpush.bf16.msrb.mxu0 %v14107_v43 }
 0x3cb   :  { %v15981_v45 = vld [vmem:[#allocation2 + $0x1304] sm:$0xf]  ;;  %v14619_v51 = vor.u32 %v16253_v40, %v14616_v41  ;;  %8493 = vmatpush.bf16.msra.mxu1 %v12123_v47  ;;  %8507 = vmatmul.bf16.vlgmr.msra.gmra.mxu2 %v17198_v56 }
 0x3cc   :  { %v13528_v48 = vld [vmem:[#allocation2 + $0x1340] sm:$0xf0]  ;;  %8551 = vmatpush.bf16.msrb.mxu2 %v15131_v46 }
 0x3cd   :  { %v16109_v49 = vld [vmem:[#allocation2 + $0x1704] sm:$0xf]  ;;  %v13531_v57 = vor.u32 %v15981_v45, %v13528_v48 }
 0x3ce   :  { %v14040_v50 = vld [vmem:[#allocation2 + $0x1740] sm:$0xf0]  ;;  %8494 = vmatmul.bf16.vlgmr.msra.gmra.mxu1 %v17202_v3 }
 0x3cf   :  { %v16365_v52 = vld [vmem:[#allocation2 + $0x1f04] sm:$0xf]  ;;  %v14043_v58 = vor.u32 %v16109_v49, %v14040_v50  ;;  %8538 = vmatpush.bf16.msrb.mxu1 %v14619_v51  ;;  %8513 = vmatpush.bf16.msra.mxu3 %v13531_v57 }
 0x3d0   :  { %v15064_v53 = vld [vmem:[#allocation2 + $0x1f40] sm:$0xf0] }
 0x3d1   :  { %v16237_v54 = vld [vmem:[#allocation2 + $0x1b04] sm:$0xf]  ;;  %v15067_v62 = vor.u32 %v16365_v52, %v15064_v53  ;;  %8526 = vmatpush.bf16.msrb.mxu0 %v14043_v58 }
 0x3d2   :  { %v14552_v34 = vld [vmem:[#allocation2 + $0x1b40] sm:$0xf0] }
 0x3d3   :  { %v15965_v61 = vld [vmem:[#allocation2 + $0x1284] sm:$0xf]  ;;  %v14555_v5 = vor.u32 %v16237_v54, %v14552_v34  ;;  %8552 = vmatpush.bf16.msrb.mxu2 %v15067_v62 }
 0x3d4   :  { %v13464_v63 = vld [vmem:[#allocation2 + $0x12c0] sm:$0xf0] }
 0x3d5   :  { %v16093_v1 = vld [vmem:[#allocation2 + $0x1684] sm:$0xf]  ;;  %v13467_v11 = vor.u32 %v15965_v61, %v13464_v63  ;;  %8539 = vmatpush.bf16.msrb.mxu1 %v14555_v5 }
 0x3d6   :  { %v13976_v4 = vld [vmem:[#allocation2 + $0x16c0] sm:$0xf0] }
 0x3d7   :  { %v16349_v6 = vld [vmem:[#allocation2 + $0x1e84] sm:$0xf]  ;;  %v13979_v13 = vor.u32 %v16093_v1, %v13976_v4  ;;  %8514 = vmatpush.bf16.msra.mxu3 %v13467_v11 }
 0x3d8   :  { %v15000_v8 = vld [vmem:[#allocation2 + $0x1ec0] sm:$0xf0] }
 0x3d9   :  { %v16221_v9 = vld [vmem:[#allocation2 + $0x1a84] sm:$0xf]  ;;  %v15003_v15 = vor.u32 %v16349_v6, %v15000_v8  ;;  %8527 = vmatpush.bf16.msrb.mxu0 %v13979_v13 }
 0x3da   :  { %v14488_v10 = vld [vmem:[#allocation2 + $0x1ac0] sm:$0xf0] }
 0x3db   :  { %v15949_v14 = vld [vmem:[#allocation2 + $0x1204] sm:$0xf]  ;;  %v14491_v18 = vor.u32 %v16221_v9, %v14488_v10  ;;  %8553 = vmatpush.bf16.msrb.mxu2 %v15003_v15  ;;  %v15494_v15 = vld [vmem:[#allocation2 + $0x3c4] sm:$0xf0] }
 0x3dc   :  { %v13400_v33 = vld [vmem:[#allocation2 + $0x1240] sm:$0xf0] }
 0x3dd   :  { %v16077_v60 = vld [vmem:[#allocation2 + $0x1604] sm:$0xf]  ;;  %v13403_v22 = vor.u32 %v15949_v14, %v13400_v33  ;;  %8540 = vmatpush.bf16.msrb.mxu1 %v14491_v18  ;;  %v11550_v14 = vld [vmem:[#allocation2 + $0x388] sm:$0xf] }
 0x3de   :  { %v13912_v17 = vld [vmem:[#allocation2 + $0x1640] sm:$0xf0]  ;;  %v12062_v33 = vld [vmem:[#allocation2 + $0x788] sm:$0xf] }
 0x3df   :  { %v16333_v35 = vld [vmem:[#allocation2 + $0x1e04] sm:$0xf]  ;;  %v13915_v26 = vor.u32 %v16077_v60, %v13912_v17  ;;  %8515 = vmatpush.bf16.msra.mxu3 %v13403_v22  ;;  %v15622_v60 = vld [vmem:[#allocation2 + $0x7c4] sm:$0xf0] }
 0x3e0   :  { %v14936_v19 = vld [vmem:[#allocation2 + $0x1e40] sm:$0xf0]  ;;  %v13086_v17 = vld [vmem:[#allocation2 + $0xf88] sm:$0xf] }
 0x3e1   :  { %v16205_v20 = vld [vmem:[#allocation2 + $0x1a04] sm:$0xf]  ;;  %v14939_v0 = vor.u32 %v16333_v35, %v14936_v19  ;;  %8528 = vmatpush.bf16.msrb.mxu0 %v13915_v26  ;;  %v15878_v18 = vld [vmem:[#allocation2 + $0xfc4] sm:$0xf0]  ;;  %v11551_v26 = vor.u32 %v15494_v15, %v11550_v14 }
 0x3e2   :  { %v14424_v21 = vld [vmem:[#allocation2 + $0x1a40] sm:$0xf0]  ;;  %v15558_v14 = vld [vmem:[#allocation2 + $0x5c4] sm:$0xf0] }
 0x3e3   :  { %v15933_v27 = vld [vmem:[#allocation2 + $0x1184] sm:$0xf]  ;;  %v14427_v24 = vor.u32 %v16205_v20, %v14424_v21  ;;  %8554 = vmatpush.bf16.msrb.mxu2 %v14939_v0  ;;  %v15750_v0 = vld [vmem:[#allocation2 + $0xbc4] sm:$0xf0] }
 0x3e4   :  { %v13336_v28 = vld [vmem:[#allocation2 + $0x11c0] sm:$0xf0]  ;;  %v12830_v15 = vld [vmem:[#allocation2 + $0xd88] sm:$0xf] }
 0x3e5   :  { %v16061_v29 = vld [vmem:[#allocation2 + $0x1584] sm:$0xf]  ;;  %v13339_v36 = vor.u32 %v15933_v27, %v13336_v28  ;;  %8541 = vmatpush.bf16.msrb.mxu1 %v14427_v24  ;;  %v12574_v27 = vld [vmem:[#allocation2 + $0xb88] sm:$0xf]  ;;  %v12063_v28 = vor.u32 %v15622_v60, %v12062_v33 }
 0x3e6   :  { %v13848_v59 = vld [vmem:[#allocation2 + $0x15c0] sm:$0xf0]  ;;  %v15478_v24 = vld [vmem:[#allocation2 + $0x344] sm:$0xf0] }
 0x3e7   :  { %v16317_v30 = vld [vmem:[#allocation2 + $0x1d84] sm:$0xf]  ;;  %v13851_v37 = vor.u32 %v16061_v29, %v13848_v59  ;;  %8516 = vmatpush.bf16.msra.mxu3 %v13339_v36  ;;  %v13087_v29 = vor.u32 %v15878_v18, %v13086_v17  ;;  %v11486_v59 = vld [vmem:[#allocation2 + $0x308] sm:$0xf] }
 0x3e8   :  { %v14872_v25 = vld [vmem:[#allocation2 + $0x1dc0] sm:$0xf0]  ;;  %v15862_v36 = vld [vmem:[#allocation2 + $0xf44] sm:$0xf0] }
 0x3e9   :  { %v16189_v31 = vld [vmem:[#allocation2 + $0x1984] sm:$0xf]  ;;  %v14875_v39 = vor.u32 %v16317_v30, %v14872_v25  ;;  %8529 = vmatpush.bf16.msrb.mxu0 %v13851_v37  ;;  %v11998_v30 = vld [vmem:[#allocation2 + $0x708] sm:$0xf]  ;;  %v12575_v37 = vor.u32 %v15750_v0, %v12574_v27 }
 0x3ea   :  { %v14360_v32 = vld [vmem:[#allocation2 + $0x19c0] sm:$0xf0]  ;;  %v15814_v33 = vld [vmem:[#allocation2 + $0xdc4] sm:$0xf0] }
 0x3eb   :  { %v15917_v38 = vld [vmem:[#allocation2 + $0x1104] sm:$0xf]  ;;  %v14363_v42 = vor.u32 %v16189_v31, %v14360_v32  ;;  %8555 = vmatpush.bf16.msrb.mxu2 %v14875_v39  ;;  %v15606_v31 = vld [vmem:[#allocation2 + $0x744] sm:$0xf0] }
 0x3ec   :  { %v13272_v44 = vld [vmem:[#allocation2 + $0x1140] sm:$0xf0]  ;;  %v13022_v32 = vld [vmem:[#allocation2 + $0xf08] sm:$0xf] }
 0x3ed   :  { %v16045_v40 = vld [vmem:[#allocation2 + $0x1504] sm:$0xf]  ;;  %v13275_v48 = vor.u32 %v15917_v38, %v13272_v44  ;;  %8542 = vmatpush.bf16.msrb.mxu1 %v14363_v42  ;;  %v11487_v38 = vor.u32 %v15478_v24, %v11486_v59  ;;  %v12510_v39 = vld [vmem:[#allocation2 + $0xb08] sm:$0xf] }
 0x3ee   :  { %v13784_v41 = vld [vmem:[#allocation2 + $0x1540] sm:$0xf0]  ;;  %v15734_v44 = vld [vmem:[#allocation2 + $0xb44] sm:$0xf0] }
 0x3ef   :  { %v16301_v43 = vld [vmem:[#allocation2 + $0x1d04] sm:$0xf]  ;;  %v13787_v49 = vor.u32 %v16045_v40, %v13784_v41  ;;  %8517 = vmatpush.bf16.msra.mxu3 %v13275_v48  ;;  %v11999_v40 = vor.u32 %v15606_v31, %v11998_v30  ;;  %v13023_v41 = vor.u32 %v15862_v36, %v13022_v32  ;;  %v11422_v42 = vld [vmem:[#allocation2 + $0x288] sm:$0xf] }
 0x3f0   :  { %v14808_v45 = vld [vmem:[#allocation2 + $0x1d40] sm:$0xf0]  ;;  %v15846_v48 = vld [vmem:[#allocation2 + $0xec4] sm:$0xf0] }
 0x3f1   :  { %v16173_v46 = vld [vmem:[#allocation2 + $0x1904] sm:$0xf]  ;;  %v14811_v51 = vor.u32 %v16301_v43, %v14808_v45  ;;  %8530 = vmatpush.bf16.msrb.mxu0 %v13787_v49  ;;  %v15462_v43 = vld [vmem:[#allocation2 + $0x2c4] sm:$0xf0]  ;;  %v12511_v49 = vor.u32 %v15734_v44, %v12510_v39 }
 0x3f2   :  { %v14296_v47 = vld [vmem:[#allocation2 + $0x1940] sm:$0xf0]  ;;  %v11934_v45 = vld [vmem:[#allocation2 + $0x688] sm:$0xf] }
 0x3f3   :  { %v15901_v50 = vld [vmem:[#allocation2 + $0x1084] sm:$0xf]  ;;  %v14299_v34 = vor.u32 %v16173_v46, %v14296_v47  ;;  %8556 = vmatpush.bf16.msrb.mxu2 %v14811_v51  ;;  %v15590_v46 = vld [vmem:[#allocation2 + $0x6c4] sm:$0xf0] }
 0x3f4   :  { %v13208_v52 = vld [vmem:[#allocation2 + $0x10c0] sm:$0xf0]  ;;  %v12958_v47 = vld [vmem:[#allocation2 + $0xe88] sm:$0xf] }
 0x3f5   :  { %v16029_v53 = vld [vmem:[#allocation2 + $0x1484] sm:$0xf]  ;;  %v13211_v63 = vor.u32 %v15901_v50, %v13208_v52  ;;  %8543 = vmatpush.bf16.msrb.mxu1 %v14299_v34  ;;  %v11423_v50 = vor.u32 %v15462_v43, %v11422_v42  ;;  %v12446_v51 = vld [vmem:[#allocation2 + $0xa88] sm:$0xf] }
 0x3f6   :  { %v13720_v54 = vld [vmem:[#allocation2 + $0x14c0] sm:$0xf0]  ;;  %v15718_v52 = vld [vmem:[#allocation2 + $0xac4] sm:$0xf0] }
 0x3f7   :  { %v16285_v57 = vld [vmem:[#allocation2 + $0x1c84] sm:$0xf]  ;;  %v13723_v1 = vor.u32 %v16029_v53, %v13720_v54  ;;  %8518 = vmatpush.bf16.msra.mxu3 %v13211_v63  ;;  %v11935_v53 = vor.u32 %v15590_v46, %v11934_v45  ;;  %v12959_v54 = vor.u32 %v15846_v48, %v12958_v47  ;;  %v11358_v34 = vld [vmem:[#allocation2 + $0x208] sm:$0xf] }
 0x3f8   :  { %v14744_v58 = vld [vmem:[#allocation2 + $0x1cc0] sm:$0xf0]  ;;  %v15830_v63 = vld [vmem:[#allocation2 + $0xe44] sm:$0xf0] }
 0x3f9   :  { %v16157_v61 = vld [vmem:[#allocation2 + $0x1884] sm:$0xf]  ;;  %v14747_v8 = vor.u32 %v16285_v57, %v14744_v58  ;;  %8531 = vmatpush.bf16.msrb.mxu0 %v13723_v1  ;;  %v15446_v57 = vld [vmem:[#allocation2 + $0x244] sm:$0xf0]  ;;  %v12447_v1 = vor.u32 %v15718_v52, %v12446_v51 }
 0x3fa   :  { %v14232_v62 = vld [vmem:[#allocation2 + $0x18c0] sm:$0xf0]  ;;  %v11870_v58 = vld [vmem:[#allocation2 + $0x608] sm:$0xf] }
 0x3fb   :  { %v15885_v4 = vld [vmem:[#allocation2 + $0x1004] sm:$0xf]  ;;  %v14235_v13 = vor.u32 %v16157_v61, %v14232_v62  ;;  %8557 = vmatpush.bf16.msrb.mxu2 %v14747_v8  ;;  %v15574_v61 = vld [vmem:[#allocation2 + $0x644] sm:$0xf0] }
 0x3fc   :  { %v13144_v5 = vld [vmem:[#allocation2 + $0x1040] sm:$0xf0]  ;;  %v12894_v62 = vld [vmem:[#allocation2 + $0xe08] sm:$0xf]  ;;  %v11871_v8 = vor.u32 %v15574_v61, %v11870_v58 }
 0x3fd   :  { %v16013_v6 = vld [vmem:[#allocation2 + $0x1404] sm:$0xf]  ;;  %v13147_v35 = vor.u32 %v15885_v4, %v13144_v5  ;;  %8544 = vmatpush.bf16.msrb.mxu1 %v14235_v13  ;;  %v11359_v4 = vor.u32 %v15446_v57, %v11358_v34  ;;  %v12382_v5 = vld [vmem:[#allocation2 + $0xa08] sm:$0xf] }
 0x3fe   :  { %v13656_v9 = vld [vmem:[#allocation2 + $0x1440] sm:$0xf0]  ;;  %v11806_v13 = vld [vmem:[#allocation2 + $0x588] sm:$0xf] }
 0x3ff   :  { %v16269_v10 = vld [vmem:[#allocation2 + $0x1c04] sm:$0xf]  ;;  %v13659_v19 = vor.u32 %v16013_v6, %v13656_v9  ;;  %8519 = vmatpush.bf16.msra.mxu3 %v13147_v35  ;;  %v15702_v6 = vld [vmem:[#allocation2 + $0xa44] sm:$0xf0]  ;;  %v12895_v9 = vor.u32 %v15830_v63, %v12894_v62 }
 0x400   :  { %v14680_v11 = vld [vmem:[#allocation2 + $0x1c40] sm:$0xf0]  ;;  %v12383_v60 = vor.u32 %v15702_v6, %v12382_v5  ;;  %v12318_v18 = vld [vmem:[#allocation2 + $0x988] sm:$0xf] }
 0x401   :  { %v16141_v20 = vld [vmem:[#allocation2 + $0x1804] sm:$0xf]  ;;  %v14683_v22 = vor.u32 %v16269_v10, %v14680_v11  ;;  %8532 = vmatpush.bf16.msrb.mxu0 %v13659_v19  ;;  %v11294_v10 = vld [vmem:[#allocation2 + $0x188] sm:$0xf]  ;;  %v11807_v19 = vor.u32 %v15558_v14, %v11806_v13 }
 0x402   :  { %v14168_v21 = vld [vmem:[#allocation2 + $0x1840] sm:$0xf0]  ;;  %8520 = vmatmul.bf16.vlgmr.msra.gmra.mxu3 %v17208_v7  ;;  %v15430_v11 = vld [vmem:[#allocation2 + $0x1c4] sm:$0xf0] }
 0x403   :  { %v14171_v25 = vor.u32 %v16141_v20, %v14168_v21  ;;  %8558 = vmatpush.bf16.msrb.mxu2 %v14683_v22  ;;  %8564 = vmatpush.bf16.msrb.mxu3 %v11551_v26  ;;  %v11295_v17 = vor.u32 %v15430_v11, %v11294_v10  ;;  %v15686_v35 = vld [vmem:[#allocation2 + $0x9c4] sm:$0xf0]  ;;  %v12831_v20 = vor.u32 %v15814_v33, %v12830_v15 }
 0x404   :  { %8533 = vmatmul.bf16.vlgmr.msrb.gmra.mxu0 %v17212_v16  ;;  %v11230_v21 = vld [vmem:[#allocation2 + $0x108] sm:$0xf] }
 0x405   :  { %8577 = vmatpush.bf16.msra.mxu0 %v12063_v28  ;;  %8545 = vmatpush.bf16.msrb.mxu1 %v14171_v25  ;;  %v15414_v22 = vld [vmem:[#allocation2 + $0x144] sm:$0xf0] }
 0x406   :  { %8559 = vmatmul.bf16.vlgmr.msrb.gmra.mxu2 %v17210_v12  ;;  %v11742_v26 = vld [vmem:[#allocation2 + $0x508] sm:$0xf]  ;;  %v11231_v59 = vor.u32 %v15414_v22, %v11230_v21 }
 0x407   :  { %8603 = vmatpush.bf16.msra.mxu2 %v13087_v29  ;;  %8565 = vmatpush.bf16.msrb.mxu3 %v11487_v38  ;;  %v15542_v27 = vld [vmem:[#allocation2 + $0x544] sm:$0xf0]  ;;  %v12319_v29 = vor.u32 %v15686_v35, %v12318_v18 }
 0x408   :  { %8546 = vmatmul.bf16.vlgmr.msrb.gmra.mxu1 %v17215_v23  ;;  %v12766_v0 = vld [vmem:[#allocation2 + $0xd08] sm:$0xf]  ;;  %v11743_v25 = vor.u32 %v15542_v27, %v11742_v26 }
 0x409   :  { %8590 = vmatpush.bf16.msra.mxu1 %v12575_v37  ;;  %8578 = vmatpush.bf16.msra.mxu0 %v11999_v40  ;;  %v15798_v28 = vld [vmem:[#allocation2 + $0xd44] sm:$0xf0] }
 0x40a   :  { %v12254_v24 = vld [vmem:[#allocation2 + $0x908] sm:$0xf]  ;;  %v12767_v31 = vor.u32 %v15798_v28, %v12766_v0 }
 0x40b   :  { %8604 = vmatpush.bf16.msra.mxu2 %v13023_v41  ;;  %8566 = vmatpush.bf16.msrb.mxu3 %v11423_v50  ;;  %v15670_v30 = vld [vmem:[#allocation2 + $0x944] sm:$0xf0] }
 0x40c   :  { %v11166_v32 = vld [vmem:[#allocation2 + $0x88] sm:$0xf]  ;;  %v12255_v40 = vor.u32 %v15670_v30, %v12254_v24 }
 0x40d   :  { %8591 = vmatpush.bf16.msra.mxu1 %v12511_v49  ;;  %8579 = vmatpush.bf16.msra.mxu0 %v11935_v53  ;;  %v15398_v36 = vld [vmem:[#allocation2 + $0xc4] sm:$0xf0] }
 0x40e   :  { %v11678_v37 = vld [vmem:[#allocation2 + $0x488] sm:$0xf]  ;;  %v11167_v42 = vor.u32 %v15398_v36, %v11166_v32 }
 0x40f   :  { %8605 = vmatpush.bf16.msra.mxu2 %v12959_v54  ;;  %8567 = vmatpush.bf16.msrb.mxu3 %v11359_v4  ;;  %v15526_v38 = vld [vmem:[#allocation2 + $0x4c4] sm:$0xf0] }
 0x410   :  { %v12702_v39 = vld [vmem:[#allocation2 + $0xc88] sm:$0xf]  ;;  %v11679_v47 = vor.u32 %v15526_v38, %v11678_v37 }
 0x411   :  { %8592 = vmatpush.bf16.msra.mxu1 %v12447_v1  ;;  %8580 = vmatpush.bf16.msra.mxu0 %v11871_v8  ;;  %v15782_v44 = vld [vmem:[#allocation2 + $0xcc4] sm:$0xf0] }
 0x412   :  { %v12190_v41 = vld [vmem:[#allocation2 + $0x888] sm:$0xf]  ;;  %v12703_v48 = vor.u32 %v15782_v44, %v12702_v39 }
 0x413   :  { %8606 = vmatpush.bf16.msra.mxu2 %v12895_v9  ;;  %8568 = vmatpush.bf16.msrb.mxu3 %v11295_v17  ;;  %v15654_v43 = vld [vmem:[#allocation2 + $0x8c4] sm:$0xf0] }
 0x414   :  { %v11102_v45 = vld [vmem:[#allocation2 + $0x8] sm:$0xf]  ;;  %v12191_v34 = vor.u32 %v15654_v43, %v12190_v41 }
 0x415   :  { %8593 = vmatpush.bf16.msra.mxu1 %v12383_v60  ;;  %8581 = vmatpush.bf16.msra.mxu0 %v11807_v19  ;;  %v15382_v46 = vld [vmem:[#allocation2 + $0x44] sm:$0xf0] }
 0x416   :  { %v11614_v49 = vld [vmem:[#allocation2 + $0x408] sm:$0xf]  ;;  %v11103_v62 = vor.u32 %v15382_v46, %v11102_v45 }
 0x417   :  { %8607 = vmatpush.bf16.msra.mxu2 %v12831_v20  ;;  %8569 = vmatpush.bf16.msrb.mxu3 %v11231_v59  ;;  %v15510_v50 = vld [vmem:[#allocation2 + $0x444] sm:$0xf0] }
 0x418   :  { %v12638_v51 = vld [vmem:[#allocation2 + $0xc08] sm:$0xf]  ;;  %v11615_v5 = vor.u32 %v15510_v50, %v11614_v49 }
 0x419   :  { %8594 = vmatpush.bf16.msra.mxu1 %v12319_v29  ;;  %8582 = vmatpush.bf16.msra.mxu0 %v11743_v25  ;;  %v15766_v52 = vld [vmem:[#allocation2 + $0xc44] sm:$0xf0] }
 0x41a   :  { %v13598_v53 = vld [vmem:[#allocation2 + $0x1388] sm:$0xf]  ;;  %v12639_v6 = vor.u32 %v15766_v52, %v12638_v51 }
 0x41b   :  { %8608 = vmatpush.bf16.msra.mxu2 %v12767_v31  ;;  %v16006_v54 = vld [vmem:[#allocation2 + $0x13c4] sm:$0xf0]  ;;  %8570 = vmatpush.bf16.msrb.mxu3 %v11167_v42 }
 0x41c   :  { %v14110_v57 = vld [vmem:[#allocation2 + $0x1788] sm:$0xf]  ;;  %v13599_v10 = vor.u32 %v16006_v54, %v13598_v53 }
 0x41d   :  { %8595 = vmatpush.bf16.msra.mxu1 %v12255_v40  ;;  %v16134_v58 = vld [vmem:[#allocation2 + $0x17c4] sm:$0xf0]  ;;  %8583 = vmatpush.bf16.msra.mxu0 %v11679_v47 }
 0x41e   :  { %v15134_v61 = vld [vmem:[#allocation2 + $0x1f88] sm:$0xf]  ;;  %v14111_v11 = vor.u32 %v16134_v58, %v14110_v57 }
 0x41f   :  { %v16390_v63 = vld [vmem:[#allocation2 + $0x1fc4] sm:$0xf0]  ;;  %8609 = vmatpush.bf16.msra.mxu2 %v12703_v48  ;;  %8571 = vmatpush.bf16.msrb.mxu3 %v11103_v62 }
 0x420   :  { %v12126_v1 = vld [vmem:[#allocation2 + $0x808] sm:$0xf]  ;;  %v15135_v14 = vor.u32 %v16390_v63, %v15134_v61 }
 0x421   :  { %v15638_v4 = vld [vmem:[#allocation2 + $0x844] sm:$0xf0]  ;;  %8596 = vmatpush.bf16.msra.mxu1 %v12191_v34  ;;  %8584 = vmatpush.bf16.msra.mxu0 %v11615_v5 }
 0x422   :  { %v14622_v8 = vld [vmem:[#allocation2 + $0x1b88] sm:$0xf]  ;;  %v12127_v15 = vor.u32 %v15638_v4, %v12126_v1  ;;  %8572 = vmatmul.bf16.vlgmr.msrb.gmra.mxu3 %v17196_v55 }
 0x423   :  { %v16262_v9 = vld [vmem:[#allocation2 + $0x1bc4] sm:$0xf0]  ;;  %8610 = vmatpush.bf16.msra.mxu2 %v12639_v6  ;;  %8616 = vmatpush.bf16.msra.mxu3 %v13599_v10 }
 0x424   :  { %v13534_v13 = vld [vmem:[#allocation2 + $0x1308] sm:$0xf]  ;;  %v14623_v18 = vor.u32 %v16262_v9, %v14622_v8  ;;  %8585 = vmatmul.bf16.vlgmr.msra.gmra.mxu0 %v17200_v2 }
 0x425   :  { %v15990_v33 = vld [vmem:[#allocation2 + $0x1344] sm:$0xf0]  ;;  %8629 = vmatpush.bf16.msrb.mxu0 %v14111_v11  ;;  %8597 = vmatpush.bf16.msra.mxu1 %v12127_v15 }
 0x426   :  { %v14046_v60 = vld [vmem:[#allocation2 + $0x1708] sm:$0xf]  ;;  %v13535_v22 = vor.u32 %v15990_v33, %v13534_v13  ;;  %8611 = vmatmul.bf16.vlgmr.msra.gmra.mxu2 %v17198_v56 }
 0x427   :  { %v16118_v17 = vld [vmem:[#allocation2 + $0x1744] sm:$0xf0]  ;;  %8655 = vmatpush.bf16.msrb.mxu2 %v15135_v14 }
 0x428   :  { %v15070_v35 = vld [vmem:[#allocation2 + $0x1f08] sm:$0xf]  ;;  %v14047_v26 = vor.u32 %v16118_v17, %v14046_v60  ;;  %8617 = vmatpush.bf16.msra.mxu3 %v13535_v22  ;;  %8598 = vmatmul.bf16.vlgmr.msra.gmra.mxu1 %v17202_v3 }
 0x429   :  { %v16374_v19 = vld [vmem:[#allocation2 + $0x1f44] sm:$0xf0]  ;;  %8642 = vmatpush.bf16.msrb.mxu1 %v14623_v18 }
 0x42a   :  { %v14558_v20 = vld [vmem:[#allocation2 + $0x1b08] sm:$0xf]  ;;  %v15071_v0 = vor.u32 %v16374_v19, %v15070_v35  ;;  %8630 = vmatpush.bf16.msrb.mxu0 %v14047_v26 }
 0x42b   :  { %v16246_v21 = vld [vmem:[#allocation2 + $0x1b44] sm:$0xf0] }
 0x42c   :  { %v13470_v27 = vld [vmem:[#allocation2 + $0x1288] sm:$0xf]  ;;  %v14559_v24 = vor.u32 %v16246_v21, %v14558_v20  ;;  %8656 = vmatpush.bf16.msrb.mxu2 %v15071_v0  ;;  %v17232_v21 = vld [vmem:[#allocation30] sm:$0xff]  ;;  %v8378_v0 = vpop.f32.mrf.mxu0 }
 0x42d   :  { %v15974_v28 = vld [vmem:[#allocation2 + $0x12c4] sm:$0xf0] }
 0x42e   :  { %v13982_v29 = vld [vmem:[#allocation2 + $0x1688] sm:$0xf]  ;;  %v13471_v36 = vor.u32 %v15974_v28, %v13470_v27  ;;  %8643 = vmatpush.bf16.msrb.mxu1 %v14559_v24 }
 0x42f   :  { %v16102_v59 = vld [vmem:[#allocation2 + $0x16c4] sm:$0xf0] }
 0x430   :  { %v15006_v30 = vld [vmem:[#allocation2 + $0x1e88] sm:$0xf]  ;;  %v13983_v37 = vor.u32 %v16102_v59, %v13982_v29  ;;  %8618 = vmatpush.bf16.msra.mxu3 %v13471_v36  ;;  %v8391_v36 = vpop.f32.mrf.mxu1 }
 0x431   :  { %v16358_v25 = vld [vmem:[#allocation2 + $0x1ec4] sm:$0xf0] }
 0x432   :  { %v14494_v31 = vld [vmem:[#allocation2 + $0x1a88] sm:$0xf]  ;;  %v15007_v39 = vor.u32 %v16358_v25, %v15006_v30  ;;  %8631 = vmatpush.bf16.msrb.mxu0 %v13983_v37 }
 0x433   :  { %v16230_v32 = vld [vmem:[#allocation2 + $0x1ac4] sm:$0xf0] }
 0x434   :  { %v13406_v38 = vld [vmem:[#allocation2 + $0x1208] sm:$0xf]  ;;  %v14495_v42 = vor.u32 %v16230_v32, %v14494_v31  ;;  %8657 = vmatpush.bf16.msrb.mxu2 %v15007_v39  ;;  %v3204_v32 = vperm.slane %v17232_v21, 0 }
 0x435   :  { %v15958_v44 = vld [vmem:[#allocation2 + $0x1244] sm:$0xf0] }
 0x436   :  { %v13918_v40 = vld [vmem:[#allocation2 + $0x1608] sm:$0xf]  ;;  %v13407_v48 = vor.u32 %v15958_v44, %v13406_v38  ;;  %8644 = vmatpush.bf16.msrb.mxu1 %v14495_v42  ;;  %v11552_v42 = vld [vmem:[#allocation2 + $0x3c8] sm:$0xf0] }
 0x437   :  { %v16086_v41 = vld [vmem:[#allocation2 + $0x1644] sm:$0xf0] }
 0x438   :  { %v14942_v43 = vld [vmem:[#allocation2 + $0x1e08] sm:$0xf]  ;;  %v13919_v49 = vor.u32 %v16086_v41, %v13918_v40  ;;  %8619 = vmatpush.bf16.msra.mxu3 %v13407_v48  ;;  %v15486_v41 = vld [vmem:[#allocation2 + $0x38c] sm:$0xf]  ;;  %v8365_v48 = vpop.f32.mrf.mxu3 }
 0x439   :  { %v16342_v45 = vld [vmem:[#allocation2 + $0x1e44] sm:$0xf0] }
 0x43a   :  { %v14430_v46 = vld [vmem:[#allocation2 + $0x1a08] sm:$0xf]  ;;  %v14943_v51 = vor.u32 %v16342_v45, %v14942_v43  ;;  %8632 = vmatpush.bf16.msrb.mxu0 %v13919_v49  ;;  %v15614_v43 = vld [vmem:[#allocation2 + $0x78c] sm:$0xf] }
 0x43b   :  { %v16214_v47 = vld [vmem:[#allocation2 + $0x1a44] sm:$0xf0]  ;;  %v12064_v45 = vld [vmem:[#allocation2 + $0x7c8] sm:$0xf0] }
 0x43c   :  { %v13342_v50 = vld [vmem:[#allocation2 + $0x1188] sm:$0xf]  ;;  %v14431_v34 = vor.u32 %v16214_v47, %v14430_v46  ;;  %8658 = vmatpush.bf16.msrb.mxu2 %v14943_v51  ;;  %v15870_v46 = vld [vmem:[#allocation2 + $0xf8c] sm:$0xf]  ;;  %v8366_v51 = vadd.f32 %v8365_v48, %v3204_v32 }
 0x43d   :  { %v15942_v52 = vld [vmem:[#allocation2 + $0x11c4] sm:$0xf0]  ;;  %v13088_v47 = vld [vmem:[#allocation2 + $0xfc8] sm:$0xf0] }
 0x43e   :  { %v13854_v53 = vld [vmem:[#allocation2 + $0x1588] sm:$0xf]  ;;  %v13343_v63 = vor.u32 %v15942_v52, %v13342_v50  ;;  %8645 = vmatpush.bf16.msrb.mxu1 %v14431_v34  ;;  %v12448_v32 = vld [vmem:[#allocation2 + $0xac8] sm:$0xf0] }
 0x43f   :  { %v16070_v54 = vld [vmem:[#allocation2 + $0x15c4] sm:$0xf0] }
 0x440   :  { %v14878_v57 = vld [vmem:[#allocation2 + $0x1d88] sm:$0xf]  ;;  %v13855_v1 = vor.u32 %v16070_v54, %v13854_v53  ;;  %8620 = vmatpush.bf16.msra.mxu3 %v13343_v63  ;;  %v8404_v54 = vpop.f32.mrf.mxu2  ;;  %v13091_v63 = vor.u32 %v15870_v46, %v13088_v47  ;;  %v15694_v46 = vld [vmem:[#allocation2 + $0xa0c] sm:$0xf] }
 0x441   :  { %v16326_v58 = vld [vmem:[#allocation2 + $0x1dc4] sm:$0xf0]  ;;  %v12384_v47 = vld [vmem:[#allocation2 + $0xa48] sm:$0xf0] }
 0x442   :  { %v14366_v61 = vld [vmem:[#allocation2 + $0x1988] sm:$0xf]  ;;  %v14879_v5 = vor.u32 %v16326_v58, %v14878_v57  ;;  %8633 = vmatpush.bf16.msrb.mxu0 %v13855_v1  ;;  %v11555_v57 = vor.u32 %v15486_v41, %v11552_v42  ;;  %v15742_v58 = vld [vmem:[#allocation2 + $0xb8c] sm:$0xf]  ;;  %v8379_v1 = vadd.f32 %v8378_v0, %v8366_v51 }
 0x443   :  { %v16198_v62 = vld [vmem:[#allocation2 + $0x19c4] sm:$0xf0]  ;;  %v11936_v0 = vld [vmem:[#allocation2 + $0x6c8] sm:$0xf0] }
 0x444   :  { %v13278_v4 = vld [vmem:[#allocation2 + $0x1108] sm:$0xf]  ;;  %v14367_v10 = vor.u32 %v16198_v62, %v14366_v61  ;;  %8659 = vmatpush.bf16.msrb.mxu2 %v14879_v5  ;;  %v12576_v61 = vld [vmem:[#allocation2 + $0xbc8] sm:$0xf0]  ;;  %v12067_v62 = vor.u32 %v15614_v43, %v12064_v45 }
 0x445   :  { %v15926_v6 = vld [vmem:[#allocation2 + $0x1144] sm:$0xf0]  ;;  %v11488_v5 = vld [vmem:[#allocation2 + $0x348] sm:$0xf0] }
 0x446   :  { %v13790_v8 = vld [vmem:[#allocation2 + $0x1508] sm:$0xf]  ;;  %v13279_v33 = vor.u32 %v15926_v6, %v13278_v4  ;;  %8646 = vmatpush.bf16.msrb.mxu1 %v14367_v10  ;;  %v15470_v4 = vld [vmem:[#allocation2 + $0x30c] sm:$0xf] }
 0x447   :  { %v16054_v9 = vld [vmem:[#allocation2 + $0x1544] sm:$0xf0]  ;;  %v15598_v6 = vld [vmem:[#allocation2 + $0x70c] sm:$0xf] }
 0x448   :  { %v14814_v11 = vld [vmem:[#allocation2 + $0x1d08] sm:$0xf]  ;;  %v13791_v60 = vor.u32 %v16054_v9, %v13790_v8  ;;  %8621 = vmatpush.bf16.msra.mxu3 %v13279_v33  ;;  %v8380_v8 = vpop.f32.mrf.mxu0  ;;  %v12000_v10 = vld [vmem:[#allocation2 + $0x748] sm:$0xf0]  ;;  %v8393_v33 = vpop.f32.mrf.mxu1 }
 0x449   :  { %v16310_v13 = vld [vmem:[#allocation2 + $0x1d44] sm:$0xf0]  ;;  %v15822_v41 = vld [vmem:[#allocation2 + $0xe0c] sm:$0xf] }
 0x44a   :  { %v14302_v14 = vld [vmem:[#allocation2 + $0x1908] sm:$0xf]  ;;  %v14815_v35 = vor.u32 %v16310_v13, %v14814_v11  ;;  %8634 = vmatpush.bf16.msrb.mxu0 %v13791_v60  ;;  %v15854_v11 = vld [vmem:[#allocation2 + $0xf0c] sm:$0xf]  ;;  %v11491_v60 = vor.u32 %v15470_v4, %v11488_v5 }
 0x44b   :  { %v16182_v15 = vld [vmem:[#allocation2 + $0x1944] sm:$0xf0]  ;;  %v13024_v13 = vld [vmem:[#allocation2 + $0xf48] sm:$0xf0] }
 0x44c   :  { %v13214_v17 = vld [vmem:[#allocation2 + $0x1088] sm:$0xf]  ;;  %v14303_v22 = vor.u32 %v16182_v15, %v14302_v14  ;;  %8660 = vmatpush.bf16.msrb.mxu2 %v14815_v35  ;;  %v12579_v14 = vor.u32 %v15742_v58, %v12576_v61  ;;  %v8392_v15 = vadd.f32 %v8391_v36, %v8379_v1  ;;  %v12003_v35 = vor.u32 %v15598_v6, %v12000_v10  ;;  %v12896_v42 = vld [vmem:[#allocation2 + $0xe48] sm:$0xf0] }
 0x44d   :  { %v15910_v18 = vld [vmem:[#allocation2 + $0x10c4] sm:$0xf0]  ;;  %v11296_v51 = vld [vmem:[#allocation2 + $0x1c8] sm:$0xf0] }
 0x44e   :  { %v13726_v19 = vld [vmem:[#allocation2 + $0x1488] sm:$0xf]  ;;  %v13215_v24 = vor.u32 %v15910_v18, %v13214_v17  ;;  %8647 = vmatpush.bf16.msrb.mxu1 %v14303_v22  ;;  %v15726_v17 = vld [vmem:[#allocation2 + $0xb0c] sm:$0xf] }
 0x44f   :  { %v16038_v20 = vld [vmem:[#allocation2 + $0x14c4] sm:$0xf0]  ;;  %v12512_v18 = vld [vmem:[#allocation2 + $0xb48] sm:$0xf0] }
 0x450   :  { %v14750_v26 = vld [vmem:[#allocation2 + $0x1c88] sm:$0xf]  ;;  %v13727_v30 = vor.u32 %v16038_v20, %v13726_v19  ;;  %8622 = vmatpush.bf16.msra.mxu3 %v13215_v24  ;;  %v13027_v19 = vor.u32 %v15854_v11, %v13024_v13  ;;  %v17235_v20 = vadd.f32 %v8404_v54, %v8392_v15  ;;  %v15454_v22 = vld [vmem:[#allocation2 + $0x28c] sm:$0xf]  ;;  %v12515_v24 = vor.u32 %v15726_v17, %v12512_v18  ;;  %v8430_v58 = vpop.f32.mrf.mxu0 }
 0x451   :  { %v16294_v27 = vld [vmem:[#allocation2 + $0x1cc4] sm:$0xf0]  ;;  %v15806_v54 = vld [vmem:[#allocation2 + $0xd8c] sm:$0xf] }
 0x452   :  { %v14238_v28 = vld [vmem:[#allocation2 + $0x1888] sm:$0xf]  ;;  %v14751_v37 = vor.u32 %v16294_v27, %v14750_v26  ;;  %8635 = vmatpush.bf16.msrb.mxu0 %v13727_v30  ;;  %v11424_v26 = vld [vmem:[#allocation2 + $0x2c8] sm:$0xf0]  ;;  %v8406_v30 = vpop.f32.mrf.mxu2 }
 0x453   :  { %v16166_v29 = vld [vmem:[#allocation2 + $0x18c4] sm:$0xf0]  ;;  %v15582_v27 = vld [vmem:[#allocation2 + $0x68c] sm:$0xf] }
 0x454   :  { %v13150_v59 = vld [vmem:[#allocation2 + $0x1008] sm:$0xf]  ;;  %v14239_v40 = vor.u32 %v16166_v29, %v14238_v28  ;;  %8661 = vmatpush.bf16.msrb.mxu2 %v14751_v37  ;;  %v15838_v28 = vld [vmem:[#allocation2 + $0xe8c] sm:$0xf]  ;;  %v11939_v36 = vor.u32 %v15582_v27, %v11936_v0 }
 0x455   :  { %v15894_v25 = vld [vmem:[#allocation2 + $0x1044] sm:$0xf0]  ;;  %v12960_v29 = vld [vmem:[#allocation2 + $0xec8] sm:$0xf0] }
 0x456   :  { %v13662_v31 = vld [vmem:[#allocation2 + $0x1408] sm:$0xf]  ;;  %v13151_v49 = vor.u32 %v15894_v25, %v13150_v59  ;;  %8648 = vmatpush.bf16.msrb.mxu1 %v14239_v40  ;;  %v8367_v59 = vpop.f32.mrf.mxu3  ;;  %v11427_v25 = vor.u32 %v15454_v22, %v11424_v26  ;;  %v12963_v37 = vor.u32 %v15838_v28, %v12960_v29  ;;  %v11872_v40 = vld [vmem:[#allocation2 + $0x648] sm:$0xf0] }
 0x457   :  { %v16022_v38 = vld [vmem:[#allocation2 + $0x1444] sm:$0xf0]  ;;  %v15406_v5 = vld [vmem:[#allocation2 + $0x10c] sm:$0xf] }
 0x458   :  { %v14686_v39 = vld [vmem:[#allocation2 + $0x1c08] sm:$0xf]  ;;  %v13663_v50 = vor.u32 %v16022_v38, %v13662_v31  ;;  %8623 = vmatpush.bf16.msra.mxu3 %v13151_v49  ;;  %v15710_v31 = vld [vmem:[#allocation2 + $0xa8c] sm:$0xf]  ;;  %v12899_v49 = vor.u32 %v15822_v41, %v12896_v42 }
 0x459   :  { %v16278_v44 = vld [vmem:[#allocation2 + $0x1c44] sm:$0xf0]  ;;  %v15438_v38 = vld [vmem:[#allocation2 + $0x20c] sm:$0xf]  ;;  %v12451_v43 = vor.u32 %v15710_v31, %v12448_v32  ;;  %v8432_v31 = vpop.f32.mrf.mxu0 }
 0x45a   :  { %v14174_v52 = vld [vmem:[#allocation2 + $0x1808] sm:$0xf]  ;;  %v14687_v34 = vor.u32 %v16278_v44, %v14686_v39  ;;  %8636 = vmatpush.bf16.msrb.mxu0 %v13663_v50  ;;  %v11360_v39 = vld [vmem:[#allocation2 + $0x248] sm:$0xf0] }
 0x45b   :  { %v16150_v53 = vld [vmem:[#allocation2 + $0x1844] sm:$0xf0]  ;;  %8624 = vmatmul.bf16.vlgmr.msra.gmra.mxu3 %v17208_v7  ;;  %v15566_v44 = vld [vmem:[#allocation2 + $0x60c] sm:$0xf]  ;;  %v11363_v45 = vor.u32 %v15438_v38, %v11360_v39 }
 0x45c   :  { %v14175_v9 = vor.u32 %v16150_v53, %v14174_v52  ;;  %8662 = vmatpush.bf16.msrb.mxu2 %v14687_v34  ;;  %8668 = vmatpush.bf16.msrb.mxu3 %v11555_v57  ;;  %v11875_v48 = vor.u32 %v15566_v44, %v11872_v40  ;;  %v15422_v50 = vld [vmem:[#allocation2 + $0x18c] sm:$0xf]  ;;  %v12387_v57 = vor.u32 %v15694_v46, %v12384_v47 }
 0x45d   :  { %8637 = vmatmul.bf16.vlgmr.msrb.gmra.mxu0 %v17212_v16  ;;  %v15550_v52 = vld [vmem:[#allocation2 + $0x58c] sm:$0xf]  ;;  %v11299_v61 = vor.u32 %v15422_v50, %v11296_v51 }
 0x45e   :  { %8681 = vmatpush.bf16.msra.mxu0 %v12067_v62  ;;  %8649 = vmatpush.bf16.msrb.mxu1 %v14175_v9  ;;  %v11808_v53 = vld [vmem:[#allocation2 + $0x5c8] sm:$0xf0]  ;;  %v8443_v9 = vpop.f32.mrf.mxu1 }
 0x45f   :  { %8663 = vmatmul.bf16.vlgmr.msrb.gmra.mxu2 %v17210_v12  ;;  %v12832_v34 = vld [vmem:[#allocation2 + $0xdc8] sm:$0xf0]  ;;  %v11811_v1 = vor.u32 %v15550_v52, %v11808_v53 }
 0x460   :  { %8707 = vmatpush.bf16.msra.mxu2 %v13091_v63  ;;  %8669 = vmatpush.bf16.msrb.mxu3 %v11491_v60  ;;  %v15678_v62 = vld [vmem:[#allocation2 + $0x98c] sm:$0xf]  ;;  %v12835_v4 = vor.u32 %v15806_v54, %v12832_v34 }
 0x461   :  { %8650 = vmatmul.bf16.vlgmr.msrb.gmra.mxu1 %v17215_v23  ;;  %v12320_v63 = vld [vmem:[#allocation2 + $0x9c8] sm:$0xf0] }
 0x462   :  { %8694 = vmatpush.bf16.msra.mxu1 %v12579_v14  ;;  %8682 = vmatpush.bf16.msra.mxu0 %v12003_v35  ;;  %v11232_v6 = vld [vmem:[#allocation2 + $0x148] sm:$0xf0]  ;;  %v8417_v14 = vpop.f32.mrf.mxu3  ;;  %v12323_v15 = vor.u32 %v15678_v62, %v12320_v63  ;;  %v8456_v35 = vpop.f32.mrf.mxu2 }
 0x463   :  { %v15534_v8 = vld [vmem:[#allocation2 + $0x50c] sm:$0xf]  ;;  %v8418_v33 = vadd.f32 %v8417_v14, %v17235_v20  ;;  %v11235_v60 = vor.u32 %v15406_v5, %v11232_v6 }
 0x464   :  { %8708 = vmatpush.bf16.msra.mxu2 %v13027_v19  ;;  %8670 = vmatpush.bf16.msrb.mxu3 %v11427_v25  ;;  %v11744_v10 = vld [vmem:[#allocation2 + $0x548] sm:$0xf0] }
 0x465   :  { %v15790_v11 = vld [vmem:[#allocation2 + $0xd0c] sm:$0xf]  ;;  %v11747_v19 = vor.u32 %v15534_v8, %v11744_v10  ;;  %v8431_v28 = vadd.f32 %v8430_v58, %v8418_v33 }
 0x466   :  { %8695 = vmatpush.bf16.msra.mxu1 %v12515_v24  ;;  %8683 = vmatpush.bf16.msra.mxu0 %v11939_v36  ;;  %v12768_v13 = vld [vmem:[#allocation2 + $0xd48] sm:$0xf0] }
 0x467   :  { %v15662_v17 = vld [vmem:[#allocation2 + $0x90c] sm:$0xf]  ;;  %v12771_v22 = vor.u32 %v15790_v11, %v12768_v13  ;;  %v8444_v20 = vadd.f32 %v8443_v9, %v8431_v28 }
 0x468   :  { %8709 = vmatpush.bf16.msra.mxu2 %v12963_v37  ;;  %8671 = vmatpush.bf16.msrb.mxu3 %v11363_v45  ;;  %v12256_v18 = vld [vmem:[#allocation2 + $0x948] sm:$0xf0] }
 0x469   :  { %v15390_v26 = vld [vmem:[#allocation2 + $0x8c] sm:$0xf]  ;;  %v12259_v30 = vor.u32 %v15662_v17, %v12256_v18  ;;  %v17242_v45 = vadd.f32 %v8456_v35, %v8444_v20 }
 0x46a   :  { %8696 = vmatpush.bf16.msra.mxu1 %v12451_v43  ;;  %8684 = vmatpush.bf16.msra.mxu0 %v11875_v48  ;;  %v11168_v27 = vld [vmem:[#allocation2 + $0xc8] sm:$0xf0]  ;;  %v8445_v43 = vpop.f32.mrf.mxu1  ;;  %v8419_v53 = vpop.f32.mrf.mxu3 }
 0x46b   :  { %v15518_v0 = vld [vmem:[#allocation2 + $0x48c] sm:$0xf]  ;;  %v11171_v32 = vor.u32 %v15390_v26, %v11168_v27 }
 0x46c   :  { %8710 = vmatpush.bf16.msra.mxu2 %v12899_v49  ;;  %8672 = vmatpush.bf16.msrb.mxu3 %v11299_v61  ;;  %v11680_v29 = vld [vmem:[#allocation2 + $0x4c8] sm:$0xf0]  ;;  %v8458_v61 = vpop.f32.mrf.mxu2 }
 0x46d   :  { %v15774_v59 = vld [vmem:[#allocation2 + $0xc8c] sm:$0xf]  ;;  %v11683_v39 = vor.u32 %v15518_v0, %v11680_v29 }
 0x46e   :  { %8697 = vmatpush.bf16.msra.mxu1 %v12387_v57  ;;  %8685 = vmatpush.bf16.msra.mxu0 %v11811_v1  ;;  %v12704_v24 = vld [vmem:[#allocation2 + $0xcc8] sm:$0xf0] }
 0x46f   :  { %v15646_v25 = vld [vmem:[#allocation2 + $0x88c] sm:$0xf]  ;;  %v12707_v44 = vor.u32 %v15774_v59, %v12704_v24 }
 0x470   :  { %8711 = vmatpush.bf16.msra.mxu2 %v12835_v4  ;;  %8673 = vmatpush.bf16.msrb.mxu3 %v11235_v60  ;;  %v12192_v36 = vld [vmem:[#allocation2 + $0x8c8] sm:$0xf0] }
 0x471   :  { %v15374_v37 = vld [vmem:[#allocation2 + $0xc] sm:$0xf]  ;;  %v12195_v49 = vor.u32 %v15646_v25, %v12192_v36 }
 0x472   :  { %8698 = vmatpush.bf16.msra.mxu1 %v12323_v15  ;;  %v11104_v38 = vld [vmem:[#allocation2 + $0x48] sm:$0xf0]  ;;  %8686 = vmatpush.bf16.msra.mxu0 %v11747_v19 }
 0x473   :  { %v15502_v40 = vld [vmem:[#allocation2 + $0x40c] sm:$0xf]  ;;  %v11107_v54 = vor.u32 %v15374_v37, %v11104_v38 }
 0x474   :  { %8712 = vmatpush.bf16.msra.mxu2 %v12771_v22  ;;  %v11616_v41 = vld [vmem:[#allocation2 + $0x448] sm:$0xf0]  ;;  %8674 = vmatpush.bf16.msrb.mxu3 %v11171_v32 }
 0x475   :  { %v15758_v42 = vld [vmem:[#allocation2 + $0xc0c] sm:$0xf]  ;;  %v11619_v62 = vor.u32 %v15502_v40, %v11616_v41 }
 0x476   :  { %v12640_v46 = vld [vmem:[#allocation2 + $0xc48] sm:$0xf0]  ;;  %8699 = vmatpush.bf16.msra.mxu1 %v12259_v30  ;;  %8687 = vmatpush.bf16.msra.mxu0 %v11683_v39 }
 0x477   :  { %v15998_v47 = vld [vmem:[#allocation2 + $0x138c] sm:$0xf]  ;;  %v12643_v63 = vor.u32 %v15758_v42, %v12640_v46 }
 0x478   :  { %v13600_v48 = vld [vmem:[#allocation2 + $0x13c8] sm:$0xf0]  ;;  %8713 = vmatpush.bf16.msra.mxu2 %v12707_v44  ;;  %8675 = vmatpush.bf16.msrb.mxu3 %v11107_v54 }
 0x479   :  { %v16126_v50 = vld [vmem:[#allocation2 + $0x178c] sm:$0xf]  ;;  %v13603_v5 = vor.u32 %v15998_v47, %v13600_v48 }
 0x47a   :  { %v14112_v51 = vld [vmem:[#allocation2 + $0x17c8] sm:$0xf0]  ;;  %8700 = vmatpush.bf16.msra.mxu1 %v12195_v49  ;;  %8688 = vmatpush.bf16.msra.mxu0 %v11619_v62 }
 0x47b   :  { %v16382_v52 = vld [vmem:[#allocation2 + $0x1f8c] sm:$0xf]  ;;  %v14115_v6 = vor.u32 %v16126_v50, %v14112_v51  ;;  %8676 = vmatmul.bf16.vlgmr.msrb.gmra.mxu3 %v17196_v55 }
 0x47c   :  { %v15136_v34 = vld [vmem:[#allocation2 + $0x1fc8] sm:$0xf0]  ;;  %8714 = vmatpush.bf16.msra.mxu2 %v12643_v63  ;;  %8720 = vmatpush.bf16.msra.mxu3 %v13603_v5  ;;  %v8495_v5 = vpop.f32.mrf.mxu1 }
 0x47d   :  { %v15630_v57 = vld [vmem:[#allocation2 + $0x80c] sm:$0xf]  ;;  %v15139_v9 = vor.u32 %v16382_v52, %v15136_v34  ;;  %8689 = vmatmul.bf16.vlgmr.msra.gmra.mxu0 %v17200_v2 }
 0x47e   :  { %v12128_v58 = vld [vmem:[#allocation2 + $0x848] sm:$0xf0]  ;;  %8733 = vmatpush.bf16.msrb.mxu0 %v14115_v6 }
 0x47f   :  { %v16254_v1 = vld [vmem:[#allocation2 + $0x1b8c] sm:$0xf]  ;;  %v12131_v10 = vor.u32 %v15630_v57, %v12128_v58  ;;  %8715 = vmatmul.bf16.vlgmr.msra.gmra.mxu2 %v17198_v56  ;;  %v8482_v57 = vpop.f32.mrf.mxu0 }
 0x480   :  { %v14624_v4 = vld [vmem:[#allocation2 + $0x1bc8] sm:$0xf0]  ;;  %8759 = vmatpush.bf16.msrb.mxu2 %v15139_v9 }
 0x481   :  { %v15982_v8 = vld [vmem:[#allocation2 + $0x130c] sm:$0xf]  ;;  %v14627_v15 = vor.u32 %v16254_v1, %v14624_v4  ;;  %8701 = vmatpush.bf16.msra.mxu1 %v12131_v10  ;;  %v3205_v4 = vperm.slane %v17232_v21, 1  ;;  %v8508_v21 = vpop.f32.mrf.mxu2 }
 0x482   :  { %v13536_v11 = vld [vmem:[#allocation2 + $0x1348] sm:$0xf0] }
 0x483   :  { %v16110_v13 = vld [vmem:[#allocation2 + $0x170c] sm:$0xf]  ;;  %v13539_v35 = vor.u32 %v15982_v8, %v13536_v11 }
 0x484   :  { %v14048_v14 = vld [vmem:[#allocation2 + $0x1748] sm:$0xf0]  ;;  %8702 = vmatmul.bf16.vlgmr.msra.gmra.mxu1 %v17202_v3 }
 0x485   :  { %v16366_v33 = vld [vmem:[#allocation2 + $0x1f0c] sm:$0xf]  ;;  %v14051_v19 = vor.u32 %v16110_v13, %v14048_v14  ;;  %8746 = vmatpush.bf16.msrb.mxu1 %v14627_v15  ;;  %8721 = vmatpush.bf16.msra.mxu3 %v13539_v35 }
 0x486   :  { %v15072_v60 = vld [vmem:[#allocation2 + $0x1f48] sm:$0xf0] }
 0x487   :  { %v16238_v17 = vld [vmem:[#allocation2 + $0x1b0c] sm:$0xf]  ;;  %v15075_v26 = vor.u32 %v16366_v33, %v15072_v60  ;;  %8734 = vmatpush.bf16.msrb.mxu0 %v14051_v19  ;;  %v8469_v60 = vpop.f32.mrf.mxu3 }
 0x488   :  { %v14560_v18 = vld [vmem:[#allocation2 + $0x1b48] sm:$0xf0]  ;;  %v8470_v19 = vadd.f32 %v8469_v60, %v3205_v4  ;;  %v12582_v4 = vld [vmem:[#allocation2 + $0xb90] sm:$0xf] }
 0x489   :  { %v15966_v22 = vld [vmem:[#allocation2 + $0x128c] sm:$0xf]  ;;  %v14563_v29 = vor.u32 %v16238_v17, %v14560_v18  ;;  %8760 = vmatpush.bf16.msrb.mxu2 %v15075_v26 }
 0x48a   :  { %v13472_v27 = vld [vmem:[#allocation2 + $0x12c8] sm:$0xf0] }
 0x48b   :  { %v16094_v0 = vld [vmem:[#allocation2 + $0x168c] sm:$0xf]  ;;  %v13475_v31 = vor.u32 %v15966_v22, %v13472_v27  ;;  %8747 = vmatpush.bf16.msrb.mxu1 %v14563_v29 }
 0x48c   :  { %v13984_v28 = vld [vmem:[#allocation2 + $0x16c8] sm:$0xf0] }
 0x48d   :  { %v16350_v59 = vld [vmem:[#allocation2 + $0x1e8c] sm:$0xf]  ;;  %v13987_v20 = vor.u32 %v16094_v0, %v13984_v28  ;;  %8722 = vmatpush.bf16.msra.mxu3 %v13475_v31 }
 0x48e   :  { %v15008_v24 = vld [vmem:[#allocation2 + $0x1ec8] sm:$0xf0] }
 0x48f   :  { %v16222_v30 = vld [vmem:[#allocation2 + $0x1a8c] sm:$0xf]  ;;  %v15011_v36 = vor.u32 %v16350_v59, %v15008_v24  ;;  %8735 = vmatpush.bf16.msrb.mxu0 %v13987_v20  ;;  %v8483_v24 = vadd.f32 %v8482_v57, %v8470_v19 }
 0x490   :  { %v14496_v25 = vld [vmem:[#allocation2 + $0x1ac8] sm:$0xf0] }
 0x491   :  { %v15950_v32 = vld [vmem:[#allocation2 + $0x120c] sm:$0xf]  ;;  %v14499_v44 = vor.u32 %v16222_v30, %v14496_v25  ;;  %8761 = vmatpush.bf16.msrb.mxu2 %v15011_v36  ;;  %v8484_v30 = vpop.f32.mrf.mxu0 }
 0x492   :  { %v13408_v37 = vld [vmem:[#allocation2 + $0x1248] sm:$0xf0]  ;;  %v12454_v30 = vld [vmem:[#allocation2 + $0xa90] sm:$0xf] }
 0x493   :  { %v16078_v38 = vld [vmem:[#allocation2 + $0x160c] sm:$0xf]  ;;  %v13411_v46 = vor.u32 %v15950_v32, %v13408_v37  ;;  %8748 = vmatpush.bf16.msrb.mxu1 %v14499_v44  ;;  %v8497_v44 = vpop.f32.mrf.mxu1 }
 0x494   :  { %v13920_v39 = vld [vmem:[#allocation2 + $0x1648] sm:$0xf0]  ;;  %v15831_v44 = vld [vmem:[#allocation2 + $0xe4c] sm:$0xf0] }
 0x495   :  { %v16334_v40 = vld [vmem:[#allocation2 + $0x1e0c] sm:$0xf]  ;;  %v13923_v47 = vor.u32 %v16078_v38, %v13920_v39  ;;  %8723 = vmatpush.bf16.msra.mxu3 %v13411_v46  ;;  %v8496_v39 = vadd.f32 %v8495_v5, %v8483_v24  ;;  %v15751_v5 = vld [vmem:[#allocation2 + $0xbcc] sm:$0xf0] }
 0x496   :  { %v14944_v41 = vld [vmem:[#allocation2 + $0x1e48] sm:$0xf0]  ;;  %v12583_v60 = vor.u32 %v15751_v5, %v12582_v4 }
 0x497   :  { %v16206_v42 = vld [vmem:[#allocation2 + $0x1a0c] sm:$0xf]  ;;  %v14947_v49 = vor.u32 %v16334_v40, %v14944_v41  ;;  %8736 = vmatpush.bf16.msrb.mxu0 %v13923_v47  ;;  %v11558_v47 = vld [vmem:[#allocation2 + $0x390] sm:$0xf] }
 0x498   :  { %v14432_v43 = vld [vmem:[#allocation2 + $0x1a48] sm:$0xf0] }
 0x499   :  { %v15934_v48 = vld [vmem:[#allocation2 + $0x118c] sm:$0xf]  ;;  %v14435_v53 = vor.u32 %v16206_v42, %v14432_v43  ;;  %8762 = vmatpush.bf16.msrb.mxu2 %v14947_v49  ;;  %v12070_v49 = vld [vmem:[#allocation2 + $0x790] sm:$0xf] }
 0x49a   :  { %v13344_v50 = vld [vmem:[#allocation2 + $0x11c8] sm:$0xf0] }
 0x49b   :  { %v16062_v51 = vld [vmem:[#allocation2 + $0x158c] sm:$0xf]  ;;  %v13347_v62 = vor.u32 %v15934_v48, %v13344_v50  ;;  %8749 = vmatpush.bf16.msrb.mxu1 %v14435_v53  ;;  %v15495_v48 = vld [vmem:[#allocation2 + $0x3cc] sm:$0xf0]  ;;  %v17249_v50 = vadd.f32 %v8508_v21, %v8496_v39 }
 0x49c   :  { %v13856_v52 = vld [vmem:[#allocation2 + $0x15c8] sm:$0xf0]  ;;  %v15879_v53 = vld [vmem:[#allocation2 + $0xfcc] sm:$0xf0] }
 0x49d   :  { %v16318_v54 = vld [vmem:[#allocation2 + $0x1d8c] sm:$0xf]  ;;  %v13859_v63 = vor.u32 %v16062_v51, %v13856_v52  ;;  %8724 = vmatpush.bf16.msra.mxu3 %v13347_v62  ;;  %v15623_v51 = vld [vmem:[#allocation2 + $0x7cc] sm:$0xf0]  ;;  %v8510_v62 = vpop.f32.mrf.mxu2 }
 0x49e   :  { %v14880_v34 = vld [vmem:[#allocation2 + $0x1dc8] sm:$0xf0]  ;;  %v13094_v52 = vld [vmem:[#allocation2 + $0xf90] sm:$0xf] }
 0x49f   :  { %v16190_v58 = vld [vmem:[#allocation2 + $0x198c] sm:$0xf]  ;;  %v14883_v6 = vor.u32 %v16318_v54, %v14880_v34  ;;  %8737 = vmatpush.bf16.msrb.mxu0 %v13859_v63  ;;  %v8471_v54 = vpop.f32.mrf.mxu3  ;;  %v12902_v39 = vld [vmem:[#allocation2 + $0xe10] sm:$0xf] }
 0x4a0   :  { %v14368_v61 = vld [vmem:[#allocation2 + $0x19c8] sm:$0xf0]  ;;  %v12838_v54 = vld [vmem:[#allocation2 + $0xd90] sm:$0xf] }
 0x4a1   :  { %v15918_v1 = vld [vmem:[#allocation2 + $0x110c] sm:$0xf]  ;;  %v14371_v11 = vor.u32 %v16190_v58, %v14368_v61  ;;  %8763 = vmatpush.bf16.msrb.mxu2 %v14883_v6  ;;  %v12071_v6 = vor.u32 %v15623_v51, %v12070_v49  ;;  %v11302_v49 = vld [vmem:[#allocation2 + $0x190] sm:$0xf] }
 0x4a2   :  { %v13280_v8 = vld [vmem:[#allocation2 + $0x1148] sm:$0xf0]  ;;  %v15431_v51 = vld [vmem:[#allocation2 + $0x1cc] sm:$0xf0] }
 0x4a3   :  { %v16046_v9 = vld [vmem:[#allocation2 + $0x150c] sm:$0xf]  ;;  %v13283_v17 = vor.u32 %v15918_v1, %v13280_v8  ;;  %8750 = vmatpush.bf16.msrb.mxu1 %v14371_v11  ;;  %v11559_v1 = vor.u32 %v15495_v48, %v11558_v47  ;;  %v13095_v8 = vor.u32 %v15879_v53, %v13094_v52  ;;  %v12006_v11 = vld [vmem:[#allocation2 + $0x710] sm:$0xf]  ;;  %v12903_v48 = vor.u32 %v15831_v44, %v12902_v39 }
 0x4a4   :  { %v13792_v10 = vld [vmem:[#allocation2 + $0x1548] sm:$0xf0]  ;;  %v11814_v52 = vld [vmem:[#allocation2 + $0x590] sm:$0xf]  ;;  %v11303_v62 = vor.u32 %v15431_v51, %v11302_v49 }
 0x4a5   :  { %v16302_v13 = vld [vmem:[#allocation2 + $0x1d0c] sm:$0xf]  ;;  %v13795_v18 = vor.u32 %v16046_v9, %v13792_v10  ;;  %8725 = vmatpush.bf16.msra.mxu3 %v13283_v17  ;;  %v11494_v9 = vld [vmem:[#allocation2 + $0x310] sm:$0xf] }
 0x4a6   :  { %v14816_v14 = vld [vmem:[#allocation2 + $0x1d48] sm:$0xf0]  ;;  %v15479_v10 = vld [vmem:[#allocation2 + $0x34c] sm:$0xf0] }
 0x4a7   :  { %v16174_v15 = vld [vmem:[#allocation2 + $0x190c] sm:$0xf]  ;;  %v14819_v22 = vor.u32 %v16302_v13, %v14816_v14  ;;  %8738 = vmatpush.bf16.msrb.mxu0 %v13795_v18  ;;  %v15607_v14 = vld [vmem:[#allocation2 + $0x74c] sm:$0xf0]  ;;  %v11495_v17 = vor.u32 %v15479_v10, %v11494_v9  ;;  %v8547_v10 = vpop.f32.mrf.mxu1 }
 0x4a8   :  { %v14304_v33 = vld [vmem:[#allocation2 + $0x1948] sm:$0xf0]  ;;  %v12518_v18 = vld [vmem:[#allocation2 + $0xb10] sm:$0xf]  ;;  %v12007_v19 = vor.u32 %v15607_v14, %v12006_v11 }
 0x4a9   :  { %v15902_v35 = vld [vmem:[#allocation2 + $0x108c] sm:$0xf]  ;;  %v14307_v28 = vor.u32 %v16174_v15, %v14304_v33  ;;  %8764 = vmatpush.bf16.msrb.mxu2 %v14819_v22  ;;  %v13030_v15 = vld [vmem:[#allocation2 + $0xf10] sm:$0xf] }
 0x4aa   :  { %v13216_v26 = vld [vmem:[#allocation2 + $0x10c8] sm:$0xf0]  ;;  %v15863_v33 = vld [vmem:[#allocation2 + $0xf4c] sm:$0xf0] }
 0x4ab   :  { %v16030_v27 = vld [vmem:[#allocation2 + $0x148c] sm:$0xf]  ;;  %v13219_v20 = vor.u32 %v15902_v35, %v13216_v26  ;;  %8751 = vmatpush.bf16.msrb.mxu1 %v14307_v28  ;;  %v15735_v35 = vld [vmem:[#allocation2 + $0xb4c] sm:$0xf0]  ;;  %v13031_v21 = vor.u32 %v15863_v33, %v13030_v15  ;;  %v8521_v15 = vpop.f32.mrf.mxu3 }
 0x4ac   :  { %v13728_v0 = vld [vmem:[#allocation2 + $0x14c8] sm:$0xf0]  ;;  %v11430_v22 = vld [vmem:[#allocation2 + $0x290] sm:$0xf] }
 0x4ad   :  { %v16286_v29 = vld [vmem:[#allocation2 + $0x1c8c] sm:$0xf]  ;;  %v13731_v32 = vor.u32 %v16030_v27, %v13728_v0  ;;  %8726 = vmatpush.bf16.msra.mxu3 %v13219_v20  ;;  %v15463_v26 = vld [vmem:[#allocation2 + $0x2cc] sm:$0xf0] }
 0x4ae   :  { %v14752_v59 = vld [vmem:[#allocation2 + $0x1cc8] sm:$0xf0]  ;;  %v11942_v27 = vld [vmem:[#allocation2 + $0x690] sm:$0xf]  ;;  %v11431_v24 = vor.u32 %v15463_v26, %v11430_v22 }
 0x4af   :  { %v16158_v25 = vld [vmem:[#allocation2 + $0x188c] sm:$0xf]  ;;  %v14755_v40 = vor.u32 %v16286_v29, %v14752_v59  ;;  %8739 = vmatpush.bf16.msrb.mxu0 %v13731_v32  ;;  %v15591_v0 = vld [vmem:[#allocation2 + $0x6cc] sm:$0xf0]  ;;  %v12519_v59 = vor.u32 %v15735_v35, %v12518_v18 }
 0x4b0   :  { %v14240_v31 = vld [vmem:[#allocation2 + $0x18c8] sm:$0xf0]  ;;  %v12966_v28 = vld [vmem:[#allocation2 + $0xe90] sm:$0xf] }
 0x4b1   :  { %v15886_v36 = vld [vmem:[#allocation2 + $0x100c] sm:$0xf]  ;;  %v14243_v46 = vor.u32 %v16158_v25, %v14240_v31  ;;  %8765 = vmatpush.bf16.msrb.mxu2 %v14755_v40  ;;  %v15847_v29 = vld [vmem:[#allocation2 + $0xecc] sm:$0xf0]  ;;  %v11943_v31 = vor.u32 %v15591_v0, %v11942_v27 }
 0x4b2   :  { %v13152_v37 = vld [vmem:[#allocation2 + $0x1048] sm:$0xf0]  ;;  %v15719_v25 = vld [vmem:[#allocation2 + $0xacc] sm:$0xf0]  ;;  %v12967_v20 = vor.u32 %v15847_v29, %v12966_v28 }
 0x4b3   :  { %v16014_v38 = vld [vmem:[#allocation2 + $0x140c] sm:$0xf]  ;;  %v13155_v34 = vor.u32 %v15886_v36, %v13152_v37  ;;  %8752 = vmatpush.bf16.msrb.mxu1 %v14243_v46  ;;  %v11366_v32 = vld [vmem:[#allocation2 + $0x210] sm:$0xf]  ;;  %v12455_v40 = vor.u32 %v15719_v25, %v12454_v30 }
 0x4b4   :  { %v13664_v41 = vld [vmem:[#allocation2 + $0x1448] sm:$0xf0]  ;;  %v15447_v36 = vld [vmem:[#allocation2 + $0x24c] sm:$0xf0] }
 0x4b5   :  { %v16270_v42 = vld [vmem:[#allocation2 + $0x1c0c] sm:$0xf]  ;;  %v13667_v57 = vor.u32 %v16014_v38, %v13664_v41  ;;  %8727 = vmatpush.bf16.msra.mxu3 %v13155_v34  ;;  %v11878_v37 = vld [vmem:[#allocation2 + $0x610] sm:$0xf]  ;;  %v10020_v41 = vmax.f32 %v17242_v45, 0.0 }
 0x4b6   :  { %v14688_v43 = vld [vmem:[#allocation2 + $0x1c48] sm:$0xf0]  ;;  %v15575_v38 = vld [vmem:[#allocation2 + $0x64c] sm:$0xf0] }
 0x4b7   :  { %v16142_v58 = vld [vmem:[#allocation2 + $0x180c] sm:$0xf]  ;;  %v14691_v63 = vor.u32 %v16270_v42, %v14688_v43  ;;  %8740 = vmatpush.bf16.msrb.mxu0 %v13667_v57  ;;  %v11367_v42 = vor.u32 %v15447_v36, %v11366_v32  ;;  %v12390_v43 = vld [vmem:[#allocation2 + $0xa10] sm:$0xf]  ;;  %v11879_v47 = vor.u32 %v15575_v38, %v11878_v37 }
 0x4b8   :  { %v14176_v61 = vld [vmem:[#allocation2 + $0x1848] sm:$0xf0]  ;;  %8728 = vmatmul.bf16.vlgmr.msra.gmra.mxu3 %v17208_v7  ;;  %v15703_v46 = vld [vmem:[#allocation2 + $0xa4c] sm:$0xf0] }
 0x4b9   :  { %v14179_v13 = vor.u32 %v16142_v58, %v14176_v61  ;;  %8766 = vmatpush.bf16.msrb.mxu2 %v14691_v63  ;;  %8772 = vmatpush.bf16.msrb.mxu3 %v11559_v1  ;;  %v15559_v53 = vld [vmem:[#allocation2 + $0x5cc] sm:$0xf0]  ;;  %v12391_v57 = vor.u32 %v15703_v46, %v12390_v43  ;;  %v8534_v58 = vpop.f32.mrf.mxu0  ;;  %v17258_v61 = vmax.f32 %v10020_v41, 1e-12  ;;  %v8549_v46 = vpop.f32.mrf.mxu1 }
 0x4ba   :  { %8741 = vmatmul.bf16.vlgmr.msrb.gmra.mxu0 %v17212_v16  ;;  %v15815_v34 = vld [vmem:[#allocation2 + $0xdcc] sm:$0xf0]  ;;  %v11815_v4 = vor.u32 %v15559_v53, %v11814_v52 }
 0x4bb   :  { %8785 = vmatpush.bf16.msra.mxu0 %v12071_v6  ;;  %8753 = vmatpush.bf16.msrb.mxu1 %v14179_v13  ;;  %v12326_v63 = vld [vmem:[#allocation2 + $0x990] sm:$0xf]  ;;  %v12839_v5 = vor.u32 %v15815_v34, %v12838_v54  ;;  %16513 = vrcp.f32 %v17258_v61  ;;  %vm10057_vm4 = vweird.f32 %v17258_v61 }
 0x4bc   :  { %8767 = vmatmul.bf16.vlgmr.msrb.gmra.mxu2 %v17210_v12  ;;  %v15687_v1 = vld [vmem:[#allocation2 + $0x9cc] sm:$0xf0] }
 0x4bd   :  { %8811 = vmatpush.bf16.msra.mxu2 %v13095_v8  ;;  %8773 = vmatpush.bf16.msrb.mxu3 %v11495_v17  ;;  %v11238_v6 = vld [vmem:[#allocation2 + $0x110] sm:$0xf]  ;;  %v12327_v33 = vor.u32 %v15687_v1, %v12326_v63 }
 0x4be   :  { %8754 = vmatmul.bf16.vlgmr.msrb.gmra.mxu1 %v17215_v23  ;;  %v15415_v8 = vld [vmem:[#allocation2 + $0x14c] sm:$0xf0] }
 0x4bf   :  { %8798 = vmatpush.bf16.msra.mxu1 %v12583_v60  ;;  %8786 = vmatpush.bf16.msra.mxu0 %v12007_v19  ;;  %v11750_v9 = vld [vmem:[#allocation2 + $0x510] sm:$0xf]  ;;  %v8522_v60 = vadd.f32 %v8521_v15, %v17249_v50  ;;  %v11239_v17 = vor.u32 %v15415_v8, %v11238_v6  ;;  %v8560_v19 = vpop.f32.mrf.mxu2 }
 0x4c0   :  { %v15543_v11 = vld [vmem:[#allocation2 + $0x54c] sm:$0xf0] }
 0x4c1   :  { %8812 = vmatpush.bf16.msra.mxu2 %v13031_v21  ;;  %8774 = vmatpush.bf16.msrb.mxu3 %v11431_v24  ;;  %v12774_v13 = vld [vmem:[#allocation2 + $0xd10] sm:$0xf]  ;;  %v11751_v21 = vor.u32 %v15543_v11, %v11750_v9  ;;  %v8535_v28 = vadd.f32 %v8534_v58, %v8522_v60  ;;  %v8536_v50 = vpop.f32.mrf.mxu0  ;;  %v8523_v58 = vpop.f32.mrf.mxu3 }
 0x4c2   :  { %v15799_v14 = vld [vmem:[#allocation2 + $0xd4c] sm:$0xf0] }
 0x4c3   :  { %8799 = vmatpush.bf16.msra.mxu1 %v12519_v59  ;;  %8787 = vmatpush.bf16.msra.mxu0 %v11943_v31  ;;  %v12262_v18 = vld [vmem:[#allocation2 + $0x910] sm:$0xf]  ;;  %v12775_v22 = vor.u32 %v15799_v14, %v12774_v13 }
 0x4c4   :  { %v15671_v35 = vld [vmem:[#allocation2 + $0x94c] sm:$0xf0] }
 0x4c5   :  { %8813 = vmatpush.bf16.msra.mxu2 %v12967_v20  ;;  %8775 = vmatpush.bf16.msrb.mxu3 %v11367_v42  ;;  %v11174_v26 = vld [vmem:[#allocation2 + $0x90] sm:$0xf]  ;;  %v12263_v30 = vor.u32 %v15671_v35, %v12262_v18  ;;  %v8548_v20 = vadd.f32 %v8547_v10, %v8535_v28 }
 0x4c6   :  { %v15399_v27 = vld [vmem:[#allocation2 + $0xcc] sm:$0xf0] }
 0x4c7   :  { %8800 = vmatpush.bf16.msra.mxu1 %v12455_v40  ;;  %8788 = vmatpush.bf16.msra.mxu0 %v11879_v47  ;;  %v11686_v0 = vld [vmem:[#allocation2 + $0x490] sm:$0xf]  ;;  %v11175_v32 = vor.u32 %v15399_v27, %v11174_v26  ;;  %v17262_v47 = vpop.eup %16513 }
 0x4c8   :  { %v15527_v29 = vld [vmem:[#allocation2 + $0x4cc] sm:$0xf0]  ;;  %v10053_v6 = vmul.f32 %v17262_v47, %v17258_v61  ;;  %vm10058_vm5 = vweird.f32 %v17262_v47 }
 0x4c9   :  { %8814 = vmatpush.bf16.msra.mxu2 %v12903_v48  ;;  %8776 = vmatpush.bf16.msrb.mxu3 %v11303_v62  ;;  %v12710_v59 = vld [vmem:[#allocation2 + $0xc90] sm:$0xf]  ;;  %v11687_v39 = vor.u32 %v15527_v29, %v11686_v0  ;;  %v17264_v48 = vadd.f32 %v8560_v19, %v8548_v20  ;;  %vm17297_vm8 = vmor %vm10057_vm4, %vm10058_vm5 }
 0x4ca   :  { %v15783_v24 = vld [vmem:[#allocation2 + $0xccc] sm:$0xf0]  ;;  %v10054_v27 = vsub.f32 1.0, %v10053_v6 }
 0x4cb   :  { %8801 = vmatpush.bf16.msra.mxu1 %v12391_v57  ;;  %8789 = vmatpush.bf16.msra.mxu0 %v11815_v4  ;;  %v12198_v25 = vld [vmem:[#allocation2 + $0x890] sm:$0xf]  ;;  %v12711_v44 = vor.u32 %v15783_v24, %v12710_v59  ;;  %v10021_v62 = vmax.f32 %v17264_v48, 0.0 }
 0x4cc   :  { %v15655_v31 = vld [vmem:[#allocation2 + $0x8cc] sm:$0xf0] }
 0x4cd   :  { %8815 = vmatpush.bf16.msra.mxu2 %v12839_v5  ;;  %8777 = vmatpush.bf16.msrb.mxu3 %v11239_v17  ;;  %v11110_v36 = vld [vmem:[#allocation2 + $0x10] sm:$0xf]  ;;  %v12199_v53 = vor.u32 %v15655_v31, %v12198_v25  ;;  %v8562_v5 = vpop.f32.mrf.mxu2  ;;  %v17271_v13 = vmax.f32 %v10021_v62, 1e-12 }
 0x4ce   :  { %v15383_v37 = vld [vmem:[#allocation2 + $0x4c] sm:$0xf0] }
 0x4cf   :  { %8802 = vmatpush.bf16.msra.mxu1 %v12327_v33  ;;  %v11622_v38 = vld [vmem:[#allocation2 + $0x410] sm:$0xf]  ;;  %8790 = vmatpush.bf16.msra.mxu0 %v11751_v21  ;;  %v11111_v63 = vor.u32 %v15383_v37, %v11110_v36  ;;  %16515 = vrcp.f32 %v17271_v13  ;;  %v10055_v37 = vmul.f32 %v17262_v47, %v10054_v27  ;;  %vm10072_vm6 = vweird.f32 %v17271_v13 }
 0x4d0   :  { %v15511_v40 = vld [vmem:[#allocation2 + $0x44c] sm:$0xf0] }
 0x4d1   :  { %8816 = vmatpush.bf16.msra.mxu2 %v12775_v22  ;;  %v12646_v42 = vld [vmem:[#allocation2 + $0xc10] sm:$0xf]  ;;  %8778 = vmatpush.bf16.msrb.mxu3 %v11175_v32  ;;  %v11623_v8 = vor.u32 %v15511_v40, %v11622_v38 }
 0x4d2   :  { %v15767_v43 = vld [vmem:[#allocation2 + $0xc4c] sm:$0xf0] }
 0x4d3   :  { %v13606_v49 = vld [vmem:[#allocation2 + $0x1390] sm:$0xf]  ;;  %8803 = vmatpush.bf16.msra.mxu1 %v12263_v30  ;;  %8791 = vmatpush.bf16.msra.mxu0 %v11687_v39  ;;  %v12647_v9 = vor.u32 %v15767_v43, %v12646_v42 }
 0x4d4   :  { %v16007_v51 = vld [vmem:[#allocation2 + $0x13cc] sm:$0xf0] }
 0x4d5   :  { %v14118_v52 = vld [vmem:[#allocation2 + $0x1790] sm:$0xf]  ;;  %8817 = vmatpush.bf16.msra.mxu2 %v12711_v44  ;;  %v13607_v14 = vor.u32 %v16007_v51, %v13606_v49  ;;  %8779 = vmatpush.bf16.msrb.mxu3 %v11111_v63  ;;  %v17278_v44 = vpop.eup %16515  ;;  %v10056_v63 = vadd.f32 %v17262_v47, %v10055_v37 }
 0x4d6   :  { %v16135_v54 = vld [vmem:[#allocation2 + $0x17cc] sm:$0xf0]  ;;  %v10068_v51 = vmul.f32 %v17278_v44, %v17271_v13  ;;  %vm10073_vm7 = vweird.f32 %v17278_v44 }
 0x4d7   :  { %v15142_v34 = vld [vmem:[#allocation2 + $0x1f90] sm:$0xf]  ;;  %v14119_v15 = vor.u32 %v16135_v54, %v14118_v52  ;;  %8804 = vmatpush.bf16.msra.mxu1 %v12199_v53  ;;  %8792 = vmatpush.bf16.msra.mxu0 %v11623_v8  ;;  %v10078_v8 = vand.u32 2147483648, %v17271_v13  ;;  %v10060_v27 = vsel %vm17297_vm8, %v17262_v47, %v10056_v63  ;;  %vm17309_vm9 = vmor %vm10072_vm6, %vm10073_vm7  ;;  %v8612_v63 = vpop.f32.mrf.mxu2 }
 0x4d8   :  { %v16391_v57 = vld [vmem:[#allocation2 + $0x1fcc] sm:$0xf0]  ;;  %8780 = vmatmul.bf16.vlgmr.msrb.gmra.mxu3 %v17196_v55 }
 0x4d9   :  { %v12134_v1 = vld [vmem:[#allocation2 + $0x810] sm:$0xf]  ;;  %v15143_v60 = vor.u32 %v16391_v57, %v15142_v34  ;;  %8818 = vmatpush.bf16.msra.mxu2 %v12647_v9  ;;  %8824 = vmatpush.bf16.msra.mxu3 %v13607_v14  ;;  %v10061_v57 = vand.u32 2147483647, %v17258_v61 }
 0x4da   :  { %v15639_v4 = vld [vmem:[#allocation2 + $0x84c] sm:$0xf0]  ;;  %8793 = vmatmul.bf16.vlgmr.msra.gmra.mxu0 %v17200_v2 }
 0x4db   :  { %v14630_v10 = vld [vmem:[#allocation2 + $0x1b90] sm:$0xf]  ;;  %v12135_v17 = vor.u32 %v15639_v4, %v12134_v1  ;;  %8837 = vmatpush.bf16.msrb.mxu0 %v14119_v15  ;;  %v10063_v1 = vand.u32 2147483648, %v17258_v61  ;;  %v10069_v4 = vsub.f32 1.0, %v10068_v51  ;;  %vm10062_vm10 = vcmp.eq.f32.partialorder %v10061_v57, 8.507059e+37 }
 0x4dc   :  { %v16263_v11 = vld [vmem:[#allocation2 + $0x1bcc] sm:$0xf0]  ;;  %8819 = vmatmul.bf16.vlgmr.msra.gmra.mxu2 %v17198_v56 }
 0x4dd   :  { %v13542_v33 = vld [vmem:[#allocation2 + $0x1310] sm:$0xf]  ;;  %v14631_v21 = vor.u32 %v16263_v11, %v14630_v10  ;;  %8863 = vmatpush.bf16.msrb.mxu2 %v15143_v60  ;;  %8805 = vmatpush.bf16.msra.mxu1 %v12135_v17  ;;  %v10076_v60 = vand.u32 2147483647, %v17271_v13 }
 0x4de   :  { %v15991_v18 = vld [vmem:[#allocation2 + $0x134c] sm:$0xf0] }
 0x4df   :  { %v14054_v35 = vld [vmem:[#allocation2 + $0x1710] sm:$0xf]  ;;  %v13543_v29 = vor.u32 %v15991_v18, %v13542_v33  ;;  %v10070_v33 = vmul.f32 %v17278_v44, %v10069_v4  ;;  %vm10077_vm11 = vcmp.eq.f32.partialorder %v10076_v60, 8.507059e+37 }
 0x4e0   :  { %v16119_v19 = vld [vmem:[#allocation2 + $0x174c] sm:$0xf0]  ;;  %8806 = vmatmul.bf16.vlgmr.msra.gmra.mxu1 %v17202_v3 }
 0x4e1   :  { %v15078_v22 = vld [vmem:[#allocation2 + $0x1f10] sm:$0xf]  ;;  %v14055_v59 = vor.u32 %v16119_v19, %v14054_v35  ;;  %8850 = vmatpush.bf16.msrb.mxu1 %v14631_v21  ;;  %8825 = vmatpush.bf16.msra.mxu3 %v13543_v29 }
 0x4e2   :  { %v16375_v26 = vld [vmem:[#allocation2 + $0x1f4c] sm:$0xf0] }
 0x4e3   :  { %v14566_v0 = vld [vmem:[#allocation2 + $0x1b10] sm:$0xf]  ;;  %v15079_v30 = vor.u32 %v16375_v26, %v15078_v22  ;;  %8838 = vmatpush.bf16.msrb.mxu0 %v14055_v59  ;;  %v8586_v26 = vpop.f32.mrf.mxu0 }
 0x4e4   :  { %v16247_v28 = vld [vmem:[#allocation2 + $0x1b4c] sm:$0xf0] }
 0x4e5   :  { %v13478_v24 = vld [vmem:[#allocation2 + $0x1290] sm:$0xf]  ;;  %v14567_v20 = vor.u32 %v16247_v28, %v14566_v0  ;;  %8864 = vmatpush.bf16.msrb.mxu2 %v15079_v30  ;;  %v10064_v0 = vor.u32 1.1754944e-38, %v10063_v1  ;;  %v10071_v28 = vadd.f32 %v17278_v44, %v10070_v33 }
 0x4e6   :  { %v15975_v25 = vld [vmem:[#allocation2 + $0x12cc] sm:$0xf0] }
 0x4e7   :  { %v13990_v31 = vld [vmem:[#allocation2 + $0x1690] sm:$0xf]  ;;  %v13479_v40 = vor.u32 %v15975_v25, %v13478_v24  ;;  %8851 = vmatpush.bf16.msrb.mxu1 %v14567_v20  ;;  %v10079_v24 = vor.u32 1.1754944e-38, %v10078_v8  ;;  %v10075_v13 = vsel %vm17309_vm9, %v17278_v44, %v10071_v28  ;;  %v15487_v28 = vld [vmem:[#allocation2 + $0x394] sm:$0xf] }
 0x4e8   :  { %v16103_v50 = vld [vmem:[#allocation2 + $0x16cc] sm:$0xf0] }
 0x4e9   :  { %v15014_v32 = vld [vmem:[#allocation2 + $0x1e90] sm:$0xf]  ;;  %v13991_v42 = vor.u32 %v16103_v50, %v13990_v31  ;;  %8826 = vmatpush.bf16.msra.mxu3 %v13479_v40  ;;  %v10080_v40 = vsel %vm10077_vm11, %v10079_v24, %v10075_v13  ;;  %v12072_v24 = vld [vmem:[#allocation2 + $0x7d0] sm:$0xf0] }
 0x4ea   :  { %v16359_v36 = vld [vmem:[#allocation2 + $0x1ecc] sm:$0xf0] }
 0x4eb   :  { %v14502_v38 = vld [vmem:[#allocation2 + $0x1a90] sm:$0xf]  ;;  %v15015_v52 = vor.u32 %v16359_v36, %v15014_v32  ;;  %8839 = vmatpush.bf16.msrb.mxu0 %v13991_v42  ;;  %v8599_v32 = vpop.f32.mrf.mxu1 }
 0x4ec   :  { %v16231_v39 = vld [vmem:[#allocation2 + $0x1acc] sm:$0xf0] }
 0x4ed   :  { %v13414_v43 = vld [vmem:[#allocation2 + $0x1210] sm:$0xf]  ;;  %v14503_v58 = vor.u32 %v16231_v39, %v14502_v38  ;;  %8865 = vmatpush.bf16.msrb.mxu2 %v15015_v52  ;;  %v10065_v39 = vsel %vm10062_vm10, %v10064_v0, %v10060_v27 }
 0x4ee   :  { %v15959_v46 = vld [vmem:[#allocation2 + $0x124c] sm:$0xf0]  ;;  %v10066_v1 = vmul.f32 %v10065_v39, %v10020_v41  ;;  %v15743_v39 = vld [vmem:[#allocation2 + $0xb94] sm:$0xf] }
 0x4ef   :  { %v13926_v49 = vld [vmem:[#allocation2 + $0x1610] sm:$0xf]  ;;  %v13415_v9 = vor.u32 %v15959_v46, %v13414_v43  ;;  %8852 = vmatpush.bf16.msrb.mxu1 %v14503_v58 }
 0x4f0   :  { %v16087_v53 = vld [vmem:[#allocation2 + $0x164c] sm:$0xf0] }
 0x4f1   :  { %v14950_v54 = vld [vmem:[#allocation2 + $0x1e10] sm:$0xf]  ;;  %v13927_v10 = vor.u32 %v16087_v53, %v13926_v49  ;;  %8827 = vmatpush.bf16.msra.mxu3 %v13415_v9  ;;  %v10081_v49 = vmul.f32 %v10080_v40, %v10021_v62  ;;  %v8573_v53 = vpop.f32.mrf.mxu3  ;;  %v12584_v40 = vld [vmem:[#allocation2 + $0xbd0] sm:$0xf0] }
 0x4f2   :  { %v16343_v34 = vld [vmem:[#allocation2 + $0x1e4c] sm:$0xf0] }
 0x4f3   :  { %v14438_v5 = vld [vmem:[#allocation2 + $0x1a10] sm:$0xf]  ;;  %v14951_v11 = vor.u32 %v16343_v34, %v14950_v54  ;;  %8840 = vmatpush.bf16.msrb.mxu0 %v13927_v10  ;;  %v10308_v4 = vrot.slane %v10081_v49, 6  ;;  %v11496_v49 = vld [vmem:[#allocation2 + $0x350] sm:$0xf0] }
 0x4f4   :  { %v16215_v6 = vld [vmem:[#allocation2 + $0x1a4c] sm:$0xf0] }
 0x4f5   :  { %v13350_v14 = vld [vmem:[#allocation2 + $0x1190] sm:$0xf]  ;;  %v14439_v19 = vor.u32 %v16215_v6, %v14438_v5  ;;  %8866 = vmatpush.bf16.msrb.mxu2 %v14951_v11  ;;  %v8588_v11 = vpop.f32.mrf.mxu0 }
 0x4f6   :  { %v15943_v15 = vld [vmem:[#allocation2 + $0x11cc] sm:$0xf0] }
 0x4f7   :  { %v13862_v17 = vld [vmem:[#allocation2 + $0x1590] sm:$0xf]  ;;  %v13351_v30 = vor.u32 %v15943_v15, %v13350_v14  ;;  %8853 = vmatpush.bf16.msrb.mxu1 %v14439_v19  ;;  %v17324_v14 = vsel %vm1089_vm1, %v10066_v1, %v10308_v4  ;;  %v8601_v19 = vpop.f32.mrf.mxu1 }
 0x4f8   :  { %v16071_v18 = vld [vmem:[#allocation2 + $0x15cc] sm:$0xf0]  ;;  %v15823_v19 = vld [vmem:[#allocation2 + $0xe14] sm:$0xf] }
 0x4f9   :  { %v14886_v21 = vld [vmem:[#allocation2 + $0x1d90] sm:$0xf]  ;;  %v13863_v25 = vor.u32 %v16071_v18, %v13862_v17  ;;  %8828 = vmatpush.bf16.msra.mxu3 %v13351_v30  ;;  %v15871_v30 = vld [vmem:[#allocation2 + $0xf94] sm:$0xf] }
 0x4fa   :  { %v16327_v22 = vld [vmem:[#allocation2 + $0x1dcc] sm:$0xf0] }
 0x4fb   :  { %v14374_v29 = vld [vmem:[#allocation2 + $0x1990] sm:$0xf]  ;;  %v14887_v36 = vor.u32 %v16327_v22, %v14886_v21  ;;  %8841 = vmatpush.bf16.msrb.mxu0 %v13863_v25  ;;  %v13096_v25 = vld [vmem:[#allocation2 + $0xfd0] sm:$0xf0] }
 0x4fc   :  { %v16199_v59 = vld [vmem:[#allocation2 + $0x19cc] sm:$0xf0] }
 0x4fd   :  { %v13286_v31 = vld [vmem:[#allocation2 + $0x1110] sm:$0xf]  ;;  %v14375_v42 = vor.u32 %v16199_v59, %v14374_v29  ;;  %8867 = vmatpush.bf16.msrb.mxu2 %v14887_v36  ;;  %v11560_v29 = vld [vmem:[#allocation2 + $0x3d0] sm:$0xf0]  ;;  %v8614_v36 = vpop.f32.mrf.mxu2 }
 0x4fe   :  { %v15927_v47 = vld [vmem:[#allocation2 + $0x114c] sm:$0xf0]  ;;  %v15615_v59 = vld [vmem:[#allocation2 + $0x794] sm:$0xf] }
 0x4ff   :  { %v17313_v50 = vld [vmem:[#allocation30] sm:$0xff]  ;;  %v13287_v44 = vor.u32 %v15927_v47, %v13286_v31  ;;  %8854 = vmatpush.bf16.msrb.mxu1 %v14375_v42  ;;  %v8575_v31 = vpop.f32.mrf.mxu3  ;;  %v12075_v42 = vor.u32 %v15615_v59, %v12072_v24 }
 0x500   :  { %v3206_v20 = vperm.slane %v17313_v50, 2  ;;  %v13798_v37 = vld [vmem:[#allocation2 + $0x1510] sm:$0xf]  ;;  %v15423_v59 = vld [vmem:[#allocation2 + $0x194] sm:$0xf] }
 0x501   :  { %v16055_v38 = vld [vmem:[#allocation2 + $0x154c] sm:$0xf0]  ;;  %8829 = vmatpush.bf16.msra.mxu3 %v13287_v44  ;;  %v15855_v44 = vld [vmem:[#allocation2 + $0xf14] sm:$0xf] }
 0x502   :  { %v14822_v43 = vld [vmem:[#allocation2 + $0x1d10] sm:$0xf]  ;;  %v13799_v54 = vor.u32 %v16055_v38, %v13798_v37  ;;  %v8574_v58 = vadd.f32 %v8573_v53, %v3206_v20  ;;  %v11563_v38 = vor.u32 %v15487_v28, %v11560_v29  ;;  %v12008_v53 = vld [vmem:[#allocation2 + $0x750] sm:$0xf0] }
 0x503   :  { %v16311_v46 = vld [vmem:[#allocation2 + $0x1d4c] sm:$0xf0]  ;;  %v11304_v24 = vld [vmem:[#allocation2 + $0x1d0] sm:$0xf0] }
 0x504   :  { %v14310_v51 = vld [vmem:[#allocation2 + $0x1910] sm:$0xf]  ;;  %v14823_v5 = vor.u32 %v16311_v46, %v14822_v43  ;;  %v8587_v10 = vadd.f32 %v8586_v26, %v8574_v58  ;;  %8842 = vmatpush.bf16.msrb.mxu0 %v13799_v54  ;;  %v13099_v43 = vor.u32 %v15871_v30, %v13096_v25  ;;  %v15471_v46 = vld [vmem:[#allocation2 + $0x314] sm:$0xf] }
 0x505   :  { %v16183_v52 = vld [vmem:[#allocation2 + $0x194c] sm:$0xf0]  ;;  %v13032_v54 = vld [vmem:[#allocation2 + $0xf50] sm:$0xf0] }
 0x506   :  { %v13222_v34 = vld [vmem:[#allocation2 + $0x1090] sm:$0xf]  ;;  %v14311_v62 = vor.u32 %v16183_v52, %v14310_v51  ;;  %v8600_v35 = vadd.f32 %v8599_v32, %v8587_v10  ;;  %8868 = vmatpush.bf16.msrb.mxu2 %v14823_v5  ;;  %v15599_v51 = vld [vmem:[#allocation2 + $0x714] sm:$0xf]  ;;  %v13035_v4 = vor.u32 %v15855_v44, %v13032_v54 }
 0x507   :  { %v15911_v57 = vld [vmem:[#allocation2 + $0x10cc] sm:$0xf0]  ;;  %v15727_v58 = vld [vmem:[#allocation2 + $0xb14] sm:$0xf]  ;;  %v12011_v1 = vor.u32 %v15599_v51, %v12008_v53  ;;  %v8625_v53 = vpop.f32.mrf.mxu3 }
 0x508   :  { %v13734_v6 = vld [vmem:[#allocation2 + $0x1490] sm:$0xf]  ;;  %v13223_v45 = vor.u32 %v15911_v57, %v13222_v34  ;;  %8855 = vmatpush.bf16.msrb.mxu1 %v14311_v62  ;;  %v17326_v61 = vadd.f32 %v8612_v63, %v8600_v35  ;;  %v12587_v34 = vor.u32 %v15743_v39, %v12584_v40  ;;  %v11499_v57 = vor.u32 %v15471_v46, %v11496_v49  ;;  %v12520_v63 = vld [vmem:[#allocation2 + $0xb50] sm:$0xf0]  ;;  %v8651_v46 = vpop.f32.mrf.mxu1 }
 0x509   :  { %v16039_v48 = vld [vmem:[#allocation2 + $0x14cc] sm:$0xf0]  ;;  %v15455_v5 = vld [vmem:[#allocation2 + $0x294] sm:$0xf]  ;;  %v12523_v10 = vor.u32 %v15727_v58, %v12520_v63  ;;  %v8664_v63 = vpop.f32.mrf.mxu2 }
 0x50a   :  { %v14758_v8 = vld [vmem:[#allocation2 + $0x1c90] sm:$0xf]  ;;  %v13735_v41 = vor.u32 %v16039_v48, %v13734_v6  ;;  %8830 = vmatpush.bf16.msra.mxu3 %v13223_v45  ;;  %v11432_v6 = vld [vmem:[#allocation2 + $0x2d0] sm:$0xf0]  ;;  %v8626_v54 = vadd.f32 %v8625_v53, %v17326_v61 }
 0x50b   :  { %v16295_v9 = vld [vmem:[#allocation2 + $0x1ccc] sm:$0xf0]  ;;  %v15583_v48 = vld [vmem:[#allocation2 + $0x694] sm:$0xf]  ;;  %v11435_v11 = vor.u32 %v15455_v5, %v11432_v6 }
 0x50c   :  { %v14246_v15 = vld [vmem:[#allocation2 + $0x1890] sm:$0xf]  ;;  %v14759_v21 = vor.u32 %v16295_v9, %v14758_v8  ;;  %8843 = vmatpush.bf16.msrb.mxu0 %v13735_v41  ;;  %v11944_v62 = vld [vmem:[#allocation2 + $0x6d0] sm:$0xf0] }
 0x50d   :  { %v16167_v33 = vld [vmem:[#allocation2 + $0x18cc] sm:$0xf0]  ;;  %v15839_v8 = vld [vmem:[#allocation2 + $0xe94] sm:$0xf]  ;;  %v11947_v45 = vor.u32 %v15583_v48, %v11944_v62 }
 0x50e   :  { %v13158_v60 = vld [vmem:[#allocation2 + $0x1010] sm:$0xf]  ;;  %v14247_v0 = vor.u32 %v16167_v33, %v14246_v15  ;;  %8869 = vmatpush.bf16.msrb.mxu2 %v14759_v21  ;;  %v12968_v9 = vld [vmem:[#allocation2 + $0xed0] sm:$0xf0] }
 0x50f   :  { %v15895_v17 = vld [vmem:[#allocation2 + $0x104c] sm:$0xf0]  ;;  %v15711_v15 = vld [vmem:[#allocation2 + $0xa94] sm:$0xf]  ;;  %v12971_v41 = vor.u32 %v15839_v8, %v12968_v9 }
 0x510   :  { %v13670_v18 = vld [vmem:[#allocation2 + $0x1410] sm:$0xf]  ;;  %v13159_v47 = vor.u32 %v15895_v17, %v13158_v60  ;;  %8856 = vmatpush.bf16.msrb.mxu1 %v14247_v0  ;;  %v12456_v33 = vld [vmem:[#allocation2 + $0xad0] sm:$0xf0] }
 0x511   :  { %v16023_v22 = vld [vmem:[#allocation2 + $0x144c] sm:$0xf0]  ;;  %v15439_v60 = vld [vmem:[#allocation2 + $0x214] sm:$0xf] }
 0x512   :  { %v14694_v27 = vld [vmem:[#allocation2 + $0x1c10] sm:$0xf]  ;;  %v13671_v20 = vor.u32 %v16023_v22, %v13670_v18  ;;  %8831 = vmatpush.bf16.msra.mxu3 %v13159_v47  ;;  %v11368_v17 = vld [vmem:[#allocation2 + $0x250] sm:$0xf0]  ;;  %v12459_v22 = vor.u32 %v15711_v15, %v12456_v33 }
 0x513   :  { %v16279_v26 = vld [vmem:[#allocation2 + $0x1c4c] sm:$0xf0]  ;;  %v15567_v18 = vld [vmem:[#allocation2 + $0x614] sm:$0xf] }
 0x514   :  { %v14182_v32 = vld [vmem:[#allocation2 + $0x1810] sm:$0xf]  ;;  %v14695_v37 = vor.u32 %v16279_v26, %v14694_v27  ;;  %8844 = vmatpush.bf16.msrb.mxu0 %v13671_v20  ;;  %v11880_v35 = vld [vmem:[#allocation2 + $0x650] sm:$0xf0]  ;;  %v11371_v27 = vor.u32 %v15439_v60, %v11368_v17 }
 0x515   :  { %v16151_v13 = vld [vmem:[#allocation2 + $0x184c] sm:$0xf0]  ;;  %8832 = vmatmul.bf16.vlgmr.msra.gmra.mxu3 %v17208_v7  ;;  %v12904_v21 = vld [vmem:[#allocation2 + $0xe50] sm:$0xf0]  ;;  %v11883_v28 = vor.u32 %v15567_v18, %v11880_v35 }
 0x516   :  { %v14183_v52 = vor.u32 %v16151_v13, %v14182_v32  ;;  %8870 = vmatpush.bf16.msrb.mxu2 %v14695_v37  ;;  %8876 = vmatpush.bf16.msrb.mxu3 %v11563_v38  ;;  %v15695_v26 = vld [vmem:[#allocation2 + $0xa14] sm:$0xf]  ;;  %v12907_v29 = vor.u32 %v15823_v19, %v12904_v21  ;;  %v8638_v32 = vpop.f32.mrf.mxu0  ;;  %v11307_v13 = vor.u32 %v15423_v59, %v11304_v24 }
 0x517   :  { %8845 = vmatmul.bf16.vlgmr.msrb.gmra.mxu0 %v17212_v16  ;;  %v12392_v0 = vld [vmem:[#allocation2 + $0xa50] sm:$0xf0]  ;;  %v8639_v62 = vadd.f32 %v8638_v32, %v8626_v54 }
 0x518   :  { %8889 = vmatpush.bf16.msra.mxu0 %v12075_v42  ;;  %8857 = vmatpush.bf16.msrb.mxu1 %v14183_v52  ;;  %v15551_v30 = vld [vmem:[#allocation2 + $0x594] sm:$0xf]  ;;  %v12395_v20 = vor.u32 %v15695_v26, %v12392_v0 }
 0x519   :  { %8871 = vmatmul.bf16.vlgmr.msrb.gmra.mxu2 %v17210_v12  ;;  %v11816_v25 = vld [vmem:[#allocation2 + $0x5d0] sm:$0xf0]  ;;  %v8652_v61 = vadd.f32 %v8651_v46, %v8639_v62 }
 0x51a   :  { %8915 = vmatpush.bf16.msra.mxu2 %v13099_v43  ;;  %8877 = vmatpush.bf16.msrb.mxu3 %v11499_v57  ;;  %v15807_v31 = vld [vmem:[#allocation2 + $0xd94] sm:$0xf]  ;;  %v11819_v38 = vor.u32 %v15551_v30, %v11816_v25 }
 0x51b   :  { %8858 = vmatmul.bf16.vlgmr.msrb.gmra.mxu1 %v17215_v23  ;;  %v12840_v47 = vld [vmem:[#allocation2 + $0xdd0] sm:$0xf0]  ;;  %v17333_v26 = vadd.f32 %v8664_v63, %v8652_v61 }
 0x51c   :  { %8902 = vmatpush.bf16.msra.mxu1 %v12587_v34  ;;  %8890 = vmatpush.bf16.msra.mxu0 %v12011_v1  ;;  %v15679_v36 = vld [vmem:[#allocation2 + $0x994] sm:$0xf]  ;;  %v12843_v39 = vor.u32 %v15807_v31, %v12840_v47  ;;  %v8627_v31 = vpop.f32.mrf.mxu3 }
 0x51d   :  { %v12328_v37 = vld [vmem:[#allocation2 + $0x9d0] sm:$0xf0] }
 0x51e   :  { %8916 = vmatpush.bf16.msra.mxu2 %v13035_v4  ;;  %8878 = vmatpush.bf16.msrb.mxu3 %v11435_v11  ;;  %v15407_v40 = vld [vmem:[#allocation2 + $0x114] sm:$0xf]  ;;  %v12331_v44 = vor.u32 %v15679_v36, %v12328_v37  ;;  %v8640_v33 = vpop.f32.mrf.mxu0  ;;  %v8666_v36 = vpop.f32.mrf.mxu2 }
 0x51f   :  { %v11240_v42 = vld [vmem:[#allocation2 + $0x150] sm:$0xf0] }
 0x520   :  { %8903 = vmatpush.bf16.msra.mxu1 %v12523_v10  ;;  %8891 = vmatpush.bf16.msra.mxu0 %v11947_v45  ;;  %v15535_v43 = vld [vmem:[#allocation2 + $0x514] sm:$0xf]  ;;  %v11243_v34 = vor.u32 %v15407_v40, %v11240_v42 }
 0x521   :  { %v11752_v49 = vld [vmem:[#allocation2 + $0x550] sm:$0xf0] }
 0x522   :  { %8917 = vmatpush.bf16.msra.mxu2 %v12971_v41  ;;  %8879 = vmatpush.bf16.msrb.mxu3 %v11371_v27  ;;  %v15791_v51 = vld [vmem:[#allocation2 + $0xd14] sm:$0xf]  ;;  %v11755_v1 = vor.u32 %v15535_v43, %v11752_v49  ;;  %v8653_v27 = vpop.f32.mrf.mxu1 }
 0x523   :  { %v12776_v52 = vld [vmem:[#allocation2 + $0xd50] sm:$0xf0] }
 0x524   :  { %8904 = vmatpush.bf16.msra.mxu1 %v12459_v22  ;;  %8892 = vmatpush.bf16.msra.mxu0 %v11883_v28  ;;  %v15663_v57 = vld [vmem:[#allocation2 + $0x914] sm:$0xf]  ;;  %v12779_v4 = vor.u32 %v15791_v51, %v12776_v52 }
 0x525   :  { %v12264_v58 = vld [vmem:[#allocation2 + $0x950] sm:$0xf0] }
 0x526   :  { %8918 = vmatpush.bf16.msra.mxu2 %v12907_v29  ;;  %8880 = vmatpush.bf16.msrb.mxu3 %v11307_v13  ;;  %v15391_v5 = vld [vmem:[#allocation2 + $0x94] sm:$0xf]  ;;  %v12267_v11 = vor.u32 %v15663_v57, %v12264_v58 }
 0x527   :  { %v11176_v6 = vld [vmem:[#allocation2 + $0xd0] sm:$0xf0] }
 0x528   :  { %8905 = vmatpush.bf16.msra.mxu1 %v12395_v20  ;;  %8893 = vmatpush.bf16.msra.mxu0 %v11819_v38  ;;  %v15519_v48 = vld [vmem:[#allocation2 + $0x494] sm:$0xf]  ;;  %v11179_v45 = vor.u32 %v15391_v5, %v11176_v6 }
 0x529   :  { %v11688_v8 = vld [vmem:[#allocation2 + $0x4d0] sm:$0xf0] }
 0x52a   :  { %8919 = vmatpush.bf16.msra.mxu2 %v12843_v39  ;;  %v15775_v9 = vld [vmem:[#allocation2 + $0xc94] sm:$0xf]  ;;  %8881 = vmatpush.bf16.msrb.mxu3 %v11243_v34  ;;  %v11691_v18 = vor.u32 %v15519_v48, %v11688_v8 }
 0x52b   :  { %v12712_v10 = vld [vmem:[#allocation2 + $0xcd0] sm:$0xf0] }
 0x52c   :  { %8906 = vmatpush.bf16.msra.mxu1 %v12331_v44  ;;  %v15647_v15 = vld [vmem:[#allocation2 + $0x894] sm:$0xf]  ;;  %8894 = vmatpush.bf16.msra.mxu0 %v11755_v1  ;;  %v12715_v35 = vor.u32 %v15775_v9, %v12712_v10 }
 0x52d   :  { %v12200_v41 = vld [vmem:[#allocation2 + $0x8d0] sm:$0xf0] }
 0x52e   :  { %v15375_v60 = vld [vmem:[#allocation2 + $0x14] sm:$0xf]  ;;  %8920 = vmatpush.bf16.msra.mxu2 %v12779_v4  ;;  %v12203_v59 = vor.u32 %v15647_v15, %v12200_v41  ;;  %8882 = vmatpush.bf16.msrb.mxu3 %v11179_v45 }
 0x52f   :  { %v11112_v17 = vld [vmem:[#allocation2 + $0x50] sm:$0xf0] }
 0x530   :  { %v15503_v19 = vld [vmem:[#allocation2 + $0x414] sm:$0xf]  ;;  %8907 = vmatpush.bf16.msra.mxu1 %v12267_v11  ;;  %v11115_v47 = vor.u32 %v15375_v60, %v11112_v17  ;;  %8895 = vmatpush.bf16.msra.mxu0 %v11691_v18 }
 0x531   :  { %v11624_v21 = vld [vmem:[#allocation2 + $0x450] sm:$0xf0] }
 0x532   :  { %v15759_v22 = vld [vmem:[#allocation2 + $0xc14] sm:$0xf]  ;;  %8921 = vmatpush.bf16.msra.mxu2 %v12715_v35  ;;  %v11627_v37 = vor.u32 %v15503_v19, %v11624_v21  ;;  %8883 = vmatpush.bf16.msrb.mxu3 %v11115_v47 }
 0x533   :  { %v12648_v0 = vld [vmem:[#allocation2 + $0xc50] sm:$0xf0] }
 0x534   :  { %v15999_v28 = vld [vmem:[#allocation2 + $0x1394] sm:$0xf]  ;;  %v12651_v38 = vor.u32 %v15759_v22, %v12648_v0  ;;  %8908 = vmatpush.bf16.msra.mxu1 %v12203_v59  ;;  %8896 = vmatpush.bf16.msra.mxu0 %v11627_v37 }
 0x535   :  { %v13608_v29 = vld [vmem:[#allocation2 + $0x13d0] sm:$0xf0]  ;;  %8884 = vmatmul.bf16.vlgmr.msrb.gmra.mxu3 %v17196_v55 }
 0x536   :  { %v16127_v24 = vld [vmem:[#allocation2 + $0x1794] sm:$0xf]  ;;  %v13611_v42 = vor.u32 %v15999_v28, %v13608_v29  ;;  %8922 = vmatpush.bf16.msra.mxu2 %v12651_v38 }
 0x537   :  { %v14120_v30 = vld [vmem:[#allocation2 + $0x17d0] sm:$0xf0]  ;;  %8897 = vmatmul.bf16.vlgmr.msra.gmra.mxu0 %v17200_v2 }
 0x538   :  { %v16383_v25 = vld [vmem:[#allocation2 + $0x1f94] sm:$0xf]  ;;  %v14123_v43 = vor.u32 %v16127_v24, %v14120_v30  ;;  %8928 = vmatpush.bf16.msra.mxu3 %v13611_v42  ;;  %v17341_v42 = vpop.f32.mrf.mxu1 }
 0x539   :  { %v15144_v20 = vld [vmem:[#allocation2 + $0x1fd0] sm:$0xf0]  ;;  %8923 = vmatmul.bf16.vlgmr.msra.gmra.mxu2 %v17198_v56 }
 0x53a   :  { %v15631_v32 = vld [vmem:[#allocation2 + $0x814] sm:$0xf]  ;;  %v15147_v49 = vor.u32 %v16383_v25, %v15144_v20  ;;  %8941 = vmatpush.bf16.msrb.mxu0 %v14123_v43 }
 0x53b   :  { %v12136_v13 = vld [vmem:[#allocation2 + $0x850] sm:$0xf0] }
 0x53c   :  { %v16255_v39 = vld [vmem:[#allocation2 + $0x1b94] sm:$0xf]  ;;  %v12139_v51 = vor.u32 %v15631_v32, %v12136_v13  ;;  %8967 = vmatpush.bf16.msrb.mxu2 %v15147_v49  ;;  %v17339_v13 = vpop.f32.mrf.mxu0 }
 0x53d   :  { %v14632_v40 = vld [vmem:[#allocation2 + $0x1bd0] sm:$0xf0] }
 0x53e   :  { %v15983_v46 = vld [vmem:[#allocation2 + $0x1314] sm:$0xf]  ;;  %v14635_v54 = vor.u32 %v16255_v39, %v14632_v40  ;;  %8909 = vmatpush.bf16.msra.mxu1 %v12139_v51 }
 0x53f   :  { %v13544_v52 = vld [vmem:[#allocation2 + $0x1350] sm:$0xf0] }
 0x540   :  { %v16111_v53 = vld [vmem:[#allocation2 + $0x1714] sm:$0xf]  ;;  %v13547_v1 = vor.u32 %v15983_v46, %v13544_v52 }
 0x541   :  { %v14056_v44 = vld [vmem:[#allocation2 + $0x1750] sm:$0xf0]  ;;  %8910 = vmatmul.bf16.vlgmr.msra.gmra.mxu1 %v17202_v3 }
 0x542   :  { %v16367_v34 = vld [vmem:[#allocation2 + $0x1f14] sm:$0xf]  ;;  %v14059_v4 = vor.u32 %v16111_v53, %v14056_v44  ;;  %8954 = vmatpush.bf16.msrb.mxu1 %v14635_v54  ;;  %8929 = vmatpush.bf16.msra.mxu3 %v13547_v1 }
 0x543   :  { %v15080_v57 = vld [vmem:[#allocation2 + $0x1f50] sm:$0xf0] }
 0x544   :  { %v16239_v58 = vld [vmem:[#allocation2 + $0x1b14] sm:$0xf]  ;;  %v15083_v6 = vor.u32 %v16367_v34, %v15080_v57  ;;  %8942 = vmatpush.bf16.msrb.mxu0 %v14059_v4  ;;  %v17343_v57 = vpop.f32.mrf.mxu3  ;;  %v17345_v4 = vpop.f32.mrf.mxu2 }
 0x545   :  { %v14568_v63 = vld [vmem:[#allocation2 + $0x1b50] sm:$0xf0] }
 0x546   :  { %v15967_v5 = vld [vmem:[#allocation2 + $0x1294] sm:$0xf]  ;;  %v14571_v9 = vor.u32 %v16239_v58, %v14568_v63  ;;  %8968 = vmatpush.bf16.msrb.mxu2 %v15083_v6 }
 0x547   :  { %v13480_v48 = vld [vmem:[#allocation2 + $0x12d0] sm:$0xf0] }
 0x548   :  { %v16095_v62 = vld [vmem:[#allocation2 + $0x1694] sm:$0xf]  ;;  %v13483_v61 = vor.u32 %v15967_v5, %v13480_v48  ;;  %8955 = vmatpush.bf16.msrb.mxu1 %v14571_v9 }
 0x549   :  { %v13992_v8 = vld [vmem:[#allocation2 + $0x16d0] sm:$0xf0] }
 0x54a   :  { %v16351_v10 = vld [vmem:[#allocation2 + $0x1e94] sm:$0xf]  ;;  %v13995_v45 = vor.u32 %v16095_v62, %v13992_v8  ;;  %8930 = vmatpush.bf16.msra.mxu3 %v13483_v61 }
 0x54b   :  { %v15016_v11 = vld [vmem:[#allocation2 + $0x1ed0] sm:$0xf0] }
 0x54c   :  { %v16223_v15 = vld [vmem:[#allocation2 + $0x1a94] sm:$0xf]  ;;  %v15019_v60 = vor.u32 %v16351_v10, %v15016_v11  ;;  %8943 = vmatpush.bf16.msrb.mxu0 %v13995_v45  ;;  %v8692_v11 = vpop.f32.mrf.mxu0 }
 0x54d   :  { %v14504_v33 = vld [vmem:[#allocation2 + $0x1ad0] sm:$0xf0]  ;;  %v15592_v11 = vld [vmem:[#allocation2 + $0x6d4] sm:$0xf0] }
 0x54e   :  { %v15951_v41 = vld [vmem:[#allocation2 + $0x1214] sm:$0xf]  ;;  %v14507_v19 = vor.u32 %v16223_v15, %v14504_v33  ;;  %8969 = vmatpush.bf16.msrb.mxu2 %v15019_v60 }
 0x54f   :  { %v13416_v17 = vld [vmem:[#allocation2 + $0x1250] sm:$0xf0] }
 0x550   :  { %v16079_v18 = vld [vmem:[#allocation2 + $0x1614] sm:$0xf]  ;;  %v13419_v28 = vor.u32 %v15951_v41, %v13416_v17  ;;  %8956 = vmatpush.bf16.msrb.mxu1 %v14507_v19 }
 0x551   :  { %v13928_v35 = vld [vmem:[#allocation2 + $0x1650] sm:$0xf0] }
 0x552   :  { %v16335_v21 = vld [vmem:[#allocation2 + $0x1e14] sm:$0xf]  ;;  %v13931_v29 = vor.u32 %v16079_v18, %v13928_v35  ;;  %8931 = vmatpush.bf16.msra.mxu3 %v13419_v28  ;;  %v8705_v18 = vpop.f32.mrf.mxu1  ;;  %v15496_v28 = vld [vmem:[#allocation2 + $0x3d4] sm:$0xf0] }
 0x553   :  { %v14952_v22 = vld [vmem:[#allocation2 + $0x1e50] sm:$0xf0] }
 0x554   :  { %v16207_v27 = vld [vmem:[#allocation2 + $0x1a14] sm:$0xf]  ;;  %v14955_v24 = vor.u32 %v16335_v21, %v14952_v22  ;;  %8944 = vmatpush.bf16.msrb.mxu0 %v13931_v29  ;;  %v12078_v29 = vld [vmem:[#allocation2 + $0x798] sm:$0xf] }
 0x555   :  { %v14440_v0 = vld [vmem:[#allocation2 + $0x1a50] sm:$0xf0] }
 0x556   :  { %v15935_v59 = vld [vmem:[#allocation2 + $0x1194] sm:$0xf]  ;;  %v14443_v47 = vor.u32 %v16207_v27, %v14440_v0  ;;  %8970 = vmatpush.bf16.msrb.mxu2 %v14955_v24  ;;  %v11566_v0 = vld [vmem:[#allocation2 + $0x398] sm:$0xf] }
 0x557   :  { %v13352_v30 = vld [vmem:[#allocation2 + $0x11d0] sm:$0xf0]  ;;  %v13102_v24 = vld [vmem:[#allocation2 + $0xf98] sm:$0xf] }
 0x558   :  { %v16063_v25 = vld [vmem:[#allocation2 + $0x1594] sm:$0xf]  ;;  %v13355_v38 = vor.u32 %v15935_v59, %v13352_v30  ;;  %8957 = vmatpush.bf16.msrb.mxu1 %v14443_v47  ;;  %v15624_v59 = vld [vmem:[#allocation2 + $0x7d4] sm:$0xf0] }
 0x559   :  { %v13864_v31 = vld [vmem:[#allocation2 + $0x15d0] sm:$0xf0]  ;;  %v15880_v30 = vld [vmem:[#allocation2 + $0xfd4] sm:$0xf0] }
 0x55a   :  { %v16319_v20 = vld [vmem:[#allocation2 + $0x1d94] sm:$0xf]  ;;  %v13867_v39 = vor.u32 %v16063_v25, %v13864_v31  ;;  %8932 = vmatpush.bf16.msra.mxu3 %v13355_v38  ;;  %v8679_v25 = vpop.f32.mrf.mxu3  ;;  %v11567_v38 = vor.u32 %v15496_v28, %v11566_v0  ;;  %v12910_v0 = vld [vmem:[#allocation2 + $0xe18] sm:$0xf] }
 0x55b   :  { %v14888_v32 = vld [vmem:[#allocation2 + $0x1dd0] sm:$0xf0]  ;;  %v15832_v28 = vld [vmem:[#allocation2 + $0xe54] sm:$0xf0] }
 0x55c   :  { %v16191_v36 = vld [vmem:[#allocation2 + $0x1994] sm:$0xf]  ;;  %v14891_v43 = vor.u32 %v16319_v20, %v14888_v32  ;;  %8945 = vmatpush.bf16.msrb.mxu0 %v13867_v39  ;;  %v3207_v39 = vperm.slane %v17313_v50, 3  ;;  %v15704_v25 = vld [vmem:[#allocation2 + $0xa54] sm:$0xf0] }
 0x55d   :  { %v14376_v37 = vld [vmem:[#allocation2 + $0x19d0] sm:$0xf0] }
 0x55e   :  { %v15919_v40 = vld [vmem:[#allocation2 + $0x1114] sm:$0xf]  ;;  %v14379_v52 = vor.u32 %v16191_v36, %v14376_v37  ;;  %8971 = vmatpush.bf16.msrb.mxu2 %v14891_v43  ;;  %v8718_v36 = vpop.f32.mrf.mxu2  ;;  %v15752_v43 = vld [vmem:[#allocation2 + $0xbd4] sm:$0xf0] }
 0x55f   :  { %v13288_v46 = vld [vmem:[#allocation2 + $0x1150] sm:$0xf0]  ;;  %v11822_v36 = vld [vmem:[#allocation2 + $0x598] sm:$0xf] }
 0x560   :  { %v16047_v49 = vld [vmem:[#allocation2 + $0x1514] sm:$0xf]  ;;  %v13291_v58 = vor.u32 %v15919_v40, %v13288_v46  ;;  %8958 = vmatpush.bf16.msrb.mxu1 %v14379_v52  ;;  %v12590_v40 = vld [vmem:[#allocation2 + $0xb98] sm:$0xf]  ;;  %v12079_v46 = vor.u32 %v15624_v59, %v12078_v29 }
 0x561   :  { %v13800_v51 = vld [vmem:[#allocation2 + $0x1550] sm:$0xf0]  ;;  %v15480_v52 = vld [vmem:[#allocation2 + $0x354] sm:$0xf0] }
 0x562   :  { %v16303_v53 = vld [vmem:[#allocation2 + $0x1d14] sm:$0xf]  ;;  %v13803_v63 = vor.u32 %v16047_v49, %v13800_v51  ;;  %8933 = vmatpush.bf16.msra.mxu3 %v13291_v58  ;;  %v13103_v49 = vor.u32 %v15880_v30, %v13102_v24  ;;  %v11502_v51 = vld [vmem:[#allocation2 + $0x318] sm:$0xf] }
 0x563   :  { %v14824_v44 = vld [vmem:[#allocation2 + $0x1d50] sm:$0xf0]  ;;  %v15864_v58 = vld [vmem:[#allocation2 + $0xf54] sm:$0xf0]  ;;  %v11503_v50 = vor.u32 %v15480_v52, %v11502_v51 }
 0x564   :  { %v16175_v54 = vld [vmem:[#allocation2 + $0x1914] sm:$0xf]  ;;  %v14827_v5 = vor.u32 %v16303_v53, %v14824_v44  ;;  %8946 = vmatpush.bf16.msrb.mxu0 %v13803_v63  ;;  %v12014_v53 = vld [vmem:[#allocation2 + $0x718] sm:$0xf]  ;;  %v12591_v63 = vor.u32 %v15752_v43, %v12590_v40  ;;  %v8742_v43 = vpop.f32.mrf.mxu0 }
 0x565   :  { %v14312_v34 = vld [vmem:[#allocation2 + $0x1950] sm:$0xf0]  ;;  %v12398_v30 = vld [vmem:[#allocation2 + $0xa18] sm:$0xf] }
 0x566   :  { %v15903_v1 = vld [vmem:[#allocation2 + $0x1094] sm:$0xf]  ;;  %v14315_v8 = vor.u32 %v16175_v54, %v14312_v34  ;;  %8972 = vmatpush.bf16.msrb.mxu2 %v14827_v5  ;;  %v15608_v54 = vld [vmem:[#allocation2 + $0x754] sm:$0xf0]  ;;  %v12399_v40 = vor.u32 %v15704_v25, %v12398_v30 }
 0x567   :  { %v13224_v6 = vld [vmem:[#allocation2 + $0x10d0] sm:$0xf0]  ;;  %v13038_v34 = vld [vmem:[#allocation2 + $0xf18] sm:$0xf] }
 0x568   :  { %v16031_v48 = vld [vmem:[#allocation2 + $0x1494] sm:$0xf]  ;;  %v13227_v61 = vor.u32 %v15903_v1, %v13224_v6  ;;  %8959 = vmatpush.bf16.msrb.mxu1 %v14315_v8  ;;  %v8678_v1 = vadd.f32 %v17343_v57, %v3207_v39  ;;  %v12526_v5 = vld [vmem:[#allocation2 + $0xb18] sm:$0xf]  ;;  %v10022_v57 = vmax.f32 %v17333_v26, 0.0 }
 0x569   :  { %v13736_v62 = vld [vmem:[#allocation2 + $0x14d0] sm:$0xf0]  ;;  %v15736_v6 = vld [vmem:[#allocation2 + $0xb54] sm:$0xf0] }
 0x56a   :  { %v16287_v9 = vld [vmem:[#allocation2 + $0x1c94] sm:$0xf]  ;;  %v13739_v45 = vor.u32 %v16031_v48, %v13736_v62  ;;  %8934 = vmatpush.bf16.msra.mxu3 %v13227_v61  ;;  %v12015_v48 = vor.u32 %v15608_v54, %v12014_v53  ;;  %v13039_v62 = vor.u32 %v15864_v58, %v13038_v34  ;;  %v11438_v8 = vld [vmem:[#allocation2 + $0x298] sm:$0xf]  ;;  %v12527_v61 = vor.u32 %v15736_v6, %v12526_v5  ;;  %v8755_v58 = vpop.f32.mrf.mxu1  ;;  %v8729_v5 = vpop.f32.mrf.mxu3 }
 0x56b   :  { %v14760_v10 = vld [vmem:[#allocation2 + $0x1cd0] sm:$0xf0]  ;;  %v17357_v29 = vmax.f32 %v10022_v57, 1e-12  ;;  %v15816_v39 = vld [vmem:[#allocation2 + $0xdd4] sm:$0xf0] }
 0x56c   :  { %v16159_v15 = vld [vmem:[#allocation2 + $0x1894] sm:$0xf]  ;;  %v14763_v35 = vor.u32 %v16287_v9, %v14760_v10  ;;  %8947 = vmatpush.bf16.msrb.mxu0 %v13739_v45  ;;  %v15464_v9 = vld [vmem:[#allocation2 + $0x2d4] sm:$0xf0]  ;;  %v8691_v45 = vadd.f32 %v17339_v13, %v8678_v1 }
 0x56d   :  { %v14248_v33 = vld [vmem:[#allocation2 + $0x18d0] sm:$0xf0]  ;;  %v11950_v10 = vld [vmem:[#allocation2 + $0x698] sm:$0xf]  ;;  %16517 = vrcp.f32 %v17357_v29  ;;  %vm10087_vm12 = vweird.f32 %v17357_v29 }
 0x56e   :  { %v15887_v41 = vld [vmem:[#allocation2 + $0x1014] sm:$0xf]  ;;  %v14251_v27 = vor.u32 %v16159_v15, %v14248_v33  ;;  %8973 = vmatpush.bf16.msrb.mxu2 %v14763_v35  ;;  %v12974_v15 = vld [vmem:[#allocation2 + $0xe98] sm:$0xf]  ;;  %v11951_v18 = vor.u32 %v15592_v11, %v11950_v10  ;;  %v8704_v59 = vadd.f32 %v17341_v42, %v8691_v45 }
 0x56f   :  { %v13160_v60 = vld [vmem:[#allocation2 + $0x1050] sm:$0xf0]  ;;  %v15848_v33 = vld [vmem:[#allocation2 + $0xed4] sm:$0xf0] }
 0x570   :  { %v16015_v17 = vld [vmem:[#allocation2 + $0x1414] sm:$0xf]  ;;  %v13163_v31 = vor.u32 %v15887_v41, %v13160_v60  ;;  %8960 = vmatpush.bf16.msrb.mxu1 %v14251_v27  ;;  %v11439_v41 = vor.u32 %v15464_v9, %v11438_v8  ;;  %v12462_v60 = vld [vmem:[#allocation2 + $0xa98] sm:$0xf]  ;;  %v12975_v35 = vor.u32 %v15848_v33, %v12974_v15  ;;  %v8717_v42 = vadd.f32 %v17345_v4, %v8704_v59  ;;  %v8768_v9 = vpop.f32.mrf.mxu2 }
 0x571   :  { %v13672_v19 = vld [vmem:[#allocation2 + $0x1450] sm:$0xf0]  ;;  %v15576_v27 = vld [vmem:[#allocation2 + $0x654] sm:$0xf0] }
 0x572   :  { %v16271_v21 = vld [vmem:[#allocation2 + $0x1c14] sm:$0xf]  ;;  %v13675_v47 = vor.u32 %v16015_v17, %v13672_v19  ;;  %8935 = vmatpush.bf16.msra.mxu3 %v13163_v31  ;;  %v15720_v17 = vld [vmem:[#allocation2 + $0xad4] sm:$0xf0]  ;;  %v8730_v4 = vadd.f32 %v8729_v5, %v8717_v42 }
 0x573   :  { %v14696_v22 = vld [vmem:[#allocation2 + $0x1c50] sm:$0xf0]  ;;  %v11374_v19 = vld [vmem:[#allocation2 + $0x218] sm:$0xf]  ;;  %v12463_v13 = vor.u32 %v15720_v17, %v12462_v60  ;;  %v17362_v45 = vpop.eup %16517 }
 0x574   :  { %v16143_v20 = vld [vmem:[#allocation2 + $0x1814] sm:$0xf]  ;;  %v14699_v37 = vor.u32 %v16271_v21, %v14696_v22  ;;  %8948 = vmatpush.bf16.msrb.mxu0 %v13675_v47  ;;  %v15448_v21 = vld [vmem:[#allocation2 + $0x254] sm:$0xf0]  ;;  %v12911_v47 = vor.u32 %v15832_v28, %v12910_v0  ;;  %vm10088_vm13 = vweird.f32 %v17362_v45 }
 0x575   :  { %v14184_v32 = vld [vmem:[#allocation2 + $0x1850] sm:$0xf0]  ;;  %8936 = vmatmul.bf16.vlgmr.msra.gmra.mxu3 %v17208_v7  ;;  %v11886_v22 = vld [vmem:[#allocation2 + $0x618] sm:$0xf]  ;;  %v11375_v24 = vor.u32 %v15448_v21, %v11374_v19  ;;  %vm17392_vm14 = vmor %vm10087_vm12, %vm10088_vm13 }
 0x576   :  { %v14187_v44 = vor.u32 %v16143_v20, %v14184_v32  ;;  %8974 = vmatpush.bf16.msrb.mxu2 %v14699_v37  ;;  %8980 = vmatpush.bf16.msrb.mxu3 %v11567_v38  ;;  %v11887_v31 = vor.u32 %v15576_v27, %v11886_v22  ;;  %v11310_v20 = vld [vmem:[#allocation2 + $0x198] sm:$0xf]  ;;  %v8744_v22 = vpop.f32.mrf.mxu0 }
 0x577   :  { %8949 = vmatmul.bf16.vlgmr.msrb.gmra.mxu0 %v17212_v16  ;;  %v15432_v32 = vld [vmem:[#allocation2 + $0x1d4] sm:$0xf0] }
 0x578   :  { %8993 = vmatpush.bf16.msra.mxu0 %v12079_v46  ;;  %8961 = vmatpush.bf16.msrb.mxu1 %v14187_v44  ;;  %v15560_v37 = vld [vmem:[#allocation2 + $0x5d4] sm:$0xf0]  ;;  %v11311_v46 = vor.u32 %v15432_v32, %v11310_v20  ;;  %v8757_v32 = vpop.f32.mrf.mxu1 }
 0x579   :  { %8975 = vmatmul.bf16.vlgmr.msrb.gmra.mxu2 %v17210_v12  ;;  %v12846_v38 = vld [vmem:[#allocation2 + $0xd98] sm:$0xf]  ;;  %v11823_v52 = vor.u32 %v15560_v37, %v11822_v36 }
 0x57a   :  { %9019 = vmatpush.bf16.msra.mxu2 %v13103_v49  ;;  %8981 = vmatpush.bf16.msrb.mxu3 %v11503_v50  ;;  %v12334_v49 = vld [vmem:[#allocation2 + $0x998] sm:$0xf]  ;;  %v12847_v53 = vor.u32 %v15816_v39, %v12846_v38 }
 0x57b   :  { %8962 = vmatmul.bf16.vlgmr.msrb.gmra.mxu1 %v17215_v23  ;;  %v15688_v51 = vld [vmem:[#allocation2 + $0x9d4] sm:$0xf0] }
 0x57c   :  { %9006 = vmatpush.bf16.msra.mxu1 %v12591_v63  ;;  %8994 = vmatpush.bf16.msra.mxu0 %v12015_v48  ;;  %v11246_v44 = vld [vmem:[#allocation2 + $0x118] sm:$0xf]  ;;  %v12335_v6 = vor.u32 %v15688_v51, %v12334_v49  ;;  %v8731_v49 = vpop.f32.mrf.mxu3 }
 0x57d   :  { %v15416_v54 = vld [vmem:[#allocation2 + $0x154] sm:$0xf0] }
 0x57e   :  { %9020 = vmatpush.bf16.msra.mxu2 %v13039_v62  ;;  %8982 = vmatpush.bf16.msrb.mxu3 %v11439_v41  ;;  %v11758_v34 = vld [vmem:[#allocation2 + $0x518] sm:$0xf]  ;;  %v11247_v48 = vor.u32 %v15416_v54, %v11246_v44  ;;  %v8743_v41 = vadd.f32 %v8742_v43, %v8730_v4  ;;  %v8770_v54 = vpop.f32.mrf.mxu2 }
 0x57f   :  { %v15544_v63 = vld [vmem:[#allocation2 + $0x554] sm:$0xf0] }
 0x580   :  { %9007 = vmatpush.bf16.msra.mxu1 %v12527_v61  ;;  %8995 = vmatpush.bf16.msra.mxu0 %v11951_v18  ;;  %v12782_v1 = vld [vmem:[#allocation2 + $0xd18] sm:$0xf]  ;;  %v11759_v10 = vor.u32 %v15544_v63, %v11758_v34  ;;  %v8756_v27 = vadd.f32 %v8755_v58, %v8743_v41 }
 0x581   :  { %v15800_v50 = vld [vmem:[#allocation2 + $0xd54] sm:$0xf0] }
 0x582   :  { %9021 = vmatpush.bf16.msra.mxu2 %v12975_v35  ;;  %8983 = vmatpush.bf16.msrb.mxu3 %v11375_v24  ;;  %v12270_v62 = vld [vmem:[#allocation2 + $0x918] sm:$0xf]  ;;  %v12783_v11 = vor.u32 %v15800_v50, %v12782_v1  ;;  %v10083_v24 = vmul.f32 %v17362_v45, %v17357_v29  ;;  %v17366_v36 = vadd.f32 %v8768_v9, %v8756_v27 }
 0x583   :  { %v15672_v8 = vld [vmem:[#allocation2 + $0x954] sm:$0xf0] }
 0x584   :  { %9008 = vmatpush.bf16.msra.mxu1 %v12463_v13  ;;  %8996 = vmatpush.bf16.msra.mxu0 %v11887_v31  ;;  %v11182_v15 = vld [vmem:[#allocation2 + $0x98] sm:$0xf]  ;;  %v12271_v35 = vor.u32 %v15672_v8, %v12270_v62  ;;  %v10023_v51 = vmax.f32 %v17366_v36, 0.0  ;;  %v10084_v34 = vsub.f32 1.0, %v10083_v24 }
 0x585   :  { %v15400_v33 = vld [vmem:[#allocation2 + $0xd4] sm:$0xf0] }
 0x586   :  { %9022 = vmatpush.bf16.msra.mxu2 %v12911_v47  ;;  %8984 = vmatpush.bf16.msrb.mxu3 %v11311_v46  ;;  %v11694_v61 = vld [vmem:[#allocation2 + $0x498] sm:$0xf]  ;;  %v11183_v0 = vor.u32 %v15400_v33, %v11182_v15  ;;  %v17371_v5 = vmax.f32 %v10023_v51, 1e-12  ;;  %v10085_v41 = vmul.f32 %v17362_v45, %v10084_v34 }
 0x587   :  { %v15528_v60 = vld [vmem:[#allocation2 + $0x4d4] sm:$0xf0] }
 0x588   :  { %9009 = vmatpush.bf16.msra.mxu1 %v12399_v40  ;;  %8997 = vmatpush.bf16.msra.mxu0 %v11823_v52  ;;  %v12718_v17 = vld [vmem:[#allocation2 + $0xc98] sm:$0xf]  ;;  %v11695_v30 = vor.u32 %v15528_v60, %v11694_v61  ;;  %16519 = vrcp.f32 %v17371_v5  ;;  %vm10102_vm0 = vweird.f32 %v17371_v5 }
 0x589   :  { %v15784_v18 = vld [vmem:[#allocation2 + $0xcd4] sm:$0xf0] }
 0x58a   :  { %9023 = vmatpush.bf16.msra.mxu2 %v12847_v53  ;;  %v12206_v19 = vld [vmem:[#allocation2 + $0x898] sm:$0xf]  ;;  %8985 = vmatpush.bf16.msrb.mxu3 %v11247_v48  ;;  %v12719_v25 = vor.u32 %v15784_v18, %v12718_v17 }
 0x58b   :  { %v15656_v21 = vld [vmem:[#allocation2 + $0x8d4] sm:$0xf0] }
 0x58c   :  { %9010 = vmatpush.bf16.msra.mxu1 %v12335_v6  ;;  %v11118_v28 = vld [vmem:[#allocation2 + $0x18] sm:$0xf]  ;;  %8998 = vmatpush.bf16.msra.mxu0 %v11759_v10  ;;  %v12207_v40 = vor.u32 %v15656_v21, %v12206_v19 }
 0x58d   :  { %v15384_v13 = vld [vmem:[#allocation2 + $0x54] sm:$0xf0] }
 0x58e   :  { %v11630_v59 = vld [vmem:[#allocation2 + $0x418] sm:$0xf]  ;;  %9024 = vmatpush.bf16.msra.mxu2 %v12783_v11  ;;  %8986 = vmatpush.bf16.msrb.mxu3 %v11183_v0  ;;  %v11119_v52 = vor.u32 %v15384_v13, %v11118_v28  ;;  %v10091_v28 = vand.u32 2147483647, %v17357_v29 }
 0x58f   :  { %v15512_v31 = vld [vmem:[#allocation2 + $0x454] sm:$0xf0] }
 0x590   :  { %v12654_v47 = vld [vmem:[#allocation2 + $0xc18] sm:$0xf]  ;;  %9011 = vmatpush.bf16.msra.mxu1 %v12271_v35  ;;  %8999 = vmatpush.bf16.msra.mxu0 %v11695_v30  ;;  %v11631_v58 = vor.u32 %v15512_v31, %v11630_v59  ;;  %v10086_v30 = vadd.f32 %v17362_v45, %v10085_v41  ;;  %vm17396_vm15 = vcmp.eq.f32.partialorder %v10091_v28, 8.507059e+37 }
 0x591   :  { %v15768_v20 = vld [vmem:[#allocation2 + $0xc54] sm:$0xf0] }
 0x592   :  { %v13614_v37 = vld [vmem:[#allocation2 + $0x1398] sm:$0xf]  ;;  %9025 = vmatpush.bf16.msra.mxu2 %v12719_v25  ;;  %v12655_v63 = vor.u32 %v15768_v20, %v12654_v47  ;;  %8987 = vmatpush.bf16.msrb.mxu3 %v11119_v52  ;;  %v10093_v25 = vand.u32 2147483648, %v17357_v29  ;;  %v17383_v20 = vpop.eup %16519  ;;  %v10090_v34 = vsel %vm17392_vm14, %v17362_v45, %v10086_v30  ;;  %v10108_v29 = vand.u32 2147483648, %v17371_v5 }
 0x593   :  { %v16008_v38 = vld [vmem:[#allocation2 + $0x13d4] sm:$0xf0]  ;;  %vm10103_vm4 = vweird.f32 %v17383_v20  ;;  %v10106_v45 = vand.u32 2147483647, %v17371_v5 }
 0x594   :  { %v14126_v39 = vld [vmem:[#allocation2 + $0x1798] sm:$0xf]  ;;  %v13615_v6 = vor.u32 %v16008_v38, %v13614_v37  ;;  %9012 = vmatpush.bf16.msra.mxu1 %v12207_v40  ;;  %9000 = vmatpush.bf16.msra.mxu0 %v11631_v58  ;;  %v10094_v58 = vor.u32 1.1754944e-38, %v10093_v25  ;;  %vm17413_vm5 = vmor %vm10102_vm0, %vm10103_vm4 }
 0x595   :  { %v16136_v43 = vld [vmem:[#allocation2 + $0x17d4] sm:$0xf0]  ;;  %8988 = vmatmul.bf16.vlgmr.msrb.gmra.mxu3 %v17196_v55  ;;  %vm10107_vm6 = vcmp.eq.f32.partialorder %v10106_v45, 8.507059e+37 }
 0x596   :  { %v15150_v42 = vld [vmem:[#allocation2 + $0x1f98] sm:$0xf]  ;;  %v14127_v4 = vor.u32 %v16136_v43, %v14126_v39  ;;  %9026 = vmatpush.bf16.msra.mxu2 %v12655_v63  ;;  %9032 = vmatpush.bf16.msra.mxu3 %v13615_v6  ;;  %v10098_v43 = vmul.f32 %v17383_v20, %v17371_v5 }
 0x597   :  { %v16392_v46 = vld [vmem:[#allocation2 + $0x1fd4] sm:$0xf0]  ;;  %9001 = vmatmul.bf16.vlgmr.msra.gmra.mxu0 %v17200_v2 }
 0x598   :  { %v12142_v53 = vld [vmem:[#allocation2 + $0x818] sm:$0xf]  ;;  %v15151_v62 = vor.u32 %v16392_v46, %v15150_v42  ;;  %9045 = vmatpush.bf16.msrb.mxu0 %v14127_v4  ;;  %v10099_v63 = vsub.f32 1.0, %v10098_v43 }
 0x599   :  { %v15640_v44 = vld [vmem:[#allocation2 + $0x854] sm:$0xf0]  ;;  %9027 = vmatmul.bf16.vlgmr.msra.gmra.mxu2 %v17198_v56 }
 0x59a   :  { %v14638_v1 = vld [vmem:[#allocation2 + $0x1b98] sm:$0xf]  ;;  %v12143_v8 = vor.u32 %v15640_v44, %v12142_v53  ;;  %9071 = vmatpush.bf16.msrb.mxu2 %v15151_v62  ;;  %v8820_v53 = vpop.f32.mrf.mxu2 }
 0x59b   :  { %v16264_v50 = vld [vmem:[#allocation2 + $0x1bd4] sm:$0xf0] }
 0x59c   :  { %v13550_v48 = vld [vmem:[#allocation2 + $0x1318] sm:$0xf]  ;;  %v14639_v15 = vor.u32 %v16264_v50, %v14638_v1  ;;  %9013 = vmatpush.bf16.msra.mxu1 %v12143_v8 }
 0x59d   :  { %v15992_v9 = vld [vmem:[#allocation2 + $0x1354] sm:$0xf0] }
 0x59e   :  { %v14062_v10 = vld [vmem:[#allocation2 + $0x1718] sm:$0xf]  ;;  %v13551_v18 = vor.u32 %v15992_v9, %v13550_v48  ;;  %v10100_v9 = vmul.f32 %v17383_v20, %v10099_v63 }
 0x59f   :  { %v16120_v11 = vld [vmem:[#allocation2 + $0x1754] sm:$0xf0]  ;;  %9014 = vmatmul.bf16.vlgmr.msra.gmra.mxu1 %v17202_v3 }
 0x5a0   :  { %v15086_v33 = vld [vmem:[#allocation2 + $0x1f18] sm:$0xf]  ;;  %v14063_v35 = vor.u32 %v16120_v11, %v14062_v10  ;;  %9058 = vmatpush.bf16.msrb.mxu1 %v14639_v15  ;;  %9033 = vmatpush.bf16.msra.mxu3 %v13551_v18  ;;  %v10095_v15 = vsel %vm17396_vm15, %v10094_v58, %v10090_v34 }
 0x5a1   :  { %v16376_v61 = vld [vmem:[#allocation2 + $0x1f54] sm:$0xf0]  ;;  %v10096_v30 = vmul.f32 %v10095_v15, %v10022_v57  ;;  %v8781_v57 = vpop.f32.mrf.mxu3 }
 0x5a2   :  { %v14574_v60 = vld [vmem:[#allocation2 + $0x1b18] sm:$0xf]  ;;  %v15087_v21 = vor.u32 %v16376_v61, %v15086_v33  ;;  %9046 = vmatpush.bf16.msrb.mxu0 %v14063_v35 }
 0x5a3   :  { %v16248_v17 = vld [vmem:[#allocation2 + $0x1b54] sm:$0xf0]  ;;  %v10309_v44 = vrot.slane %v10096_v30, 4 }
 0x5a4   :  { %v13486_v19 = vld [vmem:[#allocation2 + $0x1298] sm:$0xf]  ;;  %v14575_v13 = vor.u32 %v16248_v17, %v14574_v60  ;;  %9072 = vmatpush.bf16.msrb.mxu2 %v15087_v21  ;;  %v8794_v60 = vpop.f32.mrf.mxu0  ;;  %v10101_v17 = vadd.f32 %v17383_v20, %v10100_v9  ;;  %v10109_v21 = vor.u32 1.1754944e-38, %v10108_v29 }
 0x5a5   :  { %v15976_v22 = vld [vmem:[#allocation2 + $0x12d4] sm:$0xf0] }
 0x5a6   :  { %v13998_v27 = vld [vmem:[#allocation2 + $0x1698] sm:$0xf]  ;;  %v13487_v32 = vor.u32 %v15976_v22, %v13486_v19  ;;  %9059 = vmatpush.bf16.msrb.mxu1 %v14575_v13  ;;  %v10105_v5 = vsel %vm17413_vm5, %v17383_v20, %v10101_v17  ;;  %v15616_v19 = vld [vmem:[#allocation2 + $0x79c] sm:$0xf] }
 0x5a7   :  { %v16104_v0 = vld [vmem:[#allocation2 + $0x16d4] sm:$0xf0] }
 0x5a8   :  { %v15022_v59 = vld [vmem:[#allocation2 + $0x1e98] sm:$0xf]  ;;  %v13999_v37 = vor.u32 %v16104_v0, %v13998_v27  ;;  %9034 = vmatpush.bf16.msra.mxu3 %v13487_v32  ;;  %v10110_v32 = vsel %vm10107_vm6, %v10109_v21, %v10105_v5 }
 0x5a9   :  { %v16360_v24 = vld [vmem:[#allocation2 + $0x1ed4] sm:$0xf0] }
 0x5aa   :  { %v14510_v31 = vld [vmem:[#allocation2 + $0x1a98] sm:$0xf]  ;;  %v15023_v42 = vor.u32 %v16360_v24, %v15022_v59  ;;  %9047 = vmatpush.bf16.msrb.mxu0 %v13999_v37  ;;  %v8807_v24 = vpop.f32.mrf.mxu1 }
 0x5ab   :  { %v16232_v47 = vld [vmem:[#allocation2 + $0x1ad4] sm:$0xf0] }
 0x5ac   :  { %v13422_v38 = vld [vmem:[#allocation2 + $0x1218] sm:$0xf]  ;;  %v14511_v54 = vor.u32 %v16232_v47, %v14510_v31  ;;  %9073 = vmatpush.bf16.msrb.mxu2 %v15023_v42  ;;  %v8796_v29 = vpop.f32.mrf.mxu0 }
 0x5ad   :  { %v15960_v39 = vld [vmem:[#allocation2 + $0x1254] sm:$0xf0] }
 0x5ae   :  { %v13934_v40 = vld [vmem:[#allocation2 + $0x1618] sm:$0xf]  ;;  %v13423_v6 = vor.u32 %v15960_v39, %v13422_v38  ;;  %9060 = vmatpush.bf16.msrb.mxu1 %v14511_v54 }
 0x5af   :  { %v16088_v46 = vld [vmem:[#allocation2 + $0x1654] sm:$0xf0] }
 0x5b0   :  { %v14958_v49 = vld [vmem:[#allocation2 + $0x1e18] sm:$0xf]  ;;  %v13935_v4 = vor.u32 %v16088_v46, %v13934_v40  ;;  %9035 = vmatpush.bf16.msra.mxu3 %v13423_v6  ;;  %v10111_v40 = vmul.f32 %v10110_v32, %v10023_v51  ;;  %v15744_v32 = vld [vmem:[#allocation2 + $0xb9c] sm:$0xf] }
 0x5b1   :  { %v16344_v52 = vld [vmem:[#allocation2 + $0x1e54] sm:$0xf0] }
 0x5b2   :  { %v14446_v1 = vld [vmem:[#allocation2 + $0x1a18] sm:$0xf]  ;;  %v14959_v48 = vor.u32 %v16344_v52, %v14958_v49  ;;  %9048 = vmatpush.bf16.msrb.mxu0 %v13935_v4  ;;  %v10310_v54 = vrot.slane %v10111_v40, 2  ;;  %v15472_v40 = vld [vmem:[#allocation2 + $0x31c] sm:$0xf] }
 0x5b3   :  { %v16216_v50 = vld [vmem:[#allocation2 + $0x1a54] sm:$0xf0] }
 0x5b4   :  { %v13358_v62 = vld [vmem:[#allocation2 + $0x1198] sm:$0xf]  ;;  %v14447_v33 = vor.u32 %v16216_v50, %v14446_v1  ;;  %9074 = vmatpush.bf16.msrb.mxu2 %v14959_v48  ;;  %v10321_v6 = vsel %vm2125_vm2, %v10309_v44, %v10310_v54  ;;  %v12528_v44 = vld [vmem:[#allocation2 + $0xb58] sm:$0xf0] }
 0x5b5   :  { %v15944_v8 = vld [vmem:[#allocation2 + $0x11d4] sm:$0xf0] }
 0x5b6   :  { %v13870_v10 = vld [vmem:[#allocation2 + $0x1598] sm:$0xf]  ;;  %v13359_v22 = vor.u32 %v15944_v8, %v13358_v62  ;;  %9061 = vmatpush.bf16.msrb.mxu1 %v14447_v33  ;;  %v10322_v8 = vsel %vm814_vm3, %v17324_v14, %v10321_v6  ;;  %v8809_v33 = vpop.f32.mrf.mxu1  ;;  %v15488_v14 = vld [vmem:[#allocation2 + $0x39c] sm:$0xf] }
 0x5b7   :  { %v16072_v11 = vld [vmem:[#allocation2 + $0x15d4] sm:$0xf0]  ;;  %10336 = vst [vmem:[%s17872_s13] sm:$0xff] %v10322_v8  ;;  %v12912_v33 = vld [vmem:[#allocation2 + $0xe58] sm:$0xf0] }
 0x5b8   :  { %v14894_v61 = vld [vmem:[#allocation2 + $0x1d98] sm:$0xf]  ;;  %v13871_v27 = vor.u32 %v16072_v11, %v13870_v10  ;;  %9036 = vmatpush.bf16.msra.mxu3 %v13359_v22  ;;  %v12080_v22 = vld [vmem:[#allocation2 + $0x7d8] sm:$0xf0] }
 0x5b9   :  { %v16328_v41 = vld [vmem:[#allocation2 + $0x1dd4] sm:$0xf0] }
 0x5ba   :  { %v14382_v18 = vld [vmem:[#allocation2 + $0x1998] sm:$0xf]  ;;  %v14895_v25 = vor.u32 %v16328_v41, %v14894_v61  ;;  %9049 = vmatpush.bf16.msrb.mxu0 %v13871_v27  ;;  %v15872_v27 = vld [vmem:[#allocation2 + $0xf9c] sm:$0xf] }
 0x5bb   :  { %v16200_v35 = vld [vmem:[#allocation2 + $0x19d4] sm:$0xf0] }
 0x5bc   :  { %v13294_v0 = vld [vmem:[#allocation2 + $0x1118] sm:$0xf]  ;;  %v14383_v37 = vor.u32 %v16200_v35, %v14382_v18  ;;  %9075 = vmatpush.bf16.msrb.mxu2 %v14895_v25  ;;  %v11568_v35 = vld [vmem:[#allocation2 + $0x3d8] sm:$0xf0]  ;;  %v8822_v25 = vpop.f32.mrf.mxu2 }
 0x5bd   :  { %v15928_v28 = vld [vmem:[#allocation2 + $0x1154] sm:$0xf0]  ;;  %v12336_v25 = vld [vmem:[#allocation2 + $0x9d8] sm:$0xf0] }
 0x5be   :  { %v17417_v13 = vld [vmem:[#allocation30] sm:$0xff]  ;;  %v13295_v42 = vor.u32 %v15928_v28, %v13294_v0  ;;  %9062 = vmatpush.bf16.msrb.mxu1 %v14383_v37  ;;  %v13104_v0 = vld [vmem:[#allocation2 + $0xfd8] sm:$0xf0]  ;;  %v8783_v28 = vpop.f32.mrf.mxu3 }
 0x5bf   :  { %v3208_v59 = vperm.slane %v17417_v13, 4  ;;  %v13806_v31 = vld [vmem:[#allocation2 + $0x1518] sm:$0xf]  ;;  %v12592_v37 = vld [vmem:[#allocation2 + $0xbd8] sm:$0xf0] }
 0x5c0   :  { %v16056_v47 = vld [vmem:[#allocation2 + $0x1554] sm:$0xf0]  ;;  %9037 = vmatpush.bf16.msra.mxu3 %v13295_v42  ;;  %v12016_v42 = vld [vmem:[#allocation2 + $0x758] sm:$0xf0] }
 0x5c1   :  { %v14830_v38 = vld [vmem:[#allocation2 + $0x1d18] sm:$0xf]  ;;  %v13807_v20 = vor.u32 %v16056_v47, %v13806_v31  ;;  %v8782_v52 = vadd.f32 %v8781_v57, %v3208_v59  ;;  %v11571_v47 = vor.u32 %v15488_v14, %v11568_v35  ;;  %v15424_v35 = vld [vmem:[#allocation2 + $0x19c] sm:$0xf] }
 0x5c2   :  { %v16312_v39 = vld [vmem:[#allocation2 + $0x1d54] sm:$0xf0]  ;;  %v12848_v28 = vld [vmem:[#allocation2 + $0xdd8] sm:$0xf0] }
 0x5c3   :  { %v14318_v43 = vld [vmem:[#allocation2 + $0x1918] sm:$0xf]  ;;  %v14831_v34 = vor.u32 %v16312_v39, %v14830_v38  ;;  %v8795_v50 = vadd.f32 %v8794_v60, %v8782_v52  ;;  %9050 = vmatpush.bf16.msrb.mxu0 %v13807_v20  ;;  %v12083_v38 = vor.u32 %v15616_v19, %v12080_v22  ;;  %v13107_v39 = vor.u32 %v15872_v27, %v13104_v0  ;;  %v15856_v20 = vld [vmem:[#allocation2 + $0xf1c] sm:$0xf] }
 0x5c4   :  { %v16184_v26 = vld [vmem:[#allocation2 + $0x1954] sm:$0xf0]  ;;  %v11312_v19 = vld [vmem:[#allocation2 + $0x1d8] sm:$0xf0] }
 0x5c5   :  { %v13230_v46 = vld [vmem:[#allocation2 + $0x1098] sm:$0xf]  ;;  %v14319_v36 = vor.u32 %v16184_v26, %v14318_v43  ;;  %v8808_v15 = vadd.f32 %v8807_v24, %v8795_v50  ;;  %9076 = vmatpush.bf16.msrb.mxu2 %v14831_v34  ;;  %v11504_v43 = vld [vmem:[#allocation2 + $0x358] sm:$0xf0] }
 0x5c6   :  { %v15912_v49 = vld [vmem:[#allocation2 + $0x10d4] sm:$0xf0]  ;;  %v15600_v26 = vld [vmem:[#allocation2 + $0x71c] sm:$0xf]  ;;  %v11507_v52 = vor.u32 %v15472_v40, %v11504_v43 }
 0x5c7   :  { %v13742_v58 = vld [vmem:[#allocation2 + $0x1498] sm:$0xf]  ;;  %v13231_v4 = vor.u32 %v15912_v49, %v13230_v46  ;;  %9063 = vmatpush.bf16.msrb.mxu1 %v14319_v36  ;;  %v17433_v21 = vadd.f32 %v8820_v53, %v8808_v15  ;;  %v13040_v46 = vld [vmem:[#allocation2 + $0xf58] sm:$0xf0]  ;;  %v12595_v49 = vor.u32 %v15744_v32, %v12592_v37  ;;  %v12019_v54 = vor.u32 %v15600_v26, %v12016_v42 }
 0x5c8   :  { %v16040_v63 = vld [vmem:[#allocation2 + $0x14d4] sm:$0xf0]  ;;  %v15728_v53 = vld [vmem:[#allocation2 + $0xb1c] sm:$0xf]  ;;  %v13043_v34 = vor.u32 %v15856_v20, %v13040_v46 }
 0x5c9   :  { %v14766_v51 = vld [vmem:[#allocation2 + $0x1c98] sm:$0xf]  ;;  %v13743_v9 = vor.u32 %v16040_v63, %v13742_v58  ;;  %9038 = vmatpush.bf16.msra.mxu3 %v13231_v4  ;;  %v15456_v58 = vld [vmem:[#allocation2 + $0x29c] sm:$0xf]  ;;  %v12531_v29 = vor.u32 %v15728_v53, %v12528_v44  ;;  %v8872_v53 = vpop.f32.mrf.mxu2 }
 0x5ca   :  { %v16296_v1 = vld [vmem:[#allocation2 + $0x1cd4] sm:$0xf0]  ;;  %v11440_v63 = vld [vmem:[#allocation2 + $0x2d8] sm:$0xf0] }
 0x5cb   :  { %v14254_v48 = vld [vmem:[#allocation2 + $0x1898] sm:$0xf]  ;;  %v14767_v61 = vor.u32 %v16296_v1, %v14766_v51  ;;  %9051 = vmatpush.bf16.msrb.mxu0 %v13743_v9  ;;  %v15584_v36 = vld [vmem:[#allocation2 + $0x69c] sm:$0xf]  ;;  %v11443_v6 = vor.u32 %v15456_v58, %v11440_v63 }
 0x5cc   :  { %v16168_v62 = vld [vmem:[#allocation2 + $0x18d4] sm:$0xf0]  ;;  %v11952_v51 = vld [vmem:[#allocation2 + $0x6d8] sm:$0xf0] }
 0x5cd   :  { %v13166_v45 = vld [vmem:[#allocation2 + $0x1018] sm:$0xf]  ;;  %v14255_v18 = vor.u32 %v16168_v62, %v14254_v48  ;;  %9077 = vmatpush.bf16.msrb.mxu2 %v14767_v61  ;;  %v15840_v1 = vld [vmem:[#allocation2 + $0xe9c] sm:$0xf]  ;;  %v11955_v62 = vor.u32 %v15584_v36, %v11952_v51 }
 0x5ce   :  { %v15896_v10 = vld [vmem:[#allocation2 + $0x1054] sm:$0xf0]  ;;  %v12976_v50 = vld [vmem:[#allocation2 + $0xed8] sm:$0xf0] }
 0x5cf   :  { %v13678_v11 = vld [vmem:[#allocation2 + $0x1418] sm:$0xf]  ;;  %v13167_v59 = vor.u32 %v15896_v10, %v13166_v45  ;;  %9064 = vmatpush.bf16.msrb.mxu1 %v14255_v18  ;;  %v15712_v4 = vld [vmem:[#allocation2 + $0xa9c] sm:$0xf]  ;;  %v12979_v8 = vor.u32 %v15840_v1, %v12976_v50 }
 0x5d0   :  { %v16024_v41 = vld [vmem:[#allocation2 + $0x1454] sm:$0xf0]  ;;  %v12464_v48 = vld [vmem:[#allocation2 + $0xad8] sm:$0xf0] }
 0x5d1   :  { %v14702_v60 = vld [vmem:[#allocation2 + $0x1c18] sm:$0xf]  ;;  %v13679_v24 = vor.u32 %v16024_v41, %v13678_v11  ;;  %9039 = vmatpush.bf16.msra.mxu3 %v13167_v59  ;;  %v15440_v9 = vld [vmem:[#allocation2 + $0x21c] sm:$0xf]  ;;  %v12467_v61 = vor.u32 %v15712_v4, %v12464_v48 }
 0x5d2   :  { %v16280_v17 = vld [vmem:[#allocation2 + $0x1c54] sm:$0xf0]  ;;  %v11376_v45 = vld [vmem:[#allocation2 + $0x258] sm:$0xf0] }
 0x5d3   :  { %v14190_v30 = vld [vmem:[#allocation2 + $0x1818] sm:$0xf]  ;;  %v14703_v31 = vor.u32 %v16280_v17, %v14702_v60  ;;  %9052 = vmatpush.bf16.msrb.mxu0 %v13679_v24  ;;  %v15568_v10 = vld [vmem:[#allocation2 + $0x61c] sm:$0xf]  ;;  %v11379_v41 = vor.u32 %v15440_v9, %v11376_v45  ;;  %v8846_v24 = vpop.f32.mrf.mxu0 }
 0x5d4   :  { %v16152_v5 = vld [vmem:[#allocation2 + $0x1854] sm:$0xf0]  ;;  %9040 = vmatmul.bf16.vlgmr.msra.gmra.mxu3 %v17208_v7  ;;  %v11888_v11 = vld [vmem:[#allocation2 + $0x658] sm:$0xf0] }
 0x5d5   :  { %v14191_v57 = vor.u32 %v16152_v5, %v14190_v30  ;;  %9078 = vmatpush.bf16.msrb.mxu2 %v14703_v31  ;;  %9084 = vmatpush.bf16.msrb.mxu3 %v11571_v47  ;;  %v15824_v15 = vld [vmem:[#allocation2 + $0xe1c] sm:$0xf]  ;;  %v11891_v18 = vor.u32 %v15568_v10, %v11888_v11  ;;  %v11315_v30 = vor.u32 %v15424_v35, %v11312_v19 }
 0x5d6   :  { %9053 = vmatmul.bf16.vlgmr.msrb.gmra.mxu0 %v17212_v16  ;;  %v15696_v60 = vld [vmem:[#allocation2 + $0xa1c] sm:$0xf]  ;;  %v12915_v14 = vor.u32 %v15824_v15, %v12912_v33 }
 0x5d7   :  { %9097 = vmatpush.bf16.msra.mxu0 %v12083_v38  ;;  %9065 = vmatpush.bf16.msrb.mxu1 %v14191_v57  ;;  %v12400_v17 = vld [vmem:[#allocation2 + $0xa58] sm:$0xf0]  ;;  %v8833_v57 = vpop.f32.mrf.mxu3 }
 0x5d8   :  { %9079 = vmatmul.bf16.vlgmr.msrb.gmra.mxu2 %v17210_v12  ;;  %v15552_v22 = vld [vmem:[#allocation2 + $0x59c] sm:$0xf]  ;;  %v12403_v59 = vor.u32 %v15696_v60, %v12400_v17  ;;  %v8834_v20 = vadd.f32 %v8833_v57, %v17433_v21 }
 0x5d9   :  { %9123 = vmatpush.bf16.msra.mxu2 %v13107_v39  ;;  %9085 = vmatpush.bf16.msrb.mxu3 %v11507_v52  ;;  %v11824_v27 = vld [vmem:[#allocation2 + $0x5d8] sm:$0xf0]  ;;  %v8859_v39 = vpop.f32.mrf.mxu1 }
 0x5da   :  { %9066 = vmatmul.bf16.vlgmr.msrb.gmra.mxu1 %v17215_v23  ;;  %v15808_v0 = vld [vmem:[#allocation2 + $0xd9c] sm:$0xf]  ;;  %v11827_v31 = vor.u32 %v15552_v22, %v11824_v27  ;;  %v8847_v36 = vadd.f32 %v8846_v24, %v8834_v20 }
 0x5db   :  { %9110 = vmatpush.bf16.msra.mxu1 %v12595_v49  ;;  %9098 = vmatpush.bf16.msra.mxu0 %v12019_v54  ;;  %v15680_v5 = vld [vmem:[#allocation2 + $0x99c] sm:$0xf]  ;;  %v12851_v47 = vor.u32 %v15808_v0, %v12848_v28  ;;  %v8848_v4 = vpop.f32.mrf.mxu0 }
 0x5dc   :  { %v15408_v32 = vld [vmem:[#allocation2 + $0x11c] sm:$0xf]  ;;  %v12339_v42 = vor.u32 %v15680_v5, %v12336_v25  ;;  %v8860_v21 = vadd.f32 %v8859_v39, %v8847_v36 }
 0x5dd   :  { %9124 = vmatpush.bf16.msra.mxu2 %v13043_v34  ;;  %9086 = vmatpush.bf16.msrb.mxu3 %v11443_v6  ;;  %v11248_v37 = vld [vmem:[#allocation2 + $0x158] sm:$0xf0] }
 0x5de   :  { %v15536_v38 = vld [vmem:[#allocation2 + $0x51c] sm:$0xf]  ;;  %v11251_v46 = vor.u32 %v15408_v32, %v11248_v37 }
 0x5df   :  { %9111 = vmatpush.bf16.msra.mxu1 %v12531_v29  ;;  %9099 = vmatpush.bf16.msra.mxu0 %v11955_v62  ;;  %v11760_v40 = vld [vmem:[#allocation2 + $0x558] sm:$0xf0]  ;;  %v8835_v27 = vpop.f32.mrf.mxu3 }
 0x5e0   :  { %v15792_v43 = vld [vmem:[#allocation2 + $0xd1c] sm:$0xf]  ;;  %v11763_v44 = vor.u32 %v15536_v38, %v11760_v40 }
 0x5e1   :  { %9125 = vmatpush.bf16.msra.mxu2 %v12979_v8  ;;  %9087 = vmatpush.bf16.msrb.mxu3 %v11379_v41  ;;  %v12784_v26 = vld [vmem:[#allocation2 + $0xd58] sm:$0xf0]  ;;  %v17440_v41 = vadd.f32 %v8872_v53, %v8860_v21 }
 0x5e2   :  { %v15664_v49 = vld [vmem:[#allocation2 + $0x91c] sm:$0xf]  ;;  %v12787_v54 = vor.u32 %v15792_v43, %v12784_v26 }
 0x5e3   :  { %9112 = vmatpush.bf16.msra.mxu1 %v12467_v61  ;;  %9100 = vmatpush.bf16.msra.mxu0 %v11891_v18  ;;  %v12272_v52 = vld [vmem:[#allocation2 + $0x958] sm:$0xf0]  ;;  %v8861_v61 = vpop.f32.mrf.mxu1 }
 0x5e4   :  { %v15392_v34 = vld [vmem:[#allocation2 + $0x9c] sm:$0xf]  ;;  %v12275_v29 = vor.u32 %v15664_v49, %v12272_v52 }
 0x5e5   :  { %9126 = vmatpush.bf16.msra.mxu2 %v12915_v14  ;;  %9088 = vmatpush.bf16.msrb.mxu3 %v11315_v30  ;;  %v11184_v58 = vld [vmem:[#allocation2 + $0xd8] sm:$0xf0]  ;;  %v8874_v30 = vpop.f32.mrf.mxu2 }
 0x5e6   :  { %v15520_v63 = vld [vmem:[#allocation2 + $0x49c] sm:$0xf]  ;;  %v11187_v48 = vor.u32 %v15392_v34, %v11184_v58 }
 0x5e7   :  { %9113 = vmatpush.bf16.msra.mxu1 %v12403_v59  ;;  %9101 = vmatpush.bf16.msra.mxu0 %v11827_v31  ;;  %v11696_v51 = vld [vmem:[#allocation2 + $0x4d8] sm:$0xf0] }
 0x5e8   :  { %v15776_v1 = vld [vmem:[#allocation2 + $0xc9c] sm:$0xf]  ;;  %v11699_v45 = vor.u32 %v15520_v63, %v11696_v51 }
 0x5e9   :  { %9127 = vmatpush.bf16.msra.mxu2 %v12851_v47  ;;  %v12720_v50 = vld [vmem:[#allocation2 + $0xcd8] sm:$0xf0]  ;;  %9089 = vmatpush.bf16.msrb.mxu3 %v11251_v46 }
 0x5ea   :  { %v15648_v6 = vld [vmem:[#allocation2 + $0x89c] sm:$0xf]  ;;  %v12723_v10 = vor.u32 %v15776_v1, %v12720_v50 }
 0x5eb   :  { %9114 = vmatpush.bf16.msra.mxu1 %v12339_v42  ;;  %v12208_v62 = vld [vmem:[#allocation2 + $0x8d8] sm:$0xf0]  ;;  %9102 = vmatpush.bf16.msra.mxu0 %v11763_v44 }
 0x5ec   :  { %v15376_v8 = vld [vmem:[#allocation2 + $0x1c] sm:$0xf]  ;;  %v12211_v14 = vor.u32 %v15648_v6, %v12208_v62 }
 0x5ed   :  { %v11120_v9 = vld [vmem:[#allocation2 + $0x58] sm:$0xf0]  ;;  %9128 = vmatpush.bf16.msra.mxu2 %v12787_v54  ;;  %9090 = vmatpush.bf16.msrb.mxu3 %v11187_v48 }
 0x5ee   :  { %v15504_v11 = vld [vmem:[#allocation2 + $0x41c] sm:$0xf]  ;;  %v11123_v0 = vor.u32 %v15376_v8, %v11120_v9 }
 0x5ef   :  { %v11632_v15 = vld [vmem:[#allocation2 + $0x458] sm:$0xf0]  ;;  %9115 = vmatpush.bf16.msra.mxu1 %v12275_v29  ;;  %9103 = vmatpush.bf16.msra.mxu0 %v11699_v45 }
 0x5f0   :  { %v15760_v33 = vld [vmem:[#allocation2 + $0xc1c] sm:$0xf]  ;;  %v11635_v5 = vor.u32 %v15504_v11, %v11632_v15 }
 0x5f1   :  { %v12656_v60 = vld [vmem:[#allocation2 + $0xc58] sm:$0xf0]  ;;  %9129 = vmatpush.bf16.msra.mxu2 %v12723_v10  ;;  %9091 = vmatpush.bf16.msrb.mxu3 %v11123_v0 }
 0x5f2   :  { %v16000_v17 = vld [vmem:[#allocation2 + $0x139c] sm:$0xf]  ;;  %v12659_v25 = vor.u32 %v15760_v33, %v12656_v60 }
 0x5f3   :  { %v13616_v18 = vld [vmem:[#allocation2 + $0x13d8] sm:$0xf0]  ;;  %9116 = vmatpush.bf16.msra.mxu1 %v12211_v14  ;;  %9104 = vmatpush.bf16.msra.mxu0 %v11635_v5 }
 0x5f4   :  { %v16128_v35 = vld [vmem:[#allocation2 + $0x179c] sm:$0xf]  ;;  %v13619_v32 = vor.u32 %v16000_v17, %v13616_v18  ;;  %9092 = vmatmul.bf16.vlgmr.msrb.gmra.mxu3 %v17196_v55 }
 0x5f5   :  { %v14128_v19 = vld [vmem:[#allocation2 + $0x17d8] sm:$0xf0]  ;;  %9130 = vmatpush.bf16.msra.mxu2 %v12659_v25 }
 0x5f6   :  { %v16384_v22 = vld [vmem:[#allocation2 + $0x1f9c] sm:$0xf]  ;;  %v14131_v37 = vor.u32 %v16128_v35, %v14128_v19  ;;  %9136 = vmatpush.bf16.msra.mxu3 %v13619_v32  ;;  %9105 = vmatmul.bf16.vlgmr.msra.gmra.mxu0 %v17200_v2  ;;  %v8911_v32 = vpop.f32.mrf.mxu1 }
 0x5f7   :  { %v15152_v28 = vld [vmem:[#allocation2 + $0x1fd8] sm:$0xf0] }
 0x5f8   :  { %v15632_v59 = vld [vmem:[#allocation2 + $0x81c] sm:$0xf]  ;;  %v15155_v39 = vor.u32 %v16384_v22, %v15152_v28  ;;  %9149 = vmatpush.bf16.msrb.mxu0 %v14131_v37  ;;  %9131 = vmatmul.bf16.vlgmr.msra.gmra.mxu2 %v17198_v56 }
 0x5f9   :  { %v12144_v24 = vld [vmem:[#allocation2 + $0x858] sm:$0xf0] }
 0x5fa   :  { %v16256_v31 = vld [vmem:[#allocation2 + $0x1b9c] sm:$0xf]  ;;  %v12147_v40 = vor.u32 %v15632_v59, %v12144_v24  ;;  %9175 = vmatpush.bf16.msrb.mxu2 %v15155_v39  ;;  %v8898_v59 = vpop.f32.mrf.mxu0 }
 0x5fb   :  { %v14640_v47 = vld [vmem:[#allocation2 + $0x1bd8] sm:$0xf0] }
 0x5fc   :  { %v15984_v38 = vld [vmem:[#allocation2 + $0x131c] sm:$0xf]  ;;  %v14643_v42 = vor.u32 %v16256_v31, %v14640_v47  ;;  %9117 = vmatpush.bf16.msra.mxu1 %v12147_v40  ;;  %v3209_v47 = vperm.slane %v17417_v13, 5  ;;  %v8924_v13 = vpop.f32.mrf.mxu2 }
 0x5fd   :  { %v13552_v43 = vld [vmem:[#allocation2 + $0x1358] sm:$0xf0] }
 0x5fe   :  { %v16112_v26 = vld [vmem:[#allocation2 + $0x171c] sm:$0xf]  ;;  %v13555_v53 = vor.u32 %v15984_v38, %v13552_v43 }
 0x5ff   :  { %v14064_v57 = vld [vmem:[#allocation2 + $0x1758] sm:$0xf0]  ;;  %9118 = vmatmul.bf16.vlgmr.msra.gmra.mxu1 %v17202_v3 }
 0x600   :  { %v16368_v20 = vld [vmem:[#allocation2 + $0x1f1c] sm:$0xf]  ;;  %v14067_v44 = vor.u32 %v16112_v26, %v14064_v57  ;;  %9162 = vmatpush.bf16.msrb.mxu1 %v14643_v42  ;;  %9137 = vmatpush.bf16.msra.mxu3 %v13555_v53 }
 0x601   :  { %v15088_v46 = vld [vmem:[#allocation2 + $0x1f58] sm:$0xf0] }
 0x602   :  { %v16240_v49 = vld [vmem:[#allocation2 + $0x1b1c] sm:$0xf]  ;;  %v15091_v34 = vor.u32 %v16368_v20, %v15088_v46  ;;  %9150 = vmatpush.bf16.msrb.mxu0 %v14067_v44  ;;  %v8885_v46 = vpop.f32.mrf.mxu3 }
 0x603   :  { %v14576_v52 = vld [vmem:[#allocation2 + $0x1b58] sm:$0xf0]  ;;  %v8886_v44 = vadd.f32 %v8885_v46, %v3209_v47  ;;  %v12598_v47 = vld [vmem:[#allocation2 + $0xba0] sm:$0xf] }
 0x604   :  { %v15968_v54 = vld [vmem:[#allocation2 + $0x129c] sm:$0xf]  ;;  %v14579_v51 = vor.u32 %v16240_v49, %v14576_v52  ;;  %9176 = vmatpush.bf16.msrb.mxu2 %v15091_v34 }
 0x605   :  { %v13488_v58 = vld [vmem:[#allocation2 + $0x12d8] sm:$0xf0] }
 0x606   :  { %v16096_v63 = vld [vmem:[#allocation2 + $0x169c] sm:$0xf]  ;;  %v13491_v4 = vor.u32 %v15968_v54, %v13488_v58  ;;  %9163 = vmatpush.bf16.msrb.mxu1 %v14579_v51 }
 0x607   :  { %v14000_v36 = vld [vmem:[#allocation2 + $0x16d8] sm:$0xf0] }
 0x608   :  { %v16352_v1 = vld [vmem:[#allocation2 + $0x1e9c] sm:$0xf]  ;;  %v14003_v21 = vor.u32 %v16096_v63, %v14000_v36  ;;  %9138 = vmatpush.bf16.msra.mxu3 %v13491_v4 }
 0x609   :  { %v15024_v50 = vld [vmem:[#allocation2 + $0x1ed8] sm:$0xf0] }
 0x60a   :  { %v16224_v29 = vld [vmem:[#allocation2 + $0x1a9c] sm:$0xf]  ;;  %v15027_v62 = vor.u32 %v16352_v1, %v15024_v50  ;;  %9151 = vmatpush.bf16.msrb.mxu0 %v14003_v21  ;;  %v8899_v50 = vadd.f32 %v8898_v59, %v8886_v44 }
 0x60b   :  { %v14512_v6 = vld [vmem:[#allocation2 + $0x1ad8] sm:$0xf0] }
 0x60c   :  { %v15952_v48 = vld [vmem:[#allocation2 + $0x121c] sm:$0xf]  ;;  %v14515_v10 = vor.u32 %v16224_v29, %v14512_v6  ;;  %9177 = vmatpush.bf16.msrb.mxu2 %v15027_v62  ;;  %v8900_v29 = vpop.f32.mrf.mxu0 }
 0x60d   :  { %v13424_v8 = vld [vmem:[#allocation2 + $0x1258] sm:$0xf0]  ;;  %v12470_v29 = vld [vmem:[#allocation2 + $0xaa0] sm:$0xf] }
 0x60e   :  { %v16080_v9 = vld [vmem:[#allocation2 + $0x161c] sm:$0xf]  ;;  %v13427_v60 = vor.u32 %v15952_v48, %v13424_v8  ;;  %9164 = vmatpush.bf16.msrb.mxu1 %v14515_v10  ;;  %v8913_v10 = vpop.f32.mrf.mxu1 }
 0x60f   :  { %v13936_v45 = vld [vmem:[#allocation2 + $0x1658] sm:$0xf0]  ;;  %v15833_v10 = vld [vmem:[#allocation2 + $0xe5c] sm:$0xf0] }
 0x610   :  { %v16336_v11 = vld [vmem:[#allocation2 + $0x1e1c] sm:$0xf]  ;;  %v13939_v17 = vor.u32 %v16080_v9, %v13936_v45  ;;  %9139 = vmatpush.bf16.msra.mxu3 %v13427_v60  ;;  %v8912_v45 = vadd.f32 %v8911_v32, %v8899_v50  ;;  %v15753_v32 = vld [vmem:[#allocation2 + $0xbdc] sm:$0xf0] }
 0x611   :  { %v14960_v15 = vld [vmem:[#allocation2 + $0x1e58] sm:$0xf0]  ;;  %v12599_v46 = vor.u32 %v15753_v32, %v12598_v47 }
 0x612   :  { %v16208_v33 = vld [vmem:[#allocation2 + $0x1a1c] sm:$0xf]  ;;  %v14963_v14 = vor.u32 %v16336_v11, %v14960_v15  ;;  %9152 = vmatpush.bf16.msrb.mxu0 %v13939_v17  ;;  %v11574_v17 = vld [vmem:[#allocation2 + $0x3a0] sm:$0xf] }
 0x613   :  { %v14448_v61 = vld [vmem:[#allocation2 + $0x1a58] sm:$0xf0] }
 0x614   :  { %v15936_v18 = vld [vmem:[#allocation2 + $0x119c] sm:$0xf]  ;;  %v14451_v27 = vor.u32 %v16208_v33, %v14448_v61  ;;  %9178 = vmatpush.bf16.msrb.mxu2 %v14963_v14  ;;  %v12086_v14 = vld [vmem:[#allocation2 + $0x7a0] sm:$0xf] }
 0x615   :  { %v13360_v35 = vld [vmem:[#allocation2 + $0x11d8] sm:$0xf0] }
 0x616   :  { %v16064_v19 = vld [vmem:[#allocation2 + $0x159c] sm:$0xf]  ;;  %v13363_v5 = vor.u32 %v15936_v18, %v13360_v35  ;;  %9165 = vmatpush.bf16.msrb.mxu1 %v14451_v27  ;;  %v15497_v18 = vld [vmem:[#allocation2 + $0x3dc] sm:$0xf0]  ;;  %v17447_v35 = vadd.f32 %v8924_v13, %v8912_v45 }
 0x617   :  { %v13872_v22 = vld [vmem:[#allocation2 + $0x15d8] sm:$0xf0]  ;;  %v15881_v27 = vld [vmem:[#allocation2 + $0xfdc] sm:$0xf0] }
 0x618   :  { %v16320_v0 = vld [vmem:[#allocation2 + $0x1d9c] sm:$0xf]  ;;  %v13875_v25 = vor.u32 %v16064_v19, %v13872_v22  ;;  %9140 = vmatpush.bf16.msra.mxu3 %v13363_v5  ;;  %v15625_v19 = vld [vmem:[#allocation2 + $0x7dc] sm:$0xf0]  ;;  %v8926_v5 = vpop.f32.mrf.mxu2 }
 0x619   :  { %v14896_v28 = vld [vmem:[#allocation2 + $0x1dd8] sm:$0xf0]  ;;  %v13110_v22 = vld [vmem:[#allocation2 + $0xfa0] sm:$0xf] }
 0x61a   :  { %v16192_v24 = vld [vmem:[#allocation2 + $0x199c] sm:$0xf]  ;;  %v14899_v37 = vor.u32 %v16320_v0, %v14896_v28  ;;  %9153 = vmatpush.bf16.msrb.mxu0 %v13875_v25  ;;  %v8887_v0 = vpop.f32.mrf.mxu3  ;;  %v12918_v45 = vld [vmem:[#allocation2 + $0xe20] sm:$0xf] }
 0x61b   :  { %v14384_v30 = vld [vmem:[#allocation2 + $0x19d8] sm:$0xf0]  ;;  %v12854_v0 = vld [vmem:[#allocation2 + $0xda0] sm:$0xf] }
 0x61c   :  { %v15920_v31 = vld [vmem:[#allocation2 + $0x111c] sm:$0xf]  ;;  %v14387_v43 = vor.u32 %v16192_v24, %v14384_v30  ;;  %9179 = vmatpush.bf16.msrb.mxu2 %v14899_v37  ;;  %v12087_v37 = vor.u32 %v15625_v19, %v12086_v14  ;;  %v11318_v14 = vld [vmem:[#allocation2 + $0x1a0] sm:$0xf] }
 0x61d   :  { %v13296_v38 = vld [vmem:[#allocation2 + $0x1158] sm:$0xf0]  ;;  %v15433_v19 = vld [vmem:[#allocation2 + $0x1dc] sm:$0xf0] }
 0x61e   :  { %v16048_v39 = vld [vmem:[#allocation2 + $0x151c] sm:$0xf]  ;;  %v13299_v49 = vor.u32 %v15920_v31, %v13296_v38  ;;  %9166 = vmatpush.bf16.msrb.mxu1 %v14387_v43  ;;  %v11575_v31 = vor.u32 %v15497_v18, %v11574_v17  ;;  %v13111_v38 = vor.u32 %v15881_v27, %v13110_v22  ;;  %v12022_v43 = vld [vmem:[#allocation2 + $0x720] sm:$0xf]  ;;  %v12919_v18 = vor.u32 %v15833_v10, %v12918_v45 }
 0x61f   :  { %v13808_v40 = vld [vmem:[#allocation2 + $0x1558] sm:$0xf0]  ;;  %v11830_v22 = vld [vmem:[#allocation2 + $0x5a0] sm:$0xf]  ;;  %v11319_v5 = vor.u32 %v15433_v19, %v11318_v14 }
 0x620   :  { %v16304_v26 = vld [vmem:[#allocation2 + $0x1d1c] sm:$0xf]  ;;  %v13811_v52 = vor.u32 %v16048_v39, %v13808_v40  ;;  %9141 = vmatpush.bf16.msra.mxu3 %v13299_v49  ;;  %v11510_v39 = vld [vmem:[#allocation2 + $0x320] sm:$0xf] }
 0x621   :  { %v14832_v57 = vld [vmem:[#allocation2 + $0x1d58] sm:$0xf0]  ;;  %v15481_v40 = vld [vmem:[#allocation2 + $0x35c] sm:$0xf0] }
 0x622   :  { %v16176_v42 = vld [vmem:[#allocation2 + $0x191c] sm:$0xf]  ;;  %v14835_v54 = vor.u32 %v16304_v26, %v14832_v57  ;;  %9154 = vmatpush.bf16.msrb.mxu0 %v13811_v52  ;;  %v15609_v57 = vld [vmem:[#allocation2 + $0x75c] sm:$0xf0]  ;;  %v11511_v49 = vor.u32 %v15481_v40, %v11510_v39  ;;  %v8963_v40 = vpop.f32.mrf.mxu1 }
 0x623   :  { %v14320_v20 = vld [vmem:[#allocation2 + $0x1958] sm:$0xf0]  ;;  %v12534_v52 = vld [vmem:[#allocation2 + $0xb20] sm:$0xf]  ;;  %v12023_v44 = vor.u32 %v15609_v57, %v12022_v43 }
 0x624   :  { %v15904_v53 = vld [vmem:[#allocation2 + $0x109c] sm:$0xf]  ;;  %v14323_v36 = vor.u32 %v16176_v42, %v14320_v20  ;;  %9180 = vmatpush.bf16.msrb.mxu2 %v14835_v54  ;;  %v13046_v42 = vld [vmem:[#allocation2 + $0xf20] sm:$0xf] }
 0x625   :  { %v13232_v34 = vld [vmem:[#allocation2 + $0x10d8] sm:$0xf0]  ;;  %v15865_v20 = vld [vmem:[#allocation2 + $0xf5c] sm:$0xf0] }
 0x626   :  { %v16032_v58 = vld [vmem:[#allocation2 + $0x149c] sm:$0xf]  ;;  %v13235_v21 = vor.u32 %v15904_v53, %v13232_v34  ;;  %9167 = vmatpush.bf16.msrb.mxu1 %v14323_v36  ;;  %v15737_v53 = vld [vmem:[#allocation2 + $0xb5c] sm:$0xf0]  ;;  %v13047_v13 = vor.u32 %v15865_v20, %v13046_v42  ;;  %v8937_v42 = vpop.f32.mrf.mxu3 }
 0x627   :  { %v13744_v63 = vld [vmem:[#allocation2 + $0x14d8] sm:$0xf0]  ;;  %v11446_v54 = vld [vmem:[#allocation2 + $0x2a0] sm:$0xf] }
 0x628   :  { %v16288_v51 = vld [vmem:[#allocation2 + $0x1c9c] sm:$0xf]  ;;  %v13747_v48 = vor.u32 %v16032_v58, %v13744_v63  ;;  %9142 = vmatpush.bf16.msra.mxu3 %v13235_v21  ;;  %v15465_v34 = vld [vmem:[#allocation2 + $0x2dc] sm:$0xf0] }
 0x629   :  { %v14768_v1 = vld [vmem:[#allocation2 + $0x1cd8] sm:$0xf0]  ;;  %v11958_v58 = vld [vmem:[#allocation2 + $0x6a0] sm:$0xf]  ;;  %v11447_v50 = vor.u32 %v15465_v34, %v11446_v54 }
 0x62a   :  { %v16160_v6 = vld [vmem:[#allocation2 + $0x189c] sm:$0xf]  ;;  %v14771_v11 = vor.u32 %v16288_v51, %v14768_v1  ;;  %9155 = vmatpush.bf16.msrb.mxu0 %v13747_v48  ;;  %v15593_v63 = vld [vmem:[#allocation2 + $0x6dc] sm:$0xf0]  ;;  %v12535_v1 = vor.u32 %v15737_v53, %v12534_v52 }
 0x62b   :  { %v14256_v4 = vld [vmem:[#allocation2 + $0x18d8] sm:$0xf0]  ;;  %v12982_v36 = vld [vmem:[#allocation2 + $0xea0] sm:$0xf] }
 0x62c   :  { %v15888_v62 = vld [vmem:[#allocation2 + $0x101c] sm:$0xf]  ;;  %v14259_v60 = vor.u32 %v16160_v6, %v14256_v4  ;;  %9181 = vmatpush.bf16.msrb.mxu2 %v14771_v11  ;;  %v15849_v51 = vld [vmem:[#allocation2 + $0xedc] sm:$0xf0]  ;;  %v11959_v4 = vor.u32 %v15593_v63, %v11958_v58 }
 0x62d   :  { %v13168_v8 = vld [vmem:[#allocation2 + $0x1058] sm:$0xf0]  ;;  %v15721_v6 = vld [vmem:[#allocation2 + $0xadc] sm:$0xf0]  ;;  %v12983_v21 = vor.u32 %v15849_v51, %v12982_v36 }
 0x62e   :  { %v16016_v9 = vld [vmem:[#allocation2 + $0x141c] sm:$0xf]  ;;  %v13171_v28 = vor.u32 %v15888_v62, %v13168_v8  ;;  %9168 = vmatpush.bf16.msrb.mxu1 %v14259_v60  ;;  %v11382_v48 = vld [vmem:[#allocation2 + $0x220] sm:$0xf]  ;;  %v12471_v11 = vor.u32 %v15721_v6, %v12470_v29 }
 0x62f   :  { %v13680_v15 = vld [vmem:[#allocation2 + $0x1458] sm:$0xf0]  ;;  %v15449_v62 = vld [vmem:[#allocation2 + $0x25c] sm:$0xf0] }
 0x630   :  { %v16272_v33 = vld [vmem:[#allocation2 + $0x1c1c] sm:$0xf]  ;;  %v13683_v59 = vor.u32 %v16016_v9, %v13680_v15  ;;  %9143 = vmatpush.bf16.msra.mxu3 %v13171_v28  ;;  %v11894_v8 = vld [vmem:[#allocation2 + $0x620] sm:$0xf]  ;;  %v10024_v15 = vmax.f32 %v17440_v41, 0.0 }
 0x631   :  { %v14704_v61 = vld [vmem:[#allocation2 + $0x1c58] sm:$0xf0]  ;;  %v15577_v9 = vld [vmem:[#allocation2 + $0x65c] sm:$0xf0] }
 0x632   :  { %v16144_v24 = vld [vmem:[#allocation2 + $0x181c] sm:$0xf]  ;;  %v14707_v25 = vor.u32 %v16272_v33, %v14704_v61  ;;  %9156 = vmatpush.bf16.msrb.mxu0 %v13683_v59  ;;  %v11383_v33 = vor.u32 %v15449_v62, %v11382_v48  ;;  %v12406_v61 = vld [vmem:[#allocation2 + $0xa20] sm:$0xf]  ;;  %v11895_v17 = vor.u32 %v15577_v9, %v11894_v8 }
 0x633   :  { %v14192_v30 = vld [vmem:[#allocation2 + $0x1858] sm:$0xf0]  ;;  %9144 = vmatmul.bf16.vlgmr.msra.gmra.mxu3 %v17208_v7  ;;  %v15705_v60 = vld [vmem:[#allocation2 + $0xa5c] sm:$0xf0] }
 0x634   :  { %v14195_v26 = vor.u32 %v16144_v24, %v14192_v30  ;;  %9182 = vmatpush.bf16.msrb.mxu2 %v14707_v25  ;;  %9188 = vmatpush.bf16.msrb.mxu3 %v11575_v31  ;;  %v15561_v27 = vld [vmem:[#allocation2 + $0x5dc] sm:$0xf0]  ;;  %v12407_v59 = vor.u32 %v15705_v60, %v12406_v61  ;;  %v8950_v24 = vpop.f32.mrf.mxu0  ;;  %v17456_v30 = vmax.f32 %v10024_v15, 1e-12  ;;  %v8965_v60 = vpop.f32.mrf.mxu1 }
 0x635   :  { %9157 = vmatmul.bf16.vlgmr.msrb.gmra.mxu0 %v17212_v16  ;;  %v15817_v28 = vld [vmem:[#allocation2 + $0xddc] sm:$0xf0]  ;;  %v11831_v47 = vor.u32 %v15561_v27, %v11830_v22 }
 0x636   :  { %9201 = vmatpush.bf16.msra.mxu0 %v12087_v37  ;;  %9169 = vmatpush.bf16.msrb.mxu1 %v14195_v26  ;;  %v12342_v25 = vld [vmem:[#allocation2 + $0x9a0] sm:$0xf]  ;;  %v12855_v32 = vor.u32 %v15817_v28, %v12854_v0  ;;  %16521 = vrcp.f32 %v17456_v30  ;;  %vm10117_vm7 = vweird.f32 %v17456_v30 }
 0x637   :  { %9183 = vmatmul.bf16.vlgmr.msrb.gmra.mxu2 %v17210_v12  ;;  %v15689_v31 = vld [vmem:[#allocation2 + $0x9dc] sm:$0xf0] }
 0x638   :  { %9227 = vmatpush.bf16.msra.mxu2 %v13111_v38  ;;  %9189 = vmatpush.bf16.msrb.mxu3 %v11511_v49  ;;  %v11254_v37 = vld [vmem:[#allocation2 + $0x120] sm:$0xf]  ;;  %v12343_v20 = vor.u32 %v15689_v31, %v12342_v25 }
 0x639   :  { %9170 = vmatmul.bf16.vlgmr.msrb.gmra.mxu1 %v17215_v23  ;;  %v15417_v38 = vld [vmem:[#allocation2 + $0x15c] sm:$0xf0] }
 0x63a   :  { %9214 = vmatpush.bf16.msra.mxu1 %v12599_v46  ;;  %9202 = vmatpush.bf16.msra.mxu0 %v12023_v44  ;;  %v11766_v39 = vld [vmem:[#allocation2 + $0x520] sm:$0xf]  ;;  %v8938_v46 = vadd.f32 %v8937_v42, %v17447_v35  ;;  %v11255_v49 = vor.u32 %v15417_v38, %v11254_v37  ;;  %v8976_v44 = vpop.f32.mrf.mxu2 }
 0x63b   :  { %v15545_v43 = vld [vmem:[#allocation2 + $0x55c] sm:$0xf0] }
 0x63c   :  { %9228 = vmatpush.bf16.msra.mxu2 %v13047_v13  ;;  %9190 = vmatpush.bf16.msrb.mxu3 %v11447_v50  ;;  %v12790_v26 = vld [vmem:[#allocation2 + $0xd20] sm:$0xf]  ;;  %v11767_v13 = vor.u32 %v15545_v43, %v11766_v39  ;;  %v8951_v36 = vadd.f32 %v8950_v24, %v8938_v46  ;;  %v8952_v35 = vpop.f32.mrf.mxu0  ;;  %v8939_v24 = vpop.f32.mrf.mxu3 }
 0x63d   :  { %v15801_v57 = vld [vmem:[#allocation2 + $0xd5c] sm:$0xf0] }
 0x63e   :  { %9215 = vmatpush.bf16.msra.mxu1 %v12535_v1  ;;  %9203 = vmatpush.bf16.msra.mxu0 %v11959_v4  ;;  %v12278_v52 = vld [vmem:[#allocation2 + $0x920] sm:$0xf]  ;;  %v12791_v54 = vor.u32 %v15801_v57, %v12790_v26 }
 0x63f   :  { %v15673_v53 = vld [vmem:[#allocation2 + $0x95c] sm:$0xf0] }
 0x640   :  { %9229 = vmatpush.bf16.msra.mxu2 %v12983_v21  ;;  %9191 = vmatpush.bf16.msrb.mxu3 %v11383_v33  ;;  %v11190_v34 = vld [vmem:[#allocation2 + $0xa0] sm:$0xf]  ;;  %v12279_v29 = vor.u32 %v15673_v53, %v12278_v52  ;;  %v8964_v21 = vadd.f32 %v8963_v40, %v8951_v36 }
 0x641   :  { %v15401_v58 = vld [vmem:[#allocation2 + $0xdc] sm:$0xf0] }
 0x642   :  { %9216 = vmatpush.bf16.msra.mxu1 %v12471_v11  ;;  %9204 = vmatpush.bf16.msra.mxu0 %v11895_v17  ;;  %v11702_v63 = vld [vmem:[#allocation2 + $0x4a0] sm:$0xf]  ;;  %v11191_v48 = vor.u32 %v15401_v58, %v11190_v34  ;;  %v17460_v17 = vpop.eup %16521 }
 0x643   :  { %v15529_v51 = vld [vmem:[#allocation2 + $0x4dc] sm:$0xf0]  ;;  %v10113_v37 = vmul.f32 %v17460_v17, %v17456_v30  ;;  %vm10118_vm8 = vweird.f32 %v17460_v17 }
 0x644   :  { %9230 = vmatpush.bf16.msra.mxu2 %v12919_v18  ;;  %9192 = vmatpush.bf16.msrb.mxu3 %v11319_v5  ;;  %v12726_v1 = vld [vmem:[#allocation2 + $0xca0] sm:$0xf]  ;;  %v11703_v45 = vor.u32 %v15529_v51, %v11702_v63  ;;  %v17462_v18 = vadd.f32 %v8976_v44, %v8964_v21  ;;  %vm17495_vm11 = vmor %vm10117_vm7, %vm10118_vm8 }
 0x645   :  { %v15785_v50 = vld [vmem:[#allocation2 + $0xcdc] sm:$0xf0]  ;;  %v10114_v58 = vsub.f32 1.0, %v10113_v37 }
 0x646   :  { %9217 = vmatpush.bf16.msra.mxu1 %v12407_v59  ;;  %9205 = vmatpush.bf16.msra.mxu0 %v11831_v47  ;;  %v12214_v6 = vld [vmem:[#allocation2 + $0x8a0] sm:$0xf]  ;;  %v12727_v10 = vor.u32 %v15785_v50, %v12726_v1  ;;  %v10025_v5 = vmax.f32 %v17462_v18, 0.0 }
 0x647   :  { %v15657_v4 = vld [vmem:[#allocation2 + $0x8dc] sm:$0xf0] }
 0x648   :  { %9231 = vmatpush.bf16.msra.mxu2 %v12855_v32  ;;  %9193 = vmatpush.bf16.msrb.mxu3 %v11255_v49  ;;  %v11126_v62 = vld [vmem:[#allocation2 + $0x20] sm:$0xf]  ;;  %v12215_v27 = vor.u32 %v15657_v4, %v12214_v6  ;;  %v8978_v32 = vpop.f32.mrf.mxu2  ;;  %v17469_v26 = vmax.f32 %v10025_v5, 1e-12 }
 0x649   :  { %v15385_v8 = vld [vmem:[#allocation2 + $0x5c] sm:$0xf0] }
 0x64a   :  { %9218 = vmatpush.bf16.msra.mxu1 %v12343_v20  ;;  %v11638_v9 = vld [vmem:[#allocation2 + $0x420] sm:$0xf]  ;;  %9206 = vmatpush.bf16.msra.mxu0 %v11767_v13  ;;  %v11127_v25 = vor.u32 %v15385_v8, %v11126_v62  ;;  %16523 = vrcp.f32 %v17469_v26  ;;  %v10115_v8 = vmul.f32 %v17460_v17, %v10114_v58  ;;  %vm10132_vm9 = vweird.f32 %v17469_v26 }
 0x64b   :  { %v15513_v11 = vld [vmem:[#allocation2 + $0x45c] sm:$0xf0] }
 0x64c   :  { %9232 = vmatpush.bf16.msra.mxu2 %v12791_v54  ;;  %v12662_v33 = vld [vmem:[#allocation2 + $0xc20] sm:$0xf]  ;;  %9194 = vmatpush.bf16.msrb.mxu3 %v11191_v48  ;;  %v11639_v38 = vor.u32 %v15513_v11, %v11638_v9 }
 0x64d   :  { %v15769_v61 = vld [vmem:[#allocation2 + $0xc5c] sm:$0xf0] }
 0x64e   :  { %v13622_v14 = vld [vmem:[#allocation2 + $0x13a0] sm:$0xf]  ;;  %9219 = vmatpush.bf16.msra.mxu1 %v12279_v29  ;;  %9207 = vmatpush.bf16.msra.mxu0 %v11703_v45  ;;  %v12663_v39 = vor.u32 %v15769_v61, %v12662_v33 }
 0x64f   :  { %v16009_v19 = vld [vmem:[#allocation2 + $0x13dc] sm:$0xf0] }
 0x650   :  { %v14134_v22 = vld [vmem:[#allocation2 + $0x17a0] sm:$0xf]  ;;  %9233 = vmatpush.bf16.msra.mxu2 %v12727_v10  ;;  %v13623_v57 = vor.u32 %v16009_v19, %v13622_v14  ;;  %9195 = vmatpush.bf16.msrb.mxu3 %v11127_v25  ;;  %v17476_v10 = vpop.eup %16523  ;;  %v10116_v25 = vadd.f32 %v17460_v17, %v10115_v8 }
 0x651   :  { %v16137_v0 = vld [vmem:[#allocation2 + $0x17dc] sm:$0xf0]  ;;  %v10128_v19 = vmul.f32 %v17476_v10, %v17469_v26  ;;  %vm10133_vm10 = vweird.f32 %v17476_v10 }
 0x652   :  { %v15158_v28 = vld [vmem:[#allocation2 + $0x1fa0] sm:$0xf]  ;;  %v14135_v42 = vor.u32 %v16137_v0, %v14134_v22  ;;  %9220 = vmatpush.bf16.msra.mxu1 %v12215_v27  ;;  %9208 = vmatpush.bf16.msra.mxu0 %v11639_v38  ;;  %v10138_v38 = vand.u32 2147483648, %v17469_v26  ;;  %v10120_v58 = vsel %vm17495_vm11, %v17460_v17, %v10116_v25  ;;  %vm17507_vm12 = vmor %vm10132_vm9, %vm10133_vm10  ;;  %v9028_v25 = vpop.f32.mrf.mxu2 }
 0x653   :  { %v16393_v59 = vld [vmem:[#allocation2 + $0x1fdc] sm:$0xf0]  ;;  %9196 = vmatmul.bf16.vlgmr.msrb.gmra.mxu3 %v17196_v55 }
 0x654   :  { %v12150_v31 = vld [vmem:[#allocation2 + $0x820] sm:$0xf]  ;;  %v15159_v46 = vor.u32 %v16393_v59, %v15158_v28  ;;  %9234 = vmatpush.bf16.msra.mxu2 %v12663_v39  ;;  %9240 = vmatpush.bf16.msra.mxu3 %v13623_v57  ;;  %v10121_v59 = vand.u32 2147483647, %v17456_v30 }
 0x655   :  { %v15641_v47 = vld [vmem:[#allocation2 + $0x85c] sm:$0xf0]  ;;  %9209 = vmatmul.bf16.vlgmr.msra.gmra.mxu0 %v17200_v2 }
 0x656   :  { %v14646_v40 = vld [vmem:[#allocation2 + $0x1ba0] sm:$0xf]  ;;  %v12151_v49 = vor.u32 %v15641_v47, %v12150_v31  ;;  %9253 = vmatpush.bf16.msrb.mxu0 %v14135_v42  ;;  %v10123_v31 = vand.u32 2147483648, %v17456_v30  ;;  %v10129_v47 = vsub.f32 1.0, %v10128_v19  ;;  %vm10122_vm13 = vcmp.eq.f32.partialorder %v10121_v59, 8.507059e+37 }
 0x657   :  { %v16265_v43 = vld [vmem:[#allocation2 + $0x1bdc] sm:$0xf0]  ;;  %9235 = vmatmul.bf16.vlgmr.msra.gmra.mxu2 %v17198_v56 }
 0x658   :  { %v13558_v20 = vld [vmem:[#allocation2 + $0x1320] sm:$0xf]  ;;  %v14647_v13 = vor.u32 %v16265_v43, %v14646_v40  ;;  %9279 = vmatpush.bf16.msrb.mxu2 %v15159_v46  ;;  %9221 = vmatpush.bf16.msra.mxu1 %v12151_v49  ;;  %v10136_v46 = vand.u32 2147483647, %v17469_v26 }
 0x659   :  { %v15993_v52 = vld [vmem:[#allocation2 + $0x135c] sm:$0xf0] }
 0x65a   :  { %v14070_v53 = vld [vmem:[#allocation2 + $0x1720] sm:$0xf]  ;;  %v13559_v51 = vor.u32 %v15993_v52, %v13558_v20  ;;  %v10130_v20 = vmul.f32 %v17476_v10, %v10129_v47  ;;  %vm10137_vm14 = vcmp.eq.f32.partialorder %v10136_v46, 8.507059e+37 }
 0x65b   :  { %v16121_v44 = vld [vmem:[#allocation2 + $0x175c] sm:$0xf0]  ;;  %9222 = vmatmul.bf16.vlgmr.msra.gmra.mxu1 %v17202_v3 }
 0x65c   :  { %v15094_v54 = vld [vmem:[#allocation2 + $0x1f20] sm:$0xf]  ;;  %v14071_v1 = vor.u32 %v16121_v44, %v14070_v53  ;;  %9266 = vmatpush.bf16.msrb.mxu1 %v14647_v13  ;;  %9241 = vmatpush.bf16.msra.mxu3 %v13559_v51 }
 0x65d   :  { %v16377_v34 = vld [vmem:[#allocation2 + $0x1f5c] sm:$0xf0] }
 0x65e   :  { %v14582_v63 = vld [vmem:[#allocation2 + $0x1b20] sm:$0xf]  ;;  %v15095_v29 = vor.u32 %v16377_v34, %v15094_v54  ;;  %9254 = vmatpush.bf16.msrb.mxu0 %v14071_v1  ;;  %v9002_v34 = vpop.f32.mrf.mxu0 }
 0x65f   :  { %v16249_v36 = vld [vmem:[#allocation2 + $0x1b5c] sm:$0xf0] }
 0x660   :  { %v13494_v50 = vld [vmem:[#allocation2 + $0x12a0] sm:$0xf]  ;;  %v14583_v21 = vor.u32 %v16249_v36, %v14582_v63  ;;  %9280 = vmatpush.bf16.msrb.mxu2 %v15095_v29  ;;  %v10124_v63 = vor.u32 1.1754944e-38, %v10123_v31  ;;  %v10131_v36 = vadd.f32 %v17476_v10, %v10130_v20 }
 0x661   :  { %v15977_v6 = vld [vmem:[#allocation2 + $0x12dc] sm:$0xf0] }
 0x662   :  { %v14006_v4 = vld [vmem:[#allocation2 + $0x16a0] sm:$0xf]  ;;  %v13495_v11 = vor.u32 %v15977_v6, %v13494_v50  ;;  %9267 = vmatpush.bf16.msrb.mxu1 %v14583_v21  ;;  %v10139_v50 = vor.u32 1.1754944e-38, %v10138_v38  ;;  %v10135_v26 = vsel %vm17507_vm12, %v17476_v10, %v10131_v36  ;;  %v15489_v36 = vld [vmem:[#allocation2 + $0x3a4] sm:$0xf] }
 0x663   :  { %v16105_v35 = vld [vmem:[#allocation2 + $0x16dc] sm:$0xf0] }
 0x664   :  { %v15030_v48 = vld [vmem:[#allocation2 + $0x1ea0] sm:$0xf]  ;;  %v14007_v33 = vor.u32 %v16105_v35, %v14006_v4  ;;  %9242 = vmatpush.bf16.msra.mxu3 %v13495_v11  ;;  %v17511_v35 = vld [vmem:[#allocation30] sm:$0xff]  ;;  %v10140_v11 = vsel %vm10137_vm14, %v10139_v50, %v10135_v26  ;;  %v12088_v50 = vld [vmem:[#allocation2 + $0x7e0] sm:$0xf0] }
 0x665   :  { %v16361_v62 = vld [vmem:[#allocation2 + $0x1edc] sm:$0xf0]  ;;  %v3210_v21 = vperm.slane %v17511_v35, 6 }
 0x666   :  { %v14518_v9 = vld [vmem:[#allocation2 + $0x1aa0] sm:$0xf]  ;;  %v15031_v22 = vor.u32 %v16361_v62, %v15030_v48  ;;  %9255 = vmatpush.bf16.msrb.mxu0 %v14007_v33  ;;  %v9015_v48 = vpop.f32.mrf.mxu1 }
 0x667   :  { %v16233_v45 = vld [vmem:[#allocation2 + $0x1adc] sm:$0xf0] }
 0x668   :  { %v13430_v61 = vld [vmem:[#allocation2 + $0x1220] sm:$0xf]  ;;  %v14519_v24 = vor.u32 %v16233_v45, %v14518_v9  ;;  %9281 = vmatpush.bf16.msrb.mxu2 %v15031_v22  ;;  %v10125_v45 = vsel %vm10122_vm13, %v10124_v63, %v10120_v58 }
 0x669   :  { %v15961_v60 = vld [vmem:[#allocation2 + $0x125c] sm:$0xf0]  ;;  %v10126_v31 = vmul.f32 %v10125_v45, %v10024_v15  ;;  %v15745_v45 = vld [vmem:[#allocation2 + $0xba4] sm:$0xf] }
 0x66a   :  { %v13942_v14 = vld [vmem:[#allocation2 + $0x1620] sm:$0xf]  ;;  %v13431_v39 = vor.u32 %v15961_v60, %v13430_v61  ;;  %9268 = vmatpush.bf16.msrb.mxu1 %v14519_v24 }
 0x66b   :  { %v16089_v27 = vld [vmem:[#allocation2 + $0x165c] sm:$0xf0] }
 0x66c   :  { %v14966_v0 = vld [vmem:[#allocation2 + $0x1e20] sm:$0xf]  ;;  %v13943_v40 = vor.u32 %v16089_v27, %v13942_v14  ;;  %9243 = vmatpush.bf16.msra.mxu3 %v13431_v39  ;;  %v10141_v14 = vmul.f32 %v10140_v11, %v10025_v5  ;;  %v8989_v27 = vpop.f32.mrf.mxu3  ;;  %v12600_v11 = vld [vmem:[#allocation2 + $0xbe0] sm:$0xf0] }
 0x66d   :  { %v16345_v28 = vld [vmem:[#allocation2 + $0x1e5c] sm:$0xf0]  ;;  %v8990_v24 = vadd.f32 %v8989_v27, %v3210_v21  ;;  %v12024_v27 = vld [vmem:[#allocation2 + $0x760] sm:$0xf0] }
 0x66e   :  { %v14454_v32 = vld [vmem:[#allocation2 + $0x1a20] sm:$0xf]  ;;  %v14967_v43 = vor.u32 %v16345_v28, %v14966_v0  ;;  %9256 = vmatpush.bf16.msrb.mxu0 %v13943_v40  ;;  %v10311_v47 = vrot.slane %v10141_v14, 6  ;;  %v11512_v14 = vld [vmem:[#allocation2 + $0x360] sm:$0xf0] }
 0x66f   :  { %v16217_v37 = vld [vmem:[#allocation2 + $0x1a5c] sm:$0xf0]  ;;  %v9003_v40 = vadd.f32 %v9002_v34, %v8990_v24  ;;  %v15729_v24 = vld [vmem:[#allocation2 + $0xb24] sm:$0xf] }
 0x670   :  { %v13366_v57 = vld [vmem:[#allocation2 + $0x11a0] sm:$0xf]  ;;  %v14455_v44 = vor.u32 %v16217_v37, %v14454_v32  ;;  %9282 = vmatpush.bf16.msrb.mxu2 %v14967_v43  ;;  %v9004_v43 = vpop.f32.mrf.mxu0 }
 0x671   :  { %v15945_v42 = vld [vmem:[#allocation2 + $0x11dc] sm:$0xf0]  ;;  %v9016_v53 = vadd.f32 %v9015_v48, %v9003_v40 }
 0x672   :  { %v13878_v49 = vld [vmem:[#allocation2 + $0x15a0] sm:$0xf]  ;;  %v13367_v29 = vor.u32 %v15945_v42, %v13366_v57  ;;  %9269 = vmatpush.bf16.msrb.mxu1 %v14455_v44  ;;  %v17522_v57 = vsel %vm1089_vm1, %v10126_v31, %v10311_v47  ;;  %v9017_v44 = vpop.f32.mrf.mxu1 }
 0x673   :  { %v16073_v52 = vld [vmem:[#allocation2 + $0x15dc] sm:$0xf0]  ;;  %v17524_v30 = vadd.f32 %v9028_v25, %v9016_v53  ;;  %v12536_v25 = vld [vmem:[#allocation2 + $0xb60] sm:$0xf0] }
 0x674   :  { %v14902_v13 = vld [vmem:[#allocation2 + $0x1da0] sm:$0xf]  ;;  %v13879_v6 = vor.u32 %v16073_v52, %v13878_v49  ;;  %9244 = vmatpush.bf16.msra.mxu3 %v13367_v29  ;;  %v15873_v29 = vld [vmem:[#allocation2 + $0xfa4] sm:$0xf]  ;;  %v12539_v40 = vor.u32 %v15729_v24, %v12536_v25 }
 0x675   :  { %v16329_v54 = vld [vmem:[#allocation2 + $0x1ddc] sm:$0xf0]  ;;  %v11896_v53 = vld [vmem:[#allocation2 + $0x660] sm:$0xf0] }
 0x676   :  { %v14390_v51 = vld [vmem:[#allocation2 + $0x19a0] sm:$0xf]  ;;  %v14903_v62 = vor.u32 %v16329_v54, %v14902_v13  ;;  %9257 = vmatpush.bf16.msrb.mxu0 %v13879_v6  ;;  %v13112_v6 = vld [vmem:[#allocation2 + $0xfe0] sm:$0xf0] }
 0x677   :  { %v16201_v1 = vld [vmem:[#allocation2 + $0x19dc] sm:$0xf0]  ;;  %v15825_v44 = vld [vmem:[#allocation2 + $0xe24] sm:$0xf] }
 0x678   :  { %v13302_v4 = vld [vmem:[#allocation2 + $0x1120] sm:$0xf]  ;;  %v14391_v33 = vor.u32 %v16201_v1, %v14390_v51  ;;  %9283 = vmatpush.bf16.msrb.mxu2 %v14903_v62  ;;  %v11576_v51 = vld [vmem:[#allocation2 + $0x3e0] sm:$0xf0]  ;;  %v9030_v62 = vpop.f32.mrf.mxu2 }
 0x679   :  { %v15929_v17 = vld [vmem:[#allocation2 + $0x115c] sm:$0xf0]  ;;  %v15617_v1 = vld [vmem:[#allocation2 + $0x7a4] sm:$0xf] }
 0x67a   :  { %v13814_v8 = vld [vmem:[#allocation2 + $0x1520] sm:$0xf]  ;;  %v13303_v10 = vor.u32 %v15929_v17, %v13302_v4  ;;  %9270 = vmatpush.bf16.msrb.mxu1 %v14391_v33  ;;  %v8991_v4 = vpop.f32.mrf.mxu3  ;;  %v12091_v33 = vor.u32 %v15617_v1, %v12088_v50  ;;  %v15425_v1 = vld [vmem:[#allocation2 + $0x1a4] sm:$0xf] }
 0x67b   :  { %v16057_v9 = vld [vmem:[#allocation2 + $0x155c] sm:$0xf0]  ;;  %v11320_v50 = vld [vmem:[#allocation2 + $0x1e0] sm:$0xf0] }
 0x67c   :  { %v14838_v61 = vld [vmem:[#allocation2 + $0x1d20] sm:$0xf]  ;;  %v13815_v0 = vor.u32 %v16057_v9, %v13814_v8  ;;  %9245 = vmatpush.bf16.msra.mxu3 %v13303_v10  ;;  %v11579_v9 = vor.u32 %v15489_v36, %v11576_v51  ;;  %v15857_v10 = vld [vmem:[#allocation2 + $0xf24] sm:$0xf] }
 0x67d   :  { %v16313_v60 = vld [vmem:[#allocation2 + $0x1d5c] sm:$0xf0]  ;;  %v15809_v4 = vld [vmem:[#allocation2 + $0xda4] sm:$0xf] }
 0x67e   :  { %v14326_v19 = vld [vmem:[#allocation2 + $0x1920] sm:$0xf]  ;;  %v14839_v32 = vor.u32 %v16313_v60, %v14838_v61  ;;  %9258 = vmatpush.bf16.msrb.mxu0 %v13815_v0  ;;  %v13115_v61 = vor.u32 %v15873_v29, %v13112_v6  ;;  %v15473_v60 = vld [vmem:[#allocation2 + $0x324] sm:$0xf] }
 0x67f   :  { %v16185_v22 = vld [vmem:[#allocation2 + $0x195c] sm:$0xf0]  ;;  %v13048_v0 = vld [vmem:[#allocation2 + $0xf60] sm:$0xf0] }
 0x680   :  { %v13238_v28 = vld [vmem:[#allocation2 + $0x10a0] sm:$0xf]  ;;  %v14327_v5 = vor.u32 %v16185_v22, %v14326_v19  ;;  %9284 = vmatpush.bf16.msrb.mxu2 %v14839_v32  ;;  %v15601_v19 = vld [vmem:[#allocation2 + $0x724] sm:$0xf]  ;;  %v13051_v47 = vor.u32 %v15857_v10, %v13048_v0  ;;  %v9080_v25 = vpop.f32.mrf.mxu2 }
 0x681   :  { %v15913_v59 = vld [vmem:[#allocation2 + $0x10dc] sm:$0xf0]  ;;  %v12027_v31 = vor.u32 %v15601_v19, %v12024_v27  ;;  %v15457_v32 = vld [vmem:[#allocation2 + $0x2a4] sm:$0xf] }
 0x682   :  { %v13750_v37 = vld [vmem:[#allocation2 + $0x14a0] sm:$0xf]  ;;  %v13239_v41 = vor.u32 %v15913_v59, %v13238_v28  ;;  %9271 = vmatpush.bf16.msrb.mxu1 %v14327_v5  ;;  %v12603_v28 = vor.u32 %v15745_v45, %v12600_v11  ;;  %v11515_v59 = vor.u32 %v15473_v60, %v11512_v14  ;;  %v11960_v5 = vld [vmem:[#allocation2 + $0x6e0] sm:$0xf0]  ;;  %v9067_v60 = vpop.f32.mrf.mxu1  ;;  %v9041_v27 = vpop.f32.mrf.mxu3 }
 0x683   :  { %v16041_v18 = vld [vmem:[#allocation2 + $0x14dc] sm:$0xf0]  ;;  %v15553_v29 = vld [vmem:[#allocation2 + $0x5a4] sm:$0xf]  ;;  %v9042_v0 = vadd.f32 %v9041_v27, %v17524_v30 }
 0x684   :  { %v14774_v38 = vld [vmem:[#allocation2 + $0x1ca0] sm:$0xf]  ;;  %v13751_v15 = vor.u32 %v16041_v18, %v13750_v37  ;;  %9246 = vmatpush.bf16.msra.mxu3 %v13239_v41  ;;  %v11448_v37 = vld [vmem:[#allocation2 + $0x2e0] sm:$0xf0] }
 0x685   :  { %v16297_v39 = vld [vmem:[#allocation2 + $0x1cdc] sm:$0xf0]  ;;  %v15585_v18 = vld [vmem:[#allocation2 + $0x6a4] sm:$0xf]  ;;  %v11451_v43 = vor.u32 %v15457_v32, %v11448_v37 }
 0x686   :  { %v14262_v42 = vld [vmem:[#allocation2 + $0x18a0] sm:$0xf]  ;;  %v14775_v13 = vor.u32 %v16297_v39, %v14774_v38  ;;  %9259 = vmatpush.bf16.msrb.mxu0 %v13751_v15  ;;  %v15841_v38 = vld [vmem:[#allocation2 + $0xea4] sm:$0xf]  ;;  %v11963_v41 = vor.u32 %v15585_v18, %v11960_v5 }
 0x687   :  { %v16169_v20 = vld [vmem:[#allocation2 + $0x18dc] sm:$0xf0]  ;;  %v12984_v39 = vld [vmem:[#allocation2 + $0xee0] sm:$0xf0] }
 0x688   :  { %v13174_v46 = vld [vmem:[#allocation2 + $0x1020] sm:$0xf]  ;;  %v14263_v63 = vor.u32 %v16169_v20, %v14262_v42  ;;  %9285 = vmatpush.bf16.msrb.mxu2 %v14775_v13  ;;  %v15713_v42 = vld [vmem:[#allocation2 + $0xaa4] sm:$0xf]  ;;  %v12987_v15 = vor.u32 %v15841_v38, %v12984_v39 }
 0x689   :  { %v15897_v49 = vld [vmem:[#allocation2 + $0x105c] sm:$0xf0]  ;;  %v12472_v20 = vld [vmem:[#allocation2 + $0xae0] sm:$0xf0] }
 0x68a   :  { %v13686_v52 = vld [vmem:[#allocation2 + $0x1420] sm:$0xf]  ;;  %v13175_v17 = vor.u32 %v15897_v49, %v13174_v46  ;;  %9272 = vmatpush.bf16.msrb.mxu1 %v14263_v63  ;;  %v15441_v46 = vld [vmem:[#allocation2 + $0x224] sm:$0xf] }
 0x68b   :  { %v16025_v54 = vld [vmem:[#allocation2 + $0x145c] sm:$0xf0]  ;;  %v11384_v49 = vld [vmem:[#allocation2 + $0x260] sm:$0xf0] }
 0x68c   :  { %v14710_v58 = vld [vmem:[#allocation2 + $0x1c20] sm:$0xf]  ;;  %v13687_v21 = vor.u32 %v16025_v54, %v13686_v52  ;;  %9247 = vmatpush.bf16.msra.mxu3 %v13175_v17  ;;  %v15569_v52 = vld [vmem:[#allocation2 + $0x624] sm:$0xf]  ;;  %v12475_v54 = vor.u32 %v15713_v42, %v12472_v20 }
 0x68d   :  { %v16281_v34 = vld [vmem:[#allocation2 + $0x1c5c] sm:$0xf0]  ;;  %v12920_v13 = vld [vmem:[#allocation2 + $0xe60] sm:$0xf0]  ;;  %v11899_v36 = vor.u32 %v15569_v52, %v11896_v53 }
 0x68e   :  { %v14198_v48 = vld [vmem:[#allocation2 + $0x1820] sm:$0xf]  ;;  %v14711_v8 = vor.u32 %v16281_v34, %v14710_v58  ;;  %9260 = vmatpush.bf16.msrb.mxu0 %v13687_v21  ;;  %v11387_v58 = vor.u32 %v15441_v46, %v11384_v49  ;;  %v15697_v34 = vld [vmem:[#allocation2 + $0xa24] sm:$0xf]  ;;  %v12923_v51 = vor.u32 %v15825_v44, %v12920_v13 }
 0x68f   :  { %v16153_v26 = vld [vmem:[#allocation2 + $0x185c] sm:$0xf0]  ;;  %9248 = vmatmul.bf16.vlgmr.msra.gmra.mxu3 %v17208_v7  ;;  %v12408_v63 = vld [vmem:[#allocation2 + $0xa60] sm:$0xf0] }
 0x690   :  { %v14199_v22 = vor.u32 %v16153_v26, %v14198_v48  ;;  %9286 = vmatpush.bf16.msrb.mxu2 %v14711_v8  ;;  %9292 = vmatpush.bf16.msrb.mxu3 %v11579_v9  ;;  %v11832_v6 = vld [vmem:[#allocation2 + $0x5e0] sm:$0xf0]  ;;  %v12411_v21 = vor.u32 %v15697_v34, %v12408_v63  ;;  %v9054_v48 = vpop.f32.mrf.mxu0  ;;  %v11323_v26 = vor.u32 %v15425_v1, %v11320_v50 }
 0x691   :  { %9261 = vmatmul.bf16.vlgmr.msrb.gmra.mxu0 %v17212_v16  ;;  %v12856_v17 = vld [vmem:[#allocation2 + $0xde0] sm:$0xf0]  ;;  %v11835_v9 = vor.u32 %v15553_v29, %v11832_v6  ;;  %v9055_v5 = vadd.f32 %v9054_v48, %v9042_v0 }
 0x692   :  { %9305 = vmatpush.bf16.msra.mxu0 %v12091_v33  ;;  %9273 = vmatpush.bf16.msrb.mxu1 %v14199_v22  ;;  %v15681_v62 = vld [vmem:[#allocation2 + $0x9a4] sm:$0xf]  ;;  %v12859_v45 = vor.u32 %v15809_v4, %v12856_v17  ;;  %v9043_v4 = vpop.f32.mrf.mxu3 }
 0x693   :  { %9287 = vmatmul.bf16.vlgmr.msrb.gmra.mxu2 %v17210_v12  ;;  %v12344_v8 = vld [vmem:[#allocation2 + $0x9e0] sm:$0xf0]  ;;  %v9068_v30 = vadd.f32 %v9067_v60, %v9055_v5 }
 0x694   :  { %9331 = vmatpush.bf16.msra.mxu2 %v13115_v61  ;;  %9293 = vmatpush.bf16.msrb.mxu3 %v11515_v59  ;;  %v15409_v11 = vld [vmem:[#allocation2 + $0x124] sm:$0xf]  ;;  %v12347_v10 = vor.u32 %v15681_v62, %v12344_v8  ;;  %v9082_v62 = vpop.f32.mrf.mxu2 }
 0x695   :  { %9274 = vmatmul.bf16.vlgmr.msrb.gmra.mxu1 %v17215_v23  ;;  %v11256_v33 = vld [vmem:[#allocation2 + $0x160] sm:$0xf0]  ;;  %v17531_v34 = vadd.f32 %v9080_v25, %v9068_v30 }
 0x696   :  { %9318 = vmatpush.bf16.msra.mxu1 %v12603_v28  ;;  %9306 = vmatpush.bf16.msra.mxu0 %v12027_v31  ;;  %v15537_v61 = vld [vmem:[#allocation2 + $0x524] sm:$0xf]  ;;  %v11259_v28 = vor.u32 %v15409_v11, %v11256_v33 }
 0x697   :  { %v11768_v14 = vld [vmem:[#allocation2 + $0x560] sm:$0xf0] }
 0x698   :  { %9332 = vmatpush.bf16.msra.mxu2 %v13051_v47  ;;  %9294 = vmatpush.bf16.msrb.mxu3 %v11451_v43  ;;  %v15793_v19 = vld [vmem:[#allocation2 + $0xd24] sm:$0xf]  ;;  %v11771_v31 = vor.u32 %v15537_v61, %v11768_v14  ;;  %v9056_v20 = vpop.f32.mrf.mxu0 }
 0x699   :  { %v12792_v22 = vld [vmem:[#allocation2 + $0xd60] sm:$0xf0] }
 0x69a   :  { %9319 = vmatpush.bf16.msra.mxu1 %v12539_v40  ;;  %9307 = vmatpush.bf16.msra.mxu0 %v11963_v41  ;;  %v15665_v59 = vld [vmem:[#allocation2 + $0x924] sm:$0xf]  ;;  %v12795_v47 = vor.u32 %v15793_v19, %v12792_v22 }
 0x69b   :  { %v12280_v24 = vld [vmem:[#allocation2 + $0x960] sm:$0xf0] }
 0x69c   :  { %9333 = vmatpush.bf16.msra.mxu2 %v12987_v15  ;;  %9295 = vmatpush.bf16.msrb.mxu3 %v11387_v58  ;;  %v15393_v32 = vld [vmem:[#allocation2 + $0xa4] sm:$0xf]  ;;  %v12283_v43 = vor.u32 %v15665_v59, %v12280_v24  ;;  %v9069_v58 = vpop.f32.mrf.mxu1 }
 0x69d   :  { %v11192_v37 = vld [vmem:[#allocation2 + $0xe0] sm:$0xf0] }
 0x69e   :  { %9320 = vmatpush.bf16.msra.mxu1 %v12475_v54  ;;  %9308 = vmatpush.bf16.msra.mxu0 %v11899_v36  ;;  %v15521_v18 = vld [vmem:[#allocation2 + $0x4a4] sm:$0xf]  ;;  %v11195_v41 = vor.u32 %v15393_v32, %v11192_v37 }
 0x69f   :  { %v11704_v38 = vld [vmem:[#allocation2 + $0x4e0] sm:$0xf0] }
 0x6a0   :  { %9334 = vmatpush.bf16.msra.mxu2 %v12923_v51  ;;  %9296 = vmatpush.bf16.msrb.mxu3 %v11323_v26  ;;  %v15777_v39 = vld [vmem:[#allocation2 + $0xca4] sm:$0xf]  ;;  %v11707_v52 = vor.u32 %v15521_v18, %v11704_v38 }
 0x6a1   :  { %v12728_v40 = vld [vmem:[#allocation2 + $0xce0] sm:$0xf0] }
 0x6a2   :  { %9321 = vmatpush.bf16.msra.mxu1 %v12411_v21  ;;  %9309 = vmatpush.bf16.msra.mxu0 %v11835_v9  ;;  %v15649_v42 = vld [vmem:[#allocation2 + $0x8a4] sm:$0xf]  ;;  %v12731_v53 = vor.u32 %v15777_v39, %v12728_v40 }
 0x6a3   :  { %v12216_v15 = vld [vmem:[#allocation2 + $0x8e0] sm:$0xf0] }
 0x6a4   :  { %9335 = vmatpush.bf16.msra.mxu2 %v12859_v45  ;;  %9297 = vmatpush.bf16.msrb.mxu3 %v11259_v28  ;;  %v15377_v46 = vld [vmem:[#allocation2 + $0x24] sm:$0xf]  ;;  %v12219_v1 = vor.u32 %v15649_v42, %v12216_v15 }
 0x6a5   :  { %v11128_v49 = vld [vmem:[#allocation2 + $0x60] sm:$0xf0] }
 0x6a6   :  { %9322 = vmatpush.bf16.msra.mxu1 %v12347_v10  ;;  %9310 = vmatpush.bf16.msra.mxu0 %v11771_v31  ;;  %v15505_v44 = vld [vmem:[#allocation2 + $0x424] sm:$0xf]  ;;  %v11131_v17 = vor.u32 %v15377_v46, %v11128_v49 }
 0x6a7   :  { %v11640_v13 = vld [vmem:[#allocation2 + $0x460] sm:$0xf0] }
 0x6a8   :  { %9336 = vmatpush.bf16.msra.mxu2 %v12795_v47  ;;  %v15761_v54 = vld [vmem:[#allocation2 + $0xc24] sm:$0xf]  ;;  %9298 = vmatpush.bf16.msrb.mxu3 %v11195_v41  ;;  %v11643_v8 = vor.u32 %v15505_v44, %v11640_v13 }
 0x6a9   :  { %v12664_v63 = vld [vmem:[#allocation2 + $0xc60] sm:$0xf0] }
 0x6aa   :  { %v16001_v36 = vld [vmem:[#allocation2 + $0x13a4] sm:$0xf]  ;;  %9323 = vmatpush.bf16.msra.mxu1 %v12283_v43  ;;  %9311 = vmatpush.bf16.msra.mxu0 %v11707_v52  ;;  %v12667_v9 = vor.u32 %v15761_v54, %v12664_v63 }
 0x6ab   :  { %v13624_v51 = vld [vmem:[#allocation2 + $0x13e0] sm:$0xf0] }
 0x6ac   :  { %v16129_v50 = vld [vmem:[#allocation2 + $0x17a4] sm:$0xf]  ;;  %9337 = vmatpush.bf16.msra.mxu2 %v12731_v53  ;;  %v13627_v33 = vor.u32 %v16001_v36, %v13624_v51  ;;  %9299 = vmatpush.bf16.msrb.mxu3 %v11131_v17 }
 0x6ad   :  { %v14136_v29 = vld [vmem:[#allocation2 + $0x17e0] sm:$0xf0] }
 0x6ae   :  { %v16385_v6 = vld [vmem:[#allocation2 + $0x1fa4] sm:$0xf]  ;;  %v14139_v61 = vor.u32 %v16129_v50, %v14136_v29  ;;  %9324 = vmatpush.bf16.msra.mxu1 %v12219_v1  ;;  %9312 = vmatpush.bf16.msra.mxu0 %v11643_v8 }
 0x6af   :  { %v15160_v21 = vld [vmem:[#allocation2 + $0x1fe0] sm:$0xf0]  ;;  %9300 = vmatmul.bf16.vlgmr.msrb.gmra.mxu3 %v17196_v55 }
 0x6b0   :  { %v15633_v48 = vld [vmem:[#allocation2 + $0x824] sm:$0xf]  ;;  %v15163_v14 = vor.u32 %v16385_v6, %v15160_v21  ;;  %9338 = vmatpush.bf16.msra.mxu2 %v12667_v9  ;;  %9344 = vmatpush.bf16.msra.mxu3 %v13627_v33  ;;  %v17539_v33 = vpop.f32.mrf.mxu1 }
 0x6b1   :  { %v12152_v26 = vld [vmem:[#allocation2 + $0x860] sm:$0xf0]  ;;  %9313 = vmatmul.bf16.vlgmr.msra.gmra.mxu0 %v17200_v2 }
 0x6b2   :  { %v16257_v45 = vld [vmem:[#allocation2 + $0x1ba4] sm:$0xf]  ;;  %v12155_v19 = vor.u32 %v15633_v48, %v12152_v26  ;;  %9357 = vmatpush.bf16.msrb.mxu0 %v14139_v61  ;;  %v17537_v26 = vpop.f32.mrf.mxu0 }
 0x6b3   :  { %v14648_v11 = vld [vmem:[#allocation2 + $0x1be0] sm:$0xf0]  ;;  %9339 = vmatmul.bf16.vlgmr.msra.gmra.mxu2 %v17198_v56 }
 0x6b4   :  { %v15985_v60 = vld [vmem:[#allocation2 + $0x1324] sm:$0xf]  ;;  %v14651_v0 = vor.u32 %v16257_v45, %v14648_v11  ;;  %9383 = vmatpush.bf16.msrb.mxu2 %v15163_v14  ;;  %9325 = vmatpush.bf16.msra.mxu1 %v12155_v19 }
 0x6b5   :  { %v13560_v22 = vld [vmem:[#allocation2 + $0x1360] sm:$0xf0] }
 0x6b6   :  { %v16113_v27 = vld [vmem:[#allocation2 + $0x1724] sm:$0xf]  ;;  %v13563_v31 = vor.u32 %v15985_v60, %v13560_v22 }
 0x6b7   :  { %v14072_v10 = vld [vmem:[#allocation2 + $0x1760] sm:$0xf0]  ;;  %9326 = vmatmul.bf16.vlgmr.msra.gmra.mxu1 %v17202_v3 }
 0x6b8   :  { %v16369_v28 = vld [vmem:[#allocation2 + $0x1f24] sm:$0xf]  ;;  %v14075_v47 = vor.u32 %v16113_v27, %v14072_v10  ;;  %9370 = vmatpush.bf16.msrb.mxu1 %v14651_v0  ;;  %9345 = vmatpush.bf16.msra.mxu3 %v13563_v31 }
 0x6b9   :  { %v15096_v59 = vld [vmem:[#allocation2 + $0x1f60] sm:$0xf0] }
 0x6ba   :  { %v16241_v24 = vld [vmem:[#allocation2 + $0x1b24] sm:$0xf]  ;;  %v15099_v37 = vor.u32 %v16369_v28, %v15096_v59  ;;  %9358 = vmatpush.bf16.msrb.mxu0 %v14075_v47  ;;  %v17541_v59 = vpop.f32.mrf.mxu3  ;;  %v17543_v47 = vpop.f32.mrf.mxu2 }
 0x6bb   :  { %v14584_v25 = vld [vmem:[#allocation2 + $0x1b60] sm:$0xf0] }
 0x6bc   :  { %v15969_v32 = vld [vmem:[#allocation2 + $0x12a4] sm:$0xf]  ;;  %v14587_v39 = vor.u32 %v16241_v24, %v14584_v25  ;;  %9384 = vmatpush.bf16.msrb.mxu2 %v15099_v37 }
 0x6bd   :  { %v13496_v18 = vld [vmem:[#allocation2 + $0x12e0] sm:$0xf0] }
 0x6be   :  { %v16097_v5 = vld [vmem:[#allocation2 + $0x16a4] sm:$0xf]  ;;  %v13499_v30 = vor.u32 %v15969_v32, %v13496_v18  ;;  %9371 = vmatpush.bf16.msrb.mxu1 %v14587_v39 }
 0x6bf   :  { %v14008_v38 = vld [vmem:[#allocation2 + $0x16e0] sm:$0xf0] }
 0x6c0   :  { %v16353_v40 = vld [vmem:[#allocation2 + $0x1ea4] sm:$0xf]  ;;  %v14011_v41 = vor.u32 %v16097_v5, %v14008_v38  ;;  %9346 = vmatpush.bf16.msra.mxu3 %v13499_v30 }
 0x6c1   :  { %v15032_v43 = vld [vmem:[#allocation2 + $0x1ee0] sm:$0xf0] }
 0x6c2   :  { %v16225_v42 = vld [vmem:[#allocation2 + $0x1aa4] sm:$0xf]  ;;  %v15035_v46 = vor.u32 %v16353_v40, %v15032_v43  ;;  %9359 = vmatpush.bf16.msrb.mxu0 %v14011_v41  ;;  %v9108_v43 = vpop.f32.mrf.mxu0 }
 0x6c3   :  { %v14520_v20 = vld [vmem:[#allocation2 + $0x1ae0] sm:$0xf0]  ;;  %v15594_v43 = vld [vmem:[#allocation2 + $0x6e4] sm:$0xf0] }
 0x6c4   :  { %v15953_v15 = vld [vmem:[#allocation2 + $0x1224] sm:$0xf]  ;;  %v14523_v44 = vor.u32 %v16225_v42, %v14520_v20  ;;  %9385 = vmatpush.bf16.msrb.mxu2 %v15035_v46 }
 0x6c5   :  { %v13432_v49 = vld [vmem:[#allocation2 + $0x1260] sm:$0xf0] }
 0x6c6   :  { %v16081_v52 = vld [vmem:[#allocation2 + $0x1624] sm:$0xf]  ;;  %v13435_v36 = vor.u32 %v15953_v15, %v13432_v49  ;;  %9372 = vmatpush.bf16.msrb.mxu1 %v14523_v44 }
 0x6c7   :  { %v13944_v53 = vld [vmem:[#allocation2 + $0x1660] sm:$0xf0] }
 0x6c8   :  { %v16337_v13 = vld [vmem:[#allocation2 + $0x1e24] sm:$0xf]  ;;  %v13947_v51 = vor.u32 %v16081_v52, %v13944_v53  ;;  %9347 = vmatpush.bf16.msra.mxu3 %v13435_v36  ;;  %v9121_v52 = vpop.f32.mrf.mxu1  ;;  %v15498_v36 = vld [vmem:[#allocation2 + $0x3e4] sm:$0xf0] }
 0x6c9   :  { %v14968_v54 = vld [vmem:[#allocation2 + $0x1e60] sm:$0xf0] }
 0x6ca   :  { %v16209_v58 = vld [vmem:[#allocation2 + $0x1a24] sm:$0xf]  ;;  %v14971_v50 = vor.u32 %v16337_v13, %v14968_v54  ;;  %9360 = vmatpush.bf16.msrb.mxu0 %v13947_v51  ;;  %v12094_v51 = vld [vmem:[#allocation2 + $0x7a8] sm:$0xf] }
 0x6cb   :  { %v14456_v63 = vld [vmem:[#allocation2 + $0x1a60] sm:$0xf0] }
 0x6cc   :  { %v15937_v1 = vld [vmem:[#allocation2 + $0x11a4] sm:$0xf]  ;;  %v14459_v17 = vor.u32 %v16209_v58, %v14456_v63  ;;  %9386 = vmatpush.bf16.msrb.mxu2 %v14971_v50  ;;  %v11582_v63 = vld [vmem:[#allocation2 + $0x3a8] sm:$0xf] }
 0x6cd   :  { %v13368_v29 = vld [vmem:[#allocation2 + $0x11e0] sm:$0xf0]  ;;  %v13118_v50 = vld [vmem:[#allocation2 + $0xfa8] sm:$0xf] }
 0x6ce   :  { %v16065_v6 = vld [vmem:[#allocation2 + $0x15a4] sm:$0xf]  ;;  %v13371_v9 = vor.u32 %v15937_v1, %v13368_v29  ;;  %9373 = vmatpush.bf16.msrb.mxu1 %v14459_v17  ;;  %v15626_v1 = vld [vmem:[#allocation2 + $0x7e4] sm:$0xf0] }
 0x6cf   :  { %v13880_v4 = vld [vmem:[#allocation2 + $0x15e0] sm:$0xf0]  ;;  %v15882_v29 = vld [vmem:[#allocation2 + $0xfe4] sm:$0xf0] }
 0x6d0   :  { %v16321_v21 = vld [vmem:[#allocation2 + $0x1da4] sm:$0xf]  ;;  %v13883_v45 = vor.u32 %v16065_v6, %v13880_v4  ;;  %9348 = vmatpush.bf16.msra.mxu3 %v13371_v9  ;;  %v9095_v6 = vpop.f32.mrf.mxu3  ;;  %v11583_v9 = vor.u32 %v15498_v36, %v11582_v63  ;;  %v12926_v63 = vld [vmem:[#allocation2 + $0xe28] sm:$0xf] }
 0x6d1   :  { %v14904_v48 = vld [vmem:[#allocation2 + $0x1de0] sm:$0xf0]  ;;  %v15834_v36 = vld [vmem:[#allocation2 + $0xe64] sm:$0xf0] }
 0x6d2   :  { %v16193_v62 = vld [vmem:[#allocation2 + $0x19a4] sm:$0xf]  ;;  %v14907_v61 = vor.u32 %v16321_v21, %v14904_v48  ;;  %9361 = vmatpush.bf16.msrb.mxu0 %v13883_v45  ;;  %v3211_v45 = vperm.slane %v17511_v35, 7  ;;  %v15706_v6 = vld [vmem:[#allocation2 + $0xa64] sm:$0xf0] }
 0x6d3   :  { %v14392_v8 = vld [vmem:[#allocation2 + $0x19e0] sm:$0xf0] }
 0x6d4   :  { %v15921_v11 = vld [vmem:[#allocation2 + $0x1124] sm:$0xf]  ;;  %v14395_v22 = vor.u32 %v16193_v62, %v14392_v8  ;;  %9387 = vmatpush.bf16.msrb.mxu2 %v14907_v61  ;;  %v9134_v62 = vpop.f32.mrf.mxu2  ;;  %v15754_v61 = vld [vmem:[#allocation2 + $0xbe4] sm:$0xf0] }
 0x6d5   :  { %v13304_v60 = vld [vmem:[#allocation2 + $0x1160] sm:$0xf0]  ;;  %v11838_v62 = vld [vmem:[#allocation2 + $0x5a8] sm:$0xf] }
 0x6d6   :  { %v16049_v14 = vld [vmem:[#allocation2 + $0x1524] sm:$0xf]  ;;  %v13307_v24 = vor.u32 %v15921_v11, %v13304_v60  ;;  %9374 = vmatpush.bf16.msrb.mxu1 %v14395_v22  ;;  %v12606_v11 = vld [vmem:[#allocation2 + $0xba8] sm:$0xf]  ;;  %v12095_v60 = vor.u32 %v15626_v1, %v12094_v51 }
 0x6d7   :  { %v13816_v19 = vld [vmem:[#allocation2 + $0x1560] sm:$0xf0]  ;;  %v15482_v22 = vld [vmem:[#allocation2 + $0x364] sm:$0xf0] }
 0x6d8   :  { %v16305_v27 = vld [vmem:[#allocation2 + $0x1d24] sm:$0xf]  ;;  %v13819_v25 = vor.u32 %v16049_v14, %v13816_v19  ;;  %9349 = vmatpush.bf16.msra.mxu3 %v13307_v24  ;;  %v13119_v14 = vor.u32 %v15882_v29, %v13118_v50  ;;  %v11518_v19 = vld [vmem:[#allocation2 + $0x328] sm:$0xf] }
 0x6d9   :  { %v14840_v10 = vld [vmem:[#allocation2 + $0x1d60] sm:$0xf0]  ;;  %v15866_v24 = vld [vmem:[#allocation2 + $0xf64] sm:$0xf0]  ;;  %v11519_v35 = vor.u32 %v15482_v22, %v11518_v19 }
 0x6da   :  { %v16177_v0 = vld [vmem:[#allocation2 + $0x1924] sm:$0xf]  ;;  %v14843_v32 = vor.u32 %v16305_v27, %v14840_v10  ;;  %9362 = vmatpush.bf16.msrb.mxu0 %v13819_v25  ;;  %v12030_v27 = vld [vmem:[#allocation2 + $0x728] sm:$0xf]  ;;  %v12607_v25 = vor.u32 %v15754_v61, %v12606_v11  ;;  %v9158_v61 = vpop.f32.mrf.mxu0 }
 0x6db   :  { %v14328_v28 = vld [vmem:[#allocation2 + $0x1960] sm:$0xf0]  ;;  %v12414_v29 = vld [vmem:[#allocation2 + $0xa28] sm:$0xf] }
 0x6dc   :  { %v15905_v31 = vld [vmem:[#allocation2 + $0x10a4] sm:$0xf]  ;;  %v14331_v38 = vor.u32 %v16177_v0, %v14328_v28  ;;  %9388 = vmatpush.bf16.msrb.mxu2 %v14843_v32  ;;  %v15610_v0 = vld [vmem:[#allocation2 + $0x764] sm:$0xf0]  ;;  %v12415_v11 = vor.u32 %v15706_v6, %v12414_v29 }
 0x6dd   :  { %v13240_v37 = vld [vmem:[#allocation2 + $0x10e0] sm:$0xf0]  ;;  %v13054_v28 = vld [vmem:[#allocation2 + $0xf28] sm:$0xf] }
 0x6de   :  { %v16033_v18 = vld [vmem:[#allocation2 + $0x14a4] sm:$0xf]  ;;  %v13243_v30 = vor.u32 %v15905_v31, %v13240_v37  ;;  %9375 = vmatpush.bf16.msrb.mxu1 %v14331_v38  ;;  %v9094_v31 = vadd.f32 %v17541_v59, %v3211_v45  ;;  %v12542_v32 = vld [vmem:[#allocation2 + $0xb28] sm:$0xf]  ;;  %v10026_v59 = vmax.f32 %v17531_v34, 0.0 }
 0x6df   :  { %v13752_v5 = vld [vmem:[#allocation2 + $0x14e0] sm:$0xf0]  ;;  %v15738_v37 = vld [vmem:[#allocation2 + $0xb64] sm:$0xf0] }
 0x6e0   :  { %v16289_v39 = vld [vmem:[#allocation2 + $0x1ca4] sm:$0xf]  ;;  %v13755_v41 = vor.u32 %v16033_v18, %v13752_v5  ;;  %9350 = vmatpush.bf16.msra.mxu3 %v13243_v30  ;;  %v12031_v18 = vor.u32 %v15610_v0, %v12030_v27  ;;  %v13055_v5 = vor.u32 %v15866_v24, %v13054_v28  ;;  %v11454_v38 = vld [vmem:[#allocation2 + $0x2a8] sm:$0xf]  ;;  %v12543_v30 = vor.u32 %v15738_v37, %v12542_v32  ;;  %v9171_v24 = vpop.f32.mrf.mxu1  ;;  %v9145_v32 = vpop.f32.mrf.mxu3 }
 0x6e1   :  { %v14776_v40 = vld [vmem:[#allocation2 + $0x1ce0] sm:$0xf0]  ;;  %v17555_v51 = vmax.f32 %v10026_v59, 1e-12  ;;  %v15818_v45 = vld [vmem:[#allocation2 + $0xde4] sm:$0xf0] }
 0x6e2   :  { %v16161_v42 = vld [vmem:[#allocation2 + $0x18a4] sm:$0xf]  ;;  %v14779_v53 = vor.u32 %v16289_v39, %v14776_v40  ;;  %9363 = vmatpush.bf16.msrb.mxu0 %v13755_v41  ;;  %v15466_v39 = vld [vmem:[#allocation2 + $0x2e4] sm:$0xf0]  ;;  %v9107_v41 = vadd.f32 %v17537_v26, %v9094_v31 }
 0x6e3   :  { %v14264_v20 = vld [vmem:[#allocation2 + $0x18e0] sm:$0xf0]  ;;  %v11966_v40 = vld [vmem:[#allocation2 + $0x6a8] sm:$0xf]  ;;  %16525 = vrcp.f32 %v17555_v51  ;;  %vm10147_vm15 = vweird.f32 %v17555_v51 }
 0x6e4   :  { %v15889_v15 = vld [vmem:[#allocation2 + $0x1024] sm:$0xf]  ;;  %v14267_v58 = vor.u32 %v16161_v42, %v14264_v20  ;;  %9389 = vmatpush.bf16.msrb.mxu2 %v14779_v53  ;;  %v12990_v42 = vld [vmem:[#allocation2 + $0xea8] sm:$0xf]  ;;  %v11967_v52 = vor.u32 %v15594_v43, %v11966_v40  ;;  %v9120_v1 = vadd.f32 %v17539_v33, %v9107_v41 }
 0x6e5   :  { %v13176_v46 = vld [vmem:[#allocation2 + $0x1060] sm:$0xf0]  ;;  %v15850_v20 = vld [vmem:[#allocation2 + $0xee4] sm:$0xf0] }
 0x6e6   :  { %v16017_v49 = vld [vmem:[#allocation2 + $0x1424] sm:$0xf]  ;;  %v13179_v4 = vor.u32 %v15889_v15, %v13176_v46  ;;  %9376 = vmatpush.bf16.msrb.mxu1 %v14267_v58  ;;  %v11455_v15 = vor.u32 %v15466_v39, %v11454_v38  ;;  %v12478_v46 = vld [vmem:[#allocation2 + $0xaa8] sm:$0xf]  ;;  %v12991_v53 = vor.u32 %v15850_v20, %v12990_v42  ;;  %v9133_v33 = vadd.f32 %v17543_v47, %v9120_v1  ;;  %v9184_v39 = vpop.f32.mrf.mxu2 }
 0x6e7   :  { %v13688_v44 = vld [vmem:[#allocation2 + $0x1460] sm:$0xf0]  ;;  %v15578_v58 = vld [vmem:[#allocation2 + $0x664] sm:$0xf0] }
 0x6e8   :  { %v16273_v13 = vld [vmem:[#allocation2 + $0x1c24] sm:$0xf]  ;;  %v13691_v17 = vor.u32 %v16017_v49, %v13688_v44  ;;  %9351 = vmatpush.bf16.msra.mxu3 %v13179_v4  ;;  %v15722_v49 = vld [vmem:[#allocation2 + $0xae4] sm:$0xf0]  ;;  %v9146_v47 = vadd.f32 %v9145_v32, %v9133_v33 }
 0x6e9   :  { %v14712_v54 = vld [vmem:[#allocation2 + $0x1c60] sm:$0xf0]  ;;  %v11390_v44 = vld [vmem:[#allocation2 + $0x228] sm:$0xf]  ;;  %v12479_v26 = vor.u32 %v15722_v49, %v12478_v46  ;;  %v17560_v41 = vpop.eup %16525 }
 0x6ea   :  { %v16145_v21 = vld [vmem:[#allocation2 + $0x1824] sm:$0xf]  ;;  %v14715_v8 = vor.u32 %v16273_v13, %v14712_v54  ;;  %9364 = vmatpush.bf16.msrb.mxu0 %v13691_v17  ;;  %v15450_v13 = vld [vmem:[#allocation2 + $0x264] sm:$0xf0]  ;;  %v12927_v17 = vor.u32 %v15834_v36, %v12926_v63  ;;  %vm10148_vm0 = vweird.f32 %v17560_v41 }
 0x6eb   :  { %v14200_v48 = vld [vmem:[#allocation2 + $0x1860] sm:$0xf0]  ;;  %9352 = vmatmul.bf16.vlgmr.msra.gmra.mxu3 %v17208_v7  ;;  %v11902_v54 = vld [vmem:[#allocation2 + $0x628] sm:$0xf]  ;;  %v11391_v50 = vor.u32 %v15450_v13, %v11390_v44  ;;  %vm17590_vm4 = vmor %vm10147_vm15, %vm10148_vm0 }
 0x6ec   :  { %v14203_v10 = vor.u32 %v16145_v21, %v14200_v48  ;;  %9390 = vmatpush.bf16.msrb.mxu2 %v14715_v8  ;;  %9396 = vmatpush.bf16.msrb.mxu3 %v11583_v9  ;;  %v11903_v4 = vor.u32 %v15578_v58, %v11902_v54  ;;  %v11326_v21 = vld [vmem:[#allocation2 + $0x1a8] sm:$0xf]  ;;  %v9160_v54 = vpop.f32.mrf.mxu0 }
 0x6ed   :  { %9365 = vmatmul.bf16.vlgmr.msrb.gmra.mxu0 %v17212_v16  ;;  %v15434_v48 = vld [vmem:[#allocation2 + $0x1e4] sm:$0xf0] }
 0x6ee   :  { %9409 = vmatpush.bf16.msra.mxu0 %v12095_v60  ;;  %9377 = vmatpush.bf16.msrb.mxu1 %v14203_v10  ;;  %v15562_v8 = vld [vmem:[#allocation2 + $0x5e4] sm:$0xf0]  ;;  %v11327_v60 = vor.u32 %v15434_v48, %v11326_v21  ;;  %v9173_v48 = vpop.f32.mrf.mxu1 }
 0x6ef   :  { %9391 = vmatmul.bf16.vlgmr.msrb.gmra.mxu2 %v17210_v12  ;;  %v12862_v9 = vld [vmem:[#allocation2 + $0xda8] sm:$0xf]  ;;  %v11839_v22 = vor.u32 %v15562_v8, %v11838_v62 }
 0x6f0   :  { %9435 = vmatpush.bf16.msra.mxu2 %v13119_v14  ;;  %9397 = vmatpush.bf16.msrb.mxu3 %v11519_v35  ;;  %v12350_v14 = vld [vmem:[#allocation2 + $0x9a8] sm:$0xf]  ;;  %v12863_v27 = vor.u32 %v15818_v45, %v12862_v9 }
 0x6f1   :  { %9378 = vmatmul.bf16.vlgmr.msrb.gmra.mxu1 %v17215_v23  ;;  %v15690_v19 = vld [vmem:[#allocation2 + $0x9e4] sm:$0xf0] }
 0x6f2   :  { %9422 = vmatpush.bf16.msra.mxu1 %v12607_v25  ;;  %9410 = vmatpush.bf16.msra.mxu0 %v12031_v18  ;;  %v11262_v10 = vld [vmem:[#allocation2 + $0x128] sm:$0xf]  ;;  %v12351_v37 = vor.u32 %v15690_v19, %v12350_v14  ;;  %v9147_v14 = vpop.f32.mrf.mxu3 }
 0x6f3   :  { %v15418_v0 = vld [vmem:[#allocation2 + $0x164] sm:$0xf0] }
 0x6f4   :  { %9436 = vmatpush.bf16.msra.mxu2 %v13055_v5  ;;  %9398 = vmatpush.bf16.msrb.mxu3 %v11455_v15  ;;  %v11774_v28 = vld [vmem:[#allocation2 + $0x528] sm:$0xf]  ;;  %v11263_v18 = vor.u32 %v15418_v0, %v11262_v10  ;;  %v9159_v15 = vadd.f32 %v9158_v61, %v9146_v47  ;;  %v9186_v0 = vpop.f32.mrf.mxu2 }
 0x6f5   :  { %v15546_v25 = vld [vmem:[#allocation2 + $0x564] sm:$0xf0] }
 0x6f6   :  { %9423 = vmatpush.bf16.msra.mxu1 %v12543_v30  ;;  %9411 = vmatpush.bf16.msra.mxu0 %v11967_v52  ;;  %v12798_v31 = vld [vmem:[#allocation2 + $0xd28] sm:$0xf]  ;;  %v11775_v40 = vor.u32 %v15546_v25, %v11774_v28  ;;  %v9172_v58 = vadd.f32 %v9171_v24, %v9159_v15 }
 0x6f7   :  { %v15802_v35 = vld [vmem:[#allocation2 + $0xd64] sm:$0xf0] }
 0x6f8   :  { %9437 = vmatpush.bf16.msra.mxu2 %v12991_v53  ;;  %9399 = vmatpush.bf16.msrb.mxu3 %v11391_v50  ;;  %v12286_v5 = vld [vmem:[#allocation2 + $0x928] sm:$0xf]  ;;  %v12799_v43 = vor.u32 %v15802_v35, %v12798_v31  ;;  %v10143_v50 = vmul.f32 %v17560_v41, %v17555_v51  ;;  %v17564_v62 = vadd.f32 %v9184_v39, %v9172_v58 }
 0x6f9   :  { %v15674_v38 = vld [vmem:[#allocation2 + $0x964] sm:$0xf0] }
 0x6fa   :  { %9424 = vmatpush.bf16.msra.mxu1 %v12479_v26  ;;  %9412 = vmatpush.bf16.msra.mxu0 %v11903_v4  ;;  %v11198_v42 = vld [vmem:[#allocation2 + $0xa8] sm:$0xf]  ;;  %v12287_v53 = vor.u32 %v15674_v38, %v12286_v5  ;;  %v10027_v19 = vmax.f32 %v17564_v62, 0.0  ;;  %v10144_v28 = vsub.f32 1.0, %v10143_v50 }
 0x6fb   :  { %v15402_v20 = vld [vmem:[#allocation2 + $0xe4] sm:$0xf0] }
 0x6fc   :  { %9438 = vmatpush.bf16.msra.mxu2 %v12927_v17  ;;  %9400 = vmatpush.bf16.msrb.mxu3 %v11327_v60  ;;  %v11710_v30 = vld [vmem:[#allocation2 + $0x4a8] sm:$0xf]  ;;  %v11199_v63 = vor.u32 %v15402_v20, %v11198_v42  ;;  %v17569_v32 = vmax.f32 %v10027_v19, 1e-12  ;;  %v10145_v15 = vmul.f32 %v17560_v41, %v10144_v28 }
 0x6fd   :  { %v15530_v46 = vld [vmem:[#allocation2 + $0x4e4] sm:$0xf0] }
 0x6fe   :  { %9425 = vmatpush.bf16.msra.mxu1 %v12415_v11  ;;  %9413 = vmatpush.bf16.msra.mxu0 %v11839_v22  ;;  %v12734_v49 = vld [vmem:[#allocation2 + $0xca8] sm:$0xf]  ;;  %v11711_v29 = vor.u32 %v15530_v46, %v11710_v30  ;;  %16527 = vrcp.f32 %v17569_v32  ;;  %vm10162_vm6 = vweird.f32 %v17569_v32 }
 0x6ff   :  { %v15786_v52 = vld [vmem:[#allocation2 + $0xce4] sm:$0xf0] }
 0x700   :  { %9439 = vmatpush.bf16.msra.mxu2 %v12863_v27  ;;  %v12222_v44 = vld [vmem:[#allocation2 + $0x8a8] sm:$0xf]  ;;  %9401 = vmatpush.bf16.msrb.mxu3 %v11263_v18  ;;  %v12735_v6 = vor.u32 %v15786_v52, %v12734_v49 }
 0x701   :  { %v15658_v13 = vld [vmem:[#allocation2 + $0x8e4] sm:$0xf0] }
 0x702   :  { %9426 = vmatpush.bf16.msra.mxu1 %v12351_v37  ;;  %v11134_v36 = vld [vmem:[#allocation2 + $0x28] sm:$0xf]  ;;  %9414 = vmatpush.bf16.msra.mxu0 %v11775_v40  ;;  %v12223_v11 = vor.u32 %v15658_v13, %v12222_v44 }
 0x703   :  { %v15386_v26 = vld [vmem:[#allocation2 + $0x64] sm:$0xf0] }
 0x704   :  { %v11646_v1 = vld [vmem:[#allocation2 + $0x428] sm:$0xf]  ;;  %9440 = vmatpush.bf16.msra.mxu2 %v12799_v43  ;;  %9402 = vmatpush.bf16.msrb.mxu3 %v11199_v63  ;;  %v11135_v22 = vor.u32 %v15386_v26, %v11134_v36  ;;  %v10151_v36 = vand.u32 2147483647, %v17555_v51 }
 0x705   :  { %v15514_v4 = vld [vmem:[#allocation2 + $0x464] sm:$0xf0] }
 0x706   :  { %v12670_v17 = vld [vmem:[#allocation2 + $0xc28] sm:$0xf]  ;;  %9427 = vmatpush.bf16.msra.mxu1 %v12287_v53  ;;  %9415 = vmatpush.bf16.msra.mxu0 %v11711_v29  ;;  %v11647_v24 = vor.u32 %v15514_v4, %v11646_v1  ;;  %v10146_v29 = vadd.f32 %v17560_v41, %v10145_v15  ;;  %vm17594_vm5 = vcmp.eq.f32.partialorder %v10151_v36, 8.507059e+37 }
 0x707   :  { %v15770_v21 = vld [vmem:[#allocation2 + $0xc64] sm:$0xf0] }
 0x708   :  { %v13630_v8 = vld [vmem:[#allocation2 + $0x13a8] sm:$0xf]  ;;  %9441 = vmatpush.bf16.msra.mxu2 %v12735_v6  ;;  %v12671_v25 = vor.u32 %v15770_v21, %v12670_v17  ;;  %9403 = vmatpush.bf16.msrb.mxu3 %v11135_v22  ;;  %v10153_v6 = vand.u32 2147483648, %v17555_v51  ;;  %v17581_v21 = vpop.eup %16527  ;;  %v10168_v51 = vand.u32 2147483648, %v17569_v32 }
 0x709   :  { %v16010_v9 = vld [vmem:[#allocation2 + $0x13e4] sm:$0xf0]  ;;  %vm10163_vm7 = vweird.f32 %v17581_v21 }
 0x70a   :  { %v14142_v45 = vld [vmem:[#allocation2 + $0x17a8] sm:$0xf]  ;;  %v13631_v37 = vor.u32 %v16010_v9, %v13630_v8  ;;  %9428 = vmatpush.bf16.msra.mxu1 %v12223_v11  ;;  %9416 = vmatpush.bf16.msra.mxu0 %v11647_v24  ;;  %v10150_v24 = vsel %vm17590_vm4, %v17560_v41, %v10146_v29  ;;  %v10166_v41 = vand.u32 2147483647, %v17569_v32  ;;  %vm17613_vm8 = vmor %vm10162_vm6, %vm10163_vm7 }
 0x70b   :  { %v16138_v61 = vld [vmem:[#allocation2 + $0x17e4] sm:$0xf0]  ;;  %9404 = vmatmul.bf16.vlgmr.msrb.gmra.mxu3 %v17196_v55 }
 0x70c   :  { %v15166_v33 = vld [vmem:[#allocation2 + $0x1fa8] sm:$0xf]  ;;  %v14143_v47 = vor.u32 %v16138_v61, %v14142_v45  ;;  %9442 = vmatpush.bf16.msra.mxu2 %v12671_v25  ;;  %9448 = vmatpush.bf16.msra.mxu3 %v13631_v37  ;;  %v10158_v61 = vmul.f32 %v17581_v21, %v17569_v32  ;;  %v10154_v25 = vor.u32 1.1754944e-38, %v10153_v6  ;;  %vm10167_vm9 = vcmp.eq.f32.partialorder %v10166_v41, 8.507059e+37 }
 0x70d   :  { %v16394_v60 = vld [vmem:[#allocation2 + $0x1fe4] sm:$0xf0]  ;;  %9417 = vmatmul.bf16.vlgmr.msra.gmra.mxu0 %v17200_v2 }
 0x70e   :  { %v12158_v27 = vld [vmem:[#allocation2 + $0x828] sm:$0xf]  ;;  %v15167_v5 = vor.u32 %v16394_v60, %v15166_v33  ;;  %9461 = vmatpush.bf16.msrb.mxu0 %v14143_v47 }
 0x70f   :  { %v15642_v10 = vld [vmem:[#allocation2 + $0x864] sm:$0xf0]  ;;  %9443 = vmatmul.bf16.vlgmr.msra.gmra.mxu2 %v17198_v56 }
 0x710   :  { %v14654_v31 = vld [vmem:[#allocation2 + $0x1ba8] sm:$0xf]  ;;  %v12159_v38 = vor.u32 %v15642_v10, %v12158_v27  ;;  %9487 = vmatpush.bf16.msrb.mxu2 %v15167_v5  ;;  %v9236_v27 = vpop.f32.mrf.mxu2 }
 0x711   :  { %v16266_v35 = vld [vmem:[#allocation2 + $0x1be4] sm:$0xf0] }
 0x712   :  { %v13566_v18 = vld [vmem:[#allocation2 + $0x1328] sm:$0xf]  ;;  %v14655_v42 = vor.u32 %v16266_v35, %v14654_v31  ;;  %9429 = vmatpush.bf16.msra.mxu1 %v12159_v38  ;;  %v10159_v31 = vsub.f32 1.0, %v10158_v61 }
 0x713   :  { %v15994_v39 = vld [vmem:[#allocation2 + $0x1364] sm:$0xf0] }
 0x714   :  { %v14078_v40 = vld [vmem:[#allocation2 + $0x1728] sm:$0xf]  ;;  %v13567_v52 = vor.u32 %v15994_v39, %v13566_v18 }
 0x715   :  { %v16122_v43 = vld [vmem:[#allocation2 + $0x1764] sm:$0xf0]  ;;  %9430 = vmatmul.bf16.vlgmr.msra.gmra.mxu1 %v17202_v3 }
 0x716   :  { %v15102_v20 = vld [vmem:[#allocation2 + $0x1f28] sm:$0xf]  ;;  %v14079_v53 = vor.u32 %v16122_v43, %v14078_v40  ;;  %9474 = vmatpush.bf16.msrb.mxu1 %v14655_v42  ;;  %9449 = vmatpush.bf16.msra.mxu3 %v13567_v52  ;;  %v10160_v40 = vmul.f32 %v17581_v21, %v10159_v31  ;;  %v17606_v42 = vld [vmem:[#allocation30 + $0x8] sm:$0xff] }
 0x717   :  { %v16378_v30 = vld [vmem:[#allocation2 + $0x1f64] sm:$0xf0] }
 0x718   :  { %v14590_v46 = vld [vmem:[#allocation2 + $0x1b28] sm:$0xf]  ;;  %v15103_v13 = vor.u32 %v16378_v30, %v15102_v20  ;;  %9462 = vmatpush.bf16.msrb.mxu0 %v14079_v53  ;;  %v10155_v20 = vsel %vm17594_vm5, %v10154_v25, %v10150_v24  ;;  %v10161_v52 = vadd.f32 %v17581_v21, %v10160_v40 }
 0x719   :  { %v16250_v49 = vld [vmem:[#allocation2 + $0x1b64] sm:$0xf0]  ;;  %v10156_v29 = vmul.f32 %v10155_v20, %v10026_v59  ;;  %v9197_v59 = vpop.f32.mrf.mxu3 }
 0x71a   :  { %v13502_v44 = vld [vmem:[#allocation2 + $0x12a8] sm:$0xf]  ;;  %v14591_v26 = vor.u32 %v16250_v49, %v14590_v46  ;;  %9488 = vmatpush.bf16.msrb.mxu2 %v15103_v13  ;;  %v9210_v49 = vpop.f32.mrf.mxu0  ;;  %v10165_v32 = vsel %vm17613_vm8, %v17581_v21, %v10161_v52  ;;  %v15618_v13 = vld [vmem:[#allocation2 + $0x7ac] sm:$0xf] }
 0x71b   :  { %v15978_v54 = vld [vmem:[#allocation2 + $0x12e4] sm:$0xf0]  ;;  %v10312_v10 = vrot.slane %v10156_v29, 4 }
 0x71c   :  { %v14014_v58 = vld [vmem:[#allocation2 + $0x16a8] sm:$0xf]  ;;  %v13503_v48 = vor.u32 %v15978_v54, %v13502_v44  ;;  %9475 = vmatpush.bf16.msrb.mxu1 %v14591_v26  ;;  %v10169_v54 = vor.u32 1.1754944e-38, %v10168_v51 }
 0x71d   :  { %v16106_v63 = vld [vmem:[#allocation2 + $0x16e4] sm:$0xf0] }
 0x71e   :  { %v15038_v1 = vld [vmem:[#allocation2 + $0x1ea8] sm:$0xf]  ;;  %v14015_v8 = vor.u32 %v16106_v63, %v14014_v58  ;;  %9450 = vmatpush.bf16.msra.mxu3 %v13503_v48  ;;  %v10170_v48 = vsel %vm10167_vm9, %v10169_v54, %v10165_v32 }
 0x71f   :  { %v16362_v50 = vld [vmem:[#allocation2 + $0x1ee4] sm:$0xf0] }
 0x720   :  { %v14526_v4 = vld [vmem:[#allocation2 + $0x1aa8] sm:$0xf]  ;;  %v15039_v33 = vor.u32 %v16362_v50, %v15038_v1  ;;  %9463 = vmatpush.bf16.msrb.mxu0 %v14015_v8  ;;  %v3212_v1 = vperm.slane %v17606_v42, 0  ;;  %v9223_v50 = vpop.f32.mrf.mxu1 }
 0x721   :  { %v16234_v17 = vld [vmem:[#allocation2 + $0x1ae4] sm:$0xf0] }
 0x722   :  { %v13438_v9 = vld [vmem:[#allocation2 + $0x1228] sm:$0xf]  ;;  %v14527_v0 = vor.u32 %v16234_v17, %v14526_v4  ;;  %9489 = vmatpush.bf16.msrb.mxu2 %v15039_v33 }
 0x723   :  { %v15962_v45 = vld [vmem:[#allocation2 + $0x1264] sm:$0xf0] }
 0x724   :  { %v13950_v11 = vld [vmem:[#allocation2 + $0x1628] sm:$0xf]  ;;  %v13439_v47 = vor.u32 %v15962_v45, %v13438_v9  ;;  %9476 = vmatpush.bf16.msrb.mxu1 %v14527_v0 }
 0x725   :  { %v16090_v60 = vld [vmem:[#allocation2 + $0x1664] sm:$0xf0] }
 0x726   :  { %v14974_v14 = vld [vmem:[#allocation2 + $0x1e28] sm:$0xf]  ;;  %v13951_v18 = vor.u32 %v16090_v60, %v13950_v11  ;;  %9451 = vmatpush.bf16.msra.mxu3 %v13439_v47  ;;  %v10171_v11 = vmul.f32 %v10170_v48, %v10027_v19  ;;  %v15746_v48 = vld [vmem:[#allocation2 + $0xbac] sm:$0xf] }
 0x727   :  { %v16346_v22 = vld [vmem:[#allocation2 + $0x1e64] sm:$0xf0] }
 0x728   :  { %v14462_v28 = vld [vmem:[#allocation2 + $0x1a28] sm:$0xf]  ;;  %v14975_v5 = vor.u32 %v16346_v22, %v14974_v14  ;;  %9464 = vmatpush.bf16.msrb.mxu0 %v13951_v18  ;;  %v9198_v22 = vadd.f32 %v9197_v59, %v3212_v1  ;;  %v10313_v0 = vrot.slane %v10171_v11, 2  ;;  %v15474_v11 = vld [vmem:[#allocation2 + $0x32c] sm:$0xf] }
 0x729   :  { %v16218_v35 = vld [vmem:[#allocation2 + $0x1a64] sm:$0xf0] }
 0x72a   :  { %v13374_v37 = vld [vmem:[#allocation2 + $0x11a8] sm:$0xf]  ;;  %v14463_v30 = vor.u32 %v16218_v35, %v14462_v28  ;;  %9490 = vmatpush.bf16.msrb.mxu2 %v14975_v5  ;;  %v9211_v35 = vadd.f32 %v9210_v49, %v9198_v22  ;;  %v10324_v51 = vsel %vm2125_vm2, %v10312_v10, %v10313_v0  ;;  %v12544_v10 = vld [vmem:[#allocation2 + $0xb68] sm:$0xf0] }
 0x72b   :  { %v15946_v38 = vld [vmem:[#allocation2 + $0x11e4] sm:$0xf0] }
 0x72c   :  { %v13886_v39 = vld [vmem:[#allocation2 + $0x15a8] sm:$0xf]  ;;  %v13375_v58 = vor.u32 %v15946_v38, %v13374_v37  ;;  %9477 = vmatpush.bf16.msrb.mxu1 %v14463_v30  ;;  %v9212_v37 = vpop.f32.mrf.mxu0  ;;  %v9224_v30 = vadd.f32 %v9223_v50, %v9211_v35  ;;  %v12992_v35 = vld [vmem:[#allocation2 + $0xee8] sm:$0xf0] }
 0x72d   :  { %v16074_v43 = vld [vmem:[#allocation2 + $0x15e4] sm:$0xf0] }
 0x72e   :  { %v14910_v15 = vld [vmem:[#allocation2 + $0x1da8] sm:$0xf]  ;;  %v13887_v63 = vor.u32 %v16074_v43, %v13886_v39  ;;  %9452 = vmatpush.bf16.msra.mxu3 %v13375_v58  ;;  %v10325_v39 = vsel %vm814_vm3, %v17522_v57, %v10324_v51  ;;  %v11584_v57 = vld [vmem:[#allocation2 + $0x3e8] sm:$0xf0]  ;;  %v17631_v54 = vadd.f32 %v9236_v27, %v9224_v30 }
 0x72f   :  { %v16330_v46 = vld [vmem:[#allocation2 + $0x1de4] sm:$0xf0]  ;;  %10337 = vst [vmem:[%s17872_s13 + $0x8] sm:$0xff] %v10325_v39  ;;  %v12096_v58 = vld [vmem:[#allocation2 + $0x7e8] sm:$0xf0] }
 0x730   :  { %v14398_v53 = vld [vmem:[#allocation2 + $0x19a8] sm:$0xf]  ;;  %v14911_v6 = vor.u32 %v16330_v46, %v14910_v15  ;;  %9465 = vmatpush.bf16.msrb.mxu0 %v13887_v63  ;;  %v9225_v15 = vpop.f32.mrf.mxu1  ;;  %v15874_v63 = vld [vmem:[#allocation2 + $0xfac] sm:$0xf] }
 0x731   :  { %v16202_v44 = vld [vmem:[#allocation2 + $0x19e4] sm:$0xf0]  ;;  %v15730_v27 = vld [vmem:[#allocation2 + $0xb2c] sm:$0xf] }
 0x732   :  { %v13310_v36 = vld [vmem:[#allocation2 + $0x1128] sm:$0xf]  ;;  %v14399_v8 = vor.u32 %v16202_v44, %v14398_v53  ;;  %9491 = vmatpush.bf16.msrb.mxu2 %v14911_v6  ;;  %v15490_v44 = vld [vmem:[#allocation2 + $0x3ac] sm:$0xf]  ;;  %v9238_v6 = vpop.f32.mrf.mxu2  ;;  %v12547_v37 = vor.u32 %v15730_v27, %v12544_v10 }
 0x733   :  { %v15930_v26 = vld [vmem:[#allocation2 + $0x1164] sm:$0xf0]  ;;  %v15442_v39 = vld [vmem:[#allocation2 + $0x22c] sm:$0xf] }
 0x734   :  { %v13822_v4 = vld [vmem:[#allocation2 + $0x1528] sm:$0xf]  ;;  %v13311_v33 = vor.u32 %v15930_v26, %v13310_v36  ;;  %9478 = vmatpush.bf16.msrb.mxu1 %v14399_v8  ;;  %v13120_v36 = vld [vmem:[#allocation2 + $0xfe8] sm:$0xf0]  ;;  %v9199_v26 = vpop.f32.mrf.mxu3 }
 0x735   :  { %v16058_v17 = vld [vmem:[#allocation2 + $0x1564] sm:$0xf0]  ;;  %v12608_v8 = vld [vmem:[#allocation2 + $0xbe8] sm:$0xf0] }
 0x736   :  { %v14846_v9 = vld [vmem:[#allocation2 + $0x1d28] sm:$0xf]  ;;  %v13823_v21 = vor.u32 %v16058_v17, %v13822_v4  ;;  %9453 = vmatpush.bf16.msra.mxu3 %v13311_v33  ;;  %v11587_v17 = vor.u32 %v15490_v44, %v11584_v57  ;;  %v12032_v33 = vld [vmem:[#allocation2 + $0x768] sm:$0xf0] }
 0x737   :  { %v16314_v45 = vld [vmem:[#allocation2 + $0x1d64] sm:$0xf0]  ;;  %v12928_v30 = vld [vmem:[#allocation2 + $0xe68] sm:$0xf0] }
 0x738   :  { %v14334_v61 = vld [vmem:[#allocation2 + $0x1928] sm:$0xf]  ;;  %v14847_v28 = vor.u32 %v16314_v45, %v14846_v9  ;;  %9466 = vmatpush.bf16.msrb.mxu0 %v13823_v21  ;;  %v12099_v9 = vor.u32 %v15618_v13, %v12096_v58  ;;  %v13123_v45 = vor.u32 %v15874_v63, %v13120_v36  ;;  %v15858_v21 = vld [vmem:[#allocation2 + $0xf2c] sm:$0xf] }
 0x739   :  { %v16186_v34 = vld [vmem:[#allocation2 + $0x1964] sm:$0xf0]  ;;  %v15426_v57 = vld [vmem:[#allocation2 + $0x1ac] sm:$0xf] }
 0x73a   :  { %v13246_v60 = vld [vmem:[#allocation2 + $0x10a8] sm:$0xf]  ;;  %v14335_v62 = vor.u32 %v16186_v34, %v14334_v61  ;;  %9492 = vmatpush.bf16.msrb.mxu2 %v14847_v28  ;;  %v11520_v61 = vld [vmem:[#allocation2 + $0x368] sm:$0xf0]  ;;  %v9288_v27 = vpop.f32.mrf.mxu2 }
 0x73b   :  { %v15914_v14 = vld [vmem:[#allocation2 + $0x10e4] sm:$0xf0]  ;;  %v15602_v34 = vld [vmem:[#allocation2 + $0x72c] sm:$0xf]  ;;  %v11523_v22 = vor.u32 %v15474_v11, %v11520_v61 }
 0x73c   :  { %v13758_v24 = vld [vmem:[#allocation2 + $0x14a8] sm:$0xf]  ;;  %v13247_v47 = vor.u32 %v15914_v14, %v13246_v60  ;;  %9479 = vmatpush.bf16.msrb.mxu1 %v14335_v62  ;;  %v13056_v60 = vld [vmem:[#allocation2 + $0xf68] sm:$0xf0]  ;;  %v12611_v14 = vor.u32 %v15746_v48, %v12608_v8  ;;  %v12035_v0 = vor.u32 %v15602_v34, %v12032_v33 }
 0x73d   :  { %v16042_v25 = vld [vmem:[#allocation2 + $0x14e4] sm:$0xf0]  ;;  %v13059_v28 = vor.u32 %v15858_v21, %v13056_v60  ;;  %v15586_v62 = vld [vmem:[#allocation2 + $0x6ac] sm:$0xf] }
 0x73e   :  { %v14782_v19 = vld [vmem:[#allocation2 + $0x1ca8] sm:$0xf]  ;;  %v13759_v40 = vor.u32 %v16042_v25, %v13758_v24  ;;  %9454 = vmatpush.bf16.msra.mxu3 %v13247_v47  ;;  %v15458_v24 = vld [vmem:[#allocation2 + $0x2ac] sm:$0xf] }
 0x73f   :  { %v16298_v31 = vld [vmem:[#allocation2 + $0x1ce4] sm:$0xf0]  ;;  %v11456_v25 = vld [vmem:[#allocation2 + $0x2e8] sm:$0xf0] }
 0x740   :  { %v14270_v18 = vld [vmem:[#allocation2 + $0x18a8] sm:$0xf]  ;;  %v14783_v46 = vor.u32 %v16298_v31, %v14782_v19  ;;  %9467 = vmatpush.bf16.msrb.mxu0 %v13759_v40  ;;  %v11968_v19 = vld [vmem:[#allocation2 + $0x6e8] sm:$0xf0]  ;;  %v11459_v51 = vor.u32 %v15458_v24, %v11456_v25 }
 0x741   :  { %v16170_v5 = vld [vmem:[#allocation2 + $0x18e4] sm:$0xf0]  ;;  %v15842_v31 = vld [vmem:[#allocation2 + $0xeac] sm:$0xf] }
 0x742   :  { %v13182_v38 = vld [vmem:[#allocation2 + $0x1028] sm:$0xf]  ;;  %v14271_v53 = vor.u32 %v16170_v5, %v14270_v18  ;;  %9493 = vmatpush.bf16.msrb.mxu2 %v14783_v46  ;;  %v15714_v47 = vld [vmem:[#allocation2 + $0xaac] sm:$0xf]  ;;  %v11971_v5 = vor.u32 %v15586_v62, %v11968_v19 }
 0x743   :  { %v15898_v41 = vld [vmem:[#allocation2 + $0x1064] sm:$0xf0]  ;;  %v12480_v18 = vld [vmem:[#allocation2 + $0xae8] sm:$0xf0] }
 0x744   :  { %v13694_v43 = vld [vmem:[#allocation2 + $0x1428] sm:$0xf]  ;;  %v13183_v1 = vor.u32 %v15898_v41, %v13182_v38  ;;  %9480 = vmatpush.bf16.msrb.mxu1 %v14271_v53  ;;  %v12995_v38 = vor.u32 %v15842_v31, %v12992_v35  ;;  %v11392_v40 = vld [vmem:[#allocation2 + $0x268] sm:$0xf0]  ;;  %v12483_v15 = vor.u32 %v15714_v47, %v12480_v18 }
 0x745   :  { %v16026_v20 = vld [vmem:[#allocation2 + $0x1464] sm:$0xf0]  ;;  %v15570_v41 = vld [vmem:[#allocation2 + $0x62c] sm:$0xf]  ;;  %v11395_v46 = vor.u32 %v15442_v39, %v11392_v40 }
 0x746   :  { %v14718_v49 = vld [vmem:[#allocation2 + $0x1c28] sm:$0xf]  ;;  %v13695_v50 = vor.u32 %v16026_v20, %v13694_v43  ;;  %9455 = vmatpush.bf16.msra.mxu3 %v13183_v1  ;;  %v11904_v43 = vld [vmem:[#allocation2 + $0x668] sm:$0xf0] }
 0x747   :  { %v16282_v52 = vld [vmem:[#allocation2 + $0x1c64] sm:$0xf0]  ;;  %v15826_v20 = vld [vmem:[#allocation2 + $0xe2c] sm:$0xf]  ;;  %v11907_v53 = vor.u32 %v15570_v41, %v11904_v43 }
 0x748   :  { %v14206_v29 = vld [vmem:[#allocation2 + $0x1828] sm:$0xf]  ;;  %v14719_v4 = vor.u32 %v16282_v52, %v14718_v49  ;;  %9468 = vmatpush.bf16.msrb.mxu0 %v13695_v50  ;;  %v15698_v49 = vld [vmem:[#allocation2 + $0xa2c] sm:$0xf]  ;;  %v12931_v44 = vor.u32 %v15826_v20, %v12928_v30  ;;  %v9262_v50 = vpop.f32.mrf.mxu0 }
 0x749   :  { %v16154_v32 = vld [vmem:[#allocation2 + $0x1864] sm:$0xf0]  ;;  %9456 = vmatmul.bf16.vlgmr.msra.gmra.mxu3 %v17208_v7  ;;  %v12416_v52 = vld [vmem:[#allocation2 + $0xa68] sm:$0xf0] }
 0x74a   :  { %v14207_v59 = vor.u32 %v16154_v32, %v14206_v29  ;;  %9494 = vmatpush.bf16.msrb.mxu2 %v14719_v4  ;;  %9500 = vmatpush.bf16.msrb.mxu3 %v11587_v17  ;;  %v11328_v13 = vld [vmem:[#allocation2 + $0x1e8] sm:$0xf0]  ;;  %v12419_v1 = vor.u32 %v15698_v49, %v12416_v52 }
 0x74b   :  { %9469 = vmatmul.bf16.vlgmr.msrb.gmra.mxu0 %v17212_v16  ;;  %v15554_v58 = vld [vmem:[#allocation2 + $0x5ac] sm:$0xf]  ;;  %v11331_v29 = vor.u32 %v15426_v57, %v11328_v13 }
 0x74c   :  { %9513 = vmatpush.bf16.msra.mxu0 %v12099_v9  ;;  %9481 = vmatpush.bf16.msrb.mxu1 %v14207_v59  ;;  %v11840_v63 = vld [vmem:[#allocation2 + $0x5e8] sm:$0xf0]  ;;  %v9249_v59 = vpop.f32.mrf.mxu3 }
 0x74d   :  { %9495 = vmatmul.bf16.vlgmr.msrb.gmra.mxu2 %v17210_v12  ;;  %v15810_v36 = vld [vmem:[#allocation2 + $0xdac] sm:$0xf]  ;;  %v11843_v4 = vor.u32 %v15554_v58, %v11840_v63  ;;  %v9250_v21 = vadd.f32 %v9249_v59, %v17631_v54 }
 0x74e   :  { %9539 = vmatpush.bf16.msra.mxu2 %v13123_v45  ;;  %9501 = vmatpush.bf16.msrb.mxu3 %v11523_v22  ;;  %v12864_v26 = vld [vmem:[#allocation2 + $0xde8] sm:$0xf0]  ;;  %v9275_v45 = vpop.f32.mrf.mxu1 }
 0x74f   :  { %9482 = vmatmul.bf16.vlgmr.msrb.gmra.mxu1 %v17215_v23  ;;  %v15682_v32 = vld [vmem:[#allocation2 + $0x9ac] sm:$0xf]  ;;  %v12867_v17 = vor.u32 %v15810_v36, %v12864_v26  ;;  %v9263_v62 = vadd.f32 %v9262_v50, %v9250_v21 }
 0x750   :  { %9526 = vmatpush.bf16.msra.mxu1 %v12611_v14  ;;  %9514 = vmatpush.bf16.msra.mxu0 %v12035_v0  ;;  %v12352_v6 = vld [vmem:[#allocation2 + $0x9e8] sm:$0xf0]  ;;  %v9264_v47 = vpop.f32.mrf.mxu0 }
 0x751   :  { %v15410_v48 = vld [vmem:[#allocation2 + $0x12c] sm:$0xf]  ;;  %v12355_v33 = vor.u32 %v15682_v32, %v12352_v6  ;;  %v9276_v54 = vadd.f32 %v9275_v45, %v9263_v62 }
 0x752   :  { %9540 = vmatpush.bf16.msra.mxu2 %v13059_v28  ;;  %9502 = vmatpush.bf16.msrb.mxu3 %v11459_v51  ;;  %v11264_v8 = vld [vmem:[#allocation2 + $0x168] sm:$0xf0] }
 0x753   :  { %v15538_v9 = vld [vmem:[#allocation2 + $0x52c] sm:$0xf]  ;;  %v11267_v60 = vor.u32 %v15410_v48, %v11264_v8 }
 0x754   :  { %9527 = vmatpush.bf16.msra.mxu1 %v12547_v37  ;;  %9515 = vmatpush.bf16.msra.mxu0 %v11971_v5  ;;  %v11776_v11 = vld [vmem:[#allocation2 + $0x568] sm:$0xf0]  ;;  %v9251_v63 = vpop.f32.mrf.mxu3 }
 0x755   :  { %v15794_v61 = vld [vmem:[#allocation2 + $0xd2c] sm:$0xf]  ;;  %v11779_v10 = vor.u32 %v15538_v9, %v11776_v11 }
 0x756   :  { %9541 = vmatpush.bf16.msra.mxu2 %v12995_v38  ;;  %9503 = vmatpush.bf16.msrb.mxu3 %v11395_v46  ;;  %v12800_v34 = vld [vmem:[#allocation2 + $0xd68] sm:$0xf0]  ;;  %v17638_v46 = vadd.f32 %v9288_v27, %v9276_v54 }
 0x757   :  { %v15666_v14 = vld [vmem:[#allocation2 + $0x92c] sm:$0xf]  ;;  %v12803_v0 = vor.u32 %v15794_v61, %v12800_v34 }
 0x758   :  { %9528 = vmatpush.bf16.msra.mxu1 %v12483_v15  ;;  %9516 = vmatpush.bf16.msra.mxu0 %v11907_v53  ;;  %v12288_v22 = vld [vmem:[#allocation2 + $0x968] sm:$0xf0]  ;;  %v9277_v15 = vpop.f32.mrf.mxu1 }
 0x759   :  { %v15394_v28 = vld [vmem:[#allocation2 + $0xac] sm:$0xf]  ;;  %v12291_v37 = vor.u32 %v15666_v14, %v12288_v22 }
 0x75a   :  { %9542 = vmatpush.bf16.msra.mxu2 %v12931_v44  ;;  %9504 = vmatpush.bf16.msrb.mxu3 %v11331_v29  ;;  %v11200_v24 = vld [vmem:[#allocation2 + $0xe8] sm:$0xf0]  ;;  %v9290_v29 = vpop.f32.mrf.mxu2 }
 0x75b   :  { %v15522_v25 = vld [vmem:[#allocation2 + $0x4ac] sm:$0xf]  ;;  %v11203_v18 = vor.u32 %v15394_v28, %v11200_v24 }
 0x75c   :  { %9529 = vmatpush.bf16.msra.mxu1 %v12419_v1  ;;  %9517 = vmatpush.bf16.msra.mxu0 %v11843_v4  ;;  %v11712_v19 = vld [vmem:[#allocation2 + $0x4e8] sm:$0xf0] }
 0x75d   :  { %v15778_v31 = vld [vmem:[#allocation2 + $0xcac] sm:$0xf]  ;;  %v11715_v40 = vor.u32 %v15522_v25, %v11712_v19 }
 0x75e   :  { %9543 = vmatpush.bf16.msra.mxu2 %v12867_v17  ;;  %v12736_v35 = vld [vmem:[#allocation2 + $0xce8] sm:$0xf0]  ;;  %9505 = vmatpush.bf16.msrb.mxu3 %v11267_v60 }
 0x75f   :  { %v15650_v51 = vld [vmem:[#allocation2 + $0x8ac] sm:$0xf]  ;;  %v12739_v41 = vor.u32 %v15778_v31, %v12736_v35 }
 0x760   :  { %9530 = vmatpush.bf16.msra.mxu1 %v12355_v33  ;;  %v12224_v5 = vld [vmem:[#allocation2 + $0x8e8] sm:$0xf0]  ;;  %9518 = vmatpush.bf16.msra.mxu0 %v11779_v10 }
 0x761   :  { %v15378_v38 = vld [vmem:[#allocation2 + $0x2c] sm:$0xf]  ;;  %v12227_v44 = vor.u32 %v15650_v51, %v12224_v5 }
 0x762   :  { %v11136_v39 = vld [vmem:[#allocation2 + $0x68] sm:$0xf0]  ;;  %9544 = vmatpush.bf16.msra.mxu2 %v12803_v0  ;;  %9506 = vmatpush.bf16.msrb.mxu3 %v11203_v18 }
 0x763   :  { %v15506_v43 = vld [vmem:[#allocation2 + $0x42c] sm:$0xf]  ;;  %v11139_v36 = vor.u32 %v15378_v38, %v11136_v39 }
 0x764   :  { %v11648_v20 = vld [vmem:[#allocation2 + $0x468] sm:$0xf0]  ;;  %9531 = vmatpush.bf16.msra.mxu1 %v12291_v37  ;;  %9519 = vmatpush.bf16.msra.mxu0 %v11715_v40 }
 0x765   :  { %v15762_v30 = vld [vmem:[#allocation2 + $0xc2c] sm:$0xf]  ;;  %v11651_v32 = vor.u32 %v15506_v43, %v11648_v20 }
 0x766   :  { %v12672_v49 = vld [vmem:[#allocation2 + $0xc68] sm:$0xf0]  ;;  %9545 = vmatpush.bf16.msra.mxu2 %v12739_v41  ;;  %9507 = vmatpush.bf16.msrb.mxu3 %v11139_v36 }
 0x767   :  { %v16002_v52 = vld [vmem:[#allocation2 + $0x13ac] sm:$0xf]  ;;  %v12675_v6 = vor.u32 %v15762_v30, %v12672_v49 }
 0x768   :  { %v13632_v53 = vld [vmem:[#allocation2 + $0x13e8] sm:$0xf0]  ;;  %9532 = vmatpush.bf16.msra.mxu1 %v12227_v44  ;;  %9520 = vmatpush.bf16.msra.mxu0 %v11651_v32 }
 0x769   :  { %v16130_v57 = vld [vmem:[#allocation2 + $0x17ac] sm:$0xf]  ;;  %v13635_v48 = vor.u32 %v16002_v52, %v13632_v53  ;;  %9508 = vmatmul.bf16.vlgmr.msrb.gmra.mxu3 %v17196_v55 }
 0x76a   :  { %v14144_v13 = vld [vmem:[#allocation2 + $0x17e8] sm:$0xf0]  ;;  %9546 = vmatpush.bf16.msra.mxu2 %v12675_v6 }
 0x76b   :  { %v16386_v58 = vld [vmem:[#allocation2 + $0x1fac] sm:$0xf]  ;;  %v14147_v8 = vor.u32 %v16130_v57, %v14144_v13  ;;  %9552 = vmatpush.bf16.msra.mxu3 %v13635_v48  ;;  %9521 = vmatmul.bf16.vlgmr.msra.gmra.mxu0 %v17200_v2  ;;  %v9327_v48 = vpop.f32.mrf.mxu1 }
 0x76c   :  { %v15168_v26 = vld [vmem:[#allocation2 + $0x1fe8] sm:$0xf0] }
 0x76d   :  { %v15634_v1 = vld [vmem:[#allocation2 + $0x82c] sm:$0xf]  ;;  %v15171_v45 = vor.u32 %v16386_v58, %v15168_v26  ;;  %9565 = vmatpush.bf16.msrb.mxu0 %v14147_v8  ;;  %9547 = vmatmul.bf16.vlgmr.msra.gmra.mxu2 %v17198_v56 }
 0x76e   :  { %v12160_v50 = vld [vmem:[#allocation2 + $0x868] sm:$0xf0] }
 0x76f   :  { %v16258_v4 = vld [vmem:[#allocation2 + $0x1bac] sm:$0xf]  ;;  %v12163_v11 = vor.u32 %v15634_v1, %v12160_v50  ;;  %9591 = vmatpush.bf16.msrb.mxu2 %v15171_v45  ;;  %v9314_v1 = vpop.f32.mrf.mxu0 }
 0x770   :  { %v14656_v17 = vld [vmem:[#allocation2 + $0x1be8] sm:$0xf0] }
 0x771   :  { %v15986_v9 = vld [vmem:[#allocation2 + $0x132c] sm:$0xf]  ;;  %v14659_v33 = vor.u32 %v16258_v4, %v14656_v17  ;;  %9533 = vmatpush.bf16.msra.mxu1 %v12163_v11  ;;  %v3213_v17 = vperm.slane %v17606_v42, 1  ;;  %v9340_v42 = vpop.f32.mrf.mxu2 }
 0x772   :  { %v13568_v61 = vld [vmem:[#allocation2 + $0x1368] sm:$0xf0] }
 0x773   :  { %v16114_v34 = vld [vmem:[#allocation2 + $0x172c] sm:$0xf]  ;;  %v13571_v27 = vor.u32 %v15986_v9, %v13568_v61 }
 0x774   :  { %v14080_v59 = vld [vmem:[#allocation2 + $0x1768] sm:$0xf0]  ;;  %9534 = vmatmul.bf16.vlgmr.msra.gmra.mxu1 %v17202_v3 }
 0x775   :  { %v16370_v21 = vld [vmem:[#allocation2 + $0x1f2c] sm:$0xf]  ;;  %v14083_v10 = vor.u32 %v16114_v34, %v14080_v59  ;;  %9578 = vmatpush.bf16.msrb.mxu1 %v14659_v33  ;;  %9553 = vmatpush.bf16.msra.mxu3 %v13571_v27 }
 0x776   :  { %v15104_v60 = vld [vmem:[#allocation2 + $0x1f68] sm:$0xf0] }
 0x777   :  { %v16242_v14 = vld [vmem:[#allocation2 + $0x1b2c] sm:$0xf]  ;;  %v15107_v28 = vor.u32 %v16370_v21, %v15104_v60  ;;  %9566 = vmatpush.bf16.msrb.mxu0 %v14083_v10  ;;  %v9301_v60 = vpop.f32.mrf.mxu3 }
 0x778   :  { %v14592_v22 = vld [vmem:[#allocation2 + $0x1b68] sm:$0xf0]  ;;  %v9302_v10 = vadd.f32 %v9301_v60, %v3213_v17  ;;  %v12614_v17 = vld [vmem:[#allocation2 + $0xbb0] sm:$0xf] }
 0x779   :  { %v15970_v0 = vld [vmem:[#allocation2 + $0x12ac] sm:$0xf]  ;;  %v14595_v19 = vor.u32 %v16242_v14, %v14592_v22  ;;  %9592 = vmatpush.bf16.msrb.mxu2 %v15107_v28 }
 0x77a   :  { %v13504_v24 = vld [vmem:[#allocation2 + $0x12e8] sm:$0xf0] }
 0x77b   :  { %v16098_v25 = vld [vmem:[#allocation2 + $0x16ac] sm:$0xf]  ;;  %v13507_v47 = vor.u32 %v15970_v0, %v13504_v24  ;;  %9579 = vmatpush.bf16.msrb.mxu1 %v14595_v19 }
 0x77c   :  { %v14016_v62 = vld [vmem:[#allocation2 + $0x16e8] sm:$0xf0] }
 0x77d   :  { %v16354_v31 = vld [vmem:[#allocation2 + $0x1eac] sm:$0xf]  ;;  %v14019_v54 = vor.u32 %v16098_v25, %v14016_v62  ;;  %9554 = vmatpush.bf16.msra.mxu3 %v13507_v47 }
 0x77e   :  { %v15040_v35 = vld [vmem:[#allocation2 + $0x1ee8] sm:$0xf0] }
 0x77f   :  { %v16226_v37 = vld [vmem:[#allocation2 + $0x1aac] sm:$0xf]  ;;  %v15043_v5 = vor.u32 %v16354_v31, %v15040_v35  ;;  %9567 = vmatpush.bf16.msrb.mxu0 %v14019_v54  ;;  %v9315_v35 = vadd.f32 %v9314_v1, %v9302_v10 }
 0x780   :  { %v14528_v51 = vld [vmem:[#allocation2 + $0x1ae8] sm:$0xf0] }
 0x781   :  { %v15954_v18 = vld [vmem:[#allocation2 + $0x122c] sm:$0xf]  ;;  %v14531_v41 = vor.u32 %v16226_v37, %v14528_v51  ;;  %9593 = vmatpush.bf16.msrb.mxu2 %v15043_v5  ;;  %v9316_v37 = vpop.f32.mrf.mxu0 }
 0x782   :  { %v13440_v38 = vld [vmem:[#allocation2 + $0x1268] sm:$0xf0]  ;;  %v12486_v37 = vld [vmem:[#allocation2 + $0xab0] sm:$0xf] }
 0x783   :  { %v16082_v39 = vld [vmem:[#allocation2 + $0x162c] sm:$0xf]  ;;  %v13443_v49 = vor.u32 %v15954_v18, %v13440_v38  ;;  %9580 = vmatpush.bf16.msrb.mxu1 %v14531_v41  ;;  %v9329_v41 = vpop.f32.mrf.mxu1 }
 0x784   :  { %v13952_v40 = vld [vmem:[#allocation2 + $0x1668] sm:$0xf0]  ;;  %v15835_v41 = vld [vmem:[#allocation2 + $0xe6c] sm:$0xf0] }
 0x785   :  { %v16338_v43 = vld [vmem:[#allocation2 + $0x1e2c] sm:$0xf]  ;;  %v13955_v52 = vor.u32 %v16082_v39, %v13952_v40  ;;  %9555 = vmatpush.bf16.msra.mxu3 %v13443_v49  ;;  %v9328_v40 = vadd.f32 %v9327_v48, %v9315_v35  ;;  %v15755_v48 = vld [vmem:[#allocation2 + $0xbec] sm:$0xf0] }
 0x786   :  { %v14976_v20 = vld [vmem:[#allocation2 + $0x1e68] sm:$0xf0]  ;;  %v12615_v60 = vor.u32 %v15755_v48, %v12614_v17 }
 0x787   :  { %v16210_v30 = vld [vmem:[#allocation2 + $0x1a2c] sm:$0xf]  ;;  %v14979_v44 = vor.u32 %v16338_v43, %v14976_v20  ;;  %9568 = vmatpush.bf16.msrb.mxu0 %v13955_v52  ;;  %v11590_v52 = vld [vmem:[#allocation2 + $0x3b0] sm:$0xf] }
 0x788   :  { %v14464_v15 = vld [vmem:[#allocation2 + $0x1a68] sm:$0xf0] }
 0x789   :  { %v15938_v53 = vld [vmem:[#allocation2 + $0x11ac] sm:$0xf]  ;;  %v14467_v63 = vor.u32 %v16210_v30, %v14464_v15  ;;  %9594 = vmatpush.bf16.msrb.mxu2 %v14979_v44  ;;  %v12102_v44 = vld [vmem:[#allocation2 + $0x7b0] sm:$0xf] }
 0x78a   :  { %v13376_v57 = vld [vmem:[#allocation2 + $0x11e8] sm:$0xf0] }
 0x78b   :  { %v16066_v13 = vld [vmem:[#allocation2 + $0x15ac] sm:$0xf]  ;;  %v13379_v32 = vor.u32 %v15938_v53, %v13376_v57  ;;  %9581 = vmatpush.bf16.msrb.mxu1 %v14467_v63  ;;  %v15499_v53 = vld [vmem:[#allocation2 + $0x3ec] sm:$0xf0]  ;;  %v17645_v57 = vadd.f32 %v9340_v42, %v9328_v40 }
 0x78c   :  { %v13888_v58 = vld [vmem:[#allocation2 + $0x15e8] sm:$0xf0]  ;;  %v15883_v63 = vld [vmem:[#allocation2 + $0xfec] sm:$0xf0] }
 0x78d   :  { %v16322_v36 = vld [vmem:[#allocation2 + $0x1dac] sm:$0xf]  ;;  %v13891_v6 = vor.u32 %v16066_v13, %v13888_v58  ;;  %9556 = vmatpush.bf16.msra.mxu3 %v13379_v32  ;;  %v15627_v13 = vld [vmem:[#allocation2 + $0x7ec] sm:$0xf0]  ;;  %v9342_v32 = vpop.f32.mrf.mxu2 }
 0x78e   :  { %v14912_v26 = vld [vmem:[#allocation2 + $0x1de8] sm:$0xf0]  ;;  %v13126_v58 = vld [vmem:[#allocation2 + $0xfb0] sm:$0xf] }
 0x78f   :  { %v16194_v50 = vld [vmem:[#allocation2 + $0x19ac] sm:$0xf]  ;;  %v14915_v8 = vor.u32 %v16322_v36, %v14912_v26  ;;  %9569 = vmatpush.bf16.msrb.mxu0 %v13891_v6  ;;  %v9303_v36 = vpop.f32.mrf.mxu3  ;;  %v12934_v40 = vld [vmem:[#allocation2 + $0xe30] sm:$0xf] }
 0x790   :  { %v14400_v29 = vld [vmem:[#allocation2 + $0x19e8] sm:$0xf0]  ;;  %v12870_v36 = vld [vmem:[#allocation2 + $0xdb0] sm:$0xf] }
 0x791   :  { %v15922_v4 = vld [vmem:[#allocation2 + $0x112c] sm:$0xf]  ;;  %v14403_v61 = vor.u32 %v16194_v50, %v14400_v29  ;;  %9595 = vmatpush.bf16.msrb.mxu2 %v14915_v8  ;;  %v12103_v8 = vor.u32 %v15627_v13, %v12102_v44  ;;  %v11334_v44 = vld [vmem:[#allocation2 + $0x1b0] sm:$0xf] }
 0x792   :  { %v13312_v9 = vld [vmem:[#allocation2 + $0x1168] sm:$0xf0]  ;;  %v15435_v13 = vld [vmem:[#allocation2 + $0x1ec] sm:$0xf0] }
 0x793   :  { %v16050_v45 = vld [vmem:[#allocation2 + $0x152c] sm:$0xf]  ;;  %v13315_v14 = vor.u32 %v15922_v4, %v13312_v9  ;;  %9582 = vmatpush.bf16.msrb.mxu1 %v14403_v61  ;;  %v11591_v4 = vor.u32 %v15499_v53, %v11590_v52  ;;  %v13127_v9 = vor.u32 %v15883_v63, %v13126_v58  ;;  %v12038_v61 = vld [vmem:[#allocation2 + $0x730] sm:$0xf]  ;;  %v12935_v53 = vor.u32 %v15835_v41, %v12934_v40 }
 0x794   :  { %v13824_v11 = vld [vmem:[#allocation2 + $0x1568] sm:$0xf0]  ;;  %v11846_v58 = vld [vmem:[#allocation2 + $0x5b0] sm:$0xf]  ;;  %v11335_v32 = vor.u32 %v15435_v13, %v11334_v44 }
 0x795   :  { %v16306_v34 = vld [vmem:[#allocation2 + $0x1d2c] sm:$0xf]  ;;  %v13827_v22 = vor.u32 %v16050_v45, %v13824_v11  ;;  %9557 = vmatpush.bf16.msra.mxu3 %v13315_v14  ;;  %v11526_v45 = vld [vmem:[#allocation2 + $0x330] sm:$0xf] }
 0x796   :  { %v14848_v59 = vld [vmem:[#allocation2 + $0x1d68] sm:$0xf0]  ;;  %v15483_v11 = vld [vmem:[#allocation2 + $0x36c] sm:$0xf0] }
 0x797   :  { %v16178_v33 = vld [vmem:[#allocation2 + $0x192c] sm:$0xf]  ;;  %v14851_v0 = vor.u32 %v16306_v34, %v14848_v59  ;;  %9570 = vmatpush.bf16.msrb.mxu0 %v13827_v22  ;;  %v15611_v59 = vld [vmem:[#allocation2 + $0x76c] sm:$0xf0]  ;;  %v11527_v14 = vor.u32 %v15483_v11, %v11526_v45  ;;  %v9379_v11 = vpop.f32.mrf.mxu1 }
 0x798   :  { %v14336_v21 = vld [vmem:[#allocation2 + $0x1968] sm:$0xf0]  ;;  %v12550_v22 = vld [vmem:[#allocation2 + $0xb30] sm:$0xf]  ;;  %v12039_v10 = vor.u32 %v15611_v59, %v12038_v61 }
 0x799   :  { %v15906_v27 = vld [vmem:[#allocation2 + $0x10ac] sm:$0xf]  ;;  %v14339_v62 = vor.u32 %v16178_v33, %v14336_v21  ;;  %9596 = vmatpush.bf16.msrb.mxu2 %v14851_v0  ;;  %v13062_v33 = vld [vmem:[#allocation2 + $0xf30] sm:$0xf] }
 0x79a   :  { %v13248_v28 = vld [vmem:[#allocation2 + $0x10e8] sm:$0xf0]  ;;  %v15867_v21 = vld [vmem:[#allocation2 + $0xf6c] sm:$0xf0] }
 0x79b   :  { %v16034_v24 = vld [vmem:[#allocation2 + $0x14ac] sm:$0xf]  ;;  %v13251_v54 = vor.u32 %v15906_v27, %v13248_v28  ;;  %9583 = vmatpush.bf16.msrb.mxu1 %v14339_v62  ;;  %v15739_v27 = vld [vmem:[#allocation2 + $0xb6c] sm:$0xf0]  ;;  %v13063_v42 = vor.u32 %v15867_v21, %v13062_v33  ;;  %v9353_v33 = vpop.f32.mrf.mxu3 }
 0x79c   :  { %v13760_v25 = vld [vmem:[#allocation2 + $0x14e8] sm:$0xf0]  ;;  %v11462_v0 = vld [vmem:[#allocation2 + $0x2b0] sm:$0xf] }
 0x79d   :  { %v16290_v19 = vld [vmem:[#allocation2 + $0x1cac] sm:$0xf]  ;;  %v13763_v18 = vor.u32 %v16034_v24, %v13760_v25  ;;  %9558 = vmatpush.bf16.msra.mxu3 %v13251_v54  ;;  %v15467_v28 = vld [vmem:[#allocation2 + $0x2ec] sm:$0xf0] }
 0x79e   :  { %v14784_v31 = vld [vmem:[#allocation2 + $0x1ce8] sm:$0xf0]  ;;  %v11974_v24 = vld [vmem:[#allocation2 + $0x6b0] sm:$0xf]  ;;  %v11463_v35 = vor.u32 %v15467_v28, %v11462_v0 }
 0x79f   :  { %v16162_v51 = vld [vmem:[#allocation2 + $0x18ac] sm:$0xf]  ;;  %v14787_v43 = vor.u32 %v16290_v19, %v14784_v31  ;;  %9571 = vmatpush.bf16.msrb.mxu0 %v13763_v18  ;;  %v15595_v25 = vld [vmem:[#allocation2 + $0x6ec] sm:$0xf0]  ;;  %v12551_v31 = vor.u32 %v15739_v27, %v12550_v22 }
 0x7a0   :  { %v14272_v47 = vld [vmem:[#allocation2 + $0x18e8] sm:$0xf0]  ;;  %v12998_v62 = vld [vmem:[#allocation2 + $0xeb0] sm:$0xf] }
 0x7a1   :  { %v15890_v5 = vld [vmem:[#allocation2 + $0x102c] sm:$0xf]  ;;  %v14275_v49 = vor.u32 %v16162_v51, %v14272_v47  ;;  %9597 = vmatpush.bf16.msrb.mxu2 %v14787_v43  ;;  %v15851_v19 = vld [vmem:[#allocation2 + $0xeec] sm:$0xf0]  ;;  %v11975_v47 = vor.u32 %v15595_v25, %v11974_v24 }
 0x7a2   :  { %v13184_v38 = vld [vmem:[#allocation2 + $0x1068] sm:$0xf0]  ;;  %v15723_v51 = vld [vmem:[#allocation2 + $0xaec] sm:$0xf0]  ;;  %v12999_v54 = vor.u32 %v15851_v19, %v12998_v62 }
 0x7a3   :  { %v16018_v39 = vld [vmem:[#allocation2 + $0x142c] sm:$0xf]  ;;  %v13187_v26 = vor.u32 %v15890_v5, %v13184_v38  ;;  %9584 = vmatpush.bf16.msrb.mxu1 %v14275_v49  ;;  %v11398_v18 = vld [vmem:[#allocation2 + $0x230] sm:$0xf]  ;;  %v12487_v43 = vor.u32 %v15723_v51, %v12486_v37 }
 0x7a4   :  { %v13696_v20 = vld [vmem:[#allocation2 + $0x1468] sm:$0xf0]  ;;  %v15451_v5 = vld [vmem:[#allocation2 + $0x26c] sm:$0xf0] }
 0x7a5   :  { %v16274_v30 = vld [vmem:[#allocation2 + $0x1c2c] sm:$0xf]  ;;  %v13699_v1 = vor.u32 %v16018_v39, %v13696_v20  ;;  %9559 = vmatpush.bf16.msra.mxu3 %v13187_v26  ;;  %v11910_v38 = vld [vmem:[#allocation2 + $0x630] sm:$0xf]  ;;  %v10028_v20 = vmax.f32 %v17638_v46, 0.0 }
 0x7a6   :  { %v14720_v15 = vld [vmem:[#allocation2 + $0x1c68] sm:$0xf0]  ;;  %v15579_v39 = vld [vmem:[#allocation2 + $0x66c] sm:$0xf0] }
 0x7a7   :  { %v16146_v50 = vld [vmem:[#allocation2 + $0x182c] sm:$0xf]  ;;  %v14723_v6 = vor.u32 %v16274_v30, %v14720_v15  ;;  %9572 = vmatpush.bf16.msrb.mxu0 %v13699_v1  ;;  %v11399_v30 = vor.u32 %v15451_v5, %v11398_v18  ;;  %v12422_v15 = vld [vmem:[#allocation2 + $0xa30] sm:$0xf]  ;;  %v11911_v52 = vor.u32 %v15579_v39, %v11910_v38 }
 0x7a8   :  { %v14208_v29 = vld [vmem:[#allocation2 + $0x1868] sm:$0xf0]  ;;  %9560 = vmatmul.bf16.vlgmr.msra.gmra.mxu3 %v17208_v7  ;;  %v15707_v49 = vld [vmem:[#allocation2 + $0xa6c] sm:$0xf0] }
 0x7a9   :  { %v14211_v34 = vor.u32 %v16146_v50, %v14208_v29  ;;  %9598 = vmatpush.bf16.msrb.mxu2 %v14723_v6  ;;  %9604 = vmatpush.bf16.msrb.mxu3 %v11591_v4  ;;  %v15563_v63 = vld [vmem:[#allocation2 + $0x5ec] sm:$0xf0]  ;;  %v12423_v1 = vor.u32 %v15707_v49, %v12422_v15  ;;  %v9366_v50 = vpop.f32.mrf.mxu0  ;;  %v17654_v29 = vmax.f32 %v10028_v20, 1e-12  ;;  %v9381_v49 = vpop.f32.mrf.mxu1 }
 0x7aa   :  { %9573 = vmatmul.bf16.vlgmr.msrb.gmra.mxu0 %v17212_v16  ;;  %v15819_v26 = vld [vmem:[#allocation2 + $0xdec] sm:$0xf0]  ;;  %v11847_v17 = vor.u32 %v15563_v63, %v11846_v58 }
 0x7ab   :  { %9617 = vmatpush.bf16.msra.mxu0 %v12103_v8  ;;  %9585 = vmatpush.bf16.msrb.mxu1 %v14211_v34  ;;  %v12358_v6 = vld [vmem:[#allocation2 + $0x9b0] sm:$0xf]  ;;  %v12871_v48 = vor.u32 %v15819_v26, %v12870_v36  ;;  %16529 = vrcp.f32 %v17654_v29  ;;  %vm10177_vm10 = vweird.f32 %v17654_v29 }
 0x7ac   :  { %9599 = vmatmul.bf16.vlgmr.msrb.gmra.mxu2 %v17210_v12  ;;  %v15691_v4 = vld [vmem:[#allocation2 + $0x9ec] sm:$0xf0] }
 0x7ad   :  { %9643 = vmatpush.bf16.msra.mxu2 %v13127_v9  ;;  %9605 = vmatpush.bf16.msrb.mxu3 %v11527_v14  ;;  %v11270_v8 = vld [vmem:[#allocation2 + $0x130] sm:$0xf]  ;;  %v12359_v21 = vor.u32 %v15691_v4, %v12358_v6 }
 0x7ae   :  { %9586 = vmatmul.bf16.vlgmr.msrb.gmra.mxu1 %v17215_v23  ;;  %v15419_v9 = vld [vmem:[#allocation2 + $0x16c] sm:$0xf0] }
 0x7af   :  { %9630 = vmatpush.bf16.msra.mxu1 %v12615_v60  ;;  %9618 = vmatpush.bf16.msra.mxu0 %v12039_v10  ;;  %v11782_v45 = vld [vmem:[#allocation2 + $0x530] sm:$0xf]  ;;  %v9354_v60 = vadd.f32 %v9353_v33, %v17645_v57  ;;  %v11271_v14 = vor.u32 %v15419_v9, %v11270_v8  ;;  %v9392_v10 = vpop.f32.mrf.mxu2 }
 0x7b0   :  { %v15547_v61 = vld [vmem:[#allocation2 + $0x56c] sm:$0xf0] }
 0x7b1   :  { %9644 = vmatpush.bf16.msra.mxu2 %v13063_v42  ;;  %9606 = vmatpush.bf16.msrb.mxu3 %v11463_v35  ;;  %v12806_v34 = vld [vmem:[#allocation2 + $0xd30] sm:$0xf]  ;;  %v11783_v42 = vor.u32 %v15547_v61, %v11782_v45  ;;  %v9367_v62 = vadd.f32 %v9366_v50, %v9354_v60  ;;  %v9368_v57 = vpop.f32.mrf.mxu0  ;;  %v9355_v50 = vpop.f32.mrf.mxu3 }
 0x7b2   :  { %v15803_v59 = vld [vmem:[#allocation2 + $0xd6c] sm:$0xf0] }
 0x7b3   :  { %9631 = vmatpush.bf16.msra.mxu1 %v12551_v31  ;;  %9619 = vmatpush.bf16.msra.mxu0 %v11975_v47  ;;  %v12294_v22 = vld [vmem:[#allocation2 + $0x930] sm:$0xf]  ;;  %v12807_v0 = vor.u32 %v15803_v59, %v12806_v34 }
 0x7b4   :  { %v15675_v27 = vld [vmem:[#allocation2 + $0x96c] sm:$0xf0] }
 0x7b5   :  { %9645 = vmatpush.bf16.msra.mxu2 %v12999_v54  ;;  %9607 = vmatpush.bf16.msrb.mxu3 %v11399_v30  ;;  %v11206_v28 = vld [vmem:[#allocation2 + $0xb0] sm:$0xf]  ;;  %v12295_v37 = vor.u32 %v15675_v27, %v12294_v22  ;;  %v9380_v54 = vadd.f32 %v9379_v11, %v9367_v62 }
 0x7b6   :  { %v15403_v24 = vld [vmem:[#allocation2 + $0xec] sm:$0xf0] }
 0x7b7   :  { %9632 = vmatpush.bf16.msra.mxu1 %v12487_v43  ;;  %9620 = vmatpush.bf16.msra.mxu0 %v11911_v52  ;;  %v11718_v25 = vld [vmem:[#allocation2 + $0x4b0] sm:$0xf]  ;;  %v11207_v18 = vor.u32 %v15403_v24, %v11206_v28  ;;  %v17658_v52 = vpop.eup %16529 }
 0x7b8   :  { %v15531_v19 = vld [vmem:[#allocation2 + $0x4ec] sm:$0xf0]  ;;  %v10173_v8 = vmul.f32 %v17658_v52, %v17654_v29  ;;  %vm10178_vm11 = vweird.f32 %v17658_v52 }
 0x7b9   :  { %9646 = vmatpush.bf16.msra.mxu2 %v12935_v53  ;;  %9608 = vmatpush.bf16.msrb.mxu3 %v11335_v32  ;;  %v12742_v31 = vld [vmem:[#allocation2 + $0xcb0] sm:$0xf]  ;;  %v11719_v40 = vor.u32 %v15531_v19, %v11718_v25  ;;  %v17660_v53 = vadd.f32 %v9392_v10, %v9380_v54  ;;  %vm17693_vm14 = vmor %vm10177_vm10, %vm10178_vm11 }
 0x7ba   :  { %v15787_v35 = vld [vmem:[#allocation2 + $0xcec] sm:$0xf0]  ;;  %v10174_v24 = vsub.f32 1.0, %v10173_v8 }
 0x7bb   :  { %9633 = vmatpush.bf16.msra.mxu1 %v12423_v1  ;;  %9621 = vmatpush.bf16.msra.mxu0 %v11847_v17  ;;  %v12230_v51 = vld [vmem:[#allocation2 + $0x8b0] sm:$0xf]  ;;  %v12743_v41 = vor.u32 %v15787_v35, %v12742_v31  ;;  %v10029_v32 = vmax.f32 %v17660_v53, 0.0 }
 0x7bc   :  { %v15659_v47 = vld [vmem:[#allocation2 + $0x8ec] sm:$0xf0] }
 0x7bd   :  { %9647 = vmatpush.bf16.msra.mxu2 %v12871_v48  ;;  %9609 = vmatpush.bf16.msrb.mxu3 %v11271_v14  ;;  %v11142_v5 = vld [vmem:[#allocation2 + $0x30] sm:$0xf]  ;;  %v12231_v63 = vor.u32 %v15659_v47, %v12230_v51  ;;  %v9394_v48 = vpop.f32.mrf.mxu2  ;;  %v17667_v34 = vmax.f32 %v10029_v32, 1e-12 }
 0x7be   :  { %v15387_v38 = vld [vmem:[#allocation2 + $0x6c] sm:$0xf0] }
 0x7bf   :  { %9634 = vmatpush.bf16.msra.mxu1 %v12359_v21  ;;  %v11654_v39 = vld [vmem:[#allocation2 + $0x430] sm:$0xf]  ;;  %9622 = vmatpush.bf16.msra.mxu0 %v11783_v42  ;;  %v11143_v6 = vor.u32 %v15387_v38, %v11142_v5  ;;  %16531 = vrcp.f32 %v17667_v34  ;;  %v10175_v38 = vmul.f32 %v17658_v52, %v10174_v24  ;;  %vm10192_vm12 = vweird.f32 %v17667_v34 }
 0x7c0   :  { %v15515_v43 = vld [vmem:[#allocation2 + $0x46c] sm:$0xf0] }
 0x7c1   :  { %9648 = vmatpush.bf16.msra.mxu2 %v12807_v0  ;;  %v12678_v30 = vld [vmem:[#allocation2 + $0xc30] sm:$0xf]  ;;  %9610 = vmatpush.bf16.msrb.mxu3 %v11207_v18  ;;  %v11655_v9 = vor.u32 %v15515_v43, %v11654_v39 }
 0x7c2   :  { %v15771_v15 = vld [vmem:[#allocation2 + $0xc6c] sm:$0xf0] }
 0x7c3   :  { %v13638_v44 = vld [vmem:[#allocation2 + $0x13b0] sm:$0xf]  ;;  %9635 = vmatpush.bf16.msra.mxu1 %v12295_v37  ;;  %9623 = vmatpush.bf16.msra.mxu0 %v11719_v40  ;;  %v12679_v45 = vor.u32 %v15771_v15, %v12678_v30 }
 0x7c4   :  { %v16011_v13 = vld [vmem:[#allocation2 + $0x13ec] sm:$0xf0] }
 0x7c5   :  { %v14150_v58 = vld [vmem:[#allocation2 + $0x17b0] sm:$0xf]  ;;  %9649 = vmatpush.bf16.msra.mxu2 %v12743_v41  ;;  %v13639_v59 = vor.u32 %v16011_v13, %v13638_v44  ;;  %9611 = vmatpush.bf16.msrb.mxu3 %v11143_v6  ;;  %v17674_v41 = vpop.eup %16531  ;;  %v10176_v6 = vadd.f32 %v17658_v52, %v10175_v38 }
 0x7c6   :  { %v16139_v36 = vld [vmem:[#allocation2 + $0x17ec] sm:$0xf0]  ;;  %v10188_v13 = vmul.f32 %v17674_v41, %v17667_v34  ;;  %vm10193_vm13 = vweird.f32 %v17674_v41 }
 0x7c7   :  { %v15174_v26 = vld [vmem:[#allocation2 + $0x1fb0] sm:$0xf]  ;;  %v14151_v33 = vor.u32 %v16139_v36, %v14150_v58  ;;  %9636 = vmatpush.bf16.msra.mxu1 %v12231_v63  ;;  %9624 = vmatpush.bf16.msra.mxu0 %v11655_v9  ;;  %v10198_v9 = vand.u32 2147483648, %v17667_v34  ;;  %v10180_v24 = vsel %vm17693_vm14, %v17658_v52, %v10176_v6  ;;  %vm17705_vm15 = vmor %vm10192_vm12, %vm10193_vm13  ;;  %v9444_v6 = vpop.f32.mrf.mxu2 }
 0x7c8   :  { %v16395_v1 = vld [vmem:[#allocation2 + $0x1fec] sm:$0xf0]  ;;  %9612 = vmatmul.bf16.vlgmr.msrb.gmra.mxu3 %v17196_v55 }
 0x7c9   :  { %v12166_v4 = vld [vmem:[#allocation2 + $0x830] sm:$0xf]  ;;  %v15175_v60 = vor.u32 %v16395_v1, %v15174_v26  ;;  %9650 = vmatpush.bf16.msra.mxu2 %v12679_v45  ;;  %9656 = vmatpush.bf16.msra.mxu3 %v13639_v59  ;;  %v10181_v1 = vand.u32 2147483647, %v17654_v29 }
 0x7ca   :  { %v15643_v17 = vld [vmem:[#allocation2 + $0x86c] sm:$0xf0]  ;;  %9625 = vmatmul.bf16.vlgmr.msra.gmra.mxu0 %v17200_v2 }
 0x7cb   :  { %v14662_v11 = vld [vmem:[#allocation2 + $0x1bb0] sm:$0xf]  ;;  %v12167_v14 = vor.u32 %v15643_v17, %v12166_v4  ;;  %9669 = vmatpush.bf16.msrb.mxu0 %v14151_v33  ;;  %v10183_v4 = vand.u32 2147483648, %v17654_v29  ;;  %v10189_v17 = vsub.f32 1.0, %v10188_v13  ;;  %vm10182_vm0 = vcmp.eq.f32.partialorder %v10181_v1, 8.507059e+37 }
 0x7cc   :  { %v16267_v61 = vld [vmem:[#allocation2 + $0x1bec] sm:$0xf0]  ;;  %9651 = vmatmul.bf16.vlgmr.msra.gmra.mxu2 %v17198_v56 }
 0x7cd   :  { %v13574_v21 = vld [vmem:[#allocation2 + $0x1330] sm:$0xf]  ;;  %v14663_v42 = vor.u32 %v16267_v61, %v14662_v11  ;;  %9695 = vmatpush.bf16.msrb.mxu2 %v15175_v60  ;;  %9637 = vmatpush.bf16.msra.mxu1 %v12167_v14  ;;  %v10196_v60 = vand.u32 2147483647, %v17667_v34 }
 0x7ce   :  { %v15995_v22 = vld [vmem:[#allocation2 + $0x136c] sm:$0xf0] }
 0x7cf   :  { %v14086_v27 = vld [vmem:[#allocation2 + $0x1730] sm:$0xf]  ;;  %v13575_v19 = vor.u32 %v15995_v22, %v13574_v21  ;;  %v10190_v21 = vmul.f32 %v17674_v41, %v10189_v17  ;;  %vm10197_vm4 = vcmp.eq.f32.partialorder %v10196_v60, 8.507059e+37 }
 0x7d0   :  { %v16123_v10 = vld [vmem:[#allocation2 + $0x176c] sm:$0xf0]  ;;  %9638 = vmatmul.bf16.vlgmr.msra.gmra.mxu1 %v17202_v3 }
 0x7d1   :  { %v15110_v0 = vld [vmem:[#allocation2 + $0x1f30] sm:$0xf]  ;;  %v14087_v31 = vor.u32 %v16123_v10, %v14086_v27  ;;  %9682 = vmatpush.bf16.msrb.mxu1 %v14663_v42  ;;  %9657 = vmatpush.bf16.msra.mxu3 %v13575_v19 }
 0x7d2   :  { %v16379_v28 = vld [vmem:[#allocation2 + $0x1f6c] sm:$0xf0] }
 0x7d3   :  { %v14598_v25 = vld [vmem:[#allocation2 + $0x1b30] sm:$0xf]  ;;  %v15111_v37 = vor.u32 %v16379_v28, %v15110_v0  ;;  %9670 = vmatpush.bf16.msrb.mxu0 %v14087_v31  ;;  %v9418_v28 = vpop.f32.mrf.mxu0 }
 0x7d4   :  { %v16251_v62 = vld [vmem:[#allocation2 + $0x1b6c] sm:$0xf0] }
 0x7d5   :  { %v13510_v35 = vld [vmem:[#allocation2 + $0x12b0] sm:$0xf]  ;;  %v14599_v54 = vor.u32 %v16251_v62, %v14598_v25  ;;  %9696 = vmatpush.bf16.msrb.mxu2 %v15111_v37  ;;  %v10184_v25 = vor.u32 1.1754944e-38, %v10183_v4  ;;  %v10191_v62 = vadd.f32 %v17674_v41, %v10190_v21 }
 0x7d6   :  { %v15979_v51 = vld [vmem:[#allocation2 + $0x12ec] sm:$0xf0] }
 0x7d7   :  { %v14022_v47 = vld [vmem:[#allocation2 + $0x16b0] sm:$0xf]  ;;  %v13511_v43 = vor.u32 %v15979_v51, %v13510_v35  ;;  %9683 = vmatpush.bf16.msrb.mxu1 %v14599_v54  ;;  %v10199_v35 = vor.u32 1.1754944e-38, %v10198_v9  ;;  %v10195_v34 = vsel %vm17705_vm15, %v17674_v41, %v10191_v62  ;;  %v15491_v62 = vld [vmem:[#allocation2 + $0x3b4] sm:$0xf] }
 0x7d8   :  { %v16107_v57 = vld [vmem:[#allocation2 + $0x16ec] sm:$0xf0] }
 0x7d9   :  { %v15046_v18 = vld [vmem:[#allocation2 + $0x1eb0] sm:$0xf]  ;;  %v14023_v30 = vor.u32 %v16107_v57, %v14022_v47  ;;  %9658 = vmatpush.bf16.msra.mxu3 %v13511_v43  ;;  %v17709_v57 = vld [vmem:[#allocation30 + $0x8] sm:$0xff]  ;;  %v10200_v43 = vsel %vm10197_vm4, %v10199_v35, %v10195_v34  ;;  %v12104_v35 = vld [vmem:[#allocation2 + $0x7f0] sm:$0xf0] }
 0x7da   :  { %v16363_v5 = vld [vmem:[#allocation2 + $0x1eec] sm:$0xf0]  ;;  %v3214_v54 = vperm.slane %v17709_v57, 2 }
 0x7db   :  { %v14534_v39 = vld [vmem:[#allocation2 + $0x1ab0] sm:$0xf]  ;;  %v15047_v58 = vor.u32 %v16363_v5, %v15046_v18  ;;  %9671 = vmatpush.bf16.msrb.mxu0 %v14023_v30  ;;  %v9431_v18 = vpop.f32.mrf.mxu1 }
 0x7dc   :  { %v16235_v40 = vld [vmem:[#allocation2 + $0x1aec] sm:$0xf0] }
 0x7dd   :  { %v13446_v15 = vld [vmem:[#allocation2 + $0x1230] sm:$0xf]  ;;  %v14535_v50 = vor.u32 %v16235_v40, %v14534_v39  ;;  %9697 = vmatpush.bf16.msrb.mxu2 %v15047_v58  ;;  %v10185_v40 = vsel %vm10182_vm0, %v10184_v25, %v10180_v24 }
 0x7de   :  { %v15963_v49 = vld [vmem:[#allocation2 + $0x126c] sm:$0xf0]  ;;  %v10186_v4 = vmul.f32 %v10185_v40, %v10028_v20  ;;  %v15747_v40 = vld [vmem:[#allocation2 + $0xbb4] sm:$0xf] }
 0x7df   :  { %v13958_v44 = vld [vmem:[#allocation2 + $0x1630] sm:$0xf]  ;;  %v13447_v45 = vor.u32 %v15963_v49, %v13446_v15  ;;  %9684 = vmatpush.bf16.msrb.mxu1 %v14535_v50 }
 0x7e0   :  { %v16091_v63 = vld [vmem:[#allocation2 + $0x166c] sm:$0xf0] }
 0x7e1   :  { %v14982_v36 = vld [vmem:[#allocation2 + $0x1e30] sm:$0xf]  ;;  %v13959_v11 = vor.u32 %v16091_v63, %v13958_v44  ;;  %9659 = vmatpush.bf16.msra.mxu3 %v13447_v45  ;;  %v10201_v44 = vmul.f32 %v10200_v43, %v10029_v32  ;;  %v9405_v63 = vpop.f32.mrf.mxu3  ;;  %v12616_v43 = vld [vmem:[#allocation2 + $0xbf0] sm:$0xf0] }
 0x7e2   :  { %v16347_v26 = vld [vmem:[#allocation2 + $0x1e6c] sm:$0xf0]  ;;  %v9406_v50 = vadd.f32 %v9405_v63, %v3214_v54  ;;  %v12040_v63 = vld [vmem:[#allocation2 + $0x770] sm:$0xf0] }
 0x7e3   :  { %v14470_v48 = vld [vmem:[#allocation2 + $0x1a30] sm:$0xf]  ;;  %v14983_v61 = vor.u32 %v16347_v26, %v14982_v36  ;;  %9672 = vmatpush.bf16.msrb.mxu0 %v13959_v11  ;;  %v10314_v17 = vrot.slane %v10201_v44, 6  ;;  %v11528_v44 = vld [vmem:[#allocation2 + $0x370] sm:$0xf0] }
 0x7e4   :  { %v16219_v8 = vld [vmem:[#allocation2 + $0x1a6c] sm:$0xf0]  ;;  %v9419_v11 = vadd.f32 %v9418_v28, %v9406_v50  ;;  %v15731_v50 = vld [vmem:[#allocation2 + $0xb34] sm:$0xf] }
 0x7e5   :  { %v13382_v59 = vld [vmem:[#allocation2 + $0x11b0] sm:$0xf]  ;;  %v14471_v10 = vor.u32 %v16219_v8, %v14470_v48  ;;  %9698 = vmatpush.bf16.msrb.mxu2 %v14983_v61  ;;  %v9420_v61 = vpop.f32.mrf.mxu0 }
 0x7e6   :  { %v15947_v33 = vld [vmem:[#allocation2 + $0x11ec] sm:$0xf0]  ;;  %v9432_v27 = vadd.f32 %v9431_v18, %v9419_v11 }
 0x7e7   :  { %v13894_v14 = vld [vmem:[#allocation2 + $0x15b0] sm:$0xf]  ;;  %v13383_v37 = vor.u32 %v15947_v33, %v13382_v59  ;;  %9685 = vmatpush.bf16.msrb.mxu1 %v14471_v10  ;;  %v17720_v59 = vsel %vm1089_vm1, %v10186_v4, %v10314_v17  ;;  %v9433_v10 = vpop.f32.mrf.mxu1 }
 0x7e8   :  { %v16075_v22 = vld [vmem:[#allocation2 + $0x15ec] sm:$0xf0]  ;;  %v17722_v29 = vadd.f32 %v9444_v6, %v9432_v27  ;;  %v12552_v6 = vld [vmem:[#allocation2 + $0xb70] sm:$0xf0] }
 0x7e9   :  { %v14918_v42 = vld [vmem:[#allocation2 + $0x1db0] sm:$0xf]  ;;  %v13895_v51 = vor.u32 %v16075_v22, %v13894_v14  ;;  %9660 = vmatpush.bf16.msra.mxu3 %v13383_v37  ;;  %v15875_v37 = vld [vmem:[#allocation2 + $0xfb4] sm:$0xf]  ;;  %v12555_v11 = vor.u32 %v15731_v50, %v12552_v6 }
 0x7ea   :  { %v16331_v0 = vld [vmem:[#allocation2 + $0x1dec] sm:$0xf0]  ;;  %v11912_v27 = vld [vmem:[#allocation2 + $0x670] sm:$0xf0] }
 0x7eb   :  { %v14406_v19 = vld [vmem:[#allocation2 + $0x19b0] sm:$0xf]  ;;  %v14919_v5 = vor.u32 %v16331_v0, %v14918_v42  ;;  %9673 = vmatpush.bf16.msrb.mxu0 %v13895_v51  ;;  %v13128_v51 = vld [vmem:[#allocation2 + $0xff0] sm:$0xf0] }
 0x7ec   :  { %v16203_v31 = vld [vmem:[#allocation2 + $0x19ec] sm:$0xf0]  ;;  %v15827_v10 = vld [vmem:[#allocation2 + $0xe34] sm:$0xf] }
 0x7ed   :  { %v13318_v47 = vld [vmem:[#allocation2 + $0x1130] sm:$0xf]  ;;  %v14407_v30 = vor.u32 %v16203_v31, %v14406_v19  ;;  %9699 = vmatpush.bf16.msrb.mxu2 %v14919_v5  ;;  %v11592_v19 = vld [vmem:[#allocation2 + $0x3f0] sm:$0xf0]  ;;  %v9446_v5 = vpop.f32.mrf.mxu2 }
 0x7ee   :  { %v15931_v52 = vld [vmem:[#allocation2 + $0x116c] sm:$0xf0]  ;;  %v15619_v31 = vld [vmem:[#allocation2 + $0x7b4] sm:$0xf] }
 0x7ef   :  { %v13830_v38 = vld [vmem:[#allocation2 + $0x1530] sm:$0xf]  ;;  %v13319_v41 = vor.u32 %v15931_v52, %v13318_v47  ;;  %9686 = vmatpush.bf16.msrb.mxu1 %v14407_v30  ;;  %v9407_v47 = vpop.f32.mrf.mxu3  ;;  %v12107_v30 = vor.u32 %v15619_v31, %v12104_v35  ;;  %v15427_v31 = vld [vmem:[#allocation2 + $0x1b4] sm:$0xf] }
 0x7f0   :  { %v16059_v39 = vld [vmem:[#allocation2 + $0x156c] sm:$0xf0]  ;;  %v11336_v35 = vld [vmem:[#allocation2 + $0x1f0] sm:$0xf0] }
 0x7f1   :  { %v14854_v15 = vld [vmem:[#allocation2 + $0x1d30] sm:$0xf]  ;;  %v13831_v36 = vor.u32 %v16059_v39, %v13830_v38  ;;  %9661 = vmatpush.bf16.msra.mxu3 %v13319_v41  ;;  %v11595_v39 = vor.u32 %v15491_v62, %v11592_v19  ;;  %v15859_v41 = vld [vmem:[#allocation2 + $0xf34] sm:$0xf] }
 0x7f2   :  { %v16315_v49 = vld [vmem:[#allocation2 + $0x1d6c] sm:$0xf0]  ;;  %v15811_v47 = vld [vmem:[#allocation2 + $0xdb4] sm:$0xf] }
 0x7f3   :  { %v14342_v13 = vld [vmem:[#allocation2 + $0x1930] sm:$0xf]  ;;  %v14855_v48 = vor.u32 %v16315_v49, %v14854_v15  ;;  %9674 = vmatpush.bf16.msrb.mxu0 %v13831_v36  ;;  %v13131_v15 = vor.u32 %v15875_v37, %v13128_v51  ;;  %v15475_v49 = vld [vmem:[#allocation2 + $0x334] sm:$0xf] }
 0x7f4   :  { %v16187_v58 = vld [vmem:[#allocation2 + $0x196c] sm:$0xf0]  ;;  %v13064_v36 = vld [vmem:[#allocation2 + $0xf70] sm:$0xf0] }
 0x7f5   :  { %v13254_v26 = vld [vmem:[#allocation2 + $0x10b0] sm:$0xf]  ;;  %v14343_v32 = vor.u32 %v16187_v58, %v14342_v13  ;;  %9700 = vmatpush.bf16.msrb.mxu2 %v14855_v48  ;;  %v15603_v13 = vld [vmem:[#allocation2 + $0x734] sm:$0xf]  ;;  %v13067_v17 = vor.u32 %v15859_v41, %v13064_v36  ;;  %v9496_v6 = vpop.f32.mrf.mxu2 }
 0x7f6   :  { %v15915_v1 = vld [vmem:[#allocation2 + $0x10ec] sm:$0xf0]  ;;  %v12043_v4 = vor.u32 %v15603_v13, %v12040_v63  ;;  %v15459_v48 = vld [vmem:[#allocation2 + $0x2b4] sm:$0xf] }
 0x7f7   :  { %v13766_v8 = vld [vmem:[#allocation2 + $0x14b0] sm:$0xf]  ;;  %v13255_v46 = vor.u32 %v15915_v1, %v13254_v26  ;;  %9687 = vmatpush.bf16.msrb.mxu1 %v14343_v32  ;;  %v12619_v26 = vor.u32 %v15747_v40, %v12616_v43  ;;  %v11531_v1 = vor.u32 %v15475_v49, %v11528_v44  ;;  %v11976_v32 = vld [vmem:[#allocation2 + $0x6f0] sm:$0xf0]  ;;  %v9483_v49 = vpop.f32.mrf.mxu1  ;;  %v9457_v63 = vpop.f32.mrf.mxu3 }
 0x7f8   :  { %v16043_v53 = vld [vmem:[#allocation2 + $0x14ec] sm:$0xf0]  ;;  %v15555_v37 = vld [vmem:[#allocation2 + $0x5b4] sm:$0xf]  ;;  %v9458_v36 = vadd.f32 %v9457_v63, %v17722_v29 }
 0x7f9   :  { %v14790_v9 = vld [vmem:[#allocation2 + $0x1cb0] sm:$0xf]  ;;  %v13767_v20 = vor.u32 %v16043_v53, %v13766_v8  ;;  %9662 = vmatpush.bf16.msra.mxu3 %v13255_v46  ;;  %v11464_v8 = vld [vmem:[#allocation2 + $0x2f0] sm:$0xf0] }
 0x7fa   :  { %v16299_v45 = vld [vmem:[#allocation2 + $0x1cec] sm:$0xf0]  ;;  %v15587_v53 = vld [vmem:[#allocation2 + $0x6b4] sm:$0xf]  ;;  %v11467_v61 = vor.u32 %v15459_v48, %v11464_v8 }
 0x7fb   :  { %v14278_v33 = vld [vmem:[#allocation2 + $0x18b0] sm:$0xf]  ;;  %v14791_v42 = vor.u32 %v16299_v45, %v14790_v9  ;;  %9675 = vmatpush.bf16.msrb.mxu0 %v13767_v20  ;;  %v15843_v9 = vld [vmem:[#allocation2 + $0xeb4] sm:$0xf]  ;;  %v11979_v46 = vor.u32 %v15587_v53, %v11976_v32 }
 0x7fc   :  { %v16171_v21 = vld [vmem:[#allocation2 + $0x18ec] sm:$0xf0]  ;;  %v13000_v45 = vld [vmem:[#allocation2 + $0xef0] sm:$0xf0] }
 0x7fd   :  { %v13190_v60 = vld [vmem:[#allocation2 + $0x1030] sm:$0xf]  ;;  %v14279_v25 = vor.u32 %v16171_v21, %v14278_v33  ;;  %9701 = vmatpush.bf16.msrb.mxu2 %v14791_v42  ;;  %v15715_v33 = vld [vmem:[#allocation2 + $0xab4] sm:$0xf]  ;;  %v13003_v20 = vor.u32 %v15843_v9, %v13000_v45 }
 0x7fe   :  { %v15899_v14 = vld [vmem:[#allocation2 + $0x106c] sm:$0xf0]  ;;  %v12488_v21 = vld [vmem:[#allocation2 + $0xaf0] sm:$0xf0] }
 0x7ff   :  { %v13702_v22 = vld [vmem:[#allocation2 + $0x1430] sm:$0xf]  ;;  %v13191_v52 = vor.u32 %v15899_v14, %v13190_v60  ;;  %9688 = vmatpush.bf16.msrb.mxu1 %v14279_v25  ;;  %v15443_v60 = vld [vmem:[#allocation2 + $0x234] sm:$0xf] }
 0x800   :  { %v16027_v0 = vld [vmem:[#allocation2 + $0x146c] sm:$0xf0]  ;;  %v11400_v14 = vld [vmem:[#allocation2 + $0x270] sm:$0xf0] }
 0x801   :  { %v14726_v24 = vld [vmem:[#allocation2 + $0x1c30] sm:$0xf]  ;;  %v13703_v54 = vor.u32 %v16027_v0, %v13702_v22  ;;  %9663 = vmatpush.bf16.msra.mxu3 %v13191_v52  ;;  %v15571_v22 = vld [vmem:[#allocation2 + $0x634] sm:$0xf]  ;;  %v12491_v0 = vor.u32 %v15715_v33, %v12488_v21 }
 0x802   :  { %v16283_v28 = vld [vmem:[#allocation2 + $0x1c6c] sm:$0xf0]  ;;  %v12936_v42 = vld [vmem:[#allocation2 + $0xe70] sm:$0xf0]  ;;  %v11915_v62 = vor.u32 %v15571_v22, %v11912_v27 }
 0x803   :  { %v14214_v18 = vld [vmem:[#allocation2 + $0x1830] sm:$0xf]  ;;  %v14727_v38 = vor.u32 %v16283_v28, %v14726_v24  ;;  %9676 = vmatpush.bf16.msrb.mxu0 %v13703_v54  ;;  %v11403_v24 = vor.u32 %v15443_v60, %v11400_v14  ;;  %v15699_v28 = vld [vmem:[#allocation2 + $0xa34] sm:$0xf]  ;;  %v12939_v19 = vor.u32 %v15827_v10, %v12936_v42 }
 0x804   :  { %v16155_v34 = vld [vmem:[#allocation2 + $0x186c] sm:$0xf0]  ;;  %9664 = vmatmul.bf16.vlgmr.msra.gmra.mxu3 %v17208_v7  ;;  %v12424_v25 = vld [vmem:[#allocation2 + $0xa70] sm:$0xf0] }
 0x805   :  { %v14215_v58 = vor.u32 %v16155_v34, %v14214_v18  ;;  %9702 = vmatpush.bf16.msrb.mxu2 %v14727_v38  ;;  %9708 = vmatpush.bf16.msrb.mxu3 %v11595_v39  ;;  %v11848_v51 = vld [vmem:[#allocation2 + $0x5f0] sm:$0xf0]  ;;  %v12427_v54 = vor.u32 %v15699_v28, %v12424_v25  ;;  %v9470_v18 = vpop.f32.mrf.mxu0  ;;  %v11339_v34 = vor.u32 %v15427_v31, %v11336_v35 }
 0x806   :  { %9677 = vmatmul.bf16.vlgmr.msrb.gmra.mxu0 %v17212_v16  ;;  %v12872_v52 = vld [vmem:[#allocation2 + $0xdf0] sm:$0xf0]  ;;  %v11851_v39 = vor.u32 %v15555_v37, %v11848_v51  ;;  %v9471_v32 = vadd.f32 %v9470_v18, %v9458_v36 }
 0x807   :  { %9721 = vmatpush.bf16.msra.mxu0 %v12107_v30  ;;  %9689 = vmatpush.bf16.msrb.mxu1 %v14215_v58  ;;  %v15683_v5 = vld [vmem:[#allocation2 + $0x9b4] sm:$0xf]  ;;  %v12875_v40 = vor.u32 %v15811_v47, %v12872_v52  ;;  %v9459_v47 = vpop.f32.mrf.mxu3 }
 0x808   :  { %9703 = vmatmul.bf16.vlgmr.msrb.gmra.mxu2 %v17210_v12  ;;  %v12360_v38 = vld [vmem:[#allocation2 + $0x9f0] sm:$0xf0]  ;;  %v9484_v29 = vadd.f32 %v9483_v49, %v9471_v32 }
 0x809   :  { %9747 = vmatpush.bf16.msra.mxu2 %v13131_v15  ;;  %9709 = vmatpush.bf16.msrb.mxu3 %v11531_v1  ;;  %v15411_v43 = vld [vmem:[#allocation2 + $0x134] sm:$0xf]  ;;  %v12363_v41 = vor.u32 %v15683_v5, %v12360_v38  ;;  %v9498_v5 = vpop.f32.mrf.mxu2 }
 0x80a   :  { %9690 = vmatmul.bf16.vlgmr.msrb.gmra.mxu1 %v17215_v23  ;;  %v11272_v30 = vld [vmem:[#allocation2 + $0x170] sm:$0xf0]  ;;  %v17729_v28 = vadd.f32 %v9496_v6, %v9484_v29 }
 0x80b   :  { %9734 = vmatpush.bf16.msra.mxu1 %v12619_v26  ;;  %9722 = vmatpush.bf16.msra.mxu0 %v12043_v4  ;;  %v15539_v15 = vld [vmem:[#allocation2 + $0x534] sm:$0xf]  ;;  %v11275_v26 = vor.u32 %v15411_v43, %v11272_v30 }
 0x80c   :  { %v11784_v44 = vld [vmem:[#allocation2 + $0x570] sm:$0xf0] }
 0x80d   :  { %9748 = vmatpush.bf16.msra.mxu2 %v13067_v17  ;;  %9710 = vmatpush.bf16.msrb.mxu3 %v11467_v61  ;;  %v15795_v13 = vld [vmem:[#allocation2 + $0xd34] sm:$0xf]  ;;  %v11787_v4 = vor.u32 %v15539_v15, %v11784_v44  ;;  %v9472_v21 = vpop.f32.mrf.mxu0 }
 0x80e   :  { %v12808_v58 = vld [vmem:[#allocation2 + $0xd70] sm:$0xf0] }
 0x80f   :  { %9735 = vmatpush.bf16.msra.mxu1 %v12555_v11  ;;  %9723 = vmatpush.bf16.msra.mxu0 %v11979_v46  ;;  %v15667_v1 = vld [vmem:[#allocation2 + $0x934] sm:$0xf]  ;;  %v12811_v17 = vor.u32 %v15795_v13, %v12808_v58 }
 0x810   :  { %v12296_v50 = vld [vmem:[#allocation2 + $0x970] sm:$0xf0] }
 0x811   :  { %9749 = vmatpush.bf16.msra.mxu2 %v13003_v20  ;;  %9711 = vmatpush.bf16.msrb.mxu3 %v11403_v24  ;;  %v15395_v48 = vld [vmem:[#allocation2 + $0xb4] sm:$0xf]  ;;  %v12299_v61 = vor.u32 %v15667_v1, %v12296_v50  ;;  %v9485_v24 = vpop.f32.mrf.mxu1 }
 0x812   :  { %v11208_v8 = vld [vmem:[#allocation2 + $0xf0] sm:$0xf0] }
 0x813   :  { %9736 = vmatpush.bf16.msra.mxu1 %v12491_v0  ;;  %9724 = vmatpush.bf16.msra.mxu0 %v11915_v62  ;;  %v15523_v53 = vld [vmem:[#allocation2 + $0x4b4] sm:$0xf]  ;;  %v11211_v46 = vor.u32 %v15395_v48, %v11208_v8 }
 0x814   :  { %v11720_v9 = vld [vmem:[#allocation2 + $0x4f0] sm:$0xf0] }
 0x815   :  { %9750 = vmatpush.bf16.msra.mxu2 %v12939_v19  ;;  %9712 = vmatpush.bf16.msrb.mxu3 %v11339_v34  ;;  %v15779_v45 = vld [vmem:[#allocation2 + $0xcb4] sm:$0xf]  ;;  %v11723_v22 = vor.u32 %v15523_v53, %v11720_v9 }
 0x816   :  { %v12744_v11 = vld [vmem:[#allocation2 + $0xcf0] sm:$0xf0] }
 0x817   :  { %9737 = vmatpush.bf16.msra.mxu1 %v12427_v54  ;;  %9725 = vmatpush.bf16.msra.mxu0 %v11851_v39  ;;  %v15651_v33 = vld [vmem:[#allocation2 + $0x8b4] sm:$0xf]  ;;  %v12747_v27 = vor.u32 %v15779_v45, %v12744_v11 }
 0x818   :  { %v12232_v20 = vld [vmem:[#allocation2 + $0x8f0] sm:$0xf0] }
 0x819   :  { %9751 = vmatpush.bf16.msra.mxu2 %v12875_v40  ;;  %9713 = vmatpush.bf16.msrb.mxu3 %v11275_v26  ;;  %v15379_v60 = vld [vmem:[#allocation2 + $0x34] sm:$0xf]  ;;  %v12235_v31 = vor.u32 %v15651_v33, %v12232_v20 }
 0x81a   :  { %v11144_v14 = vld [vmem:[#allocation2 + $0x70] sm:$0xf0] }
 0x81b   :  { %9738 = vmatpush.bf16.msra.mxu1 %v12363_v41  ;;  %9726 = vmatpush.bf16.msra.mxu0 %v11787_v4  ;;  %v15507_v10 = vld [vmem:[#allocation2 + $0x434] sm:$0xf]  ;;  %v11147_v52 = vor.u32 %v15379_v60, %v11144_v14 }
 0x81c   :  { %v11656_v42 = vld [vmem:[#allocation2 + $0x470] sm:$0xf0] }
 0x81d   :  { %9752 = vmatpush.bf16.msra.mxu2 %v12811_v17  ;;  %v15763_v0 = vld [vmem:[#allocation2 + $0xc34] sm:$0xf]  ;;  %9714 = vmatpush.bf16.msrb.mxu3 %v11211_v46  ;;  %v11659_v38 = vor.u32 %v15507_v10, %v11656_v42 }
 0x81e   :  { %v12680_v25 = vld [vmem:[#allocation2 + $0xc70] sm:$0xf0] }
 0x81f   :  { %v16003_v62 = vld [vmem:[#allocation2 + $0x13b4] sm:$0xf]  ;;  %9739 = vmatpush.bf16.msra.mxu1 %v12299_v61  ;;  %9727 = vmatpush.bf16.msra.mxu0 %v11723_v22  ;;  %v12683_v39 = vor.u32 %v15763_v0, %v12680_v25 }
 0x820   :  { %v13640_v19 = vld [vmem:[#allocation2 + $0x13f0] sm:$0xf0] }
 0x821   :  { %v16131_v35 = vld [vmem:[#allocation2 + $0x17b4] sm:$0xf]  ;;  %9753 = vmatpush.bf16.msra.mxu2 %v12747_v27  ;;  %v13643_v30 = vor.u32 %v16003_v62, %v13640_v19  ;;  %9715 = vmatpush.bf16.msrb.mxu3 %v11147_v52 }
 0x822   :  { %v14152_v37 = vld [vmem:[#allocation2 + $0x17f0] sm:$0xf0] }
 0x823   :  { %v16387_v51 = vld [vmem:[#allocation2 + $0x1fb4] sm:$0xf]  ;;  %v14155_v15 = vor.u32 %v16131_v35, %v14152_v37  ;;  %9740 = vmatpush.bf16.msra.mxu1 %v12235_v31  ;;  %9728 = vmatpush.bf16.msra.mxu0 %v11659_v38 }
 0x824   :  { %v15176_v54 = vld [vmem:[#allocation2 + $0x1ff0] sm:$0xf0]  ;;  %9716 = vmatmul.bf16.vlgmr.msrb.gmra.mxu3 %v17196_v55 }
 0x825   :  { %v15635_v18 = vld [vmem:[#allocation2 + $0x834] sm:$0xf]  ;;  %v15179_v44 = vor.u32 %v16387_v51, %v15176_v54  ;;  %9754 = vmatpush.bf16.msra.mxu2 %v12683_v39  ;;  %9760 = vmatpush.bf16.msra.mxu3 %v13643_v30  ;;  %v17737_v30 = vpop.f32.mrf.mxu1 }
 0x826   :  { %v12168_v34 = vld [vmem:[#allocation2 + $0x870] sm:$0xf0]  ;;  %9729 = vmatmul.bf16.vlgmr.msra.gmra.mxu0 %v17200_v2 }
 0x827   :  { %v16259_v40 = vld [vmem:[#allocation2 + $0x1bb4] sm:$0xf]  ;;  %v12171_v13 = vor.u32 %v15635_v18, %v12168_v34  ;;  %9773 = vmatpush.bf16.msrb.mxu0 %v14155_v15  ;;  %v17735_v34 = vpop.f32.mrf.mxu0 }
 0x828   :  { %v14664_v43 = vld [vmem:[#allocation2 + $0x1bf0] sm:$0xf0]  ;;  %9755 = vmatmul.bf16.vlgmr.msra.gmra.mxu2 %v17198_v56 }
 0x829   :  { %v15987_v49 = vld [vmem:[#allocation2 + $0x1334] sm:$0xf]  ;;  %v14667_v36 = vor.u32 %v16259_v40, %v14664_v43  ;;  %9799 = vmatpush.bf16.msrb.mxu2 %v15179_v44  ;;  %9741 = vmatpush.bf16.msra.mxu1 %v12171_v13 }
 0x82a   :  { %v13576_v58 = vld [vmem:[#allocation2 + $0x1370] sm:$0xf0] }
 0x82b   :  { %v16115_v63 = vld [vmem:[#allocation2 + $0x1734] sm:$0xf]  ;;  %v13579_v4 = vor.u32 %v15987_v49, %v13576_v58 }
 0x82c   :  { %v14088_v41 = vld [vmem:[#allocation2 + $0x1770] sm:$0xf0]  ;;  %9742 = vmatmul.bf16.vlgmr.msra.gmra.mxu1 %v17202_v3 }
 0x82d   :  { %v16371_v26 = vld [vmem:[#allocation2 + $0x1f34] sm:$0xf]  ;;  %v14091_v17 = vor.u32 %v16115_v63, %v14088_v41  ;;  %9786 = vmatpush.bf16.msrb.mxu1 %v14667_v36  ;;  %9761 = vmatpush.bf16.msra.mxu3 %v13579_v4 }
 0x82e   :  { %v15112_v1 = vld [vmem:[#allocation2 + $0x1f70] sm:$0xf0] }
 0x82f   :  { %v16243_v50 = vld [vmem:[#allocation2 + $0x1b34] sm:$0xf]  ;;  %v15115_v8 = vor.u32 %v16371_v26, %v15112_v1  ;;  %9774 = vmatpush.bf16.msrb.mxu0 %v14091_v17  ;;  %v17739_v1 = vpop.f32.mrf.mxu3  ;;  %v17741_v17 = vpop.f32.mrf.mxu2 }
 0x830   :  { %v14600_v6 = vld [vmem:[#allocation2 + $0x1b70] sm:$0xf0] }
 0x831   :  { %v15971_v48 = vld [vmem:[#allocation2 + $0x12b4] sm:$0xf]  ;;  %v14603_v45 = vor.u32 %v16243_v50, %v14600_v6  ;;  %9800 = vmatpush.bf16.msrb.mxu2 %v15115_v8 }
 0x832   :  { %v13512_v53 = vld [vmem:[#allocation2 + $0x12f0] sm:$0xf0] }
 0x833   :  { %v16099_v32 = vld [vmem:[#allocation2 + $0x16b4] sm:$0xf]  ;;  %v13515_v29 = vor.u32 %v15971_v48, %v13512_v53  ;;  %9787 = vmatpush.bf16.msrb.mxu1 %v14603_v45 }
 0x834   :  { %v14024_v9 = vld [vmem:[#allocation2 + $0x16f0] sm:$0xf0] }
 0x835   :  { %v16355_v11 = vld [vmem:[#allocation2 + $0x1eb4] sm:$0xf]  ;;  %v14027_v46 = vor.u32 %v16099_v32, %v14024_v9  ;;  %9762 = vmatpush.bf16.msra.mxu3 %v13515_v29 }
 0x836   :  { %v15048_v61 = vld [vmem:[#allocation2 + $0x1ef0] sm:$0xf0] }
 0x837   :  { %v16227_v33 = vld [vmem:[#allocation2 + $0x1ab4] sm:$0xf]  ;;  %v15051_v60 = vor.u32 %v16355_v11, %v15048_v61  ;;  %9775 = vmatpush.bf16.msrb.mxu0 %v14027_v46  ;;  %v9524_v61 = vpop.f32.mrf.mxu0 }
 0x838   :  { %v14536_v21 = vld [vmem:[#allocation2 + $0x1af0] sm:$0xf0]  ;;  %v15596_v61 = vld [vmem:[#allocation2 + $0x6f4] sm:$0xf0] }
 0x839   :  { %v15955_v20 = vld [vmem:[#allocation2 + $0x1234] sm:$0xf]  ;;  %v14539_v10 = vor.u32 %v16227_v33, %v14536_v21  ;;  %9801 = vmatpush.bf16.msrb.mxu2 %v15051_v60 }
 0x83a   :  { %v13448_v14 = vld [vmem:[#allocation2 + $0x1270] sm:$0xf0] }
 0x83b   :  { %v16083_v22 = vld [vmem:[#allocation2 + $0x1634] sm:$0xf]  ;;  %v13451_v62 = vor.u32 %v15955_v20, %v13448_v14  ;;  %9788 = vmatpush.bf16.msrb.mxu1 %v14539_v10 }
 0x83c   :  { %v13960_v27 = vld [vmem:[#allocation2 + $0x1670] sm:$0xf0] }
 0x83d   :  { %v16339_v42 = vld [vmem:[#allocation2 + $0x1e34] sm:$0xf]  ;;  %v13963_v19 = vor.u32 %v16083_v22, %v13960_v27  ;;  %9763 = vmatpush.bf16.msra.mxu3 %v13451_v62  ;;  %v9537_v22 = vpop.f32.mrf.mxu1  ;;  %v15500_v62 = vld [vmem:[#allocation2 + $0x3f4] sm:$0xf0] }
 0x83e   :  { %v14984_v0 = vld [vmem:[#allocation2 + $0x1e70] sm:$0xf0] }
 0x83f   :  { %v16211_v24 = vld [vmem:[#allocation2 + $0x1a34] sm:$0xf]  ;;  %v14987_v35 = vor.u32 %v16339_v42, %v14984_v0  ;;  %9776 = vmatpush.bf16.msrb.mxu0 %v13963_v19  ;;  %v12110_v19 = vld [vmem:[#allocation2 + $0x7b8] sm:$0xf] }
 0x840   :  { %v14472_v25 = vld [vmem:[#allocation2 + $0x1a70] sm:$0xf0] }
 0x841   :  { %v15939_v31 = vld [vmem:[#allocation2 + $0x11b4] sm:$0xf]  ;;  %v14475_v52 = vor.u32 %v16211_v24, %v14472_v25  ;;  %9802 = vmatpush.bf16.msrb.mxu2 %v14987_v35  ;;  %v11598_v25 = vld [vmem:[#allocation2 + $0x3b8] sm:$0xf] }
 0x842   :  { %v13384_v37 = vld [vmem:[#allocation2 + $0x11f0] sm:$0xf0]  ;;  %v13134_v35 = vld [vmem:[#allocation2 + $0xfb8] sm:$0xf] }
 0x843   :  { %v16067_v51 = vld [vmem:[#allocation2 + $0x15b4] sm:$0xf]  ;;  %v13387_v39 = vor.u32 %v15939_v31, %v13384_v37  ;;  %9789 = vmatpush.bf16.msrb.mxu1 %v14475_v52  ;;  %v15628_v31 = vld [vmem:[#allocation2 + $0x7f4] sm:$0xf0] }
 0x844   :  { %v13896_v47 = vld [vmem:[#allocation2 + $0x15f0] sm:$0xf0]  ;;  %v15884_v37 = vld [vmem:[#allocation2 + $0xff4] sm:$0xf0] }
 0x845   :  { %v16323_v54 = vld [vmem:[#allocation2 + $0x1db4] sm:$0xf]  ;;  %v13899_v40 = vor.u32 %v16067_v51, %v13896_v47  ;;  %9764 = vmatpush.bf16.msra.mxu3 %v13387_v39  ;;  %v9511_v51 = vpop.f32.mrf.mxu3  ;;  %v11599_v39 = vor.u32 %v15500_v62, %v11598_v25  ;;  %v12942_v25 = vld [vmem:[#allocation2 + $0xe38] sm:$0xf] }
 0x846   :  { %v14920_v18 = vld [vmem:[#allocation2 + $0x1df0] sm:$0xf0]  ;;  %v15836_v62 = vld [vmem:[#allocation2 + $0xe74] sm:$0xf0] }
 0x847   :  { %v16195_v5 = vld [vmem:[#allocation2 + $0x19b4] sm:$0xf]  ;;  %v14923_v15 = vor.u32 %v16323_v54, %v14920_v18  ;;  %9777 = vmatpush.bf16.msrb.mxu0 %v13899_v40  ;;  %v3215_v40 = vperm.slane %v17709_v57, 3  ;;  %v15708_v51 = vld [vmem:[#allocation2 + $0xa74] sm:$0xf0] }
 0x848   :  { %v14408_v38 = vld [vmem:[#allocation2 + $0x19f0] sm:$0xf0] }
 0x849   :  { %v15923_v43 = vld [vmem:[#allocation2 + $0x1134] sm:$0xf]  ;;  %v14411_v58 = vor.u32 %v16195_v5, %v14408_v38  ;;  %9803 = vmatpush.bf16.msrb.mxu2 %v14923_v15  ;;  %v9550_v5 = vpop.f32.mrf.mxu2  ;;  %v15756_v15 = vld [vmem:[#allocation2 + $0xbf4] sm:$0xf0] }
 0x84a   :  { %v13320_v49 = vld [vmem:[#allocation2 + $0x1170] sm:$0xf0]  ;;  %v11854_v5 = vld [vmem:[#allocation2 + $0x5b8] sm:$0xf] }
 0x84b   :  { %v16051_v44 = vld [vmem:[#allocation2 + $0x1534] sm:$0xf]  ;;  %v13323_v50 = vor.u32 %v15923_v43, %v13320_v49  ;;  %9790 = vmatpush.bf16.msrb.mxu1 %v14411_v58  ;;  %v12622_v43 = vld [vmem:[#allocation2 + $0xbb8] sm:$0xf]  ;;  %v12111_v49 = vor.u32 %v15628_v31, %v12110_v19 }
 0x84c   :  { %v13832_v13 = vld [vmem:[#allocation2 + $0x1570] sm:$0xf0]  ;;  %v15484_v58 = vld [vmem:[#allocation2 + $0x374] sm:$0xf0] }
 0x84d   :  { %v16307_v63 = vld [vmem:[#allocation2 + $0x1d34] sm:$0xf]  ;;  %v13835_v6 = vor.u32 %v16051_v44, %v13832_v13  ;;  %9765 = vmatpush.bf16.msra.mxu3 %v13323_v50  ;;  %v13135_v44 = vor.u32 %v15884_v37, %v13134_v35  ;;  %v11534_v13 = vld [vmem:[#allocation2 + $0x338] sm:$0xf] }
 0x84e   :  { %v14856_v41 = vld [vmem:[#allocation2 + $0x1d70] sm:$0xf0]  ;;  %v15868_v50 = vld [vmem:[#allocation2 + $0xf74] sm:$0xf0]  ;;  %v11535_v57 = vor.u32 %v15484_v58, %v11534_v13 }
 0x84f   :  { %v16179_v36 = vld [vmem:[#allocation2 + $0x1934] sm:$0xf]  ;;  %v14859_v48 = vor.u32 %v16307_v63, %v14856_v41  ;;  %9778 = vmatpush.bf16.msrb.mxu0 %v13835_v6  ;;  %v12046_v63 = vld [vmem:[#allocation2 + $0x738] sm:$0xf]  ;;  %v12623_v6 = vor.u32 %v15756_v15, %v12622_v43  ;;  %v9574_v15 = vpop.f32.mrf.mxu0 }
 0x850   :  { %v14344_v26 = vld [vmem:[#allocation2 + $0x1970] sm:$0xf0]  ;;  %v12430_v37 = vld [vmem:[#allocation2 + $0xa38] sm:$0xf] }
 0x851   :  { %v15907_v4 = vld [vmem:[#allocation2 + $0x10b4] sm:$0xf]  ;;  %v14347_v9 = vor.u32 %v16179_v36, %v14344_v26  ;;  %9804 = vmatpush.bf16.msrb.mxu2 %v14859_v48  ;;  %v15612_v36 = vld [vmem:[#allocation2 + $0x774] sm:$0xf0]  ;;  %v12431_v43 = vor.u32 %v15708_v51, %v12430_v37 }
 0x852   :  { %v13256_v8 = vld [vmem:[#allocation2 + $0x10f0] sm:$0xf0]  ;;  %v13070_v26 = vld [vmem:[#allocation2 + $0xf38] sm:$0xf] }
 0x853   :  { %v16035_v53 = vld [vmem:[#allocation2 + $0x14b4] sm:$0xf]  ;;  %v13259_v29 = vor.u32 %v15907_v4, %v13256_v8  ;;  %9791 = vmatpush.bf16.msrb.mxu1 %v14347_v9  ;;  %v9510_v4 = vadd.f32 %v17739_v1, %v3215_v40  ;;  %v12558_v48 = vld [vmem:[#allocation2 + $0xb38] sm:$0xf]  ;;  %v10030_v1 = vmax.f32 %v17729_v28, 0.0 }
 0x854   :  { %v13768_v32 = vld [vmem:[#allocation2 + $0x14f0] sm:$0xf0]  ;;  %v15740_v8 = vld [vmem:[#allocation2 + $0xb74] sm:$0xf0] }
 0x855   :  { %v16291_v45 = vld [vmem:[#allocation2 + $0x1cb4] sm:$0xf]  ;;  %v13771_v46 = vor.u32 %v16035_v53, %v13768_v32  ;;  %9766 = vmatpush.bf16.msra.mxu3 %v13259_v29  ;;  %v12047_v53 = vor.u32 %v15612_v36, %v12046_v63  ;;  %v13071_v32 = vor.u32 %v15868_v50, %v13070_v26  ;;  %v11470_v9 = vld [vmem:[#allocation2 + $0x2b8] sm:$0xf]  ;;  %v12559_v29 = vor.u32 %v15740_v8, %v12558_v48  ;;  %v9587_v50 = vpop.f32.mrf.mxu1  ;;  %v9561_v48 = vpop.f32.mrf.mxu3 }
 0x856   :  { %v14792_v11 = vld [vmem:[#allocation2 + $0x1cf0] sm:$0xf0]  ;;  %v17753_v19 = vmax.f32 %v10030_v1, 1e-12  ;;  %v15820_v40 = vld [vmem:[#allocation2 + $0xdf4] sm:$0xf0] }
 0x857   :  { %v16163_v33 = vld [vmem:[#allocation2 + $0x18b4] sm:$0xf]  ;;  %v14795_v27 = vor.u32 %v16291_v45, %v14792_v11  ;;  %9779 = vmatpush.bf16.msrb.mxu0 %v13771_v46  ;;  %v15468_v45 = vld [vmem:[#allocation2 + $0x2f4] sm:$0xf0]  ;;  %v9523_v46 = vadd.f32 %v17735_v34, %v9510_v4 }
 0x858   :  { %v14280_v21 = vld [vmem:[#allocation2 + $0x18f0] sm:$0xf0]  ;;  %v11982_v11 = vld [vmem:[#allocation2 + $0x6b8] sm:$0xf]  ;;  %16533 = vrcp.f32 %v17753_v19  ;;  %vm10207_vm5 = vweird.f32 %v17753_v19 }
 0x859   :  { %v15891_v20 = vld [vmem:[#allocation2 + $0x1034] sm:$0xf]  ;;  %v14283_v24 = vor.u32 %v16163_v33, %v14280_v21  ;;  %9805 = vmatpush.bf16.msrb.mxu2 %v14795_v27  ;;  %v13006_v33 = vld [vmem:[#allocation2 + $0xeb8] sm:$0xf]  ;;  %v11983_v22 = vor.u32 %v15596_v61, %v11982_v11  ;;  %v9536_v31 = vadd.f32 %v17737_v30, %v9523_v46 }
 0x85a   :  { %v13192_v60 = vld [vmem:[#allocation2 + $0x1070] sm:$0xf0]  ;;  %v15852_v21 = vld [vmem:[#allocation2 + $0xef4] sm:$0xf0] }
 0x85b   :  { %v16019_v14 = vld [vmem:[#allocation2 + $0x1434] sm:$0xf]  ;;  %v13195_v47 = vor.u32 %v15891_v20, %v13192_v60  ;;  %9792 = vmatpush.bf16.msrb.mxu1 %v14283_v24  ;;  %v11471_v20 = vor.u32 %v15468_v45, %v11470_v9  ;;  %v12494_v60 = vld [vmem:[#allocation2 + $0xab8] sm:$0xf]  ;;  %v13007_v27 = vor.u32 %v15852_v21, %v13006_v33  ;;  %v9549_v30 = vadd.f32 %v17741_v17, %v9536_v31  ;;  %v9600_v45 = vpop.f32.mrf.mxu2 }
 0x85c   :  { %v13704_v10 = vld [vmem:[#allocation2 + $0x1470] sm:$0xf0]  ;;  %v15580_v24 = vld [vmem:[#allocation2 + $0x674] sm:$0xf0] }
 0x85d   :  { %v16275_v42 = vld [vmem:[#allocation2 + $0x1c34] sm:$0xf]  ;;  %v13707_v52 = vor.u32 %v16019_v14, %v13704_v10  ;;  %9767 = vmatpush.bf16.msra.mxu3 %v13195_v47  ;;  %v15724_v14 = vld [vmem:[#allocation2 + $0xaf4] sm:$0xf0]  ;;  %v9562_v17 = vadd.f32 %v9561_v48, %v9549_v30 }
 0x85e   :  { %v14728_v0 = vld [vmem:[#allocation2 + $0x1c70] sm:$0xf0]  ;;  %v11406_v10 = vld [vmem:[#allocation2 + $0x238] sm:$0xf]  ;;  %v12495_v34 = vor.u32 %v15724_v14, %v12494_v60  ;;  %v17758_v46 = vpop.eup %16533 }
 0x85f   :  { %v16147_v54 = vld [vmem:[#allocation2 + $0x1834] sm:$0xf]  ;;  %v14731_v38 = vor.u32 %v16275_v42, %v14728_v0  ;;  %9780 = vmatpush.bf16.msrb.mxu0 %v13707_v52  ;;  %v15452_v42 = vld [vmem:[#allocation2 + $0x274] sm:$0xf0]  ;;  %v12943_v52 = vor.u32 %v15836_v62, %v12942_v25  ;;  %vm10208_vm6 = vweird.f32 %v17758_v46 }
 0x860   :  { %v14216_v18 = vld [vmem:[#allocation2 + $0x1870] sm:$0xf0]  ;;  %9768 = vmatmul.bf16.vlgmr.msra.gmra.mxu3 %v17208_v7  ;;  %v11918_v0 = vld [vmem:[#allocation2 + $0x638] sm:$0xf]  ;;  %v11407_v35 = vor.u32 %v15452_v42, %v11406_v10  ;;  %vm17788_vm7 = vmor %vm10207_vm5, %vm10208_vm6 }
 0x861   :  { %v14219_v41 = vor.u32 %v16147_v54, %v14216_v18  ;;  %9806 = vmatpush.bf16.msrb.mxu2 %v14731_v38  ;;  %9812 = vmatpush.bf16.msrb.mxu3 %v11599_v39  ;;  %v11919_v47 = vor.u32 %v15580_v24, %v11918_v0  ;;  %v11342_v54 = vld [vmem:[#allocation2 + $0x1b8] sm:$0xf]  ;;  %v9576_v0 = vpop.f32.mrf.mxu0 }
 0x862   :  { %9781 = vmatmul.bf16.vlgmr.msrb.gmra.mxu0 %v17212_v16  ;;  %v15436_v18 = vld [vmem:[#allocation2 + $0x1f4] sm:$0xf0] }
 0x863   :  { %9825 = vmatpush.bf16.msra.mxu0 %v12111_v49  ;;  %9793 = vmatpush.bf16.msrb.mxu1 %v14219_v41  ;;  %v15564_v38 = vld [vmem:[#allocation2 + $0x5f4] sm:$0xf0]  ;;  %v11343_v49 = vor.u32 %v15436_v18, %v11342_v54  ;;  %v9589_v18 = vpop.f32.mrf.mxu1 }
 0x864   :  { %9807 = vmatmul.bf16.vlgmr.msrb.gmra.mxu2 %v17210_v12  ;;  %v12878_v39 = vld [vmem:[#allocation2 + $0xdb8] sm:$0xf]  ;;  %v11855_v58 = vor.u32 %v15564_v38, %v11854_v5 }
 0x865   :  { %9851 = vmatpush.bf16.msra.mxu2 %v13135_v44  ;;  %9813 = vmatpush.bf16.msrb.mxu3 %v11535_v57  ;;  %v12366_v44 = vld [vmem:[#allocation2 + $0x9b8] sm:$0xf]  ;;  %v12879_v63 = vor.u32 %v15820_v40, %v12878_v39 }
 0x866   :  { %9794 = vmatmul.bf16.vlgmr.msrb.gmra.mxu1 %v17215_v23  ;;  %v15692_v13 = vld [vmem:[#allocation2 + $0x9f4] sm:$0xf0] }
 0x867   :  { %9838 = vmatpush.bf16.msra.mxu1 %v12623_v6  ;;  %9826 = vmatpush.bf16.msra.mxu0 %v12047_v53  ;;  %v11278_v41 = vld [vmem:[#allocation2 + $0x138] sm:$0xf]  ;;  %v12367_v8 = vor.u32 %v15692_v13, %v12366_v44  ;;  %v9563_v44 = vpop.f32.mrf.mxu3 }
 0x868   :  { %v15420_v36 = vld [vmem:[#allocation2 + $0x174] sm:$0xf0] }
 0x869   :  { %9852 = vmatpush.bf16.msra.mxu2 %v13071_v32  ;;  %9814 = vmatpush.bf16.msrb.mxu3 %v11471_v20  ;;  %v11790_v26 = vld [vmem:[#allocation2 + $0x538] sm:$0xf]  ;;  %v11279_v53 = vor.u32 %v15420_v36, %v11278_v41  ;;  %v9575_v20 = vadd.f32 %v9574_v15, %v9562_v17  ;;  %v9602_v36 = vpop.f32.mrf.mxu2 }
 0x86a   :  { %v15548_v6 = vld [vmem:[#allocation2 + $0x574] sm:$0xf0] }
 0x86b   :  { %9839 = vmatpush.bf16.msra.mxu1 %v12559_v29  ;;  %9827 = vmatpush.bf16.msra.mxu0 %v11983_v22  ;;  %v12814_v4 = vld [vmem:[#allocation2 + $0xd38] sm:$0xf]  ;;  %v11791_v11 = vor.u32 %v15548_v6, %v11790_v26  ;;  %v9588_v24 = vadd.f32 %v9587_v50, %v9575_v20 }
 0x86c   :  { %v15804_v57 = vld [vmem:[#allocation2 + $0xd74] sm:$0xf0] }
 0x86d   :  { %9853 = vmatpush.bf16.msra.mxu2 %v13007_v27  ;;  %9815 = vmatpush.bf16.msrb.mxu3 %v11407_v35  ;;  %v12302_v32 = vld [vmem:[#allocation2 + $0x938] sm:$0xf]  ;;  %v12815_v61 = vor.u32 %v15804_v57, %v12814_v4  ;;  %v10203_v35 = vmul.f32 %v17758_v46, %v17753_v19  ;;  %v17762_v5 = vadd.f32 %v9600_v45, %v9588_v24 }
 0x86e   :  { %v15676_v9 = vld [vmem:[#allocation2 + $0x974] sm:$0xf0] }
 0x86f   :  { %9840 = vmatpush.bf16.msra.mxu1 %v12495_v34  ;;  %9828 = vmatpush.bf16.msra.mxu0 %v11919_v47  ;;  %v11214_v33 = vld [vmem:[#allocation2 + $0xb8] sm:$0xf]  ;;  %v12303_v27 = vor.u32 %v15676_v9, %v12302_v32  ;;  %v10031_v13 = vmax.f32 %v17762_v5, 0.0  ;;  %v10204_v26 = vsub.f32 1.0, %v10203_v35 }
 0x870   :  { %v15404_v21 = vld [vmem:[#allocation2 + $0xf4] sm:$0xf0] }
 0x871   :  { %9854 = vmatpush.bf16.msra.mxu2 %v12943_v52  ;;  %9816 = vmatpush.bf16.msrb.mxu3 %v11343_v49  ;;  %v11726_v29 = vld [vmem:[#allocation2 + $0x4b8] sm:$0xf]  ;;  %v11215_v25 = vor.u32 %v15404_v21, %v11214_v33  ;;  %v17767_v48 = vmax.f32 %v10031_v13, 1e-12  ;;  %v10205_v20 = vmul.f32 %v17758_v46, %v10204_v26 }
 0x872   :  { %v15532_v60 = vld [vmem:[#allocation2 + $0x4f4] sm:$0xf0] }
 0x873   :  { %9841 = vmatpush.bf16.msra.mxu1 %v12431_v43  ;;  %9829 = vmatpush.bf16.msra.mxu0 %v11855_v58  ;;  %v12750_v14 = vld [vmem:[#allocation2 + $0xcb8] sm:$0xf]  ;;  %v11727_v37 = vor.u32 %v15532_v60, %v11726_v29  ;;  %16535 = vrcp.f32 %v17767_v48  ;;  %vm10222_vm9 = vweird.f32 %v17767_v48 }
 0x874   :  { %v15788_v22 = vld [vmem:[#allocation2 + $0xcf4] sm:$0xf0] }
 0x875   :  { %9855 = vmatpush.bf16.msra.mxu2 %v12879_v63  ;;  %v12238_v10 = vld [vmem:[#allocation2 + $0x8b8] sm:$0xf]  ;;  %9817 = vmatpush.bf16.msrb.mxu3 %v11279_v53  ;;  %v12751_v51 = vor.u32 %v15788_v22, %v12750_v14 }
 0x876   :  { %v15660_v42 = vld [vmem:[#allocation2 + $0x8f4] sm:$0xf0] }
 0x877   :  { %9842 = vmatpush.bf16.msra.mxu1 %v12367_v8  ;;  %v11150_v62 = vld [vmem:[#allocation2 + $0x38] sm:$0xf]  ;;  %9830 = vmatpush.bf16.msra.mxu0 %v11791_v11  ;;  %v12239_v43 = vor.u32 %v15660_v42, %v12238_v10 }
 0x878   :  { %v15388_v34 = vld [vmem:[#allocation2 + $0x74] sm:$0xf0] }
 0x879   :  { %v11662_v31 = vld [vmem:[#allocation2 + $0x438] sm:$0xf]  ;;  %9856 = vmatpush.bf16.msra.mxu2 %v12815_v61  ;;  %9818 = vmatpush.bf16.msrb.mxu3 %v11215_v25  ;;  %v11151_v58 = vor.u32 %v15388_v34, %v11150_v62  ;;  %v10211_v62 = vand.u32 2147483647, %v17753_v19 }
 0x87a   :  { %v15516_v47 = vld [vmem:[#allocation2 + $0x474] sm:$0xf0] }
 0x87b   :  { %v12686_v52 = vld [vmem:[#allocation2 + $0xc38] sm:$0xf]  ;;  %9843 = vmatpush.bf16.msra.mxu1 %v12303_v27  ;;  %9831 = vmatpush.bf16.msra.mxu0 %v11727_v37  ;;  %v11663_v50 = vor.u32 %v15516_v47, %v11662_v31  ;;  %v10206_v37 = vadd.f32 %v17758_v46, %v10205_v20  ;;  %vm17792_vm8 = vcmp.eq.f32.partialorder %v10211_v62, 8.507059e+37 }
 0x87c   :  { %v15772_v54 = vld [vmem:[#allocation2 + $0xc74] sm:$0xf0] }
 0x87d   :  { %v13646_v38 = vld [vmem:[#allocation2 + $0x13b8] sm:$0xf]  ;;  %9857 = vmatpush.bf16.msra.mxu2 %v12751_v51  ;;  %v12687_v6 = vor.u32 %v15772_v54, %v12686_v52  ;;  %9819 = vmatpush.bf16.msrb.mxu3 %v11151_v58  ;;  %v10213_v51 = vand.u32 2147483648, %v17753_v19  ;;  %v17779_v54 = vpop.eup %16535  ;;  %v10210_v26 = vsel %vm17788_vm7, %v17758_v46, %v10206_v37  ;;  %v10228_v19 = vand.u32 2147483648, %v17767_v48 }
 0x87e   :  { %v16012_v39 = vld [vmem:[#allocation2 + $0x13f4] sm:$0xf0]  ;;  %vm10223_vm10 = vweird.f32 %v17779_v54  ;;  %v10226_v46 = vand.u32 2147483647, %v17767_v48 }
 0x87f   :  { %v14158_v40 = vld [vmem:[#allocation2 + $0x17b8] sm:$0xf]  ;;  %v13647_v8 = vor.u32 %v16012_v39, %v13646_v38  ;;  %9844 = vmatpush.bf16.msra.mxu1 %v12239_v43  ;;  %9832 = vmatpush.bf16.msra.mxu0 %v11663_v50  ;;  %v10214_v50 = vor.u32 1.1754944e-38, %v10213_v51  ;;  %vm17809_vm11 = vmor %vm10222_vm9, %vm10223_vm10 }
 0x880   :  { %v16140_v15 = vld [vmem:[#allocation2 + $0x17f4] sm:$0xf0]  ;;  %9820 = vmatmul.bf16.vlgmr.msrb.gmra.mxu3 %v17196_v55  ;;  %vm10227_vm12 = vcmp.eq.f32.partialorder %v10226_v46, 8.507059e+37 }
 0x881   :  { %v15182_v30 = vld [vmem:[#allocation2 + $0x1fb8] sm:$0xf]  ;;  %v14159_v17 = vor.u32 %v16140_v15, %v14158_v40  ;;  %9858 = vmatpush.bf16.msra.mxu2 %v12687_v6  ;;  %9864 = vmatpush.bf16.msra.mxu3 %v13647_v8  ;;  %v10218_v15 = vmul.f32 %v17779_v54, %v17767_v48 }
 0x882   :  { %v16396_v49 = vld [vmem:[#allocation2 + $0x1ff4] sm:$0xf0]  ;;  %9833 = vmatmul.bf16.vlgmr.msra.gmra.mxu0 %v17200_v2 }
 0x883   :  { %v12174_v63 = vld [vmem:[#allocation2 + $0x838] sm:$0xf]  ;;  %v15183_v32 = vor.u32 %v16396_v49, %v15182_v30  ;;  %9877 = vmatpush.bf16.msrb.mxu0 %v14159_v17  ;;  %v10219_v6 = vsub.f32 1.0, %v10218_v15 }
 0x884   :  { %v15644_v41 = vld [vmem:[#allocation2 + $0x874] sm:$0xf0]  ;;  %9859 = vmatmul.bf16.vlgmr.msra.gmra.mxu2 %v17198_v56 }
 0x885   :  { %v14670_v4 = vld [vmem:[#allocation2 + $0x1bb8] sm:$0xf]  ;;  %v12175_v9 = vor.u32 %v15644_v41, %v12174_v63  ;;  %9903 = vmatpush.bf16.msrb.mxu2 %v15183_v32  ;;  %v9652_v63 = vpop.f32.mrf.mxu2 }
 0x886   :  { %v16268_v57 = vld [vmem:[#allocation2 + $0x1bf4] sm:$0xf0] }
 0x887   :  { %v13582_v53 = vld [vmem:[#allocation2 + $0x1338] sm:$0xf]  ;;  %v14671_v33 = vor.u32 %v16268_v57, %v14670_v4  ;;  %9845 = vmatpush.bf16.msra.mxu1 %v12175_v9 }
 0x888   :  { %v15996_v45 = vld [vmem:[#allocation2 + $0x1374] sm:$0xf0] }
 0x889   :  { %v14094_v11 = vld [vmem:[#allocation2 + $0x1738] sm:$0xf]  ;;  %v13583_v22 = vor.u32 %v15996_v45, %v13582_v53  ;;  %v10220_v45 = vmul.f32 %v17779_v54, %v10219_v6 }
 0x88a   :  { %v16124_v61 = vld [vmem:[#allocation2 + $0x1774] sm:$0xf0]  ;;  %9846 = vmatmul.bf16.vlgmr.msra.gmra.mxu1 %v17202_v3 }
 0x88b   :  { %v15118_v21 = vld [vmem:[#allocation2 + $0x1f38] sm:$0xf]  ;;  %v14095_v27 = vor.u32 %v16124_v61, %v14094_v11  ;;  %9890 = vmatpush.bf16.msrb.mxu1 %v14671_v33  ;;  %9865 = vmatpush.bf16.msra.mxu3 %v13583_v22  ;;  %v10215_v33 = vsel %vm17792_vm8, %v10214_v50, %v10210_v26 }
 0x88c   :  { %v16380_v29 = vld [vmem:[#allocation2 + $0x1f74] sm:$0xf0]  ;;  %v10216_v37 = vmul.f32 %v10215_v33, %v10030_v1  ;;  %v9613_v1 = vpop.f32.mrf.mxu3 }
 0x88d   :  { %v14606_v60 = vld [vmem:[#allocation2 + $0x1b38] sm:$0xf]  ;;  %v15119_v42 = vor.u32 %v16380_v29, %v15118_v21  ;;  %9878 = vmatpush.bf16.msrb.mxu0 %v14095_v27 }
 0x88e   :  { %v16252_v14 = vld [vmem:[#allocation2 + $0x1b74] sm:$0xf0]  ;;  %v10315_v41 = vrot.slane %v10216_v37, 4 }
 0x88f   :  { %v13518_v10 = vld [vmem:[#allocation2 + $0x12b8] sm:$0xf]  ;;  %v14607_v34 = vor.u32 %v16252_v14, %v14606_v60  ;;  %9904 = vmatpush.bf16.msrb.mxu2 %v15119_v42  ;;  %v9626_v60 = vpop.f32.mrf.mxu0  ;;  %v10221_v14 = vadd.f32 %v17779_v54, %v10220_v45  ;;  %v10229_v42 = vor.u32 1.1754944e-38, %v10228_v19 }
 0x890   :  { %v15980_v0 = vld [vmem:[#allocation2 + $0x12f4] sm:$0xf0] }
 0x891   :  { %v14030_v24 = vld [vmem:[#allocation2 + $0x16b8] sm:$0xf]  ;;  %v13519_v18 = vor.u32 %v15980_v0, %v13518_v10  ;;  %9891 = vmatpush.bf16.msrb.mxu1 %v14607_v34  ;;  %v10225_v48 = vsel %vm17809_vm11, %v17779_v54, %v10221_v14  ;;  %v15620_v10 = vld [vmem:[#allocation2 + $0x7bc] sm:$0xf] }
 0x892   :  { %v16108_v25 = vld [vmem:[#allocation2 + $0x16f4] sm:$0xf0] }
 0x893   :  { %v15054_v31 = vld [vmem:[#allocation2 + $0x1eb8] sm:$0xf]  ;;  %v14031_v38 = vor.u32 %v16108_v25, %v14030_v24  ;;  %9866 = vmatpush.bf16.msra.mxu3 %v13519_v18  ;;  %v10230_v18 = vsel %vm10227_vm12, %v10229_v42, %v10225_v48 }
 0x894   :  { %v16364_v35 = vld [vmem:[#allocation2 + $0x1ef4] sm:$0xf0] }
 0x895   :  { %v14542_v47 = vld [vmem:[#allocation2 + $0x1ab8] sm:$0xf]  ;;  %v15055_v30 = vor.u32 %v16364_v35, %v15054_v31  ;;  %9879 = vmatpush.bf16.msrb.mxu0 %v14031_v38  ;;  %v9639_v35 = vpop.f32.mrf.mxu1 }
 0x896   :  { %v16236_v52 = vld [vmem:[#allocation2 + $0x1af4] sm:$0xf0] }
 0x897   :  { %v13454_v39 = vld [vmem:[#allocation2 + $0x1238] sm:$0xf]  ;;  %v14543_v36 = vor.u32 %v16236_v52, %v14542_v47  ;;  %9905 = vmatpush.bf16.msrb.mxu2 %v15055_v30  ;;  %v9628_v19 = vpop.f32.mrf.mxu0 }
 0x898   :  { %v15964_v40 = vld [vmem:[#allocation2 + $0x1274] sm:$0xf0] }
 0x899   :  { %v13966_v43 = vld [vmem:[#allocation2 + $0x1638] sm:$0xf]  ;;  %v13455_v8 = vor.u32 %v15964_v40, %v13454_v39  ;;  %9892 = vmatpush.bf16.msrb.mxu1 %v14543_v36 }
 0x89a   :  { %v16092_v49 = vld [vmem:[#allocation2 + $0x1674] sm:$0xf0] }
 0x89b   :  { %v14990_v44 = vld [vmem:[#allocation2 + $0x1e38] sm:$0xf]  ;;  %v13967_v17 = vor.u32 %v16092_v49, %v13966_v43  ;;  %9867 = vmatpush.bf16.msra.mxu3 %v13455_v8  ;;  %v10231_v43 = vmul.f32 %v10230_v18, %v10031_v13  ;;  %v15748_v18 = vld [vmem:[#allocation2 + $0xbbc] sm:$0xf] }
 0x89c   :  { %v16348_v58 = vld [vmem:[#allocation2 + $0x1e74] sm:$0xf0] }
 0x89d   :  { %v14478_v4 = vld [vmem:[#allocation2 + $0x1a38] sm:$0xf]  ;;  %v14991_v53 = vor.u32 %v16348_v58, %v14990_v44  ;;  %9880 = vmatpush.bf16.msrb.mxu0 %v13967_v17  ;;  %v10316_v36 = vrot.slane %v10231_v43, 2  ;;  %v15476_v43 = vld [vmem:[#allocation2 + $0x33c] sm:$0xf] }
 0x89e   :  { %v16220_v57 = vld [vmem:[#allocation2 + $0x1a74] sm:$0xf0] }
 0x89f   :  { %v13390_v32 = vld [vmem:[#allocation2 + $0x11b8] sm:$0xf]  ;;  %v14479_v21 = vor.u32 %v16220_v57, %v14478_v4  ;;  %9906 = vmatpush.bf16.msrb.mxu2 %v14991_v53  ;;  %v10327_v8 = vsel %vm2125_vm2, %v10315_v41, %v10316_v36  ;;  %v12560_v41 = vld [vmem:[#allocation2 + $0xb78] sm:$0xf0] }
 0x8a0   :  { %v15948_v9 = vld [vmem:[#allocation2 + $0x11f4] sm:$0xf0]  ;;  %v10328_v45 = vsel %vm814_vm3, %v17720_v59, %v10327_v8  ;;  %v11600_v59 = vld [vmem:[#allocation2 + $0x3f8] sm:$0xf0] }
 0x8a1   :  { %v13902_v11 = vld [vmem:[#allocation2 + $0x15b8] sm:$0xf]  ;;  %v13391_v0 = vor.u32 %v15948_v9, %v13390_v32  ;;  %9893 = vmatpush.bf16.msrb.mxu1 %v14479_v21  ;;  %10338 = vst [vmem:[%s17872_s13 + $0x10] sm:$0xff] %v10328_v45  ;;  %v15444_v45 = vld [vmem:[#allocation2 + $0x23c] sm:$0xf] }
 0x8a2   :  { %v16076_v61 = vld [vmem:[#allocation2 + $0x15f4] sm:$0xf0] }
 0x8a3   :  { %v14926_v29 = vld [vmem:[#allocation2 + $0x1db8] sm:$0xf]  ;;  %v13903_v24 = vor.u32 %v16076_v61, %v13902_v11  ;;  %9868 = vmatpush.bf16.msra.mxu3 %v13391_v0  ;;  %v12112_v0 = vld [vmem:[#allocation2 + $0x7f8] sm:$0xf0] }
 0x8a4   :  { %v16332_v20 = vld [vmem:[#allocation2 + $0x1df4] sm:$0xf0] }
 0x8a5   :  { %v14414_v22 = vld [vmem:[#allocation2 + $0x19b8] sm:$0xf]  ;;  %v14927_v51 = vor.u32 %v16332_v20, %v14926_v29  ;;  %9881 = vmatpush.bf16.msrb.mxu0 %v13903_v24  ;;  %v9641_v29 = vpop.f32.mrf.mxu1  ;;  %v15876_v24 = vld [vmem:[#allocation2 + $0xfbc] sm:$0xf] }
 0x8a6   :  { %v16204_v27 = vld [vmem:[#allocation2 + $0x19f4] sm:$0xf0] }
 0x8a7   :  { %v13326_v25 = vld [vmem:[#allocation2 + $0x1138] sm:$0xf]  ;;  %v14415_v38 = vor.u32 %v16204_v27, %v14414_v22  ;;  %9907 = vmatpush.bf16.msrb.mxu2 %v14927_v51  ;;  %v15492_v27 = vld [vmem:[#allocation2 + $0x3bc] sm:$0xf]  ;;  %v9654_v51 = vpop.f32.mrf.mxu2 }
 0x8a8   :  { %v15932_v62 = vld [vmem:[#allocation2 + $0x1174] sm:$0xf0]  ;;  %v12368_v51 = vld [vmem:[#allocation2 + $0x9f8] sm:$0xf0] }
 0x8a9   :  { %v17813_v34 = vld [vmem:[#allocation30 + $0x8] sm:$0xff]  ;;  %v13327_v30 = vor.u32 %v15932_v62, %v13326_v25  ;;  %9894 = vmatpush.bf16.msrb.mxu1 %v14415_v38  ;;  %v9615_v62 = vpop.f32.mrf.mxu3 }
 0x8aa   :  { %v3216_v31 = vperm.slane %v17813_v34, 4  ;;  %v13838_v47 = vld [vmem:[#allocation2 + $0x1538] sm:$0xf]  ;;  %v13136_v25 = vld [vmem:[#allocation2 + $0xff8] sm:$0xf0] }
 0x8ab   :  { %v16060_v52 = vld [vmem:[#allocation2 + $0x1574] sm:$0xf0]  ;;  %9869 = vmatpush.bf16.msra.mxu3 %v13327_v30  ;;  %v12624_v38 = vld [vmem:[#allocation2 + $0xbf8] sm:$0xf0] }
 0x8ac   :  { %v14862_v39 = vld [vmem:[#allocation2 + $0x1d38] sm:$0xf]  ;;  %v13839_v54 = vor.u32 %v16060_v52, %v13838_v47  ;;  %v9614_v58 = vadd.f32 %v9613_v1, %v3216_v31  ;;  %v11603_v52 = vor.u32 %v15492_v27, %v11600_v59  ;;  %v12048_v30 = vld [vmem:[#allocation2 + $0x778] sm:$0xf0] }
 0x8ad   :  { %v16316_v40 = vld [vmem:[#allocation2 + $0x1d74] sm:$0xf0]  ;;  %v15428_v59 = vld [vmem:[#allocation2 + $0x1bc] sm:$0xf] }
 0x8ae   :  { %v14350_v15 = vld [vmem:[#allocation2 + $0x1938] sm:$0xf]  ;;  %v14863_v26 = vor.u32 %v16316_v40, %v14862_v39  ;;  %v9627_v57 = vadd.f32 %v9626_v60, %v9614_v58  ;;  %9882 = vmatpush.bf16.msrb.mxu0 %v13839_v54  ;;  %v12115_v39 = vor.u32 %v15620_v10, %v12112_v0  ;;  %v13139_v40 = vor.u32 %v15876_v24, %v13136_v25  ;;  %v15860_v54 = vld [vmem:[#allocation2 + $0xf3c] sm:$0xf] }
 0x8af   :  { %v16188_v28 = vld [vmem:[#allocation2 + $0x1974] sm:$0xf0]  ;;  %v11344_v10 = vld [vmem:[#allocation2 + $0x1f8] sm:$0xf0] }
 0x8b0   :  { %v13262_v49 = vld [vmem:[#allocation2 + $0x10b8] sm:$0xf]  ;;  %v14351_v5 = vor.u32 %v16188_v28, %v14350_v15  ;;  %v9640_v21 = vadd.f32 %v9639_v35, %v9627_v57  ;;  %9908 = vmatpush.bf16.msrb.mxu2 %v14863_v26  ;;  %v11536_v15 = vld [vmem:[#allocation2 + $0x378] sm:$0xf0] }
 0x8b1   :  { %v15916_v44 = vld [vmem:[#allocation2 + $0x10f4] sm:$0xf0]  ;;  %v15604_v28 = vld [vmem:[#allocation2 + $0x73c] sm:$0xf]  ;;  %v11539_v58 = vor.u32 %v15476_v43, %v11536_v15 }
 0x8b2   :  { %v13774_v50 = vld [vmem:[#allocation2 + $0x14b8] sm:$0xf]  ;;  %v13263_v17 = vor.u32 %v15916_v44, %v13262_v49  ;;  %9895 = vmatpush.bf16.msrb.mxu1 %v14351_v5  ;;  %v17829_v42 = vadd.f32 %v9652_v63, %v9640_v21  ;;  %v13072_v49 = vld [vmem:[#allocation2 + $0xf78] sm:$0xf0]  ;;  %v12627_v44 = vor.u32 %v15748_v18, %v12624_v38  ;;  %v12051_v36 = vor.u32 %v15604_v28, %v12048_v30 }
 0x8b3   :  { %v16044_v6 = vld [vmem:[#allocation2 + $0x14f4] sm:$0xf0]  ;;  %v15732_v63 = vld [vmem:[#allocation2 + $0xb3c] sm:$0xf]  ;;  %v13075_v26 = vor.u32 %v15860_v54, %v13072_v49 }
 0x8b4   :  { %v14798_v13 = vld [vmem:[#allocation2 + $0x1cb8] sm:$0xf]  ;;  %v13775_v46 = vor.u32 %v16044_v6, %v13774_v50  ;;  %9870 = vmatpush.bf16.msra.mxu3 %v13263_v17  ;;  %v15460_v50 = vld [vmem:[#allocation2 + $0x2bc] sm:$0xf]  ;;  %v12563_v19 = vor.u32 %v15732_v63, %v12560_v41  ;;  %v9704_v63 = vpop.f32.mrf.mxu2 }
 0x8b5   :  { %v16300_v4 = vld [vmem:[#allocation2 + $0x1cf4] sm:$0xf0]  ;;  %v11472_v6 = vld [vmem:[#allocation2 + $0x2f8] sm:$0xf0] }
 0x8b6   :  { %v14286_v53 = vld [vmem:[#allocation2 + $0x18b8] sm:$0xf]  ;;  %v14799_v20 = vor.u32 %v16300_v4, %v14798_v13  ;;  %9883 = vmatpush.bf16.msrb.mxu0 %v13775_v46  ;;  %v15588_v5 = vld [vmem:[#allocation2 + $0x6bc] sm:$0xf]  ;;  %v11475_v8 = vor.u32 %v15460_v50, %v11472_v6 }
 0x8b7   :  { %v16172_v32 = vld [vmem:[#allocation2 + $0x18f4] sm:$0xf0]  ;;  %v11984_v13 = vld [vmem:[#allocation2 + $0x6f8] sm:$0xf0] }
 0x8b8   :  { %v13198_v9 = vld [vmem:[#allocation2 + $0x1038] sm:$0xf]  ;;  %v14287_v22 = vor.u32 %v16172_v32, %v14286_v53  ;;  %9909 = vmatpush.bf16.msrb.mxu2 %v14799_v20  ;;  %v15844_v4 = vld [vmem:[#allocation2 + $0xebc] sm:$0xf]  ;;  %v11987_v32 = vor.u32 %v15588_v5, %v11984_v13 }
 0x8b9   :  { %v15900_v11 = vld [vmem:[#allocation2 + $0x1074] sm:$0xf0]  ;;  %v13008_v57 = vld [vmem:[#allocation2 + $0xef8] sm:$0xf0] }
 0x8ba   :  { %v13710_v61 = vld [vmem:[#allocation2 + $0x1438] sm:$0xf]  ;;  %v13199_v31 = vor.u32 %v15900_v11, %v13198_v9  ;;  %9896 = vmatpush.bf16.msrb.mxu1 %v14287_v22  ;;  %v15716_v17 = vld [vmem:[#allocation2 + $0xabc] sm:$0xf]  ;;  %v13011_v9 = vor.u32 %v15844_v4, %v13008_v57 }
 0x8bb   :  { %v16028_v33 = vld [vmem:[#allocation2 + $0x1474] sm:$0xf0]  ;;  %v12496_v53 = vld [vmem:[#allocation2 + $0xaf8] sm:$0xf0] }
 0x8bc   :  { %v14734_v60 = vld [vmem:[#allocation2 + $0x1c38] sm:$0xf]  ;;  %v13711_v35 = vor.u32 %v16028_v33, %v13710_v61  ;;  %9871 = vmatpush.bf16.msra.mxu3 %v13199_v31  ;;  %v11408_v46 = vld [vmem:[#allocation2 + $0x278] sm:$0xf0]  ;;  %v12499_v29 = vor.u32 %v15716_v17, %v12496_v53 }
 0x8bd   :  { %v16284_v14 = vld [vmem:[#allocation2 + $0x1c74] sm:$0xf0]  ;;  %v15572_v11 = vld [vmem:[#allocation2 + $0x63c] sm:$0xf]  ;;  %v11411_v20 = vor.u32 %v15444_v45, %v11408_v46 }
 0x8be   :  { %v14222_v37 = vld [vmem:[#allocation2 + $0x1838] sm:$0xf]  ;;  %v14735_v47 = vor.u32 %v16284_v14, %v14734_v60  ;;  %9884 = vmatpush.bf16.msrb.mxu0 %v13711_v35  ;;  %v11920_v61 = vld [vmem:[#allocation2 + $0x678] sm:$0xf0]  ;;  %v9678_v35 = vpop.f32.mrf.mxu0 }
 0x8bf   :  { %v16156_v48 = vld [vmem:[#allocation2 + $0x1874] sm:$0xf0]  ;;  %9872 = vmatmul.bf16.vlgmr.msra.gmra.mxu3 %v17208_v7  ;;  %v15828_v33 = vld [vmem:[#allocation2 + $0xe3c] sm:$0xf]  ;;  %v11923_v22 = vor.u32 %v15572_v11, %v11920_v61 }
 0x8c0   :  { %v14223_v1 = vor.u32 %v16156_v48, %v14222_v37  ;;  %9910 = vmatpush.bf16.msrb.mxu2 %v14735_v47  ;;  %9916 = vmatpush.bf16.msrb.mxu3 %v11603_v52  ;;  %v12944_v21 = vld [vmem:[#allocation2 + $0xe78] sm:$0xf0]  ;;  %v11347_v37 = vor.u32 %v15428_v59, %v11344_v10 }
 0x8c1   :  { %9885 = vmatmul.bf16.vlgmr.msrb.gmra.mxu0 %v17212_v16  ;;  %v15700_v60 = vld [vmem:[#allocation2 + $0xa3c] sm:$0xf]  ;;  %v12947_v27 = vor.u32 %v15828_v33, %v12944_v21 }
 0x8c2   :  { %9929 = vmatpush.bf16.msra.mxu0 %v12115_v39  ;;  %9897 = vmatpush.bf16.msrb.mxu1 %v14223_v1  ;;  %v12432_v14 = vld [vmem:[#allocation2 + $0xa78] sm:$0xf0]  ;;  %v9665_v1 = vpop.f32.mrf.mxu3 }
 0x8c3   :  { %9911 = vmatmul.bf16.vlgmr.msrb.gmra.mxu2 %v17210_v12  ;;  %v15556_v0 = vld [vmem:[#allocation2 + $0x5bc] sm:$0xf]  ;;  %v12435_v31 = vor.u32 %v15700_v60, %v12432_v14  ;;  %v9666_v54 = vadd.f32 %v9665_v1, %v17829_v42 }
 0x8c4   :  { %9955 = vmatpush.bf16.msra.mxu2 %v13139_v40  ;;  %9917 = vmatpush.bf16.msrb.mxu3 %v11539_v58  ;;  %v11856_v24 = vld [vmem:[#allocation2 + $0x5f8] sm:$0xf0]  ;;  %v9691_v40 = vpop.f32.mrf.mxu1 }
 0x8c5   :  { %9898 = vmatmul.bf16.vlgmr.msrb.gmra.mxu1 %v17215_v23  ;;  %v15812_v25 = vld [vmem:[#allocation2 + $0xdbc] sm:$0xf]  ;;  %v11859_v47 = vor.u32 %v15556_v0, %v11856_v24  ;;  %v9679_v5 = vadd.f32 %v9678_v35, %v9666_v54 }
 0x8c6   :  { %9942 = vmatpush.bf16.msra.mxu1 %v12627_v44  ;;  %9930 = vmatpush.bf16.msra.mxu0 %v12051_v36  ;;  %v12880_v62 = vld [vmem:[#allocation2 + $0xdf8] sm:$0xf0]  ;;  %v9680_v17 = vpop.f32.mrf.mxu0 }
 0x8c7   :  { %v15684_v48 = vld [vmem:[#allocation2 + $0x9bc] sm:$0xf]  ;;  %v12883_v52 = vor.u32 %v15812_v25, %v12880_v62  ;;  %v9692_v42 = vadd.f32 %v9691_v40, %v9679_v5 }
 0x8c8   :  { %9956 = vmatpush.bf16.msra.mxu2 %v13075_v26  ;;  %9918 = vmatpush.bf16.msrb.mxu3 %v11475_v8  ;;  %v15412_v18 = vld [vmem:[#allocation2 + $0x13c] sm:$0xf]  ;;  %v12371_v30 = vor.u32 %v15684_v48, %v12368_v51 }
 0x8c9   :  { %v11280_v38 = vld [vmem:[#allocation2 + $0x178] sm:$0xf0] }
 0x8ca   :  { %9943 = vmatpush.bf16.msra.mxu1 %v12563_v19  ;;  %9931 = vmatpush.bf16.msra.mxu0 %v11987_v32  ;;  %v15540_v39 = vld [vmem:[#allocation2 + $0x53c] sm:$0xf]  ;;  %v11283_v49 = vor.u32 %v15412_v18, %v11280_v38  ;;  %v9667_v24 = vpop.f32.mrf.mxu3 }
 0x8cb   :  { %v11792_v43 = vld [vmem:[#allocation2 + $0x578] sm:$0xf0] }
 0x8cc   :  { %9957 = vmatpush.bf16.msra.mxu2 %v13011_v9  ;;  %9919 = vmatpush.bf16.msrb.mxu3 %v11411_v20  ;;  %v15796_v15 = vld [vmem:[#allocation2 + $0xd3c] sm:$0xf]  ;;  %v11795_v41 = vor.u32 %v15540_v39, %v11792_v43  ;;  %v17836_v20 = vadd.f32 %v9704_v63, %v9692_v42 }
 0x8cd   :  { %v12816_v28 = vld [vmem:[#allocation2 + $0xd78] sm:$0xf0] }
 0x8ce   :  { %9944 = vmatpush.bf16.msra.mxu1 %v12499_v29  ;;  %9932 = vmatpush.bf16.msra.mxu0 %v11923_v22  ;;  %v15668_v44 = vld [vmem:[#allocation2 + $0x93c] sm:$0xf]  ;;  %v12819_v36 = vor.u32 %v15796_v15, %v12816_v28  ;;  %v9693_v29 = vpop.f32.mrf.mxu1 }
 0x8cf   :  { %v12304_v58 = vld [vmem:[#allocation2 + $0x978] sm:$0xf0] }
 0x8d0   :  { %9958 = vmatpush.bf16.msra.mxu2 %v12947_v27  ;;  %9920 = vmatpush.bf16.msrb.mxu3 %v11347_v37  ;;  %v15396_v26 = vld [vmem:[#allocation2 + $0xbc] sm:$0xf]  ;;  %v12307_v19 = vor.u32 %v15668_v44, %v12304_v58  ;;  %v9706_v37 = vpop.f32.mrf.mxu2 }
 0x8d1   :  { %v11216_v50 = vld [vmem:[#allocation2 + $0xf8] sm:$0xf0]  ;;  %v3217_v37 = vperm.slane %v17813_v34, 5 }
 0x8d2   :  { %9945 = vmatpush.bf16.msra.mxu1 %v12435_v31  ;;  %9933 = vmatpush.bf16.msra.mxu0 %v11859_v47  ;;  %v15524_v6 = vld [vmem:[#allocation2 + $0x4bc] sm:$0xf]  ;;  %v11219_v53 = vor.u32 %v15396_v26, %v11216_v50 }
 0x8d3   :  { %v11728_v13 = vld [vmem:[#allocation2 + $0x4f8] sm:$0xf0] }
 0x8d4   :  { %9959 = vmatpush.bf16.msra.mxu2 %v12883_v52  ;;  %v15780_v4 = vld [vmem:[#allocation2 + $0xcbc] sm:$0xf]  ;;  %9921 = vmatpush.bf16.msrb.mxu3 %v11283_v49  ;;  %v11731_v46 = vor.u32 %v15524_v6, %v11728_v13 }
 0x8d5   :  { %v12752_v57 = vld [vmem:[#allocation2 + $0xcf8] sm:$0xf0] }
 0x8d6   :  { %9946 = vmatpush.bf16.msra.mxu1 %v12371_v30  ;;  %v15652_v8 = vld [vmem:[#allocation2 + $0x8bc] sm:$0xf]  ;;  %9934 = vmatpush.bf16.msra.mxu0 %v11795_v41  ;;  %v12755_v11 = vor.u32 %v15780_v4, %v12752_v57 }
 0x8d7   :  { %v12240_v32 = vld [vmem:[#allocation2 + $0x8f8] sm:$0xf0] }
 0x8d8   :  { %v15380_v9 = vld [vmem:[#allocation2 + $0x3c] sm:$0xf]  ;;  %9960 = vmatpush.bf16.msra.mxu2 %v12819_v36  ;;  %v12243_v27 = vor.u32 %v15652_v8, %v12240_v32  ;;  %9922 = vmatpush.bf16.msrb.mxu3 %v11219_v53 }
 0x8d9   :  { %v11152_v45 = vld [vmem:[#allocation2 + $0x78] sm:$0xf0] }
 0x8da   :  { %v15508_v61 = vld [vmem:[#allocation2 + $0x43c] sm:$0xf]  ;;  %9947 = vmatpush.bf16.msra.mxu1 %v12307_v19  ;;  %v11155_v25 = vor.u32 %v15380_v9, %v11152_v45  ;;  %9935 = vmatpush.bf16.msra.mxu0 %v11731_v46 }
 0x8db   :  { %v11664_v33 = vld [vmem:[#allocation2 + $0x478] sm:$0xf0] }
 0x8dc   :  { %v15764_v21 = vld [vmem:[#allocation2 + $0xc3c] sm:$0xf]  ;;  %9961 = vmatpush.bf16.msra.mxu2 %v12755_v11  ;;  %v11667_v48 = vor.u32 %v15508_v61, %v11664_v33  ;;  %9923 = vmatpush.bf16.msrb.mxu3 %v11155_v25 }
 0x8dd   :  { %v12688_v60 = vld [vmem:[#allocation2 + $0xc78] sm:$0xf0] }
 0x8de   :  { %v16004_v14 = vld [vmem:[#allocation2 + $0x13bc] sm:$0xf]  ;;  %v12691_v51 = vor.u32 %v15764_v21, %v12688_v60  ;;  %9948 = vmatpush.bf16.msra.mxu1 %v12243_v27  ;;  %9936 = vmatpush.bf16.msra.mxu0 %v11667_v48  ;;  %v9743_v48 = vpop.f32.mrf.mxu1 }
 0x8df   :  { %v13648_v22 = vld [vmem:[#allocation2 + $0x13f8] sm:$0xf0]  ;;  %9924 = vmatmul.bf16.vlgmr.msrb.gmra.mxu3 %v17196_v55 }
 0x8e0   :  { %v16132_v59 = vld [vmem:[#allocation2 + $0x17bc] sm:$0xf]  ;;  %v13651_v18 = vor.u32 %v16004_v14, %v13648_v22  ;;  %9962 = vmatpush.bf16.msra.mxu2 %v12691_v51 }
 0x8e1   :  { %v14160_v10 = vld [vmem:[#allocation2 + $0x17f8] sm:$0xf0]  ;;  %9937 = vmatmul.bf16.vlgmr.msra.gmra.mxu0 %v17200_v2 }
 0x8e2   :  { %v16388_v0 = vld [vmem:[#allocation2 + $0x1fbc] sm:$0xf]  ;;  %v14163_v38 = vor.u32 %v16132_v59, %v14160_v10  ;;  %9968 = vmatpush.bf16.msra.mxu3 %v13651_v18 }
 0x8e3   :  { %v15184_v62 = vld [vmem:[#allocation2 + $0x1ff8] sm:$0xf0]  ;;  %9963 = vmatmul.bf16.vlgmr.msra.gmra.mxu2 %v17198_v56 }
 0x8e4   :  { %v15636_v31 = vld [vmem:[#allocation2 + $0x83c] sm:$0xf]  ;;  %v15187_v40 = vor.u32 %v16388_v0, %v15184_v62  ;;  %9981 = vmatpush.bf16.msrb.mxu0 %v14163_v38  ;;  %v9730_v0 = vpop.f32.mrf.mxu0 }
 0x8e5   :  { %v12176_v35 = vld [vmem:[#allocation2 + $0x878] sm:$0xf0] }
 0x8e6   :  { %v16260_v47 = vld [vmem:[#allocation2 + $0x1bbc] sm:$0xf]  ;;  %v12179_v43 = vor.u32 %v15636_v31, %v12176_v35  ;;  %10007 = vmatpush.bf16.msrb.mxu2 %v15187_v40 }
 0x8e7   :  { %v14672_v52 = vld [vmem:[#allocation2 + $0x1bf8] sm:$0xf0] }
 0x8e8   :  { %v15988_v39 = vld [vmem:[#allocation2 + $0x133c] sm:$0xf]  ;;  %v14675_v30 = vor.u32 %v16260_v47, %v14672_v52  ;;  %9949 = vmatpush.bf16.msra.mxu1 %v12179_v43 }
 0x8e9   :  { %v13584_v15 = vld [vmem:[#allocation2 + $0x1378] sm:$0xf0] }
 0x8ea   :  { %v16116_v28 = vld [vmem:[#allocation2 + $0x173c] sm:$0xf]  ;;  %v13587_v63 = vor.u32 %v15988_v39, %v13584_v15 }
 0x8eb   :  { %v14096_v1 = vld [vmem:[#allocation2 + $0x1778] sm:$0xf0]  ;;  %9950 = vmatmul.bf16.vlgmr.msra.gmra.mxu1 %v17202_v3 }
 0x8ec   :  { %v16372_v54 = vld [vmem:[#allocation2 + $0x1f3c] sm:$0xf]  ;;  %v14099_v41 = vor.u32 %v16116_v28, %v14096_v1  ;;  %9994 = vmatpush.bf16.msrb.mxu1 %v14675_v30  ;;  %9969 = vmatpush.bf16.msra.mxu3 %v13587_v63  ;;  %v9717_v28 = vpop.f32.mrf.mxu3 }
 0x8ed   :  { %v15120_v49 = vld [vmem:[#allocation2 + $0x1f78] sm:$0xf0] }
 0x8ee   :  { %v16244_v44 = vld [vmem:[#allocation2 + $0x1b3c] sm:$0xf]  ;;  %v15123_v26 = vor.u32 %v16372_v54, %v15120_v49  ;;  %9982 = vmatpush.bf16.msrb.mxu0 %v14099_v41  ;;  %v9718_v49 = vadd.f32 %v9717_v28, %v3217_v37 }
 0x8ef   :  { %v14608_v58 = vld [vmem:[#allocation2 + $0x1b78] sm:$0xf0] }
 0x8f0   :  { %v15972_v36 = vld [vmem:[#allocation2 + $0x12bc] sm:$0xf]  ;;  %v14611_v13 = vor.u32 %v16244_v44, %v14608_v58  ;;  %10008 = vmatpush.bf16.msrb.mxu2 %v15123_v26  ;;  %v9756_v44 = vpop.f32.mrf.mxu2 }
 0x8f1   :  { %v13520_v50 = vld [vmem:[#allocation2 + $0x12f8] sm:$0xf0] }
 0x8f2   :  { %v16100_v6 = vld [vmem:[#allocation2 + $0x16bc] sm:$0xf]  ;;  %v13523_v17 = vor.u32 %v15972_v36, %v13520_v50  ;;  %9995 = vmatpush.bf16.msrb.mxu1 %v14611_v13  ;;  %v9732_v13 = vpop.f32.mrf.mxu0 }
 0x8f3   :  { %v14032_v5 = vld [vmem:[#allocation2 + $0x16f8] sm:$0xf0] }
 0x8f4   :  { %v16356_v4 = vld [vmem:[#allocation2 + $0x1ebc] sm:$0xf]  ;;  %v14035_v42 = vor.u32 %v16100_v6, %v14032_v5  ;;  %9970 = vmatpush.bf16.msra.mxu3 %v13523_v17  ;;  %v9731_v5 = vadd.f32 %v9730_v0, %v9718_v49 }
 0x8f5   :  { %v15056_v57 = vld [vmem:[#allocation2 + $0x1ef8] sm:$0xf0] }
 0x8f6   :  { %v16228_v19 = vld [vmem:[#allocation2 + $0x1abc] sm:$0xf]  ;;  %v15059_v32 = vor.u32 %v16356_v4, %v15056_v57  ;;  %9983 = vmatpush.bf16.msrb.mxu0 %v14035_v42  ;;  %v9744_v42 = vadd.f32 %v9743_v48, %v9731_v5 }
 0x8f7   :  { %v14544_v8 = vld [vmem:[#allocation2 + $0x1af8] sm:$0xf0] }
 0x8f8   :  { %v15956_v53 = vld [vmem:[#allocation2 + $0x123c] sm:$0xf]  ;;  %v14547_v55 = vor.u32 %v16228_v19, %v14544_v8  ;;  %10009 = vmatpush.bf16.msrb.mxu2 %v15059_v32 }
 0x8f9   :  { %v13456_v9 = vld [vmem:[#allocation2 + $0x1278] sm:$0xf0] }
 0x8fa   :  { %v16084_v45 = vld [vmem:[#allocation2 + $0x163c] sm:$0xf]  ;;  %v13459_v2 = vor.u32 %v15956_v53, %v13456_v9  ;;  %9996 = vmatpush.bf16.msrb.mxu1 %v14547_v55  ;;  %v9745_v53 = vpop.f32.mrf.mxu1 }
 0x8fb   :  { %v13968_v46 = vld [vmem:[#allocation2 + $0x1678] sm:$0xf0] }
 0x8fc   :  { %v16340_v11 = vld [vmem:[#allocation2 + $0x1e3c] sm:$0xf]  ;;  %v13971_v21 = vor.u32 %v16084_v45, %v13968_v46  ;;  %9971 = vmatpush.bf16.msra.mxu3 %v13459_v2 }
 0x8fd   :  { %v14992_v61 = vld [vmem:[#allocation2 + $0x1e78] sm:$0xf0] }
 0x8fe   :  { %v16212_v33 = vld [vmem:[#allocation2 + $0x1a3c] sm:$0xf]  ;;  %v14995_v60 = vor.u32 %v16340_v11, %v14992_v61  ;;  %9984 = vmatpush.bf16.msrb.mxu0 %v13971_v21  ;;  %v9719_v21 = vpop.f32.mrf.mxu3 }
 0x8ff   :  { %v14480_v56 = vld [vmem:[#allocation2 + $0x1a78] sm:$0xf0] }
 0x900   :  { %v15940_v29 = vld [vmem:[#allocation2 + $0x11bc] sm:$0xf]  ;;  %v14483_v59 = vor.u32 %v16212_v33, %v14480_v56  ;;  %10010 = vmatpush.bf16.msrb.mxu2 %v14995_v60  ;;  %v9757_v33 = vadd.f32 %v9756_v44, %v9744_v42 }
 0x901   :  { %v13392_v14 = vld [vmem:[#allocation2 + $0x11f8] sm:$0xf0] }
 0x902   :  { %v16068_v22 = vld [vmem:[#allocation2 + $0x15bc] sm:$0xf]  ;;  %v13395_v62 = vor.u32 %v15940_v29, %v13392_v14  ;;  %9997 = vmatpush.bf16.msrb.mxu1 %v14483_v59  ;;  %v9758_v14 = vpop.f32.mrf.mxu2  ;;  %v10032_v59 = vmax.f32 %v17836_v20, 0.0  ;;  %v9795_v0 = vpop.f32.mrf.mxu1 }
 0x903   :  { %v13904_v27 = vld [vmem:[#allocation2 + $0x15f8] sm:$0xf0] }
 0x904   :  { %v16324_v10 = vld [vmem:[#allocation2 + $0x1dbc] sm:$0xf]  ;;  %v13907_v31 = vor.u32 %v16068_v22, %v13904_v27  ;;  %9972 = vmatpush.bf16.msra.mxu3 %v13395_v62 }
 0x905   :  { %v14928_v3 = vld [vmem:[#allocation2 + $0x1df8] sm:$0xf0] }
 0x906   :  { %v16196_v24 = vld [vmem:[#allocation2 + $0x19bc] sm:$0xf]  ;;  %v14931_v51 = vor.u32 %v16324_v10, %v14928_v3  ;;  %9985 = vmatpush.bf16.msrb.mxu0 %v13907_v31  ;;  %v9782_v10 = vpop.f32.mrf.mxu0  ;;  %v10048_v3 = vmax.f32 %v10032_v59, 1e-12 }
 0x907   :  { %v14416_v25 = vld [vmem:[#allocation2 + $0x19f8] sm:$0xf0] }
 0x908   :  { %v15924_v35 = vld [vmem:[#allocation2 + $0x113c] sm:$0xf]  ;;  %v14419_v38 = vor.u32 %v16196_v24, %v14416_v25  ;;  %10011 = vmatpush.bf16.msrb.mxu2 %v14931_v51  ;;  %v9769_v24 = vpop.f32.mrf.mxu3  ;;  %16537 = vrcp.f32 %v10048_v3  ;;  %vm10237_vm13 = vweird.f32 %v10048_v3  ;;  %v10243_v28 = vand.u32 2147483648, %v10048_v3 }
 0x909   :  { %v13328_v47 = vld [vmem:[#allocation2 + $0x1178] sm:$0xf0]  ;;  %v9770_v25 = vadd.f32 %v9769_v24, %v9757_v33 }
 0x90a   :  { %v16052_v52 = vld [vmem:[#allocation2 + $0x153c] sm:$0xf]  ;;  %v13331_v1 = vor.u32 %v15924_v35, %v13328_v47  ;;  %9998 = vmatpush.bf16.msrb.mxu1 %v14419_v38  ;;  %v9808_v62 = vpop.f32.mrf.mxu2  ;;  %v9797_v48 = vpop.f32.mrf.mxu1 }
 0x90b   :  { %v13840_v18 = vld [vmem:[#allocation2 + $0x1578] sm:$0xf0]  ;;  %v9783_v31 = vadd.f32 %v9782_v10, %v9770_v25  ;;  %v3219_v48 = vperm.slane %v17813_v34, 7 }
 0x90c   :  { %v16308_v39 = vld [vmem:[#allocation2 + $0x1d3c] sm:$0xf]  ;;  %v13843_v30 = vor.u32 %v16052_v52, %v13840_v18  ;;  %9973 = vmatpush.bf16.msra.mxu3 %v13331_v1 }
 0x90d   :  { %v14864_v40 = vld [vmem:[#allocation2 + $0x1d78] sm:$0xf0]  ;;  %v9796_v37 = vadd.f32 %v9795_v0, %v9783_v31 }
 0x90e   :  { %v16180_v43 = vld [vmem:[#allocation2 + $0x193c] sm:$0xf]  ;;  %v14867_v58 = vor.u32 %v16308_v39, %v14864_v40  ;;  %9986 = vmatpush.bf16.msrb.mxu0 %v13843_v30  ;;  %v9784_v35 = vpop.f32.mrf.mxu0 }
 0x90f   :  { %v14352_v15 = vld [vmem:[#allocation2 + $0x1978] sm:$0xf0]  ;;  %v9809_v51 = vadd.f32 %v9808_v62, %v9796_v37 }
 0x910   :  { %v15908_v54 = vld [vmem:[#allocation2 + $0x10bc] sm:$0xf]  ;;  %v14355_v26 = vor.u32 %v16180_v43, %v14352_v15  ;;  %10012 = vmatpush.bf16.msrb.mxu2 %v14867_v58  ;;  %v10241_v15 = vand.u32 2147483647, %v10048_v3 }
 0x911   :  { %v13264_v63 = vld [vmem:[#allocation2 + $0x10f8] sm:$0xf0]  ;;  %v10033_v47 = vmax.f32 %v9809_v51, 0.0 }
 0x912   :  { %v16036_v41 = vld [vmem:[#allocation2 + $0x14bc] sm:$0xf]  ;;  %v13267_v19 = vor.u32 %v15908_v54, %v13264_v63  ;;  %9999 = vmatpush.bf16.msrb.mxu1 %v14355_v26  ;;  %v10244_v63 = vor.u32 1.1754944e-38, %v10243_v28  ;;  %v9847_v26 = vpop.f32.mrf.mxu1  ;;  %vm10242_vm6 = vcmp.eq.f32.partialorder %v10241_v15, 8.507059e+37 }
 0x913   :  { %v13776_v36 = vld [vmem:[#allocation2 + $0x14f8] sm:$0xf0] }
 0x914   :  { %v16292_v50 = vld [vmem:[#allocation2 + $0x1cbc] sm:$0xf]  ;;  %v13779_v8 = vor.u32 %v16036_v41, %v13776_v36  ;;  %9974 = vmatpush.bf16.msra.mxu3 %v13267_v19  ;;  %v3218_v36 = vperm.slane %v17813_v34, 6 }
 0x915   :  { %v14800_v6 = vld [vmem:[#allocation2 + $0x1cf8] sm:$0xf0] }
 0x916   :  { %v16164_v4 = vld [vmem:[#allocation2 + $0x18bc] sm:$0xf]  ;;  %v14803_v32 = vor.u32 %v16292_v50, %v14800_v6  ;;  %9987 = vmatpush.bf16.msrb.mxu0 %v13779_v8  ;;  %v9834_v49 = vpop.f32.mrf.mxu0 }
 0x917   :  { %v14288_v57 = vld [vmem:[#allocation2 + $0x18f8] sm:$0xf0] }
 0x918   :  { %v15892_v17 = vld [vmem:[#allocation2 + $0x103c] sm:$0xf]  ;;  %v14291_v55 = vor.u32 %v16164_v4, %v14288_v57  ;;  %10013 = vmatpush.bf16.msrb.mxu2 %v14803_v32 }
 0x919   :  { %v13200_v9 = vld [vmem:[#allocation2 + $0x1078] sm:$0xf0] }
 0x91a   :  { %v16020_v45 = vld [vmem:[#allocation2 + $0x143c] sm:$0xf]  ;;  %v13203_v29 = vor.u32 %v15892_v17, %v13200_v9  ;;  %10000 = vmatpush.bf16.msrb.mxu1 %v14291_v55 }
 0x91b   :  { %v13712_v46 = vld [vmem:[#allocation2 + $0x1478] sm:$0xf0] }
 0x91c   :  { %v16276_v11 = vld [vmem:[#allocation2 + $0x1c3c] sm:$0xf]  ;;  %v13715_v60 = vor.u32 %v16020_v45, %v13712_v46  ;;  %9975 = vmatpush.bf16.msra.mxu3 %v13203_v29  ;;  %v9849_v45 = vpop.f32.mrf.mxu1 }
 0x91d   :  { %v14736_v61 = vld [vmem:[#allocation2 + $0x1c78] sm:$0xf0] }
 0x91e   :  { %v16148_v56 = vld [vmem:[#allocation2 + $0x183c] sm:$0xf]  ;;  %v14739_v22 = vor.u32 %v16276_v11, %v14736_v61  ;;  %9988 = vmatpush.bf16.msrb.mxu0 %v13715_v60  ;;  %v9836_v53 = vpop.f32.mrf.mxu0 }
 0x91f   :  { %v14224_v2 = vld [vmem:[#allocation2 + $0x1878] sm:$0xf0]  ;;  %9976 = vmatmul.bf16.vlgmr.msra.gmra.mxu3 %v17208_v7  ;;  %v16538_v7 = vpop.eup %16537 }
 0x920   :  { %v14227_v27 = vor.u32 %v16148_v56, %v14224_v2  ;;  %10014 = vmatpush.bf16.msrb.mxu2 %v14739_v22  ;;  %v10233_v52 = vmul.f32 %v16538_v7, %v10048_v3  ;;  %vm10238_vm14 = vweird.f32 %v16538_v7 }
 0x921   :  { %9989 = vmatmul.bf16.vlgmr.msrb.gmra.mxu0 %v17212_v16  ;;  %v9771_v16 = vpop.f32.mrf.mxu3  ;;  %vm10239_vm4 = vmor %vm10237_vm13, %vm10238_vm14 }
 0x922   :  { %10001 = vmatpush.bf16.msrb.mxu1 %v14227_v27  ;;  %v10234_v20 = vsub.f32 1.0, %v10233_v52 }
 0x923   :  { %10015 = vmatmul.bf16.vlgmr.msrb.gmra.mxu2 %v17210_v12  ;;  %v9810_v12 = vpop.f32.mrf.mxu2 }
 0x924   :  { %v10235_v18 = vmul.f32 %v16538_v7, %v10234_v20 }
 0x925   :  { %10002 = vmatmul.bf16.vlgmr.msrb.gmra.mxu1 %v17215_v23  ;;  %v10049_v23 = vmax.f32 %v10033_v47, 1e-12 }
 0x926   :  { %v10236_v40 = vadd.f32 %v16538_v7, %v10235_v18 }
 0x927   :  { %16539 = vrcp.f32 %v10049_v23  ;;  %v10258_v1 = vand.u32 2147483648, %v10049_v23  ;;  %vm10252_vm15 = vweird.f32 %v10049_v23  ;;  %v10256_v54 = vand.u32 2147483647, %v10049_v23 }
 0x928   :  { %v10240_v44 = vsel %vm10239_vm4, %v16538_v7, %v10236_v40 }
 0x929   :  { %v10259_v41 = vor.u32 1.1754944e-38, %v10258_v1  ;;  %vm10257_vm7 = vcmp.eq.f32.partialorder %v10256_v54, 8.507059e+37  ;;  %v10245_v6 = vsel %vm10242_vm6, %v10244_v63, %v10240_v44  ;;  %v9821_v4 = vpop.f32.mrf.mxu3 }
 0x92a   :  { %v9822_v57 = vadd.f32 %v9821_v4, %v3218_v36  ;;  %v10246_v8 = vmul.f32 %v10245_v6, %v10032_v59 }
 0x92b   :  { %v9860_v19 = vpop.f32.mrf.mxu2 }
 0x92c   :  { %v9835_v42 = vadd.f32 %v9834_v49, %v9822_v57 }
 0x92d   :  { %v16540_v38 = vpop.eup %16539 }
 0x92e   :  { %v10248_v39 = vmul.f32 %v16540_v38, %v10049_v23  ;;  %vm10253_vm0 = vweird.f32 %v16540_v38  ;;  %v9848_v9 = vadd.f32 %v9847_v26, %v9835_v42 }
 0x92f   :  { %vm10254_vm5 = vmor %vm10252_vm15, %vm10253_vm0 }
 0x930   :  { %v10249_v43 = vsub.f32 1.0, %v10248_v39  ;;  %v9861_v46 = vadd.f32 %v9860_v19, %v9848_v9 }
 0x931   :  { %v9823_v55 = vpop.f32.mrf.mxu3 }
 0x932   :  { %v10250_v30 = vmul.f32 %v16540_v38, %v10249_v43 }
 0x933   :  { %v9862_v11 = vpop.f32.mrf.mxu2 }
 0x934   :  { %v10251_v58 = vadd.f32 %v16540_v38, %v10250_v30 }
 0x936   :  { %v10255_v50 = vsel %vm10254_vm5, %v16540_v38, %v10251_v58 }
 0x937   :  { %v10260_v5 = vsel %vm10257_vm7, %v10259_v41, %v10255_v50 }
 0x938   :  { %v10261_v13 = vmul.f32 %v10260_v5, %v10033_v47 }
 0x93a   :  { %v10317_v17 = vrot.slane %v10261_v13, 6 }
 0x93c   :  { %v17850_v32 = vsel %vm1089_vm1, %v10246_v8, %v10317_v17 }
 0x93e   :  { %v9886_v61 = vpop.f32.mrf.mxu0 }
 0x942   :  { %v9899_v33 = vpop.f32.mrf.mxu1  ;;  %v9873_v56 = vpop.f32.mrf.mxu3 }
 0x943   :  { %v9874_v2 = vadd.f32 %v9873_v56, %v9861_v46 }
 0x945   :  { %v9887_v29 = vadd.f32 %v9886_v61, %v9874_v2 }
 0x946   :  { %v9912_v21 = vpop.f32.mrf.mxu2  ;;  %v9888_v60 = vpop.f32.mrf.mxu0 }
 0x947   :  { %v9900_v14 = vadd.f32 %v9899_v33, %v9887_v29 }
 0x949   :  { %v9913_v27 = vadd.f32 %v9912_v21, %v9900_v14 }
 0x94a   :  { %v9901_v22 = vpop.f32.mrf.mxu1  ;;  %v9875_v59 = vpop.f32.mrf.mxu3 }
 0x94b   :  { %v10034_v51 = vmax.f32 %v9913_v27, 0.0 }
 0x94d   :  { %v10050_v47 = vmax.f32 %v10034_v51, 1e-12 }
 0x94e   :  { %v9914_v10 = vpop.f32.mrf.mxu2 }
 0x94f   :  { %16541 = vrcp.f32 %v10050_v47  ;;  %vm10267_vm1 = vweird.f32 %v10050_v47  ;;  %v10273_v50 = vand.u32 2147483648, %v10050_v47  ;;  %v10271_v6 = vand.u32 2147483647, %v10050_v47 }
 0x951   :  { %v10274_v57 = vor.u32 1.1754944e-38, %v10273_v50  ;;  %vm10272_vm10 = vcmp.eq.f32.partialorder %v10271_v6, 8.507059e+37 }
 0x955   :  { %v16542_v43 = vpop.eup %16541 }
 0x956   :  { %v10263_v30 = vmul.f32 %v16542_v43, %v10050_v47  ;;  %vm10268_vm8 = vweird.f32 %v16542_v43 }
 0x957   :  { %vm10269_vm9 = vmor %vm10267_vm1, %vm10268_vm8 }
 0x958   :  { %v10264_v58 = vsub.f32 1.0, %v10263_v30 }
 0x95a   :  { %v10265_v41 = vmul.f32 %v16542_v43, %v10264_v58 }
 0x95c   :  { %v10266_v36 = vadd.f32 %v16542_v43, %v10265_v41 }
 0x95e   :  { %v9938_v3 = vpop.f32.mrf.mxu0  ;;  %v10270_v13 = vsel %vm10269_vm9, %v16542_v43, %v10266_v36 }
 0x95f   :  { %v10275_v42 = vsel %vm10272_vm10, %v10274_v57, %v10270_v13 }
 0x960   :  { %v10276_v45 = vmul.f32 %v10275_v42, %v10034_v51 }
 0x962   :  { %v9925_v24 = vpop.f32.mrf.mxu3  ;;  %v10318_v61 = vrot.slane %v10276_v45, 4 }
 0x963   :  { %v9926_v7 = vadd.f32 %v9925_v24, %v3219_v48 }
 0x965   :  { %v9939_v16 = vadd.f32 %v9938_v3, %v9926_v7 }
 0x966   :  { %v9964_v25 = vpop.f32.mrf.mxu2  ;;  %v9940_v62 = vpop.f32.mrf.mxu0 }
 0x968   :  { %v9951_v0 = vpop.f32.mrf.mxu1 }
 0x969   :  { %v9952_v52 = vadd.f32 %v9951_v0, %v9939_v16 }
 0x96a   :  { %v9927_v35 = vpop.f32.mrf.mxu3 }
 0x96b   :  { %v9965_v20 = vadd.f32 %v9964_v25, %v9952_v52 }
 0x96e   :  { %v9966_v37 = vpop.f32.mrf.mxu2 }
 0x970   :  { %v9953_v31 = vpop.f32.mrf.mxu1 }
 0x99e   :  { %v9990_v12 = vpop.f32.mrf.mxu0 }
 0x9a2   :  { %v10003_v23 = vpop.f32.mrf.mxu1  ;;  %v9977_v18 = vpop.f32.mrf.mxu3 }
 0x9a3   :  { %v9978_v38 = vadd.f32 %v9977_v18, %v9965_v20 }
 0x9a5   :  { %v9991_v15 = vadd.f32 %v9990_v12, %v9978_v38 }
 0x9a6   :  { %v10016_v39 = vpop.f32.mrf.mxu2  ;;  %v9992_v40 = vpop.f32.mrf.mxu0 }
 0x9a7   :  { %v10004_v1 = vadd.f32 %v10003_v23, %v9991_v15 }
 0x9a9   :  { %v10017_v54 = vadd.f32 %v10016_v39, %v10004_v1 }
 0x9aa   :  { %v10005_v28 = vpop.f32.mrf.mxu1  ;;  %v9979_v34 = vpop.f32.mrf.mxu3 }
 0x9ab   :  { %v10035_v49 = vmax.f32 %v10017_v54, 0.0 }
 0x9ad   :  { %v10051_v63 = vmax.f32 %v10035_v49, 1e-12 }
 0x9ae   :  { %v10018_v44 = vpop.f32.mrf.mxu2 }
 0x9af   :  { %16543 = vrcp.f32 %v10051_v63  ;;  %v10288_v19 = vand.u32 2147483648, %v10051_v63  ;;  %v10286_v17 = vand.u32 2147483647, %v10051_v63  ;;  %vm10282_vm12 = vweird.f32 %v10051_v63 }
 0x9b1   :  { %v10289_v9 = vor.u32 1.1754944e-38, %v10288_v19  ;;  %vm10287_vm14 = vcmp.eq.f32.partialorder %v10286_v17, 8.507059e+37 }
 0x9b5   :  { %v16544_v26 = vpop.eup %16543 }
 0x9b6   :  { %v10278_v5 = vmul.f32 %v16544_v26, %v10051_v63  ;;  %vm10283_vm11 = vweird.f32 %v16544_v26 }
 0x9b7   :  { %vm10284_vm13 = vmor %vm10282_vm12, %vm10283_vm11 }
 0x9b8   :  { %v10279_v4 = vsub.f32 1.0, %v10278_v5 }
 0x9ba   :  { %v10280_v8 = vmul.f32 %v16544_v26, %v10279_v4 }
 0x9bc   :  { %v10281_v53 = vadd.f32 %v16544_v26, %v10280_v8 }
 0x9be   :  { %v10285_v46 = vsel %vm10284_vm13, %v16544_v26, %v10281_v53 }
 0x9bf   :  { %v10290_v55 = vsel %vm10287_vm14, %v10289_v9, %v10285_v46 }
 0x9c0   :  { %v10291_v11 = vmul.f32 %v10290_v55, %v10035_v49 }
 0x9c2   :  { %v10319_v33 = vrot.slane %v10291_v11, 2 }
 0x9c4   :  { %v10330_v56 = vsel %vm2125_vm2, %v10318_v61, %v10319_v33 }
 0x9c5   :  { %v10331_v2 = vsel %vm814_vm3, %v17850_v32, %v10330_v56 }
 0x9c6   :  { %10339 = vst [vmem:[%s17872_s13 + $0x18] sm:$0xff] %v10331_v2 }
 0x9c7   :  { %10344 = vsyncpa [#allocation15], 1 }
 0x9c8   :  { %10345 = vsyncpa [#allocation17], 1 }
 0x9c9   :  { %10346 = vsyncpa [#allocation20], 1 }
 0x9ca   :  { %10347 = vsyncpa [#allocation23], 1 }
 0x9cb   :  { %10348 = vsyncpa [#allocation26], 1 }
 0x9cc   :  { %10349 = vsyncpa [#allocation29], 1 }
 0x9cd   :  { %10350 = vsyncmov [#allocation3] }
 0x9d0   :  { %s10351_s8 = vpop.sfrf %10350 }
 0x9d1   :  { %p15188_p0 = scmp.ne.s32.totalorder %s10351_s8, 0 }
 0x9d3   :  { %10355 = shalt.err (%p15188_p0)  }

</bundles_post_ra>
